<compile_context>
chip_gen: v7x
topology: tpu7x:2x2x1
jax: 0.10.0
libtpu: 0.0.40
codegen_flags: <defaults>
</compile_context>

<pallas_src>
import jax
import jax.numpy as jnp
from jax import lax
from jax.experimental import pallas as pl
from jax.experimental.pallas import tpu as pltpu

EPS = 1e-5  # nn.InstanceNorm2d default eps (affine=False -> no gamma/beta)


def resnet_block_kernel(x_ref, w1_ref, w2_ref, o_ref, pad_ref):
    """Fused: pad -> conv1 -> IN -> ReLU -> pad -> conv2 -> IN -> +x.

    x_ref  : (1, H, W, C) f32    input tile (one batch element)
    w*_ref : (9, C, C)    bf16   conv weights, tap-major rows (ky*3+kx)
    o_ref  : (1, H, W, C) f32    output tile
    pad_ref: (H+2, W+2, C) bf16  VMEM scratch, reused by both convs
    """
    _, H, W, C = x_ref.shape

    def reflect_border():
        # Interior [1:H+1, 1:W+1, :] must already be written.
        # Rows first (ReflectionPad2d(1): out row 0 <- in row 1, ...), then
        # columns, which also fills the four corners correctly.
        pad_ref[0:1, :, :] = pad_ref[2:3, :, :]
        pad_ref[H + 1:H + 2, :, :] = pad_ref[H - 1:H, :, :]
        pad_ref[:, 0:1, :] = pad_ref[:, 2:3, :]
        pad_ref[:, W + 1:W + 2, :] = pad_ref[:, W - 1:W, :]

    def conv3x3_instnorm(w_ref):
        # 9 accumulating bf16 MXU matmuls (one per tap), f32 accumulation.
        # No im2col concat: K = C per tap still feeds the MXU on all gens.
        acc = None
        for k in range(9):
            dy, dx = divmod(k, 3)
            tap = pad_ref[dy:dy + H, dx:dx + W, :].reshape(H * W, C)
            part = jnp.dot(tap, w_ref[k], preferred_element_type=jnp.float32)
            acc = part if acc is None else acc + part
        # NOTE: conv bias intentionally omitted — exactly cancelled by the
        # per-channel mean subtraction below (InstanceNorm, affine=False).
        inv_n = 1.0 / float(H * W)
        s = jnp.sum(acc, axis=0, keepdims=True)             # (1, C)
        ss = jnp.sum(acc * acc, axis=0, keepdims=True)      # (1, C)
        mean = s * inv_n
        var = ss * inv_n - mean * mean                      # E[x^2] - mean^2
        return (acc - mean) * lax.rsqrt(var + EPS)          # (H*W, C) f32

    # ---- reflection-pad x into the bf16 VMEM scratch ------------------------
    pad_ref[1:H + 1, 1:W + 1, :] = x_ref[0].astype(jnp.bfloat16)
    reflect_border()

    # ---- conv1 + InstanceNorm + ReLU, written back into the SAME scratch ----
    y1 = jnp.maximum(conv3x3_instnorm(w1_ref), 0.0)
    pad_ref[1:H + 1, 1:W + 1, :] = y1.reshape(H, W, C).astype(jnp.bfloat16)
    reflect_border()

    # ---- conv2 + InstanceNorm + residual add (f32) ---------------------------
    y2 = conv3x3_instnorm(w2_ref)
    o_ref[...] = (x_ref[...] + y2.reshape(1, H, W, C)).astype(o_ref.dtype)


def _vmem_limit_bytes():
    """~3/4 of physical VMEM: ~96 MiB on v5e/v6e, ~48 MiB on v7x."""
    try:
        cap = getattr(pltpu.get_tpu_info(), "vmem_capacity_bytes", None)
        if cap:
            return int(min(cap * 3 // 4, 112 * 1024 * 1024))
    except Exception:
        pass
    return 64 * 1024 * 1024


def prepare_params(params):
    """One-time weight prep (hoisted out of the per-call path).

    HWIO (3,3,C,C) -> tap-major (9,C,C) bf16.  Conv biases are dropped: with
    InstanceNorm2d(affine=False) right after each conv, a per-channel bias is
    exactly cancelled by the mean subtraction.
    """
    w1, b1, w2, b2 = params
    del b1, b2
    C = w1.shape[-1]
    return (w1.reshape(9, C, C).astype(jnp.bfloat16),
            w2.reshape(9, C, C).astype(jnp.bfloat16))


@jax.jit
def resnet_block_nhwc(x, w1p, w2p):
    """Production entry point. x: (B,H,W,C) f32, w*p: (9,C,C) bf16."""
    B, H, W, C = x.shape
    return pl.pallas_call(
        resnet_block_kernel,
        out_shape=jax.ShapeDtypeStruct((B, H, W, C), jnp.float32),
        grid=(B,),
        in_specs=[
            pl.BlockSpec((1, H, W, C), lambda i: (i, 0, 0, 0)),
            pl.BlockSpec((9, C, C), lambda i: (0, 0, 0)),   # VMEM-resident
            pl.BlockSpec((9, C, C), lambda i: (0, 0, 0)),   # VMEM-resident
        ],
        out_specs=pl.BlockSpec((1, H, W, C), lambda i: (i, 0, 0, 0)),
        scratch_shapes=[
            pltpu.VMEM((H + 2, W + 2, C), jnp.bfloat16),    # shared padded buf
        ],
        compiler_params=pltpu.CompilerParams(
            dimension_semantics=("parallel",),
            vmem_limit_bytes=_vmem_limit_bytes()),
    )(x, w1p, w2p)


def residual_block_forward(x_nchw, params):
    """PyTorch-parity wrapper: (B,C,H,W) f32 -> (B,C,H,W) f32.

    The two transposes are pure layout glue; callers with an NHWC network
    should call resnet_block_nhwc directly and skip them.
    """
    w1p, w2p = prepare_params(params)
    x = jnp.transpose(x_nchw, (0, 2, 3, 1)).astype(jnp.float32)   # NCHW->NHWC
    out = resnet_block_nhwc(x, w1p, w2p)
    return jnp.transpose(out, (0, 3, 1, 2))                        # NHWC->NCHW


def make_params(key, in_features):
    """Deterministic synthetic parameters (Conv2d weight+bias x2), HWIO layout."""
    k1, k2, k3, k4 = jax.random.split(key, 4)
    scale = 1.0 / (in_features * 9) ** 0.5
    w1 = jax.random.normal(k1, (3, 3, in_features, in_features), jnp.float32) * scale
    b1 = jax.random.normal(k2, (1, in_features), jnp.float32) * scale
    w2 = jax.random.normal(k3, (3, 3, in_features, in_features), jnp.float32) * scale
    b2 = jax.random.normal(k4, (1, in_features), jnp.float32) * scale
    return (w1, b1, w2, b2)


# -------- pure-JAX reference for correctness check ---------------------------
def _ref_forward(x_nchw, params, matmul_dtype=jnp.bfloat16):
    """Faithful ReflectionPad/Conv(+bias)/InstanceNorm/ReLU reference.

    With matmul_dtype=bf16 it mirrors the kernel's MXU precision (tight
    comparison); with f32 it is the exact PyTorch-semantics reference
    (loose comparison, since the kernel runs the matmuls in bf16).
    """
    w1, b1, w2, b2 = params
    x = jnp.transpose(x_nchw, (0, 2, 3, 1))

    def conv_in(inp, w, b):
        p = jnp.pad(inp, ((0, 0), (1, 1), (1, 1), (0, 0)), mode="reflect")
        y = lax.conv_general_dilated(
            p.astype(matmul_dtype), w.astype(matmul_dtype),
            window_strides=(1, 1), padding="VALID",
            dimension_numbers=("NHWC", "HWIO", "NHWC"),
            preferred_element_type=jnp.float32)
        y = y + b.reshape(1, 1, 1, -1)   # bias kept here; IN cancels it
        mean = jnp.mean(y, axis=(1, 2), keepdims=True)
        var = jnp.mean((y - mean) ** 2, axis=(1, 2), keepdims=True)
        return (y - mean) / jnp.sqrt(var + EPS)

    y = jax.nn.relu(conv_in(x, w1, b1))
    y = conv_in(y, w2, b2)
    return jnp.transpose(x + y, (0, 3, 1, 2))


if __name__ == "__main__":
    B, C, H, W = 2, 4, 16, 16                 # dim = 4 (small test config)
    key = jax.random.PRNGKey(0)
    kx, kp = jax.random.split(key)
    x = jax.random.normal(kx, (B, C, H, W), jnp.float32)
    params = make_params(kp, C)

    out = jax.block_until_ready(residual_block_forward(x, params))
    ref_bf16 = jax.block_until_ready(_ref_forward(x, params, jnp.bfloat16))
    ref_f32 = jax.block_until_ready(_ref_forward(x, params, jnp.float32))

    assert out.shape == (B, C, H, W)
    err_tight = float(jnp.max(jnp.abs(out - ref_bf16)))
    err_loose = float(jnp.max(jnp.abs(out - ref_f32)))
    assert err_tight < 3e-3, f"mismatch vs bf16-matmul reference: {err_tight}"
    assert err_loose < 5e-2, f"mismatch vs f32 reference: {err_loose}"
    print("KERNEL_OK")
</pallas_src>

<mosaic_0001>
module attributes {stable_mosaic.version = 11 : i64} {
  func.func @resnet_block_kernel(%arg0: i32, %arg1: memref<1x16x16x4xf32, #tpu.memory_space<vmem>>, %arg2: memref<9x4x4xbf16, #tpu.memory_space<vmem>>, %arg3: memref<9x4x4xbf16, #tpu.memory_space<vmem>>, %arg4: memref<1x16x16x4xf32, #tpu.memory_space<vmem>>, %arg5: memref<18x18x4xbf16, #tpu.memory_space<vmem>>) attributes {dimension_semantics = [#tpu.dimension_semantics<parallel>], iteration_bounds = array<i64: 2>, scalar_prefetch = 0 : i64, scratch_operands = 1 : i64, tpu.core_type = #tpu.core_type<tc>, window_params = [{transform_indices = @transform_0, window_bounds = array<i64: 1, 16, 16, 4>}, {pipeline_mode = #tpu.pipeline_mode<synchronous>, transform_indices = @transform_1, window_bounds = array<i64: 9, 4, 4>}, {pipeline_mode = #tpu.pipeline_mode<synchronous>, transform_indices = @transform_2, window_bounds = array<i64: 9, 4, 4>}, {transform_indices = @transform_3, window_bounds = array<i64: 1, 16, 16, 4>}]} {
    %c0 = arith.constant 0 : index
    %c0_0 = arith.constant 0 : index
    %c0_1 = arith.constant 0 : index
    %c0_2 = arith.constant 0 : index
    %0 = vector.load %arg1[%c0, %c0_0, %c0_1, %c0_2] : memref<1x16x16x4xf32, #tpu.memory_space<vmem>>, vector<1x16x16x4xf32>
    %1 = vector.shape_cast %0 : vector<1x16x16x4xf32> to vector<16x16x4xf32>
    %2 = arith.truncf %1 : vector<16x16x4xf32> to vector<16x16x4xbf16>
    %c1 = arith.constant 1 : index
    %c1_3 = arith.constant 1 : index
    %c0_4 = arith.constant 0 : index
    %3 = vector.load %arg5[%c1, %c1_3, %c0_4] : memref<18x18x4xbf16, #tpu.memory_space<vmem>>, vector<16x16x4xbf16>
    tpu.vector_store %arg5[%c1, %c1_3, %c0_4], %2 {strides = array<i32>} : memref<18x18x4xbf16, #tpu.memory_space<vmem>>, vector<16x16x4xbf16>,
    %c2 = arith.constant 2 : index
    %c0_5 = arith.constant 0 : index
    %c0_6 = arith.constant 0 : index
    %4 = vector.load %arg5[%c2, %c0_5, %c0_6] : memref<18x18x4xbf16, #tpu.memory_space<vmem>>, vector<1x18x4xbf16>
    %c0_7 = arith.constant 0 : index
    %c0_8 = arith.constant 0 : index
    %c0_9 = arith.constant 0 : index
    %5 = vector.load %arg5[%c0_7, %c0_8, %c0_9] : memref<18x18x4xbf16, #tpu.memory_space<vmem>>, vector<1x18x4xbf16>
    tpu.vector_store %arg5[%c0_7, %c0_8, %c0_9], %4 {strides = array<i32>} : memref<18x18x4xbf16, #tpu.memory_space<vmem>>, vector<1x18x4xbf16>,
    %c15 = arith.constant 15 : index
    %c0_10 = arith.constant 0 : index
    %c0_11 = arith.constant 0 : index
    %6 = vector.load %arg5[%c15, %c0_10, %c0_11] : memref<18x18x4xbf16, #tpu.memory_space<vmem>>, vector<1x18x4xbf16>
    %c17 = arith.constant 17 : index
    %c0_12 = arith.constant 0 : index
    %c0_13 = arith.constant 0 : index
    %7 = vector.load %arg5[%c17, %c0_12, %c0_13] : memref<18x18x4xbf16, #tpu.memory_space<vmem>>, vector<1x18x4xbf16>
    tpu.vector_store %arg5[%c17, %c0_12, %c0_13], %6 {strides = array<i32>} : memref<18x18x4xbf16, #tpu.memory_space<vmem>>, vector<1x18x4xbf16>,
    %c0_14 = arith.constant 0 : index
    %c2_15 = arith.constant 2 : index
    %c0_16 = arith.constant 0 : index
    %8 = vector.load %arg5[%c0_14, %c2_15, %c0_16] : memref<18x18x4xbf16, #tpu.memory_space<vmem>>, vector<18x1x4xbf16>
    %c0_17 = arith.constant 0 : index
    %c0_18 = arith.constant 0 : index
    %c0_19 = arith.constant 0 : index
    %9 = vector.load %arg5[%c0_17, %c0_18, %c0_19] : memref<18x18x4xbf16, #tpu.memory_space<vmem>>, vector<18x1x4xbf16>
    tpu.vector_store %arg5[%c0_17, %c0_18, %c0_19], %8 {strides = array<i32>} : memref<18x18x4xbf16, #tpu.memory_space<vmem>>, vector<18x1x4xbf16>,
    %c0_20 = arith.constant 0 : index
    %c15_21 = arith.constant 15 : index
    %c0_22 = arith.constant 0 : index
    %10 = vector.load %arg5[%c0_20, %c15_21, %c0_22] : memref<18x18x4xbf16, #tpu.memory_space<vmem>>, vector<18x1x4xbf16>
    %c0_23 = arith.constant 0 : index
    %c17_24 = arith.constant 17 : index
    %c0_25 = arith.constant 0 : index
    %11 = vector.load %arg5[%c0_23, %c17_24, %c0_25] : memref<18x18x4xbf16, #tpu.memory_space<vmem>>, vector<18x1x4xbf16>
    tpu.vector_store %arg5[%c0_23, %c17_24, %c0_25], %10 {strides = array<i32>} : memref<18x18x4xbf16, #tpu.memory_space<vmem>>, vector<18x1x4xbf16>,
    %c0_26 = arith.constant 0 : index
    %c0_27 = arith.constant 0 : index
    %c0_28 = arith.constant 0 : index
    %12 = vector.load %arg5[%c0_26, %c0_27, %c0_28] : memref<18x18x4xbf16, #tpu.memory_space<vmem>>, vector<16x16x4xbf16>
    %13 = vector.shape_cast %12 : vector<16x16x4xbf16> to vector<256x4xbf16>
    %c0_29 = arith.constant 0 : index
    %c0_30 = arith.constant 0 : index
    %c0_31 = arith.constant 0 : index
    %14 = vector.load %arg2[%c0_29, %c0_30, %c0_31] : memref<9x4x4xbf16, #tpu.memory_space<vmem>>, vector<1x4x4xbf16>
    %15 = vector.shape_cast %14 : vector<1x4x4xbf16> to vector<4x4xbf16>
    %cst = arith.constant dense<0.000000e+00> : vector<256x4xf32>
    %16 = tpu.matmul %13, %15, %cst {dimension_numbers = #tpu.dot_dimension_numbers<[1], [0], [0], [1], [0, 0, 1, 1], [], []>} : vector<256x4xbf16>, vector<4x4xbf16>, vector<256x4xf32> -> vector<256x4xf32>
    %c0_32 = arith.constant 0 : index
    %c1_33 = arith.constant 1 : index
    %c0_34 = arith.constant 0 : index
    %17 = vector.load %arg5[%c0_32, %c1_33, %c0_34] : memref<18x18x4xbf16, #tpu.memory_space<vmem>>, vector<16x16x4xbf16>
    %18 = vector.shape_cast %17 : vector<16x16x4xbf16> to vector<256x4xbf16>
    %c1_35 = arith.constant 1 : index
    %c0_36 = arith.constant 0 : index
    %c0_37 = arith.constant 0 : index
    %19 = vector.load %arg2[%c1_35, %c0_36, %c0_37] : memref<9x4x4xbf16, #tpu.memory_space<vmem>>, vector<1x4x4xbf16>
    %20 = vector.shape_cast %19 : vector<1x4x4xbf16> to vector<4x4xbf16>
    %cst_38 = arith.constant dense<0.000000e+00> : vector<256x4xf32>
    %21 = tpu.matmul %18, %20, %cst_38 {dimension_numbers = #tpu.dot_dimension_numbers<[1], [0], [0], [1], [0, 0, 1, 1], [], []>} : vector<256x4xbf16>, vector<4x4xbf16>, vector<256x4xf32> -> vector<256x4xf32>
    %22 = arith.addf %16, %21 : vector<256x4xf32>
    %c0_39 = arith.constant 0 : index
    %c2_40 = arith.constant 2 : index
    %c0_41 = arith.constant 0 : index
    %23 = vector.load %arg5[%c0_39, %c2_40, %c0_41] : memref<18x18x4xbf16, #tpu.memory_space<vmem>>, vector<16x16x4xbf16>
    %24 = vector.shape_cast %23 : vector<16x16x4xbf16> to vector<256x4xbf16>
    %c2_42 = arith.constant 2 : index
    %c0_43 = arith.constant 0 : index
    %c0_44 = arith.constant 0 : index
    %25 = vector.load %arg2[%c2_42, %c0_43, %c0_44] : memref<9x4x4xbf16, #tpu.memory_space<vmem>>, vector<1x4x4xbf16>
    %26 = vector.shape_cast %25 : vector<1x4x4xbf16> to vector<4x4xbf16>
    %cst_45 = arith.constant dense<0.000000e+00> : vector<256x4xf32>
    %27 = tpu.matmul %24, %26, %cst_45 {dimension_numbers = #tpu.dot_dimension_numbers<[1], [0], [0], [1], [0, 0, 1, 1], [], []>} : vector<256x4xbf16>, vector<4x4xbf16>, vector<256x4xf32> -> vector<256x4xf32>
    %28 = arith.addf %22, %27 : vector<256x4xf32>
    %c1_46 = arith.constant 1 : index
    %c0_47 = arith.constant 0 : index
    %c0_48 = arith.constant 0 : index
    %29 = vector.load %arg5[%c1_46, %c0_47, %c0_48] : memref<18x18x4xbf16, #tpu.memory_space<vmem>>, vector<16x16x4xbf16>
    %30 = vector.shape_cast %29 : vector<16x16x4xbf16> to vector<256x4xbf16>
    %c3 = arith.constant 3 : index
    %c0_49 = arith.constant 0 : index
    %c0_50 = arith.constant 0 : index
    %31 = vector.load %arg2[%c3, %c0_49, %c0_50] : memref<9x4x4xbf16, #tpu.memory_space<vmem>>, vector<1x4x4xbf16>
    %32 = vector.shape_cast %31 : vector<1x4x4xbf16> to vector<4x4xbf16>
    %cst_51 = arith.constant dense<0.000000e+00> : vector<256x4xf32>
    %33 = tpu.matmul %30, %32, %cst_51 {dimension_numbers = #tpu.dot_dimension_numbers<[1], [0], [0], [1], [0, 0, 1, 1], [], []>} : vector<256x4xbf16>, vector<4x4xbf16>, vector<256x4xf32> -> vector<256x4xf32>
    %34 = arith.addf %28, %33 : vector<256x4xf32>
    %c1_52 = arith.constant 1 : index
    %c1_53 = arith.constant 1 : index
    %c0_54 = arith.constant 0 : index
    %35 = vector.load %arg5[%c1_52, %c1_53, %c0_54] : memref<18x18x4xbf16, #tpu.memory_space<vmem>>, vector<16x16x4xbf16>
    %36 = vector.shape_cast %35 : vector<16x16x4xbf16> to vector<256x4xbf16>
    %c4 = arith.constant 4 : index
    %c0_55 = arith.constant 0 : index
    %c0_56 = arith.constant 0 : index
    %37 = vector.load %arg2[%c4, %c0_55, %c0_56] : memref<9x4x4xbf16, #tpu.memory_space<vmem>>, vector<1x4x4xbf16>
    %38 = vector.shape_cast %37 : vector<1x4x4xbf16> to vector<4x4xbf16>
    %cst_57 = arith.constant dense<0.000000e+00> : vector<256x4xf32>
    %39 = tpu.matmul %36, %38, %cst_57 {dimension_numbers = #tpu.dot_dimension_numbers<[1], [0], [0], [1], [0, 0, 1, 1], [], []>} : vector<256x4xbf16>, vector<4x4xbf16>, vector<256x4xf32> -> vector<256x4xf32>
    %40 = arith.addf %34, %39 : vector<256x4xf32>
    %c1_58 = arith.constant 1 : index
    %c2_59 = arith.constant 2 : index
    %c0_60 = arith.constant 0 : index
    %41 = vector.load %arg5[%c1_58, %c2_59, %c0_60] : memref<18x18x4xbf16, #tpu.memory_space<vmem>>, vector<16x16x4xbf16>
    %42 = vector.shape_cast %41 : vector<16x16x4xbf16> to vector<256x4xbf16>
    %c5 = arith.constant 5 : index
    %c0_61 = arith.constant 0 : index
    %c0_62 = arith.constant 0 : index
    %43 = vector.load %arg2[%c5, %c0_61, %c0_62] : memref<9x4x4xbf16, #tpu.memory_space<vmem>>, vector<1x4x4xbf16>
    %44 = vector.shape_cast %43 : vector<1x4x4xbf16> to vector<4x4xbf16>
    %cst_63 = arith.constant dense<0.000000e+00> : vector<256x4xf32>
    %45 = tpu.matmul %42, %44, %cst_63 {dimension_numbers = #tpu.dot_dimension_numbers<[1], [0], [0], [1], [0, 0, 1, 1], [], []>} : vector<256x4xbf16>, vector<4x4xbf16>, vector<256x4xf32> -> vector<256x4xf32>
    %46 = arith.addf %40, %45 : vector<256x4xf32>
    %c2_64 = arith.constant 2 : index
    %c0_65 = arith.constant 0 : index
    %c0_66 = arith.constant 0 : index
    %47 = vector.load %arg5[%c2_64, %c0_65, %c0_66] : memref<18x18x4xbf16, #tpu.memory_space<vmem>>, vector<16x16x4xbf16>
    %48 = vector.shape_cast %47 : vector<16x16x4xbf16> to vector<256x4xbf16>
    %c6 = arith.constant 6 : index
    %c0_67 = arith.constant 0 : index
    %c0_68 = arith.constant 0 : index
    %49 = vector.load %arg2[%c6, %c0_67, %c0_68] : memref<9x4x4xbf16, #tpu.memory_space<vmem>>, vector<1x4x4xbf16>
    %50 = vector.shape_cast %49 : vector<1x4x4xbf16> to vector<4x4xbf16>
    %cst_69 = arith.constant dense<0.000000e+00> : vector<256x4xf32>
    %51 = tpu.matmul %48, %50, %cst_69 {dimension_numbers = #tpu.dot_dimension_numbers<[1], [0], [0], [1], [0, 0, 1, 1], [], []>} : vector<256x4xbf16>, vector<4x4xbf16>, vector<256x4xf32> -> vector<256x4xf32>
    %52 = arith.addf %46, %51 : vector<256x4xf32>
    %c2_70 = arith.constant 2 : index
    %c1_71 = arith.constant 1 : index
    %c0_72 = arith.constant 0 : index
    %53 = vector.load %arg5[%c2_70, %c1_71, %c0_72] : memref<18x18x4xbf16, #tpu.memory_space<vmem>>, vector<16x16x4xbf16>
    %54 = vector.shape_cast %53 : vector<16x16x4xbf16> to vector<256x4xbf16>
    %c7 = arith.constant 7 : index
    %c0_73 = arith.constant 0 : index
    %c0_74 = arith.constant 0 : index
    %55 = vector.load %arg2[%c7, %c0_73, %c0_74] : memref<9x4x4xbf16, #tpu.memory_space<vmem>>, vector<1x4x4xbf16>
    %56 = vector.shape_cast %55 : vector<1x4x4xbf16> to vector<4x4xbf16>
    %cst_75 = arith.constant dense<0.000000e+00> : vector<256x4xf32>
    %57 = tpu.matmul %54, %56, %cst_75 {dimension_numbers = #tpu.dot_dimension_numbers<[1], [0], [0], [1], [0, 0, 1, 1], [], []>} : vector<256x4xbf16>, vector<4x4xbf16>, vector<256x4xf32> -> vector<256x4xf32>
    %58 = arith.addf %52, %57 : vector<256x4xf32>
    %c2_76 = arith.constant 2 : index
    %c2_77 = arith.constant 2 : index
    %c0_78 = arith.constant 0 : index
    %59 = vector.load %arg5[%c2_76, %c2_77, %c0_78] : memref<18x18x4xbf16, #tpu.memory_space<vmem>>, vector<16x16x4xbf16>
    %60 = vector.shape_cast %59 : vector<16x16x4xbf16> to vector<256x4xbf16>
    %c8 = arith.constant 8 : index
    %c0_79 = arith.constant 0 : index
    %c0_80 = arith.constant 0 : index
    %61 = vector.load %arg2[%c8, %c0_79, %c0_80] : memref<9x4x4xbf16, #tpu.memory_space<vmem>>, vector<1x4x4xbf16>
    %62 = vector.shape_cast %61 : vector<1x4x4xbf16> to vector<4x4xbf16>
    %cst_81 = arith.constant dense<0.000000e+00> : vector<256x4xf32>
    %63 = tpu.matmul %60, %62, %cst_81 {dimension_numbers = #tpu.dot_dimension_numbers<[1], [0], [0], [1], [0, 0, 1, 1], [], []>} : vector<256x4xbf16>, vector<4x4xbf16>, vector<256x4xf32> -> vector<256x4xf32>
    %64 = arith.addf %58, %63 : vector<256x4xf32>
    %cst_82 = arith.constant dense<0.000000e+00> : vector<4xf32>
    %65 = vector.multi_reduction <add>, %64, %cst_82 [0] : vector<256x4xf32> to vector<4xf32>
    %66 = vector.shape_cast %65 : vector<4xf32> to vector<1x4xf32>
    %67 = arith.mulf %64, %64 : vector<256x4xf32>
    %cst_83 = arith.constant dense<0.000000e+00> : vector<4xf32>
    %68 = vector.multi_reduction <add>, %67, %cst_83 [0] : vector<256x4xf32> to vector<4xf32>
    %69 = vector.shape_cast %68 : vector<4xf32> to vector<1x4xf32>
    %cst_84 = arith.constant 3.906250e-03 : f32
    %70 = vector.broadcast %cst_84 : f32 to vector<1x4xf32>
    %71 = arith.mulf %66, %70 : vector<1x4xf32>
    %cst_85 = arith.constant 3.906250e-03 : f32
    %72 = vector.broadcast %cst_85 : f32 to vector<1x4xf32>
    %73 = arith.mulf %69, %72 : vector<1x4xf32>
    %74 = arith.mulf %71, %71 : vector<1x4xf32>
    %75 = arith.subf %73, %74 : vector<1x4xf32>
    %76 = vector.broadcast %71 : vector<1x4xf32> to vector<256x4xf32>
    %77 = arith.subf %64, %76 : vector<256x4xf32>
    %cst_86 = arith.constant 9.99999974E-6 : f32
    %78 = vector.broadcast %cst_86 : f32 to vector<1x4xf32>
    %79 = arith.addf %75, %78 : vector<1x4xf32>
    %80 = math.rsqrt %79 : vector<1x4xf32>
    %81 = vector.broadcast %80 : vector<1x4xf32> to vector<256x4xf32>
    %82 = arith.mulf %77, %81 : vector<256x4xf32>
    %cst_87 = arith.constant 0.000000e+00 : f32
    %83 = vector.broadcast %cst_87 : f32 to vector<256x4xf32>
    %84 = arith.maximumf %82, %83 : vector<256x4xf32>
    %85 = vector.shape_cast %84 : vector<256x4xf32> to vector<16x16x4xf32>
    %86 = arith.truncf %85 : vector<16x16x4xf32> to vector<16x16x4xbf16>
    %c1_88 = arith.constant 1 : index
    %c1_89 = arith.constant 1 : index
    %c0_90 = arith.constant 0 : index
    %87 = vector.load %arg5[%c1_88, %c1_89, %c0_90] : memref<18x18x4xbf16, #tpu.memory_space<vmem>>, vector<16x16x4xbf16>
    tpu.vector_store %arg5[%c1_88, %c1_89, %c0_90], %86 {strides = array<i32>} : memref<18x18x4xbf16, #tpu.memory_space<vmem>>, vector<16x16x4xbf16>,
    %c2_91 = arith.constant 2 : index
    %c0_92 = arith.constant 0 : index
    %c0_93 = arith.constant 0 : index
    %88 = vector.load %arg5[%c2_91, %c0_92, %c0_93] : memref<18x18x4xbf16, #tpu.memory_space<vmem>>, vector<1x18x4xbf16>
    %c0_94 = arith.constant 0 : index
    %c0_95 = arith.constant 0 : index
    %c0_96 = arith.constant 0 : index
    %89 = vector.load %arg5[%c0_94, %c0_95, %c0_96] : memref<18x18x4xbf16, #tpu.memory_space<vmem>>, vector<1x18x4xbf16>
    tpu.vector_store %arg5[%c0_94, %c0_95, %c0_96], %88 {strides = array<i32>} : memref<18x18x4xbf16, #tpu.memory_space<vmem>>, vector<1x18x4xbf16>,
    %c15_97 = arith.constant 15 : index
    %c0_98 = arith.constant 0 : index
    %c0_99 = arith.constant 0 : index
    %90 = vector.load %arg5[%c15_97, %c0_98, %c0_99] : memref<18x18x4xbf16, #tpu.memory_space<vmem>>, vector<1x18x4xbf16>
    %c17_100 = arith.constant 17 : index
    %c0_101 = arith.constant 0 : index
    %c0_102 = arith.constant 0 : index
    %91 = vector.load %arg5[%c17_100, %c0_101, %c0_102] : memref<18x18x4xbf16, #tpu.memory_space<vmem>>, vector<1x18x4xbf16>
    tpu.vector_store %arg5[%c17_100, %c0_101, %c0_102], %90 {strides = array<i32>} : memref<18x18x4xbf16, #tpu.memory_space<vmem>>, vector<1x18x4xbf16>,
    %c0_103 = arith.constant 0 : index
    %c2_104 = arith.constant 2 : index
    %c0_105 = arith.constant 0 : index
    %92 = vector.load %arg5[%c0_103, %c2_104, %c0_105] : memref<18x18x4xbf16, #tpu.memory_space<vmem>>, vector<18x1x4xbf16>
    %c0_106 = arith.constant 0 : index
    %c0_107 = arith.constant 0 : index
    %c0_108 = arith.constant 0 : index
    %93 = vector.load %arg5[%c0_106, %c0_107, %c0_108] : memref<18x18x4xbf16, #tpu.memory_space<vmem>>, vector<18x1x4xbf16>
    tpu.vector_store %arg5[%c0_106, %c0_107, %c0_108], %92 {strides = array<i32>} : memref<18x18x4xbf16, #tpu.memory_space<vmem>>, vector<18x1x4xbf16>,
    %c0_109 = arith.constant 0 : index
    %c15_110 = arith.constant 15 : index
    %c0_111 = arith.constant 0 : index
    %94 = vector.load %arg5[%c0_109, %c15_110, %c0_111] : memref<18x18x4xbf16, #tpu.memory_space<vmem>>, vector<18x1x4xbf16>
    %c0_112 = arith.constant 0 : index
    %c17_113 = arith.constant 17 : index
    %c0_114 = arith.constant 0 : index
    %95 = vector.load %arg5[%c0_112, %c17_113, %c0_114] : memref<18x18x4xbf16, #tpu.memory_space<vmem>>, vector<18x1x4xbf16>
    tpu.vector_store %arg5[%c0_112, %c17_113, %c0_114], %94 {strides = array<i32>} : memref<18x18x4xbf16, #tpu.memory_space<vmem>>, vector<18x1x4xbf16>,
    %c0_115 = arith.constant 0 : index
    %c0_116 = arith.constant 0 : index
    %c0_117 = arith.constant 0 : index
    %96 = vector.load %arg5[%c0_115, %c0_116, %c0_117] : memref<18x18x4xbf16, #tpu.memory_space<vmem>>, vector<16x16x4xbf16>
    %97 = vector.shape_cast %96 : vector<16x16x4xbf16> to vector<256x4xbf16>
    %c0_118 = arith.constant 0 : index
    %c0_119 = arith.constant 0 : index
    %c0_120 = arith.constant 0 : index
    %98 = vector.load %arg3[%c0_118, %c0_119, %c0_120] : memref<9x4x4xbf16, #tpu.memory_space<vmem>>, vector<1x4x4xbf16>
    %99 = vector.shape_cast %98 : vector<1x4x4xbf16> to vector<4x4xbf16>
    %cst_121 = arith.constant dense<0.000000e+00> : vector<256x4xf32>
    %100 = tpu.matmul %97, %99, %cst_121 {dimension_numbers = #tpu.dot_dimension_numbers<[1], [0], [0], [1], [0, 0, 1, 1], [], []>} : vector<256x4xbf16>, vector<4x4xbf16>, vector<256x4xf32> -> vector<256x4xf32>
    %c0_122 = arith.constant 0 : index
    %c1_123 = arith.constant 1 : index
    %c0_124 = arith.constant 0 : index
    %101 = vector.load %arg5[%c0_122, %c1_123, %c0_124] : memref<18x18x4xbf16, #tpu.memory_space<vmem>>, vector<16x16x4xbf16>
    %102 = vector.shape_cast %101 : vector<16x16x4xbf16> to vector<256x4xbf16>
    %c1_125 = arith.constant 1 : index
    %c0_126 = arith.constant 0 : index
    %c0_127 = arith.constant 0 : index
    %103 = vector.load %arg3[%c1_125, %c0_126, %c0_127] : memref<9x4x4xbf16, #tpu.memory_space<vmem>>, vector<1x4x4xbf16>
    %104 = vector.shape_cast %103 : vector<1x4x4xbf16> to vector<4x4xbf16>
    %cst_128 = arith.constant dense<0.000000e+00> : vector<256x4xf32>
    %105 = tpu.matmul %102, %104, %cst_128 {dimension_numbers = #tpu.dot_dimension_numbers<[1], [0], [0], [1], [0, 0, 1, 1], [], []>} : vector<256x4xbf16>, vector<4x4xbf16>, vector<256x4xf32> -> vector<256x4xf32>
    %106 = arith.addf %100, %105 : vector<256x4xf32>
    %c0_129 = arith.constant 0 : index
    %c2_130 = arith.constant 2 : index
    %c0_131 = arith.constant 0 : index
    %107 = vector.load %arg5[%c0_129, %c2_130, %c0_131] : memref<18x18x4xbf16, #tpu.memory_space<vmem>>, vector<16x16x4xbf16>
    %108 = vector.shape_cast %107 : vector<16x16x4xbf16> to vector<256x4xbf16>
    %c2_132 = arith.constant 2 : index
    %c0_133 = arith.constant 0 : index
    %c0_134 = arith.constant 0 : index
    %109 = vector.load %arg3[%c2_132, %c0_133, %c0_134] : memref<9x4x4xbf16, #tpu.memory_space<vmem>>, vector<1x4x4xbf16>
    %110 = vector.shape_cast %109 : vector<1x4x4xbf16> to vector<4x4xbf16>
    %cst_135 = arith.constant dense<0.000000e+00> : vector<256x4xf32>
    %111 = tpu.matmul %108, %110, %cst_135 {dimension_numbers = #tpu.dot_dimension_numbers<[1], [0], [0], [1], [0, 0, 1, 1], [], []>} : vector<256x4xbf16>, vector<4x4xbf16>, vector<256x4xf32> -> vector<256x4xf32>
    %112 = arith.addf %106, %111 : vector<256x4xf32>
    %c1_136 = arith.constant 1 : index
    %c0_137 = arith.constant 0 : index
    %c0_138 = arith.constant 0 : index
    %113 = vector.load %arg5[%c1_136, %c0_137, %c0_138] : memref<18x18x4xbf16, #tpu.memory_space<vmem>>, vector<16x16x4xbf16>
    %114 = vector.shape_cast %113 : vector<16x16x4xbf16> to vector<256x4xbf16>
    %c3_139 = arith.constant 3 : index
    %c0_140 = arith.constant 0 : index
    %c0_141 = arith.constant 0 : index
    %115 = vector.load %arg3[%c3_139, %c0_140, %c0_141] : memref<9x4x4xbf16, #tpu.memory_space<vmem>>, vector<1x4x4xbf16>
    %116 = vector.shape_cast %115 : vector<1x4x4xbf16> to vector<4x4xbf16>
    %cst_142 = arith.constant dense<0.000000e+00> : vector<256x4xf32>
    %117 = tpu.matmul %114, %116, %cst_142 {dimension_numbers = #tpu.dot_dimension_numbers<[1], [0], [0], [1], [0, 0, 1, 1], [], []>} : vector<256x4xbf16>, vector<4x4xbf16>, vector<256x4xf32> -> vector<256x4xf32>
    %118 = arith.addf %112, %117 : vector<256x4xf32>
    %c1_143 = arith.constant 1 : index
    %c1_144 = arith.constant 1 : index
    %c0_145 = arith.constant 0 : index
    %119 = vector.load %arg5[%c1_143, %c1_144, %c0_145] : memref<18x18x4xbf16, #tpu.memory_space<vmem>>, vector<16x16x4xbf16>
    %120 = vector.shape_cast %119 : vector<16x16x4xbf16> to vector<256x4xbf16>
    %c4_146 = arith.constant 4 : index
    %c0_147 = arith.constant 0 : index
    %c0_148 = arith.constant 0 : index
    %121 = vector.load %arg3[%c4_146, %c0_147, %c0_148] : memref<9x4x4xbf16, #tpu.memory_space<vmem>>, vector<1x4x4xbf16>
    %122 = vector.shape_cast %121 : vector<1x4x4xbf16> to vector<4x4xbf16>
    %cst_149 = arith.constant dense<0.000000e+00> : vector<256x4xf32>
    %123 = tpu.matmul %120, %122, %cst_149 {dimension_numbers = #tpu.dot_dimension_numbers<[1], [0], [0], [1], [0, 0, 1, 1], [], []>} : vector<256x4xbf16>, vector<4x4xbf16>, vector<256x4xf32> -> vector<256x4xf32>
    %124 = arith.addf %118, %123 : vector<256x4xf32>
    %c1_150 = arith.constant 1 : index
    %c2_151 = arith.constant 2 : index
    %c0_152 = arith.constant 0 : index
    %125 = vector.load %arg5[%c1_150, %c2_151, %c0_152] : memref<18x18x4xbf16, #tpu.memory_space<vmem>>, vector<16x16x4xbf16>
    %126 = vector.shape_cast %125 : vector<16x16x4xbf16> to vector<256x4xbf16>
    %c5_153 = arith.constant 5 : index
    %c0_154 = arith.constant 0 : index
    %c0_155 = arith.constant 0 : index
    %127 = vector.load %arg3[%c5_153, %c0_154, %c0_155] : memref<9x4x4xbf16, #tpu.memory_space<vmem>>, vector<1x4x4xbf16>
    %128 = vector.shape_cast %127 : vector<1x4x4xbf16> to vector<4x4xbf16>
    %cst_156 = arith.constant dense<0.000000e+00> : vector<256x4xf32>
    %129 = tpu.matmul %126, %128, %cst_156 {dimension_numbers = #tpu.dot_dimension_numbers<[1], [0], [0], [1], [0, 0, 1, 1], [], []>} : vector<256x4xbf16>, vector<4x4xbf16>, vector<256x4xf32> -> vector<256x4xf32>
    %130 = arith.addf %124, %129 : vector<256x4xf32>
    %c2_157 = arith.constant 2 : index
    %c0_158 = arith.constant 0 : index
    %c0_159 = arith.constant 0 : index
    %131 = vector.load %arg5[%c2_157, %c0_158, %c0_159] : memref<18x18x4xbf16, #tpu.memory_space<vmem>>, vector<16x16x4xbf16>
    %132 = vector.shape_cast %131 : vector<16x16x4xbf16> to vector<256x4xbf16>
    %c6_160 = arith.constant 6 : index
    %c0_161 = arith.constant 0 : index
    %c0_162 = arith.constant 0 : index
    %133 = vector.load %arg3[%c6_160, %c0_161, %c0_162] : memref<9x4x4xbf16, #tpu.memory_space<vmem>>, vector<1x4x4xbf16>
    %134 = vector.shape_cast %133 : vector<1x4x4xbf16> to vector<4x4xbf16>
    %cst_163 = arith.constant dense<0.000000e+00> : vector<256x4xf32>
    %135 = tpu.matmul %132, %134, %cst_163 {dimension_numbers = #tpu.dot_dimension_numbers<[1], [0], [0], [1], [0, 0, 1, 1], [], []>} : vector<256x4xbf16>, vector<4x4xbf16>, vector<256x4xf32> -> vector<256x4xf32>
    %136 = arith.addf %130, %135 : vector<256x4xf32>
    %c2_164 = arith.constant 2 : index
    %c1_165 = arith.constant 1 : index
    %c0_166 = arith.constant 0 : index
    %137 = vector.load %arg5[%c2_164, %c1_165, %c0_166] : memref<18x18x4xbf16, #tpu.memory_space<vmem>>, vector<16x16x4xbf16>
    %138 = vector.shape_cast %137 : vector<16x16x4xbf16> to vector<256x4xbf16>
    %c7_167 = arith.constant 7 : index
    %c0_168 = arith.constant 0 : index
    %c0_169 = arith.constant 0 : index
    %139 = vector.load %arg3[%c7_167, %c0_168, %c0_169] : memref<9x4x4xbf16, #tpu.memory_space<vmem>>, vector<1x4x4xbf16>
    %140 = vector.shape_cast %139 : vector<1x4x4xbf16> to vector<4x4xbf16>
    %cst_170 = arith.constant dense<0.000000e+00> : vector<256x4xf32>
    %141 = tpu.matmul %138, %140, %cst_170 {dimension_numbers = #tpu.dot_dimension_numbers<[1], [0], [0], [1], [0, 0, 1, 1], [], []>} : vector<256x4xbf16>, vector<4x4xbf16>, vector<256x4xf32> -> vector<256x4xf32>
    %142 = arith.addf %136, %141 : vector<256x4xf32>
    %c2_171 = arith.constant 2 : index
    %c2_172 = arith.constant 2 : index
    %c0_173 = arith.constant 0 : index
    %143 = vector.load %arg5[%c2_171, %c2_172, %c0_173] : memref<18x18x4xbf16, #tpu.memory_space<vmem>>, vector<16x16x4xbf16>
    %144 = vector.shape_cast %143 : vector<16x16x4xbf16> to vector<256x4xbf16>
    %c8_174 = arith.constant 8 : index
    %c0_175 = arith.constant 0 : index
    %c0_176 = arith.constant 0 : index
    %145 = vector.load %arg3[%c8_174, %c0_175, %c0_176] : memref<9x4x4xbf16, #tpu.memory_space<vmem>>, vector<1x4x4xbf16>
    %146 = vector.shape_cast %145 : vector<1x4x4xbf16> to vector<4x4xbf16>
    %cst_177 = arith.constant dense<0.000000e+00> : vector<256x4xf32>
    %147 = tpu.matmul %144, %146, %cst_177 {dimension_numbers = #tpu.dot_dimension_numbers<[1], [0], [0], [1], [0, 0, 1, 1], [], []>} : vector<256x4xbf16>, vector<4x4xbf16>, vector<256x4xf32> -> vector<256x4xf32>
    %148 = arith.addf %142, %147 : vector<256x4xf32>
    %cst_178 = arith.constant dense<0.000000e+00> : vector<4xf32>
    %149 = vector.multi_reduction <add>, %148, %cst_178 [0] : vector<256x4xf32> to vector<4xf32>
    %150 = vector.shape_cast %149 : vector<4xf32> to vector<1x4xf32>
    %151 = arith.mulf %148, %148 : vector<256x4xf32>
    %cst_179 = arith.constant dense<0.000000e+00> : vector<4xf32>
    %152 = vector.multi_reduction <add>, %151, %cst_179 [0] : vector<256x4xf32> to vector<4xf32>
    %153 = vector.shape_cast %152 : vector<4xf32> to vector<1x4xf32>
    %cst_180 = arith.constant 3.906250e-03 : f32
    %154 = vector.broadcast %cst_180 : f32 to vector<1x4xf32>
    %155 = arith.mulf %150, %154 : vector<1x4xf32>
    %cst_181 = arith.constant 3.906250e-03 : f32
    %156 = vector.broadcast %cst_181 : f32 to vector<1x4xf32>
    %157 = arith.mulf %153, %156 : vector<1x4xf32>
    %158 = arith.mulf %155, %155 : vector<1x4xf32>
    %159 = arith.subf %157, %158 : vector<1x4xf32>
    %160 = vector.broadcast %155 : vector<1x4xf32> to vector<256x4xf32>
    %161 = arith.subf %148, %160 : vector<256x4xf32>
    %cst_182 = arith.constant 9.99999974E-6 : f32
    %162 = vector.broadcast %cst_182 : f32 to vector<1x4xf32>
    %163 = arith.addf %159, %162 : vector<1x4xf32>
    %164 = math.rsqrt %163 : vector<1x4xf32>
    %165 = vector.broadcast %164 : vector<1x4xf32> to vector<256x4xf32>
    %166 = arith.mulf %161, %165 : vector<256x4xf32>
    %c0_183 = arith.constant 0 : index
    %c0_184 = arith.constant 0 : index
    %c0_185 = arith.constant 0 : index
    %c0_186 = arith.constant 0 : index
    %167 = vector.load %arg1[%c0_183, %c0_184, %c0_185, %c0_186] : memref<1x16x16x4xf32, #tpu.memory_space<vmem>>, vector<1x16x16x4xf32>
    %168 = vector.shape_cast %166 : vector<256x4xf32> to vector<1x16x16x4xf32>
    %169 = arith.addf %167, %168 : vector<1x16x16x4xf32>
    %c0_187 = arith.constant 0 : index
    %c0_188 = arith.constant 0 : index
    %c0_189 = arith.constant 0 : index
    %c0_190 = arith.constant 0 : index
    %170 = vector.load %arg4[%c0_187, %c0_188, %c0_189, %c0_190] : memref<1x16x16x4xf32, #tpu.memory_space<vmem>>, vector<1x16x16x4xf32>
    tpu.vector_store %arg4[%c0_187, %c0_188, %c0_189, %c0_190], %169 {strides = array<i32>} : memref<1x16x16x4xf32, #tpu.memory_space<vmem>>, vector<1x16x16x4xf32>,
    return
  }
  func.func @transform_0(%arg0: i32) -> (i32, i32, i32, i32) {
    %c0_i32 = arith.constant 0 : i32
    %c0_i32_0 = arith.constant 0 : i32
    %c0_i32_1 = arith.constant 0 : i32
    %c0_i32_2 = arith.constant 0 : i32
    return %arg0, %c0_i32, %c0_i32_0, %c0_i32_1 : i32, i32, i32, i32
  }
  func.func @transform_1(%arg0: i32) -> (i32, i32, i32) {
    %c0_i32 = arith.constant 0 : i32
    %c0_i32_0 = arith.constant 0 : i32
    %c0_i32_1 = arith.constant 0 : i32
    %c0_i32_2 = arith.constant 0 : i32
    return %c0_i32, %c0_i32_0, %c0_i32_1 : i32, i32, i32
  }
  func.func @transform_2(%arg0: i32) -> (i32, i32, i32) {
    %c0_i32 = arith.constant 0 : i32
    %c0_i32_0 = arith.constant 0 : i32
    %c0_i32_1 = arith.constant 0 : i32
    %c0_i32_2 = arith.constant 0 : i32
    return %c0_i32, %c0_i32_0, %c0_i32_1 : i32, i32, i32
  }
  func.func @transform_3(%arg0: i32) -> (i32, i32, i32, i32) {
    %c0_i32 = arith.constant 0 : i32
    %c0_i32_0 = arith.constant 0 : i32
    %c0_i32_1 = arith.constant 0 : i32
    %c0_i32_2 = arith.constant 0 : i32
    return %arg0, %c0_i32, %c0_i32_0, %c0_i32_1 : i32, i32, i32, i32
  }
}

</mosaic_0001>

<bundles_post_ra>
// kernel: resnet_block_nhwc.1
= control target key start
LH: loop header
LB: loop body
LE: loop exit
PB: predicated region body
PF: predicated region fallthrough
CT: control target
= control target key end

     0   :  { %8 = vsyncpa [#allocation4], 0  ;;  %s19256_s0 = inlined_call_operand.hbm [shape: f32[2,16,16,4], index: 0, kind: input, shape index: {}]   ;;  %s19257_s1 = inlined_call_operand.hbm [shape: bf16[9,4,4], index: 1, kind: input, shape index: {}]   ;;  %s19258_s2 = inlined_call_operand.hbm [shape: bf16[9,4,4], index: 2, kind: input, shape index: {}]   ;;  %s19259_s3 = inlined_call_operand.hbm [shape: f32[2,16,16,4], index: 3, kind: output, shape index: {}]  }
   0x1   :  { %10 = vsyncpa [#allocation4 + $0x1], 0 }
   0x2   :  { %11 = vsyncpa [#allocation7], 0 }
   0x3   :  { %12 = vsyncpa [#allocation5], 0 }
   0x4   :  { %14 = vsyncpa [#allocation5 + $0x1], 0  ;;  %s14450_s12 = smov 0   ;;  %s14452_s13 = smov 0  }
   0x5   :  { %s14454_s14 = smov 0   ;;  %s14456_s15 = smov 0  }
   0x6 LB: > { %s14471_s16 = sadd.s32 4294967295, %s14418_s15   ;;  %s11741_s17 = sadd.s32 4294967294, %s14418_s15   ;;  %s14418_s15 = sphi %s14456_s15, %s19619_s15   ;;  %s14414_s14 = sphi %s14454_s14, %s19618_s14   ;;  %s14410_s13 = sphi %s14452_s13, %s19617_s13   ;;  %s14406_s12 = sphi %s14450_s12, %s19616_s12  }
   0x7   : > { %p40_p0 = scmp.ne.s32.totalorder %s14410_s13, %s14406_s12  ;;  %p19260_p1 = scmp.eq.s32.totalorder %s14471_s16, 0 }
   0x8   : > { %p112_p3 = scmp.eq.s32.totalorder %s11741_s17, 1  ;;  %p11742_p5 = scmp.ge.s32.totalorder %s14418_s15, 1 }
   0x9   : > { %p14480_p4 = por %p19260_p1, %p40_p0  ;;  %p119_p7 = scmp.lt.s32.totalorder %s14418_s15, 3 }
   0xa   : > { %p14485_p6 = por %p112_p3, %p40_p0  ;;  %s14420_s21 = smov [#allocation6]  }
   0xb   : > { %s19362_s18 = scalar_select %p14480_p4, 1, 0 }
   0xc   : > { %s19363_s19 = scalar_select %p14485_p6, 1, 0 }
   0xd   : > { %p14490_p8 = pnand %p11742_p5, %p119_p7  ;;  %s131_s22 = sshll.u32 %s14420_s21, 4  ;;  %s14494_s22 = int_to_ptr.vmem [resolvable:$true] %s131_s22 }
   0xe   : > { %s14421_s24 = smov [#allocation8]   ;;  %s14262_s28 = scalar_lea.hbm %s19257_s1, 288 }
   0xf   : > { %p14093_p9 = pneg %p14490_p8  ;;  %s144_s25 = sshll.u32 %s14421_s24, 4  ;;  %s14505_s25 = int_to_ptr.vmem [resolvable:$true] %s144_s25 }
  0x10   : > { %p14263_p12 = scmp.ne.s32.totalorder %s19257_s1, %s14262_s28  ;;  %p14269_p5 = scmp.lt.u32.totalorder %s14262_s28, %s19257_s1 }
  0x11   : > { %p14501_p11 = pnand %p14093_p9, %p19260_p1 }
  0x13   : > { %p14264_p13 = pneg %p14501_p11 }
  0x15   : > { %p14265_p0 = pnand %p14264_p13, %p14263_p12 }
  0x17   : > { %p14266_p3 = pneg %p14265_p0 }
  0x19   : > { %p14271_p7 = pnand %p14269_p5, %p14266_p3 }
  0x1b   : > { %14274 = shalt.err (!%p14271_p7)
}
  0x1c   : > { %s14275_s6 = scalar_lea.vmem %s14494_s22, 288  ;;  %p14283_p2 = scmp.lt.s32.totalorder %s14494_s22, %s14494_s22 }
  0x1d   : > { %p14276_p9 = scmp.ne.s32.totalorder %s14494_s22, %s14275_s6  ;;  %p14284_p12 = scmp.lt.s32.totalorder %s14275_s6, %s14275_s6 }
  0x1f   : > { %p14278_p10 = pnand %p14276_p9, %p14264_p13  ;;  %p14285_p0 = por %p14284_p12, %p14283_p2 }
  0x21   : > { %p14279_p1 = pneg %p14278_p10 }
  0x23   : > { %p14286_p6 = pnand %p14285_p0, %p14279_p1 }
  0x25   : > { %14289 = shalt.err (!%p14286_p6)
}
  0x26   : > { %s14422_s7 = smov 32   ;;  %s14423_s8 = smov 2  }
  0x27   : > { %14096 = dma.hbm_to_vmem [thread:$0]  (!%p14501_p11), %s19257_s1, 288, %s14494_s22, [#allocation7], %s14422_s7, %s14422_s7, %s14423_s8  }
  0x28   : > { %s14290_s21 = scalar_lea.hbm %s19258_s2, 288 }
  0x29   : > { %p14291_p2 = scmp.ne.s32.totalorder %s19258_s2, %s14290_s21  ;;  %p14297_p10 = scmp.lt.u32.totalorder %s14290_s21, %s19258_s2 }
  0x2b   : > { %p14293_p1 = pnand %p14291_p2, %p14264_p13 }
  0x2d   : > { %p14294_p6 = pneg %p14293_p1 }
  0x2f   : > { %p14299_p3 = pnand %p14297_p10, %p14294_p6 }
  0x31   : > { %14302 = shalt.err (!%p14299_p3)
}
  0x32   : > { %s14303_s22 = scalar_lea.vmem %s14505_s25, 288  ;;  %p14311_p12 = scmp.lt.s32.totalorder %s14505_s25, %s14505_s25 }
  0x33   : > { %p14304_p5 = scmp.ne.s32.totalorder %s14505_s25, %s14303_s22  ;;  %p14312_p0 = scmp.lt.s32.totalorder %s14303_s22, %s14303_s22 }
  0x35   : > { %p14306_p7 = pnand %p14304_p5, %p14264_p13  ;;  %p14313_p2 = por %p14312_p0, %p14311_p12 }
  0x37   : > { %p14307_p9 = pneg %p14306_p7 }
  0x39   : > { %p14314_p1 = pnand %p14313_p2, %p14307_p9 }
  0x3b   : > { %14317 = shalt.err (!%p14314_p1)
}
  0x3c   : > { %14099 = dma.hbm_to_vmem [thread:$0]  (!%p14501_p11), %s19258_s2, 288, %s14505_s25, [#allocation7], %s14422_s7, %s14422_s7, %s14423_s8  }
  0x3d   : > { %s14560_s4 = sadd.s32 1, %s14418_s15   ;;  %s27_s23 = sadd.s32 1, %s14414_s14 }
  0x3e   : > { %s24_s5 = ssub.s32 %s14418_s15, %s14560_s4  ;;  %p34_p13 = scmp.ne.s32.totalorder %s14414_s14, %s14410_s13 }
  0x3f   : > { %p25_p6 = scmp.eq.s32.totalorder %s24_s5, 0  ;;  %p35_p10 = scmp.eq.s32.totalorder %s14418_s15, 0 }
  0x40   : > { %p19366_p3 = scmp.eq.s32.totalorder %s14471_s16, 1  ;;  %p14110_p7 = scmp.lt.s32.totalorder %s14418_s15, 2 }
  0x41   : > { %s14576_s9 = scalar_select %p25_p6, %s14414_s14, %s27_s23  }
  0x42   : > { %p14570_p5 = por %p19366_p3, %p34_p13  ;;  %p36_p9 = por %p35_p10, %p34_p13 }
  0x43   : > { %s158_s10 = sand.u32 1, %s14414_s14   ;;  %s12567_s25 = sshll.u32 %s14418_s15, 12 }
  0x44   : > { %s19367_s6 = scalar_select %p14570_p5, 1, 0 }
  0x45   : > { %s11746_s11 = sshll.u32 %s158_s10, 8  ;;  %s14583_s17 = scalar_lea.hbm %s19256_s0, %s12567_s25 }
  0x46   : > { %s162_s21 = scalar_lea.vmem [#allocation3], %s11746_s11  ;;  %p14587_p11 = pnand %p14110_p7, %p36_p9 }
  0x47   : > { %s169_s24 = sshll.u32 %s162_s21, 4  ;;  %s14591_s27 = scalar_lea.sflag [#allocation4], %s158_s10  ;;  %s14585_s24 = int_to_ptr.vmem [resolvable:$true] %s169_s24 }
  0x48   : > { %s14318_s28 = scalar_lea.hbm %s14583_s17, 4096  ;;  %p14320_p0 = pneg %p14587_p11 }
  0x49   : > { %p14319_p12 = scmp.ne.s32.totalorder %s14583_s17, %s14318_s28  ;;  %s14323_s30 = scalar_lea.hbm %s19256_s0, 8192 }
  0x4a   : > { %p14324_p13 = scmp.lt.u32.totalorder %s14583_s17, %s19256_s0  ;;  %p14325_p6 = scmp.lt.u32.totalorder %s14323_s30, %s14318_s28 }
  0x4b   : > { %p14321_p2 = pnand %p14320_p0, %p14319_p12  ;;  %p14327_p3 = scmp.lt.u32.totalorder %s14318_s28, %s14583_s17 }
  0x4c   : > { %p14326_p10 = por %p14325_p6, %p14324_p13 }
  0x4d   : > { %p14322_p1 = pneg %p14321_p2 }
  0x4e   : > { %p14328_p7 = por %p14327_p3, %p14326_p10 }
  0x50   : > { %p14329_p9 = pnand %p14328_p7, %p14322_p1 }
  0x52   : > { %14332 = shalt.err (!%p14329_p9)
}
  0x53   : > { %s14333_s10 = scalar_lea.vmem %s14585_s24, 4096  ;;  %s14424_s11 = smov [#allocation3]  }
  0x54   : > { %p14334_p12 = scmp.ne.s32.totalorder %s14585_s24, %s14333_s10  ;;  %s14338_s25 = sshll.u32 %s14424_s11, 4  ;;  %s14339_s25 = int_to_ptr.vmem [resolvable:$false] %s14338_s25 }
  0x55   : > { %s14340_s7 = scalar_lea.vmem %s14339_s25, 8192  ;;  %p14341_p4 = scmp.lt.s32.totalorder %s14585_s24, %s14339_s25 }
  0x56   : > { %p14336_p2 = pnand %p14334_p12, %p14320_p0  ;;  %p14342_p13 = scmp.lt.s32.totalorder %s14340_s7, %s14333_s10 }
  0x58   : > { %p14337_p5 = pneg %p14336_p2  ;;  %p14343_p6 = por %p14342_p13, %p14341_p4 }
  0x5a   : > { %p14344_p10 = pnand %p14343_p6, %p14337_p5 }
  0x5c   : > { %14347 = shalt.err (!%p14344_p10)
}
  0x5d   : > { %s14425_s8 = smov 128   ;;  %s14426_s21 = smov 8  }
  0x5e   : > { %14103 = dma.hbm_to_vmem [thread:$0]  (!%p14587_p11), %s14583_s17, 4096, %s14585_s24, %s14591_s27, %s14425_s8, %s14425_s8, %s14426_s21  }
  0x5f   : > { %181 = sbr.rel (%p14490_p8) target bundleno = 2049 (0x801), region = 32 }
  0x66   : > { %s14622_s28 = sand.u32 1, %s14410_s13   ;;  %p19369_p4 = scmp.ne.s32.totalorder %s19362_s18, 0 }
  0x67   : > { %s11750_s22 = sshll.u32 %s14622_s28, 8  ;;  %s184_s29 = scalar_lea.sflag [#allocation4], %s14622_s28 }
  0x68   : > { %s14628_s30 = scalar_lea.vmem [#allocation3], %s11750_s22 }
  0x69   : > { %14393 = dma.done.wait (%p19369_p4), %s184_s29, 4096  }
  0x6a   : > { %14395 = vsyncadd (%p19369_p4), %s184_s29, 4294963200  ;;  %p19370_p5 = scmp.eq.s32.totalorder %s14471_s16, 0 }
  0x6c   : > { %14397 = dma.done.wait (%p19370_p5), [#allocation7], 576   ;;  %p19371_p8 = pmov %p19370_p5 }
  0x6d   : > { %vm1629_vm0 = vcmask 1041408   ;;  %vm347_vm1 = vsmask.f32 256  ;;  %v1531_v0 = vld [vmem:[#allocation6 + $0x2] sm:$0x3]  ;;  %v221_v1 = vld [vmem:[%s14628_s30 + $0x10] sm:$0xff] }
  0x6e   : > { %14399 = vsyncadd (%p19371_p8), [#allocation7], 4294966720  ;;  %v222_v2 = vld [vmem:[%s14628_s30 + $0x18] sm:$0xff]  ;;  %vm348_vm2 = vsmask.f32 4368  ;;  %14063 = vmatprep.subr.msk.bf16.mxu0 %vm1629_vm0, %v1531_v0  ;;  %v1631_v3 = vsel %vm1629_vm0, %v1531_v0, 0  ;;  %v12570_v4 = vpack.c.bf16 %v221_v1, %v221_v1 }
  0x6f   : > { %v12571_v5 = vpack.c.bf16 %v222_v2, %v222_v2  ;;  %vm671_vm3 = vcmask 27648   ;;  %v219_v6 = vld [vmem:[%s14628_s30] sm:$0xff]  ;;  %12940 = vmatpush3.bf16.msra.mxu0 %v1631_v3  ;;  %vm672_vm4 = vsmask.f32 7938  ;;  %vm679_vm5 = vcmask 24576   ;;  %v220_v8 = vld [vmem:[%s14628_s30 + $0x8] sm:$0xff]  ;;  %vm14645_vm6 = vmor %vm347_vm1, %vm348_vm2 }
  0x70   : > { %v1126_v7 = vld [vmem:[#allocation6] sm:$0x3]  ;;  %v12568_v9 = vpack.c.bf16 %v219_v6, %v219_v6  ;;  %v19372_v10 = vmov 0  ;;  %v368_v11 = vshrl.u32 %v12570_v4, 16  ;;  %v371_v12 = vshll.u32 %v12570_v4, 16  ;;  %v224_v20 = vld [vmem:[%s14628_s30 + $0x28] sm:$0xff]  ;;  %vm14658_vm7 = vmand %vm671_vm3, %vm672_vm4 }
  0x71   : > { %v19373_v10 = vsel %vm14645_vm6, 4294967295, %v19372_v10  ;;  %v376_v13 = vshrl.u32 %v12571_v5, 16  ;;  %v379_v14 = vshll.u32 %v12571_v5, 16  ;;  %14064 = vmatprep.subr.msk.bf16.mxu0 %vm1629_vm0, %v1126_v7  ;;  %v12569_v15 = vpack.c.bf16 %v220_v8, %v220_v8  ;;  %v223_v19 = vld [vmem:[%s14628_s30 + $0x20] sm:$0xff]  ;;  %v225_v21 = vld [vmem:[%s14628_s30 + $0x30] sm:$0xff]  ;;  %vm14664_vm8 = vmand %vm679_vm5, %vm347_vm1  ;;  %s19068_s18 = scalar_lea.vmem [#allocation9], %s11750_s22 }
  0x72   : > { %19374 = vst [vmem:[#allocation13_spill] sm:$0xff] %v19373_v10  ;;  %v351_v16 = vshrl.u32 %v12568_v9, 16  ;;  %v354_v17 = vshll.u32 %v12568_v9, 16  ;;  %v14651_v18 = vsel %vm1629_vm0, %v1126_v7, 0  ;;  %v370_v22 = vrot.slane %v368_v11, 7  ;;  %v226_v43 = vld [vmem:[%s14628_s30 + $0x38] sm:$0xff]  ;;  %vm14713_vm9 = vmand %vm679_vm5, %vm672_vm4 }
  0x73   : > { %v378_v23 = vrot.slane %v376_v13, 7  ;;  %v19375_v24 = vmov 0  ;;  %v684_v25 = vld [vmem:[#allocation2 + $0x18] sm:$0xf]  ;;  %v12572_v26 = vpack.c.bf16 %v223_v19, %v223_v19  ;;  %v12573_v27 = vpack.c.bf16 %v224_v20, %v224_v20  ;;  %v688_v29 = vld [vmem:[#allocation2 + $0x20] sm:$0x1] }
  0x74   : > { %v19376_v24 = vsel %vm14658_vm7, 4294967295, %v19375_v24  ;;  %v19378_v28 = vmov 0  ;;  %v353_v30 = vrot.slane %v351_v16, 7  ;;  %v359_v31 = vshrl.u32 %v12569_v15, 16  ;;  %v674_v38 = vld [vmem:[#allocation2 + $0xc] sm:$0xf] }
  0x75   : > { %19377 = vst [vmem:[#allocation14_spill] sm:$0xff] %v19376_v24  ;;  %v19379_v28 = vsel %vm14664_vm8, 4294967295, %v19378_v28  ;;  %v362_v32 = vshll.u32 %v12569_v15, 16  ;;  %v12574_v33 = vpack.c.bf16 %v225_v21, %v225_v21  ;;  %v373_v34 = vor.u32 %v371_v12, %v370_v22  ;;  %v681_v47 = vld [vmem:[#allocation2 + $0x14] sm:$0x1]  ;;  %v227_v58 = vld [vmem:[%s14628_s30 + $0x40] sm:$0xff] }
  0x76   : > { %19380 = vst [vmem:[#allocation15_spill] sm:$0xff] %v19379_v28  ;;  %v374_v35 = vrot.slane %v370_v22, 4  ;;  %v381_v36 = vor.u32 %v379_v14, %v378_v23  ;;  %v383_v37 = vrot.slane %v378_v23, 4  ;;  %v356_v39 = vor.u32 %v354_v17, %v353_v30  ;;  %v691_v53 = vld [vmem:[#allocation2 + $0x24] sm:$0xf]  ;;  %v229_v15 = vld [vmem:[%s14628_s30 + $0x50] sm:$0xff] }
  0x77   : > { %v357_v40 = vrot.slane %v353_v30, 4  ;;  %v361_v41 = vrot.slane %v359_v31, 7  ;;  %v385_v42 = vshrl.u32 %v12572_v26, 16  ;;  %v685_v45 = vsel %vm14658_vm7, %v373_v34, %v684_v25  ;;  %v228_v59 = vld [vmem:[%s14628_s30 + $0x48] sm:$0xff]  ;;  %v695_v5 = vld [vmem:[#allocation2 + $0x2c] sm:$0x1] }
  0x78   : > { %v382_v44 = vsel %vm14645_vm6, %v374_v35, %v381_v36  ;;  %v689_v46 = vsel %vm14664_vm8, %v383_v37, %v688_v29  ;;  %v388_v48 = vshll.u32 %v12572_v26, 16  ;;  %686 = vst [vmem:[#allocation2 + $0x18] sm:$0xf] %v685_v45  ;;  %v675_v51 = vsel %vm14658_vm7, %v356_v39, %v674_v38  ;;  %v698_v7 = vld [vmem:[#allocation2 + $0x30] sm:$0xf]  ;;  %v231_v22 = vld [vmem:[%s14628_s30 + $0x60] sm:$0xff] }
  0x79   : > { %687 = vst.msk [vmem:[#allocation2 + $0x1c] sm:$0xf] %vm671_vm3, %v382_v44  ;;  %690 = vst [vmem:[#allocation2 + $0x20] sm:$0x1] %v689_v46  ;;  %v364_v49 = vor.u32 %v362_v32, %v361_v41  ;;  %v366_v50 = vrot.slane %v361_v41, 4  ;;  %v387_v52 = vrot.slane %v385_v42, 7  ;;  %v12575_v56 = vpack.c.bf16 %v226_v43, %v226_v43 }
  0x7a   : > { %676 = vst [vmem:[#allocation2 + $0xc] sm:$0xf] %v675_v51  ;;  %v393_v54 = vshrl.u32 %v12573_v27, 16  ;;  %v396_v55 = vshll.u32 %v12573_v27, 16  ;;  %v402_v57 = vshrl.u32 %v12574_v33, 16  ;;  %v405_v2 = vshll.u32 %v12574_v33, 16 }
  0x7b   : > { %v365_v60 = vsel %vm14645_vm6, %v357_v40, %v364_v49  ;;  %v682_v61 = vsel %vm14664_vm8, %v366_v50, %v681_v47  ;;  %v390_v62 = vor.u32 %v388_v48, %v387_v52  ;;  %v391_v63 = vrot.slane %v387_v52, 4  ;;  %v230_v21 = vld [vmem:[%s14628_s30 + $0x58] sm:$0xff]  ;;  %v232_v31 = vld [vmem:[%s14628_s30 + $0x68] sm:$0xff]  ;;  %v702_v41 = vld [vmem:[#allocation2 + $0x38] sm:$0x1]  ;;  %s12632_s20 = sshll.u32 %s14471_s16, 12 }
  0x7c   : > { %678 = vst.msk [vmem:[#allocation2 + $0x10] sm:$0xf] %vm671_vm3, %v365_v60  ;;  %683 = vst [vmem:[#allocation2 + $0x14] sm:$0x1] %v682_v61  ;;  %v395_v0 = vrot.slane %v393_v54, 7  ;;  %v404_v1 = vrot.slane %v402_v57, 7  ;;  %v14687_v8 = vpack.c.bf16 %v227_v58, %v227_v58  ;;  %v14689_v9 = vpack.c.bf16 %v228_v59, %v228_v59  ;;  %s19180_s27 = scalar_lea.hbm %s19259_s3, %s12632_s20 }
  0x7d   : > { %v410_v3 = vshrl.u32 %v12575_v56, 16  ;;  %v692_v4 = vsel %vm14658_vm7, %v390_v62, %v691_v53  ;;  %v413_v6 = vshll.u32 %v12575_v56, 16  ;;  %v19381_v36 = vmov 0  ;;  %v233_v49 = vld [vmem:[%s14628_s30 + $0x70] sm:$0xff]  ;;  %v234_v50 = vld [vmem:[%s14628_s30 + $0x78] sm:$0xff]  ;;  %v235_v56 = vld [vmem:[%s14628_s30 + $0x80] sm:$0xff] }
  0x7e   : > { %v398_v11 = vor.u32 %v396_v55, %v395_v0  ;;  %v400_v12 = vrot.slane %v395_v0, 4  ;;  %693 = vst [vmem:[#allocation2 + $0x24] sm:$0xf] %v692_v4  ;;  %v407_v13 = vor.u32 %v405_v2, %v404_v1  ;;  %v408_v14 = vrot.slane %v404_v1, 4  ;;  %v236_v4 = vld [vmem:[%s14628_s30 + $0x88] sm:$0xff]  ;;  %s11649_s17 = sshll.u32 %s19068_s18, 4  ;;  %s19184_s17 = int_to_ptr.vmem [resolvable:$true] %s11649_s17 }
  0x7f   : > { %v14692_v16 = vrot.slane %v410_v3, 7  ;;  %v419_v17 = vshrl.u32 %v14687_v8, 16  ;;  %v422_v19 = vshll.u32 %v14687_v8, 16  ;;  %v427_v20 = vshrl.u32 %v14689_v9, 16  ;;  %v790_v23 = vld [vmem:[#allocation2 + $0x18] sm:$0xf] }
  0x80   : > { %v791_v25 = vld [vmem:[#allocation2 + $0x1c] sm:$0xf]  ;;  %v792_v26 = vld [vmem:[#allocation2 + $0x20] sm:$0x1]  ;;  %v399_v27 = vsel %vm14645_vm6, %v391_v63, %v398_v11  ;;  %v696_v29 = vsel %vm14664_vm8, %v400_v12, %v695_v5  ;;  %v699_v30 = vsel %vm14658_vm7, %v407_v13, %v698_v7  ;;  %793 = vst.msk [vmem:[#allocation2] sm:$0xf] %vm671_vm3, %v790_v23  ;;  %v14719_v46 = vpack.c.bf16 %v229_v15, %v229_v15 }
  0x81   : > { %794 = vst.msk [vmem:[#allocation2 + $0x4] sm:$0xf] %vm671_vm3, %v791_v25  ;;  %v806_v32 = vld [vmem:[#allocation2 + $0xc] sm:$0x2]  ;;  %v898_v33 = vld [vmem:[#allocation2 + $0xc] sm:$0x1]  ;;  %v415_v35 = vor.u32 %v413_v6, %v14692_v16  ;;  %v14721_v47 = vpack.c.bf16 %v230_v21, %v230_v21  ;;  %v14723_v48 = vpack.c.bf16 %v231_v22, %v231_v22  ;;  %v14734_v62 = vpack.c.bf16 %v232_v31, %v232_v31 }
  0x82   : > { %796 = vst.msk [vmem:[#allocation2 + $0x8] sm:$0x1] %vm679_vm5, %v792_v26  ;;  %v807_v34 = vld [vmem:[#allocation2 + $0x18] sm:$0x2]  ;;  %697 = vst [vmem:[#allocation2 + $0x2c] sm:$0x1] %v696_v29  ;;  %v14748_v21 = vpack.c.bf16 %v234_v50, %v234_v50  ;;  %v14750_v22 = vpack.c.bf16 %v235_v56, %v235_v56 }
  0x83   : > { %694 = vst.msk [vmem:[#allocation2 + $0x28] sm:$0xf] %vm671_vm3, %v399_v27  ;;  %700 = vst [vmem:[#allocation2 + $0x30] sm:$0xf] %v699_v30  ;;  %v19382_v36 = vsel %vm14713_vm9, 4294967295, %v19381_v36  ;;  %v11787_v37 = vrot.slane %v806_v32, 9  ;;  %v416_v45 = vsel %vm14645_vm6, %v408_v14, %v415_v35  ;;  %v14754_v30 = vpack.c.bf16 %v236_v4, %v236_v4 }
  0x84   : > { %19383 = vst [vmem:[#allocation16_spill] sm:$0xff] %v19382_v36  ;;  %v11788_v38 = vrot.slane %v807_v34, 9  ;;  %v901_v39 = vld [vmem:[#allocation2 + $0x18] sm:$0x1]  ;;  %v951_v40 = vld [vmem:[#allocation2 + $0x1c] sm:$0x8] }
  0x85   : > { %v950_v42 = vld [vmem:[#allocation2 + $0x10] sm:$0x8]  ;;  %v1043_v43 = vld [vmem:[#allocation2 + $0x14] sm:$0x1]  ;;  %v899_v51 = vsel %vm14664_vm8, %v11787_v37, %v898_v33  ;;  %v1046_v55 = vld [vmem:[#allocation2 + $0x20] sm:$0x1] }
  0x86   : > { %v1097_v44 = vld [vmem:[#allocation2 + $0x10] sm:$0xf]  ;;  %v11805_v52 = vrot.slane %v950_v42, 11  ;;  %701 = vst.msk [vmem:[#allocation2 + $0x34] sm:$0xf] %vm671_vm3, %v416_v45  ;;  %v902_v57 = vsel %vm14664_vm8, %v11788_v38, %v901_v39  ;;  %v11806_v58 = vrot.slane %v951_v40, 11 }
  0x87   : > { %v1180_v53 = vshll.u32 %v1097_v44, 16  ;;  %v1184_v54 = vshrl.u32 %v1097_v44, 16  ;;  %vm1143_vm10 = vsmask.f32 3328  ;;  %vm1144_vm11 = vsmask.f32 7440 }
  0x88   : > { %900 = vst [vmem:[#allocation2 + $0xc] sm:$0x1] %v899_v51  ;;  %v1099_v59 = vld [vmem:[#allocation2 + $0x1c] sm:$0xf]  ;;  %v808_v60 = vld [vmem:[#allocation2 + $0x24] sm:$0x2]  ;;  %v1044_v63 = vsel %vm14713_vm9, %v11805_v52, %v1043_v43  ;;  %v1047_v5 = vsel %vm14713_vm9, %v11806_v58, %v1046_v55  ;;  %vm14777_vm12 = vmor %vm1143_vm10, %vm1144_vm11 }
  0x89   : > { %v417_v61 = vrot.slane %v14692_v16, 4  ;;  %v14738_v0 = vrot.slane %v1180_v53, 5  ;;  %v1186_v1 = vrot.slane %v1184_v54, 4  ;;  %903 = vst [vmem:[#allocation2 + $0x18] sm:$0x1] %v902_v57  ;;  %v1204_v2 = vshll.u32 %v1099_v59, 16 }
  0x8a   : > { %v904_v3 = vld [vmem:[#allocation2 + $0x24] sm:$0x1]  ;;  %1045 = vst [vmem:[#allocation2 + $0x14] sm:$0x1] %v1044_v63  ;;  %v1208_v6 = vshrl.u32 %v1099_v59, 16  ;;  %v11789_v7 = vrot.slane %v808_v60, 9  ;;  %v14746_v16 = vpack.c.bf16 %v233_v49, %v233_v49 }
  0x8b   : > { %v703_v11 = vsel %vm14664_vm8, %v417_v61, %v702_v41  ;;  %v805_v12 = vld [vmem:[#allocation2] sm:$0x2]  ;;  %v895_v13 = vld [vmem:[#allocation2] sm:$0x1]  ;;  %v949_v14 = vld [vmem:[#allocation2 + $0x4] sm:$0x8]  ;;  %v1187_v15 = vor.u32 %v1186_v1, %v14738_v0 }
  0x8c   : > { %1048 = vst [vmem:[#allocation2 + $0x20] sm:$0x1] %v1047_v5  ;;  %704 = vst [vmem:[#allocation2 + $0x38] sm:$0x1] %v703_v11  ;;  %v11786_v23 = vrot.slane %v805_v12, 9  ;;  %v11804_v25 = vrot.slane %v949_v14, 11  ;;  %v905_v29 = vsel %vm14664_vm8, %v11789_v7, %v904_v3 }
  0x8d   : > { %v1040_v26 = vld [vmem:[#allocation2 + $0x8] sm:$0x1]  ;;  %v1095_v27 = vld [vmem:[#allocation2 + $0x4] sm:$0xf]  ;;  %v14757_v34 = vrot.slane %v1187_v15, 4  ;;  %v14759_v35 = vrot.slane %v1204_v2, 5 }
  0x8e   : > { %v237_v31 = vld [vmem:[%s14628_s30 + $0x90] sm:$0xff]  ;;  %v1156_v32 = vshll.u32 %v1095_v27, 16  ;;  %v1160_v33 = vshrl.u32 %v1095_v27, 16  ;;  %906 = vst [vmem:[#allocation2 + $0x24] sm:$0x1] %v905_v29  ;;  %v896_v38 = vsel %vm14664_vm8, %v11786_v23, %v895_v13  ;;  %v1041_v39 = vsel %vm14713_vm9, %v11804_v25, %v1040_v26  ;;  %s11636_s16 = scalar_lea.sflag [#allocation5], %s14622_s28 }
  0x8f   : > { %v952_v37 = vld [vmem:[#allocation2 + $0x28] sm:$0x8]  ;;  %v1210_v40 = vrot.slane %v1208_v6, 4  ;;  %v1049_v42 = vld [vmem:[#allocation2 + $0x2c] sm:$0x1]  ;;  %v14771_v63 = vpack.c.bf16 %v237_v31, %v237_v31  ;;  %v19384_v6 = vmov 0 }
  0x90   : > { %v11807_v41 = vrot.slane %v952_v37, 11  ;;  %v1101_v43 = vld [vmem:[#allocation2 + $0x28] sm:$0xf]  ;;  %897 = vst [vmem:[#allocation2] sm:$0x1] %v896_v38  ;;  %v14765_v44 = vrot.slane %v1156_v32, 5 }
  0x91   : > { %1042 = vst [vmem:[#allocation2 + $0x8] sm:$0x1] %v1041_v39  ;;  %v1162_v45 = vrot.slane %v1160_v33, 4  ;;  %v1096_v49 = vld [vmem:[#allocation2 + $0xc] sm:$0xf]  ;;  %v1228_v50 = vshll.u32 %v1101_v43, 16  ;;  %v1211_v55 = vor.u32 %v1210_v40, %v14759_v35 }
  0x92   : > { %v1232_v51 = vshrl.u32 %v1101_v43, 16  ;;  %v1171_v52 = vshrl.u32 %v1096_v49, 16  ;;  %v1174_v53 = vshll.u32 %v1096_v49, 16  ;;  %v1098_v54 = vld [vmem:[#allocation2 + $0x18] sm:$0xf]  ;;  %v1050_v56 = vsel %vm14713_vm9, %v11807_v41, %v1049_v42  ;;  %s14348_s23 = scalar_lea.vmem %s19184_s17, 4096 }
  0x93   : > { %v1163_v57 = vor.u32 %v1162_v45, %v14765_v44  ;;  %v1128_v58 = vld [vmem:[#allocation2 + $0x14] sm:$0x1]  ;;  %v1195_v59 = vshrl.u32 %v1098_v54, 16  ;;  %v1198_v60 = vshll.u32 %v1098_v54, 16  ;;  %1051 = vst [vmem:[#allocation2 + $0x2c] sm:$0x1] %v1050_v56  ;;  %p14349_p11 = scmp.ne.s32.totalorder %s19184_s17, %s14348_s23 }
  0x94   : > { %v809_v61 = vld [vmem:[#allocation2 + $0x30] sm:$0x2]  ;;  %v1173_v1 = vrot.slane %v1171_v52, 4  ;;  %v1176_v2 = vrot.slane %v1174_v53, 5  ;;  %v1190_v3 = vshll.u32 %v1128_v58, 16  ;;  %v14773_v5 = vrot.slane %v1228_v50, 5 }
  0x95   : > { %v1129_v4 = vld [vmem:[#allocation2 + $0x20] sm:$0x1]  ;;  %v19385_v6 = vsel %vm14777_vm12, 4294967295, %v19384_v6  ;;  %v14781_v7 = vrot.slane %v1163_v57, 4  ;;  %v1197_v11 = vrot.slane %v1195_v59, 4  ;;  %v1200_v12 = vrot.slane %v1198_v60, 5 }
  0x96   : > { %19386 = vst [vmem:[#allocation17_spill] sm:$0xff] %v19385_v6  ;;  %v1212_v13 = vrot.slane %v1211_v55, 4  ;;  %v1177_v14 = vor.u32 %v1176_v2, %v1173_v1  ;;  %v1192_v15 = vrot.slane %v1190_v3, 5  ;;  %v1214_v23 = vshll.u32 %v1129_v4, 16  ;;  %v1100_v25 = vld [vmem:[#allocation2 + $0x24] sm:$0xf] }
  0x97   : > { %v1234_v26 = vrot.slane %v1232_v51, 4  ;;  %v1201_v27 = vor.u32 %v1200_v12, %v1197_v11  ;;  %v1219_v29 = vshrl.u32 %v1100_v25, 16  ;;  %v1222_v31 = vshll.u32 %v1100_v25, 16  ;;  %v1094_v33 = vld [vmem:[#allocation2] sm:$0xf]  ;;  %p19613_p0 = scmp.ne.s32.totalorder %s19367_s6, 0 }
  0x98   : > { %v11790_v32 = vrot.slane %v809_v61, 9  ;;  %v1127_v37 = vld [vmem:[#allocation2 + $0x8] sm:$0x1]  ;;  %v1178_v38 = vrot.slane %v1177_v14, 4  ;;  %v1193_v39 = vsel %vm14777_vm12, %v14757_v34, %v1192_v15  ;;  %v1216_v40 = vrot.slane %v1214_v23, 5  ;;  %s14427_s5 = smov [#allocation9]  }
  0x99   : > { %v1235_v41 = vor.u32 %v1234_v26, %v14773_v5  ;;  %v1147_v42 = vshrl.u32 %v1094_v33, 16  ;;  %v1150_v43 = vshll.u32 %v1094_v33, 16  ;;  %v1166_v45 = vshll.u32 %v1127_v37, 16  ;;  %v907_v50 = vld [vmem:[#allocation2 + $0x30] sm:$0x1]  ;;  %p14350_p1 = pnand %p14349_p11, %p19613_p0  ;;  %s14352_s10 = sshll.u32 %s14427_s5, 4  ;;  %s14353_s10 = int_to_ptr.vmem [resolvable:$false] %s14352_s10 }
  0x9a   : > { %vm1580_vm13 = vcmask 31744   ;;  %v1202_v49 = vrot.slane %v1201_v27, 4  ;;  %v1183_v51 = vsel %vm14777_vm12, %v1178_v38, %v14738_v0  ;;  %v1217_v52 = vsel %vm14777_vm12, %v1212_v13, %v1216_v40  ;;  %v1130_v53 = vld [vmem:[#allocation2 + $0x2c] sm:$0x1]  ;;  %v953_v34 = vld [vmem:[#allocation2 + $0x34] sm:$0x8]  ;;  %p14355_p7 = scmp.lt.s32.totalorder %s19184_s17, %s14353_s10 }
  0x9b   : > { %v1221_v54 = vrot.slane %v1219_v29, 4  ;;  %v1224_v55 = vrot.slane %v1222_v31, 5  ;;  %v1149_v56 = vrot.slane %v1147_v42, 4  ;;  %v1152_v57 = vrot.slane %v1150_v43, 5  ;;  %v1103_v60 = vld [vmem:[#allocation2 + $0x34] sm:$0xf]  ;;  %p14351_p3 = pneg %p14350_p1 }
  0x9c   : > { %v1168_v58 = vrot.slane %v1166_v45, 5  ;;  %v11823_v59 = vcombine.low %v1183_v51, %v1193_v39  ;;  %v1207_v61 = vsel %vm14777_vm12, %v1202_v49, %v14759_v35  ;;  %v1236_v2 = vrot.slane %v1235_v41, 4  ;;  %v1052_v13 = vld [vmem:[#allocation2 + $0x38] sm:$0x1]  ;;  %v705_v37 = vld [vmem:[#allocation2 + $0x3c] sm:$0xf] }
  0x9d   : > { %v1225_v1 = vor.u32 %v1224_v55, %v1221_v54  ;;  %v1238_v3 = vshll.u32 %v1130_v53, 16  ;;  %v1153_v0 = vor.u32 %v1152_v57, %v1149_v56  ;;  %v11824_v11 = vcombine.low %v1207_v61, %v1217_v52  ;;  %v709_v39 = vld [vmem:[#allocation2 + $0x44] sm:$0x1]  ;;  %v2250_v45 = vld [vmem:[#allocation6 + $0x4] sm:$0x3]  ;;  %s14354_s11 = scalar_lea.vmem %s14353_s10, 8192 }
  0x9e   : > { %v1169_v4 = vsel %vm14777_vm12, %v14781_v7, %v1168_v58  ;;  %v908_v12 = vsel %vm14664_vm8, %v11790_v32, %v907_v50  ;;  %v11808_v23 = vrot.slane %v953_v34, 11  ;;  %v1252_v25 = vshll.u32 %v1103_v60, 16  ;;  %v712_v53 = vld [vmem:[#allocation2 + $0x48] sm:$0xf]  ;;  %v719_v61 = vld [vmem:[#allocation2 + $0x54] sm:$0xf]  ;;  %p14356_p9 = scmp.lt.s32.totalorder %s14354_s11, %s14348_s23 }
  0x9f   : > { %v1226_v14 = vrot.slane %v1225_v1, 4  ;;  %v1240_v15 = vrot.slane %v1238_v3, 5  ;;  %909 = vst [vmem:[#allocation2 + $0x30] sm:$0x1] %v908_v12  ;;  %v1154_v26 = vrot.slane %v1153_v0, 4  ;;  %v1256_v35 = vshrl.u32 %v1103_v60, 16 }
  0xa0   : > { %v421_v27 = vrot.slane %v419_v17, 7  ;;  %v429_v29 = vrot.slane %v427_v20, 7  ;;  %v1053_v32 = vsel %vm14713_vm9, %v11808_v23, %v1052_v13  ;;  %v14811_v33 = vrot.slane %v1252_v25, 5  ;;  %v238_v13 = vld [vmem:[%s14628_s30 + $0x98] sm:$0xff]  ;;  %p14357_p12 = por %p14356_p9, %p14355_p7 }
  0xa1   : > { %v1231_v7 = vsel %vm14777_vm12, %v1226_v14, %v14773_v5  ;;  %v1241_v31 = vsel %vm14777_vm12, %v1236_v2, %v1240_v15  ;;  %v1159_v17 = vsel %vm14777_vm12, %v1154_v26, %v14765_v44  ;;  %1054 = vst [vmem:[#allocation2 + $0x38] sm:$0x1] %v1053_v32  ;;  %v1258_v20 = vrot.slane %v1256_v35, 4  ;;  %v723_v26 = vld [vmem:[#allocation2 + $0x5c] sm:$0x1] }
  0xa2   : > { %v14816_v38 = vcombine.low %v1231_v7, %v1241_v31  ;;  %v424_v5 = vor.u32 %v422_v19, %v421_v27  ;;  %v11822_v40 = vcombine.low %v1159_v17, %v1169_v4  ;;  %v425_v41 = vrot.slane %v421_v27, 4  ;;  %p14358_p2 = pnand %p14357_p12, %p14351_p3 }
  0xa3   : > { %v430_v42 = vshll.u32 %v14689_v9, 16  ;;  %v434_v43 = vrot.slane %v429_v29, 4  ;;  %v1259_v49 = vor.u32 %v1258_v20, %v14811_v33  ;;  %v436_v44 = vshrl.u32 %v14719_v46, 16 }
  0xa4   : > { %v706_v50 = vsel %vm14658_vm7, %v424_v5, %v705_v37  ;;  %v439_v51 = vshll.u32 %v14719_v46, 16  ;;  %12941 = vmatprep.mubr.msk.bf16.mxu0 %vm1580_vm13, %v11822_v40  ;;  %v444_v9 = vshrl.u32 %v14721_v47, 16  ;;  %v447_v52 = vshll.u32 %v14721_v47, 16  ;;  %v716_v46 = vld [vmem:[#allocation2 + $0x50] sm:$0x1] }
  0xa5   : > { %v432_v8 = vor.u32 %v430_v42, %v429_v29  ;;  %707 = vst [vmem:[#allocation2 + $0x3c] sm:$0xf] %v706_v50  ;;  %v710_v19 = vsel %vm14664_vm8, %v434_v43, %v709_v39  ;;  %12942 = vmatmul.mubr.msk.bf16.vlgmr.msra.gmra.mrb[0].mxu0 %vm1580_vm13, %v11823_v59  ;;  %v14832_v55 = vrot.slane %v1259_v49, 4  ;;  %v438_v34 = vrot.slane %v436_v44, 7 }
  0xa6   : > { %v1102_v54 = vld [vmem:[#allocation2 + $0x30] sm:$0xf]  ;;  %711 = vst [vmem:[#allocation2 + $0x44] sm:$0x1] %v710_v19  ;;  %v453_v56 = vshrl.u32 %v14723_v48, 16  ;;  %v456_v57 = vshll.u32 %v14723_v48, 16  ;;  %12974 = vmatpush3.bf16.msra.mxu0 %v14651_v18  ;;  %12945 = vmatprep.mubr.msk.bf16.mxu0 %vm1580_vm13, %v11824_v11  ;;  %v14854_v5 = vpack.c.bf16 %v238_v13, %v238_v13 }
  0xa7   : > { %v1243_v58 = vshrl.u32 %v1102_v54, 16  ;;  %v1246_v47 = vshll.u32 %v1102_v54, 16  ;;  %v433_v59 = vsel %vm14645_vm6, %v425_v41, %v432_v8  ;;  %v446_v60 = vrot.slane %v444_v9, 7  ;;  %14065 = vmatprep.subr.msk.bf16.mxu0 %vm1629_vm0, %v2250_v45  ;;  %v239_v45 = vld [vmem:[%s14628_s30 + $0xa0] sm:$0xff]  ;;  %v240_v54 = vld [vmem:[%s14628_s30 + $0xa8] sm:$0xff] }
  0xa8   : > { %708 = vst.msk [vmem:[#allocation2 + $0x40] sm:$0xf] %vm671_vm3, %v433_v59  ;;  %v441_v1 = vor.u32 %v439_v51, %v438_v34  ;;  %v442_v2 = vrot.slane %v438_v34, 4  ;;  %v455_v3 = vrot.slane %v453_v56, 7  ;;  %v461_v0 = vshrl.u32 %v14734_v62, 16  ;;  %v241_v56 = vld [vmem:[%s14628_s30 + $0xb0] sm:$0xff] }
  0xa9   : > { %v1131_v18 = vld [vmem:[#allocation2 + $0x38] sm:$0x1]  ;;  %v1245_v48 = vrot.slane %v1243_v58, 4  ;;  %v1248_v4 = vrot.slane %v1246_v47, 5  ;;  %v449_v11 = vor.u32 %v447_v52, %v446_v60  ;;  %v451_v12 = vrot.slane %v446_v60, 4 }
  0xaa   : > { %v1262_v14 = vshll.u32 %v1131_v18, 16  ;;  %v713_v15 = vsel %vm14658_vm7, %v441_v1, %v712_v53  ;;  %v458_v23 = vor.u32 %v456_v57, %v455_v3  ;;  %v459_v25 = vrot.slane %v455_v3, 4  ;;  %v726_v51 = vld [vmem:[#allocation2 + $0x60] sm:$0xf]  ;;  %v730_v59 = vld [vmem:[#allocation2 + $0x68] sm:$0x1] }
  0xab   : > { %v1249_v35 = vor.u32 %v1248_v4, %v1245_v48  ;;  %v450_v27 = vsel %vm14645_vm6, %v442_v2, %v449_v11  ;;  %714 = vst [vmem:[#allocation2 + $0x48] sm:$0xf] %v713_v15  ;;  %v717_v29 = vsel %vm14664_vm8, %v451_v12, %v716_v46  ;;  %v463_v7 = vrot.slane %v461_v0, 7  ;;  %v242_v18 = vld [vmem:[%s14628_s30 + $0xb8] sm:$0xff] }
  0xac   : > { %v1264_v31 = vrot.slane %v1262_v14, 5  ;;  %v810_v32 = vld [vmem:[#allocation2 + $0x3c] sm:$0x2]  ;;  %v910_v37 = vld [vmem:[#allocation2 + $0x3c] sm:$0x1]  ;;  %v464_v17 = vshll.u32 %v14734_v62, 16  ;;  %v720_v20 = vsel %vm14658_vm7, %v458_v23, %v719_v61  ;;  %v14882_v0 = vpack.c.bf16 %v239_v45, %v239_v45 }
  0xad   : > { %715 = vst.msk [vmem:[#allocation2 + $0x4c] sm:$0xf] %vm671_vm3, %v450_v27  ;;  %718 = vst [vmem:[#allocation2 + $0x50] sm:$0x1] %v717_v29  ;;  %v1250_v39 = vrot.slane %v1249_v35, 4  ;;  %v11791_v40 = vrot.slane %v810_v32, 9  ;;  %12946 = vmatmul.mubr.msk.bf16.gmra.mrb[4].mxu0 %vm1580_vm13, %v14816_v38  ;;  %v14888_v14 = vpack.c.bf16 %v240_v54, %v240_v54  ;;  %v14891_v27 = vpack.c.bf16 %v241_v56, %v241_v56 }
  0xae   : > { %v1055_v41 = vld [vmem:[#allocation2 + $0x44] sm:$0x1]  ;;  %v468_v42 = vrot.slane %v463_v7, 4  ;;  %721 = vst [vmem:[#allocation2 + $0x54] sm:$0xf] %v720_v20  ;;  %v470_v43 = vshrl.u32 %v14746_v16, 16  ;;  %v1265_v62 = vsel %vm14777_vm12, %v14832_v55, %v1264_v31  ;;  %v466_v49 = vor.u32 %v464_v17, %v463_v7 }
  0xaf   : > { %v473_v50 = vshll.u32 %v14746_v16, 16  ;;  %v478_v44 = vshrl.u32 %v14748_v21, 16  ;;  %v1255_v8 = vsel %vm14777_vm12, %v1250_v39, %v14811_v33  ;;  %v911_v19 = vsel %vm14664_vm8, %v11791_v40, %v910_v37  ;;  %v954_v9 = vld [vmem:[#allocation2 + $0x40] sm:$0x8]  ;;  %v243_v40 = vld [vmem:[%s14628_s30 + $0xc0] sm:$0xff] }
  0xb0   : > { %v1105_v38 = vld [vmem:[#allocation2 + $0x40] sm:$0xf]  ;;  %v724_v52 = vsel %vm14664_vm8, %v468_v42, %v723_v26  ;;  %v472_v53 = vrot.slane %v470_v43, 7  ;;  %v11826_v55 = vcombine.low %v1255_v8, %v1265_v62  ;;  %912 = vst [vmem:[#allocation2 + $0x3c] sm:$0x1] %v911_v19  ;;  %v11809_v16 = vrot.slane %v954_v9, 11 }
  0xb1   : > { %v1276_v34 = vshll.u32 %v1105_v38, 16  ;;  %v1280_v46 = vshrl.u32 %v1105_v38, 16  ;;  %725 = vst [vmem:[#allocation2 + $0x5c] sm:$0x1] %v724_v52  ;;  %v467_v33 = vsel %vm14645_vm6, %v459_v25, %v466_v49  ;;  %v480_v47 = vrot.slane %v478_v44, 7 }
  0xb2   : > { %v475_v57 = vor.u32 %v473_v50, %v472_v53  ;;  %v476_v58 = vrot.slane %v472_v53, 4  ;;  %12949 = vmatprep.mubr.msk.bf16.mxu0 %vm1580_vm13, %v11826_v55  ;;  %v1056_v60 = vsel %vm14713_vm9, %v11809_v16, %v1055_v41  ;;  %v811_v2 = vld [vmem:[#allocation2 + $0x48] sm:$0x2]  ;;  %v913_v3 = vld [vmem:[#allocation2 + $0x48] sm:$0x1]  ;;  %v481_v12 = vshll.u32 %v14748_v21, 16 }
  0xb3   : > { %v14879_v61 = vrot.slane %v1276_v34, 5  ;;  %v1282_v1 = vrot.slane %v1280_v46, 4  ;;  %722 = vst.msk [vmem:[#allocation2 + $0x58] sm:$0xf] %vm671_vm3, %v467_v33  ;;  %1057 = vst [vmem:[#allocation2 + $0x44] sm:$0x1] %v1056_v60  ;;  %v14908_v49 = vpack.c.bf16 %v242_v18, %v242_v18  ;;  %v14921_v54 = vpack.c.bf16 %v243_v40, %v243_v40 }
  0xb4   : > { %v11792_v48 = vrot.slane %v811_v2, 9  ;;  %v955_v4 = vld [vmem:[#allocation2 + $0x4c] sm:$0x8]  ;;  %v1058_v11 = vld [vmem:[#allocation2 + $0x50] sm:$0x1]  ;;  %v727_v13 = vsel %vm14658_vm7, %v475_v57, %v726_v51  ;;  %v485_v35 = vrot.slane %v480_v47, 4  ;;  %v483_v20 = vor.u32 %v481_v12, %v480_v47 }
  0xb5   : > { %v1283_v15 = vor.u32 %v1282_v1, %v14879_v61  ;;  %v11810_v23 = vrot.slane %v955_v4, 11  ;;  %v1107_v25 = vld [vmem:[#allocation2 + $0x4c] sm:$0xf]  ;;  %v812_v26 = vld [vmem:[#allocation2 + $0x54] sm:$0x2]  ;;  %v487_v8 = vshrl.u32 %v14750_v22, 16 }
  0xb6   : > { %728 = vst [vmem:[#allocation2 + $0x60] sm:$0xf] %v727_v13  ;;  %v914_v29 = vsel %vm14664_vm8, %v11792_v48, %v913_v3  ;;  %v1300_v7 = vshll.u32 %v1107_v25, 16  ;;  %v1304_v21 = vshrl.u32 %v1107_v25, 16  ;;  %v11793_v31 = vrot.slane %v812_v26, 9 }
  0xb7   : > { %v916_v32 = vld [vmem:[#allocation2 + $0x54] sm:$0x1]  ;;  %v14895_v37 = vrot.slane %v1283_v15, 4  ;;  %915 = vst [vmem:[#allocation2 + $0x48] sm:$0x1] %v914_v29  ;;  %v1059_v17 = vsel %vm14713_vm9, %v11810_v23, %v1058_v11  ;;  %v731_v39 = vsel %vm14664_vm8, %v485_v35, %v730_v59  ;;  %v484_v51 = vsel %vm14645_vm6, %v476_v58, %v483_v20 }
  0xb8   : > { %v14902_v41 = vld [vmem:[#allocation2 + $0x3c] sm:$0xf]  ;;  %1060 = vst [vmem:[#allocation2 + $0x50] sm:$0x1] %v1059_v17  ;;  %v14904_v42 = vrot.slane %v1300_v7, 5  ;;  %v1306_v43 = vrot.slane %v1304_v21, 4  ;;  %v917_v45 = vsel %vm14664_vm8, %v11793_v31, %v916_v32 }
  0xb9   : > { %v1061_v62 = vld [vmem:[#allocation2 + $0x5c] sm:$0x1]  ;;  %732 = vst [vmem:[#allocation2 + $0x68] sm:$0x1] %v731_v39  ;;  %v1267_v50 = vshrl.u32 %v14902_v41, 16  ;;  %v1270_v44 = vshll.u32 %v14902_v41, 16 }
  0xba   : > { %918 = vst [vmem:[#allocation2 + $0x54] sm:$0x1] %v917_v45  ;;  %v1307_v19 = vor.u32 %v1306_v43, %v14904_v42  ;;  %v956_v9 = vld [vmem:[#allocation2 + $0x58] sm:$0x8]  ;;  %729 = vst.msk [vmem:[#allocation2 + $0x64] sm:$0xf] %vm671_vm3, %v484_v51 }
  0xbb   : > { %v14916_v38 = vld [vmem:[#allocation2 + $0x58] sm:$0xf]  ;;  %v490_v52 = vshll.u32 %v14750_v22, 16  ;;  %v495_v53 = vshrl.u32 %v14754_v30, 16  ;;  %v1132_v55 = vld [vmem:[#allocation2 + $0x44] sm:$0x1] }
  0xbc   : > { %v1269_v16 = vrot.slane %v1267_v50, 4  ;;  %v1272_v34 = vrot.slane %v1270_v44, 5  ;;  %v11811_v46 = vrot.slane %v956_v9, 11  ;;  %v1324_v56 = vshll.u32 %v14916_v38, 16  ;;  %v733_v51 = vld [vmem:[#allocation2 + $0x6c] sm:$0xf] }
  0xbd   : > { %v1286_v33 = vshll.u32 %v1132_v55, 16  ;;  %v14924_v57 = vrot.slane %v1307_v19, 4  ;;  %v1328_v58 = vshrl.u32 %v14916_v38, 16  ;;  %v813_v47 = vld [vmem:[#allocation2 + $0x60] sm:$0x2]  ;;  %v14927_v59 = vrot.slane %v487_v8, 7 }
  0xbe   : > { %v1273_v60 = vor.u32 %v1272_v34, %v1269_v16  ;;  %v1062_v22 = vsel %vm14713_vm9, %v11811_v46, %v1061_v62  ;;  %v14931_v1 = vrot.slane %v1324_v56, 5  ;;  %v11794_v2 = vrot.slane %v813_v47, 9  ;;  %v919_v3 = vld [vmem:[#allocation2 + $0x60] sm:$0x1]  ;;  %v14933_v48 = vld [vmem:[#allocation2 + $0x48] sm:$0xf] }
  0xbf   : > { %v1288_v18 = vrot.slane %v1286_v33, 5  ;;  %1063 = vst [vmem:[#allocation2 + $0x5c] sm:$0x1] %v1062_v22  ;;  %v1330_v4 = vrot.slane %v1328_v58, 4  ;;  %v492_v11 = vor.u32 %v490_v52, %v14927_v59  ;;  %v493_v12 = vrot.slane %v14927_v59, 4 }
  0xc0   : > { %v1274_v13 = vrot.slane %v1273_v60, 4  ;;  %v1133_v15 = vld [vmem:[#allocation2 + $0x50] sm:$0x1]  ;;  %v1291_v23 = vshrl.u32 %v14933_v48, 16  ;;  %v1294_v25 = vshll.u32 %v14933_v48, 16  ;;  %v920_v26 = vsel %vm14664_vm8, %v11794_v2, %v919_v3 }
  0xc1   : > { %v1289_v35 = vsel %vm14777_vm12, %v14895_v37, %v1288_v18  ;;  %v1310_v29 = vshll.u32 %v1133_v15, 16  ;;  %v14944_v7 = vld [vmem:[#allocation2 + $0x54] sm:$0xf]  ;;  %v1331_v21 = vor.u32 %v1330_v4, %v14931_v1  ;;  %921 = vst [vmem:[#allocation2 + $0x60] sm:$0x1] %v920_v26  ;;  %v497_v32 = vrot.slane %v495_v53, 7 }
  0xc2   : > { %v1064_v31 = vld [vmem:[#allocation2 + $0x68] sm:$0x1]  ;;  %v1279_v17 = vsel %vm14777_vm12, %v1274_v13, %v14879_v61  ;;  %v1293_v20 = vrot.slane %v1291_v23, 4  ;;  %v1296_v39 = vrot.slane %v1294_v25, 5  ;;  %v1315_v40 = vshrl.u32 %v14944_v7, 16 }
  0xc3   : > { %v957_v43 = vld [vmem:[#allocation2 + $0x64] sm:$0x8]  ;;  %v11827_v45 = vcombine.low %v1279_v17, %v1289_v35  ;;  %v1312_v62 = vrot.slane %v1310_v29, 5  ;;  %v1318_v37 = vshll.u32 %v14944_v7, 16  ;;  %v1332_v50 = vrot.slane %v1331_v21, 4 }
  0xc4   : > { %v14952_v44 = vld [vmem:[#allocation2 + $0x64] sm:$0xf]  ;;  %v737_v8 = vld [vmem:[#allocation2 + $0x74] sm:$0x1]  ;;  %v1297_v19 = vor.u32 %v1296_v39, %v1293_v20  ;;  %v1317_v9 = vrot.slane %v1315_v40, 4  ;;  %v11812_v52 = vrot.slane %v957_v43, 11 }
  0xc5   : > { %v1348_v53 = vshll.u32 %v14952_v44, 16  ;;  %12950 = vmatmul.mubr.msk.bf16.gmra.mrb[8].mxu0 %vm1580_vm13, %v11827_v45  ;;  %v1313_v61 = vsel %vm14777_vm12, %v14924_v57, %v1312_v62  ;;  %v1320_v55 = vrot.slane %v1318_v37, 5  ;;  %v1352_v16 = vshrl.u32 %v14952_v44, 16  ;;  %v740_v40 = vld [vmem:[#allocation2 + $0x78] sm:$0xf]  ;;  %v244_v37 = vld [vmem:[%s14628_s30 + $0xc8] sm:$0xff] }
  0xc6   : > { %v498_v34 = vshll.u32 %v14754_v30, 16  ;;  %v1298_v46 = vrot.slane %v1297_v19, 4  ;;  %v1134_v56 = vld [vmem:[#allocation2 + $0x5c] sm:$0x1]  ;;  %v1065_v33 = vsel %vm14713_vm9, %v11812_v52, %v1064_v31  ;;  %v502_v47 = vrot.slane %v497_v32, 4 }
  0xc7   : > { %v14963_v58 = vrot.slane %v1348_v53, 5  ;;  %v1321_v59 = vor.u32 %v1320_v55, %v1317_v9  ;;  %v1334_v60 = vshll.u32 %v1134_v56, 16  ;;  %1066 = vst [vmem:[#allocation2 + $0x68] sm:$0x1] %v1065_v33  ;;  %v1354_v22 = vrot.slane %v1352_v16, 4 }
  0xc8   : > { %v500_v2 = vor.u32 %v498_v34, %v497_v32  ;;  %v1303_v57 = vsel %vm14777_vm12, %v1298_v46, %v14904_v42  ;;  %v14968_v3 = vld [vmem:[#allocation2 + $0x60] sm:$0xf]  ;;  %v734_v30 = vsel %vm14658_vm7, %v492_v11, %v733_v51  ;;  %v738_v18 = vsel %vm14664_vm8, %v502_v47, %v737_v8  ;;  %v245_v51 = vld [vmem:[%s14628_s30 + $0xd0] sm:$0xff] }
  0xc9   : > { %v504_v4 = vshrl.u32 %v14771_v63, 16  ;;  %v11828_v13 = vcombine.low %v1303_v57, %v1313_v61  ;;  %v1322_v15 = vrot.slane %v1321_v59, 4  ;;  %v1336_v23 = vrot.slane %v1334_v60, 5  ;;  %735 = vst [vmem:[#allocation2 + $0x6c] sm:$0xf] %v734_v30 }
  0xca   : > { %v1339_v25 = vshrl.u32 %v14968_v3, 16  ;;  %739 = vst [vmem:[#allocation2 + $0x74] sm:$0x1] %v738_v18  ;;  %v1342_v26 = vshll.u32 %v14968_v3, 16  ;;  %v1355_v42 = vor.u32 %v1354_v22, %v14963_v58  ;;  %v501_v35 = vsel %vm14645_vm6, %v493_v12, %v500_v2  ;;  %v744_v61 = vld [vmem:[#allocation2 + $0x80] sm:$0x1] }
  0xcb   : > { %v506_v11 = vrot.slane %v504_v4, 7  ;;  %12953 = vmatprep.mubr.msk.bf16.mxu0 %vm1580_vm13, %v11828_v13  ;;  %v1327_v29 = vsel %vm14777_vm12, %v1322_v15, %v14931_v1  ;;  %v1337_v21 = vsel %vm14777_vm12, %v1332_v50, %v1336_v23  ;;  %736 = vst.msk [vmem:[#allocation2 + $0x70] sm:$0xf] %vm671_vm3, %v501_v35  ;;  %v507_v32 = vshll.u32 %v14771_v63, 16  ;;  %v747_v2 = vld [vmem:[#allocation2 + $0x84] sm:$0xf] }
  0xcc   : > { %v1341_v31 = vrot.slane %v1339_v25, 4  ;;  %v11829_v17 = vcombine.low %v1327_v29, %v1337_v21  ;;  %v1344_v20 = vrot.slane %v1342_v26, 5  ;;  %v1356_v12 = vrot.slane %v1355_v42, 4  ;;  %v751_v21 = vld [vmem:[#allocation2 + $0x8c] sm:$0x1] }
  0xcd   : > { %v510_v39 = vrot.slane %v506_v11, 4  ;;  %v509_v43 = vor.u32 %v507_v32, %v506_v11  ;;  %v512_v45 = vshrl.u32 %v14854_v5, 16  ;;  %v515_v62 = vshll.u32 %v14854_v5, 16 }
  0xce   : > { %v521_v1 = vshrl.u32 %v14882_v0, 16  ;;  %12954 = vmatmul.mubr.msk.bf16.gmra.mrb[12].mxu0 %vm1580_vm13, %v11829_v17  ;;  %v14994_v50 = vld [vmem:[#allocation2 + $0x68] sm:$0x1]  ;;  %v1345_v8 = vor.u32 %v1344_v20, %v1341_v31  ;;  %v524_v63 = vshll.u32 %v14882_v0, 16  ;;  %v529_v19 = vshrl.u32 %v14888_v14, 16  ;;  %v246_v31 = vld [vmem:[%s14628_s30 + $0xd8] sm:$0xff] }
  0xcf   : > { %v532_v9 = vshll.u32 %v14888_v14, 16  ;;  %v1358_v52 = vshll.u32 %v14994_v50, 16  ;;  %v514_v53 = vrot.slane %v512_v45, 7  ;;  %v741_v5 = vsel %vm14658_vm7, %v509_v43, %v740_v40 }
  0xd0   : > { %v523_v55 = vrot.slane %v521_v1, 7  ;;  %v1346_v16 = vrot.slane %v1345_v8, 4  ;;  %v814_v34 = vld [vmem:[#allocation2 + $0x6c] sm:$0x2]  ;;  %v922_v46 = vld [vmem:[#allocation2 + $0x6c] sm:$0x1]  ;;  %v15002_v33 = vpack.c.bf16 %v244_v37, %v244_v37  ;;  %v15004_v0 = vpack.c.bf16 %v245_v51, %v245_v51 }
  0xd1   : > { %742 = vst [vmem:[#allocation2 + $0x78] sm:$0xf] %v741_v5  ;;  %v531_v56 = vrot.slane %v529_v19, 7  ;;  %v1360_v47 = vrot.slane %v1358_v52, 5  ;;  %v11795_v59 = vrot.slane %v814_v34, 9  ;;  %v517_v60 = vor.u32 %v515_v62, %v514_v53  ;;  %v247_v34 = vld [vmem:[%s14628_s30 + $0xe0] sm:$0xff] }
  0xd2   : > { %v1067_v14 = vld [vmem:[#allocation2 + $0x74] sm:$0x1]  ;;  %v519_v22 = vrot.slane %v514_v53, 4  ;;  %v1351_v57 = vsel %vm14777_vm12, %v1346_v16, %v14963_v58  ;;  %v958_v30 = vld [vmem:[#allocation2 + $0x70] sm:$0x8]  ;;  %v526_v4 = vor.u32 %v524_v63, %v523_v55  ;;  %v527_v13 = vrot.slane %v523_v55, 4 }
  0xd3   : > { %v15009_v18 = vld [vmem:[#allocation2 + $0x70] sm:$0xf]  ;;  %v534_v15 = vor.u32 %v532_v9, %v531_v56  ;;  %v1361_v23 = vsel %vm14777_vm12, %v1356_v12, %v1360_v47  ;;  %v923_v25 = vsel %vm14664_vm8, %v11795_v59, %v922_v46  ;;  %v11813_v26 = vrot.slane %v958_v30, 11  ;;  %v758_v59 = vld [vmem:[#allocation2 + $0x98] sm:$0x1] }
  0xd4   : > { %v1372_v42 = vshll.u32 %v15009_v18, 16  ;;  %v11830_v35 = vcombine.low %v1351_v57, %v1361_v23  ;;  %924 = vst [vmem:[#allocation2 + $0x6c] sm:$0x1] %v923_v25  ;;  %v1376_v58 = vshrl.u32 %v15009_v18, 16  ;;  %v518_v11 = vsel %vm14645_vm6, %v510_v39, %v517_v60  ;;  %v754_v53 = vld [vmem:[#allocation2 + $0x90] sm:$0xf] }
  0xd5   : > { %v745_v29 = vsel %vm14664_vm8, %v519_v22, %v744_v61  ;;  %v1068_v32 = vsel %vm14713_vm9, %v11813_v26, %v1067_v14  ;;  %743 = vst.msk [vmem:[#allocation2 + $0x7c] sm:$0xf] %vm671_vm3, %v518_v11  ;;  %v535_v20 = vsel %vm14645_vm6, %v527_v13, %v534_v15  ;;  %v536_v12 = vrot.slane %v531_v56, 4 }
  0xd6   : > { %v15024_v17 = vrot.slane %v1372_v42, 5  ;;  %746 = vst [vmem:[#allocation2 + $0x80] sm:$0x1] %v745_v29  ;;  %12957 = vmatprep.mubr.msk.bf16.mxu0 %vm1580_vm13, %v11830_v35  ;;  %1069 = vst [vmem:[#allocation2 + $0x74] sm:$0x1] %v1068_v32  ;;  %v1378_v39 = vrot.slane %v1376_v58, 4  ;;  %v748_v40 = vsel %vm14658_vm7, %v526_v4, %v747_v2  ;;  %v15039_v63 = vpack.c.bf16 %v246_v31, %v246_v31 }
  0xd7   : > { %750 = vst.msk [vmem:[#allocation2 + $0x88] sm:$0xf] %vm671_vm3, %v535_v20  ;;  %v538_v43 = vshrl.u32 %v14891_v27, 16  ;;  %v541_v45 = vshll.u32 %v14891_v27, 16  ;;  %749 = vst [vmem:[#allocation2 + $0x84] sm:$0xf] %v748_v40  ;;  %v752_v37 = vsel %vm14664_vm8, %v536_v12, %v751_v21  ;;  %v15059_v15 = vpack.c.bf16 %v247_v34, %v247_v34 }
  0xd8   : > { %v815_v62 = vld [vmem:[#allocation2 + $0x78] sm:$0x2]  ;;  %v925_v1 = vld [vmem:[#allocation2 + $0x78] sm:$0x1]  ;;  %v546_v51 = vshrl.u32 %v14908_v49, 16  ;;  %v549_v8 = vshll.u32 %v14908_v49, 16  ;;  %v1379_v19 = vor.u32 %v1378_v39, %v15024_v17 }
  0xd9   : > { %v11796_v9 = vrot.slane %v815_v62, 9  ;;  %753 = vst [vmem:[#allocation2 + $0x8c] sm:$0x1] %v752_v37  ;;  %v540_v52 = vrot.slane %v538_v43, 7  ;;  %v555_v27 = vshrl.u32 %v14921_v54, 16  ;;  %v558_v61 = vshll.u32 %v14921_v54, 16 }
  0xda   : > { %v548_v5 = vrot.slane %v546_v51, 7  ;;  %v563_v55 = vshrl.u32 %v15002_v33, 16  ;;  %v566_v16 = vshll.u32 %v15002_v33, 16  ;;  %v15047_v46 = vrot.slane %v1379_v19, 4  ;;  %v761_v62 = vld [vmem:[#allocation2 + $0x9c] sm:$0xf] }
  0xdb   : > { %v926_v49 = vsel %vm14664_vm8, %v11796_v9, %v925_v1  ;;  %v543_v56 = vor.u32 %v541_v45, %v540_v52  ;;  %v544_v47 = vrot.slane %v540_v52, 4  ;;  %v15051_v14 = vld [vmem:[#allocation2 + $0x6c] sm:$0xf]  ;;  %v557_v2 = vrot.slane %v555_v27, 7 }
  0xdc   : > { %927 = vst [vmem:[#allocation2 + $0x78] sm:$0x1] %v926_v49  ;;  %v551_v60 = vor.u32 %v549_v8, %v548_v5  ;;  %v553_v22 = vrot.slane %v548_v5, 4  ;;  %v15053_v54 = vrot.slane %v563_v55, 7  ;;  %v1363_v57 = vshrl.u32 %v15051_v14, 16 }
  0xdd   : > { %v1366_v33 = vshll.u32 %v15051_v14, 16  ;;  %v959_v30 = vld [vmem:[#allocation2 + $0x7c] sm:$0x8]  ;;  %v1070_v4 = vld [vmem:[#allocation2 + $0x80] sm:$0x1]  ;;  %v755_v13 = vsel %vm14658_vm7, %v543_v56, %v754_v53  ;;  %v560_v58 = vor.u32 %v558_v61, %v557_v2  ;;  %v561_v27 = vrot.slane %v557_v2, 4 }
  0xde   : > { %v15061_v23 = vld [vmem:[#allocation2 + $0x74] sm:$0x1]  ;;  %v11814_v25 = vrot.slane %v959_v30, 11  ;;  %v15063_v26 = vld [vmem:[#allocation2 + $0x7c] sm:$0xf]  ;;  %v552_v42 = vsel %vm14645_vm6, %v544_v47, %v551_v60  ;;  %v759_v35 = vsel %vm14664_vm8, %v553_v22, %v758_v59  ;;  %v1365_v11 = vrot.slane %v1363_v57, 4 }
  0xdf   : > { %756 = vst [vmem:[#allocation2 + $0x90] sm:$0xf] %v755_v13  ;;  %v1368_v29 = vrot.slane %v1366_v33, 5  ;;  %v1382_v21 = vshll.u32 %v15061_v23, 16  ;;  %v1396_v31 = vshll.u32 %v15063_v26, 16  ;;  %v1400_v12 = vshrl.u32 %v15063_v26, 16 }
  0xe0   : > { %v816_v32 = vld [vmem:[#allocation2 + $0x84] sm:$0x2]  ;;  %757 = vst.msk [vmem:[#allocation2 + $0x94] sm:$0xf] %vm671_vm3, %v552_v42  ;;  %760 = vst [vmem:[#allocation2 + $0x98] sm:$0x1] %v759_v35  ;;  %v1071_v20 = vsel %vm14713_vm9, %v11814_v25, %v1070_v4  ;;  %v568_v45 = vor.u32 %v566_v16, %v15053_v54  ;;  %v762_v30 = vsel %vm14658_vm7, %v560_v58, %v761_v62 }
  0xe1   : > { %v11797_v39 = vrot.slane %v816_v32, 9  ;;  %v928_v40 = vld [vmem:[#allocation2 + $0x84] sm:$0x1]  ;;  %v960_v43 = vld [vmem:[#allocation2 + $0x88] sm:$0x8]  ;;  %v1369_v1 = vor.u32 %v1368_v29, %v1365_v11  ;;  %v1384_v37 = vrot.slane %v1382_v21, 5 }
  0xe2   : > { %1072 = vst [vmem:[#allocation2 + $0x80] sm:$0x1] %v1071_v20  ;;  %v15076_v51 = vrot.slane %v1396_v31, 5  ;;  %v11815_v8 = vrot.slane %v960_v43, 11  ;;  %v1073_v19 = vld [vmem:[#allocation2 + $0x8c] sm:$0x1]  ;;  %v569_v33 = vsel %vm14645_vm6, %v561_v27, %v568_v45 }
  0xe3   : > { %v1402_v9 = vrot.slane %v1400_v12, 4  ;;  %v929_v52 = vsel %vm14664_vm8, %v11797_v39, %v928_v40  ;;  %v15080_v53 = vld [vmem:[#allocation2 + $0x88] sm:$0xf]  ;;  %v570_v5 = vrot.slane %v15053_v54, 4  ;;  %v1370_v61 = vrot.slane %v1369_v1, 4  ;;  %v248_v4 = vld [vmem:[%s14628_s30 + $0xe8] sm:$0xff] }
  0xe4   : > { %v1385_v55 = vsel %vm14777_vm12, %v15047_v46, %v1384_v37  ;;  %v15086_v16 = vld [vmem:[#allocation2 + $0x78] sm:$0xf]  ;;  %930 = vst [vmem:[#allocation2 + $0x84] sm:$0x1] %v929_v52  ;;  %v1074_v34 = vsel %vm14713_vm9, %v11815_v8, %v1073_v19  ;;  %v1420_v49 = vshll.u32 %v15080_v53, 16  ;;  %v1424_v60 = vshrl.u32 %v15080_v53, 16 }
  0xe5   : > { %v1387_v56 = vshrl.u32 %v15086_v16, 16  ;;  %v1390_v47 = vshll.u32 %v15086_v16, 16  ;;  %v1403_v59 = vor.u32 %v1402_v9, %v15076_v51  ;;  %1075 = vst [vmem:[#allocation2 + $0x8c] sm:$0x1] %v1074_v34  ;;  %v765_v22 = vld [vmem:[#allocation2 + $0xa4] sm:$0x1]  ;;  %v1375_v46 = vsel %vm14777_vm12, %v1370_v61, %v15024_v17 }
  0xe6   : > { %v15098_v2 = vrot.slane %v1420_v49, 5  ;;  %v817_v54 = vld [vmem:[#allocation2 + $0x90] sm:$0x2]  ;;  %v931_v57 = vld [vmem:[#allocation2 + $0x90] sm:$0x1]  ;;  %v11831_v13 = vcombine.low %v1375_v46, %v1385_v55  ;;  %v1426_v17 = vrot.slane %v1424_v60, 4  ;;  %v766_v32 = vsel %vm14664_vm8, %v570_v5, %v765_v22 }
  0xe7   : > { %v1389_v25 = vrot.slane %v1387_v56, 4  ;;  %v1392_v42 = vrot.slane %v1390_v47, 5  ;;  %v1404_v35 = vrot.slane %v1403_v59, 4  ;;  %v961_v11 = vld [vmem:[#allocation2 + $0x94] sm:$0x8]  ;;  %v11798_v29 = vrot.slane %v817_v54, 9 }
  0xe8   : > { %763 = vst [vmem:[#allocation2 + $0x9c] sm:$0xf] %v762_v30  ;;  %764 = vst.msk [vmem:[#allocation2 + $0xa0] sm:$0xf] %vm671_vm3, %v569_v33  ;;  %v11816_v21 = vrot.slane %v961_v11, 11  ;;  %12958 = vmatmul.mubr.msk.bf16.gmra.mrb[16].mxu0 %vm1580_vm13, %v11831_v13  ;;  %v572_v39 = vshrl.u32 %v15004_v0, 16  ;;  %v15115_v43 = vpack.c.bf16 %v248_v4, %v248_v4  ;;  %v1427_v62 = vor.u32 %v1426_v17, %v15098_v2 }
  0xe9   : > { %v1076_v31 = vld [vmem:[#allocation2 + $0x98] sm:$0x1]  ;;  %v15109_v20 = vld [vmem:[#allocation2 + $0x80] sm:$0x1]  ;;  %v1393_v58 = vor.u32 %v1392_v42, %v1389_v25  ;;  %v15111_v12 = vld [vmem:[#allocation2 + $0x94] sm:$0xf]  ;;  %v932_v1 = vsel %vm14664_vm8, %v11798_v29, %v931_v57 }
  0xea   : > { %767 = vst [vmem:[#allocation2 + $0xa4] sm:$0x1] %v766_v32  ;;  %v575_v40 = vshll.u32 %v15004_v0, 16  ;;  %v1406_v45 = vshll.u32 %v15109_v20, 16  ;;  %v1077_v37 = vsel %vm14713_vm9, %v11816_v21, %v1076_v31  ;;  %933 = vst [vmem:[#allocation2 + $0x90] sm:$0x1] %v932_v1 }
  0xeb   : > { %v1394_v8 = vrot.slane %v1393_v58, 4  ;;  %v15123_v19 = vld [vmem:[#allocation2 + $0x84] sm:$0xf]  ;;  %1078 = vst [vmem:[#allocation2 + $0x98] sm:$0x1] %v1077_v37  ;;  %v1444_v9 = vshll.u32 %v15111_v12, 16 }
  0xec   : > { %v1448_v0 = vshrl.u32 %v15111_v12, 16  ;;  %v15127_v52 = vrot.slane %v572_v39, 7  ;;  %v1408_v27 = vrot.slane %v1406_v45, 5  ;;  %v15129_v5 = vld [vmem:[#allocation2 + $0x8c] sm:$0x1]  ;;  %v1411_v61 = vshrl.u32 %v15123_v19, 16 }
  0xed   : > { %v1414_v55 = vshll.u32 %v15123_v19, 16  ;;  %v1428_v34 = vrot.slane %v1427_v62, 4  ;;  %v1399_v49 = vsel %vm14777_vm12, %v1394_v8, %v15076_v51  ;;  %v1430_v56 = vshll.u32 %v15129_v5, 16  ;;  %v768_v60 = vld [vmem:[#allocation2 + $0xa8] sm:$0xf] }
  0xee   : > { %v15137_v47 = vrot.slane %v1444_v9, 5  ;;  %v1450_v59 = vrot.slane %v1448_v0, 4  ;;  %v1409_v22 = vsel %vm14777_vm12, %v1404_v35, %v1408_v27  ;;  %v1413_v46 = vrot.slane %v1411_v61, 4  ;;  %v6398_v6 = vld [vmem:[#allocation2 + $0x74] sm:$0x1] }
  0xef   : > { %v1416_v54 = vrot.slane %v1414_v55, 5  ;;  %v818_v57 = vld [vmem:[#allocation2 + $0x9c] sm:$0x2]  ;;  %v934_v33 = vld [vmem:[#allocation2 + $0x9c] sm:$0x1]  ;;  %v577_v30 = vor.u32 %v575_v40, %v15127_v52  ;;  %v11832_v4 = vcombine.low %v1399_v49, %v1409_v22  ;;  %v1432_v13 = vrot.slane %v1430_v56, 5 }
  0xf0   : > { %v1451_v25 = vor.u32 %v1450_v59, %v15137_v47  ;;  %v11799_v51 = vrot.slane %v818_v57, 9  ;;  %v962_v42 = vld [vmem:[#allocation2 + $0xa0] sm:$0x8]  ;;  %v578_v40 = vrot.slane %v15127_v52, 4  ;;  %v583_v49 = vshll.u32 %v15039_v63, 16 }
  0xf1   : > { %v15143_v11 = vld [vmem:[#allocation2 + $0xa0] sm:$0xf]  ;;  %v1417_v17 = vor.u32 %v1416_v54, %v1413_v46  ;;  %v11817_v29 = vrot.slane %v962_v42, 11  ;;  %v1079_v21 = vld [vmem:[#allocation2 + $0xa4] sm:$0x1]  ;;  %12961 = vmatprep.mubr.msk.bf16.mxu0 %vm1580_vm13, %v11832_v4  ;;  %v1433_v32 = vsel %vm14777_vm12, %v1428_v34, %v1432_v13  ;;  %v769_v9 = vsel %vm14658_vm7, %v577_v30, %v768_v60 }
  0xf2   : > { %v1468_v31 = vshll.u32 %v15143_v11, 16  ;;  %v1472_v35 = vshrl.u32 %v15143_v11, 16  ;;  %v1452_v58 = vrot.slane %v1451_v25, 4  ;;  %v935_v39 = vsel %vm14664_vm8, %v11799_v51, %v934_v33  ;;  %v15153_v62 = vld [vmem:[#allocation2 + $0x90] sm:$0xf] }
  0xf3   : > { %v1418_v45 = vrot.slane %v1417_v17, 4  ;;  %v15155_v1 = vld [vmem:[#allocation2 + $0x98] sm:$0x1]  ;;  %936 = vst [vmem:[#allocation2 + $0x9c] sm:$0x1] %v935_v39  ;;  %v1080_v37 = vsel %vm14713_vm9, %v11817_v29, %v1079_v21  ;;  %v1435_v0 = vshrl.u32 %v15153_v62, 16 }
  0xf4   : > { %v15159_v8 = vrot.slane %v1468_v31, 5  ;;  %v1438_v27 = vshll.u32 %v15153_v62, 16  ;;  %v1454_v52 = vshll.u32 %v15155_v1, 16  ;;  %1081 = vst [vmem:[#allocation2 + $0xa4] sm:$0x1] %v1080_v37  ;;  %v1474_v61 = vrot.slane %v1472_v35, 4 }
  0xf5   : > { %770 = vst [vmem:[#allocation2 + $0xa8] sm:$0xf] %v769_v9  ;;  %v1423_v55 = vsel %vm14777_vm12, %v1418_v45, %v15098_v2  ;;  %v580_v34 = vshrl.u32 %v15039_v63, 16  ;;  %v589_v56 = vshrl.u32 %v15059_v15, 16  ;;  %v1437_v60 = vrot.slane %v1435_v0, 4 }
  0xf6   : > { %v11833_v59 = vcombine.low %v1423_v55, %v1433_v32  ;;  %v1440_v22 = vrot.slane %v1438_v27, 5  ;;  %v1456_v46 = vrot.slane %v1454_v52, 5  ;;  %v1475_v54 = vor.u32 %v1474_v61, %v15159_v8  ;;  %v772_v33 = vld [vmem:[#allocation2 + $0xb0] sm:$0x1]  ;;  %v775_v29 = vld [vmem:[#allocation2 + $0xb4] sm:$0xf] }
  0xf7   : > { %v582_v57 = vrot.slane %v580_v34, 7  ;;  %v591_v30 = vrot.slane %v589_v56, 7  ;;  %v592_v4 = vshll.u32 %v15059_v15, 16  ;;  %v597_v13 = vshrl.u32 %v15115_v43, 16  ;;  %v779_v39 = vld [vmem:[#allocation2 + $0xbc] sm:$0x1] }
  0xf8   : > { %12962 = vmatmul.mubr.msk.bf16.gmra.mrb[20].mxu0 %vm1580_vm13, %v11833_v59  ;;  %v1441_v2 = vor.u32 %v1440_v22, %v1437_v60  ;;  %v600_v63 = vshll.u32 %v15115_v43, 16  ;;  %v1457_v25 = vsel %vm14777_vm12, %v1452_v58, %v1456_v46  ;;  %v1476_v51 = vrot.slane %v1475_v54, 4 }
  0xf9   : > { %v585_v42 = vor.u32 %v583_v49, %v582_v57  ;;  %v587_v17 = vrot.slane %v582_v57, 4  ;;  %v594_v35 = vor.u32 %v592_v4, %v591_v30  ;;  %v595_v32 = vrot.slane %v591_v30, 4 }
  0xfa   : > { %v1442_v21 = vrot.slane %v1441_v2, 4  ;;  %v15179_v31 = vld [vmem:[#allocation2 + $0x9c] sm:$0xf]  ;;  %v599_v15 = vrot.slane %v597_v13, 7  ;;  %vm2134_vm14 = vcmask 1042432   ;;  %vm2135_vm15 = vcmask 1046532  }
  0xfb   : > { %v15181_v45 = vld [vmem:[#allocation2 + $0xa4] sm:$0x1]  ;;  %v1459_v37 = vshrl.u32 %v15179_v31, 16  ;;  %v1462_v43 = vshll.u32 %v15179_v31, 16  ;;  %v586_v58 = vsel %vm14645_vm6, %v578_v40, %v585_v42  ;;  %v773_v9 = vsel %vm14664_vm8, %v587_v17, %v772_v33  ;;  %vm15316_vm1 = vmor %vm2134_vm14, %vm2135_vm15 }
  0xfc   : > { %v819_v0 = vld [vmem:[#allocation2 + $0xa8] sm:$0x2]  ;;  %v1447_v27 = vsel %vm14777_vm12, %v1442_v21, %v15137_v47  ;;  %v1478_v52 = vshll.u32 %v15181_v45, 16  ;;  %771 = vst.msk [vmem:[#allocation2 + $0xac] sm:$0xf] %vm671_vm3, %v586_v58  ;;  %v602_v34 = vor.u32 %v600_v63, %v599_v15  ;;  %v604_v40 = vrot.slane %v599_v15, 4 }
  0xfd   : > { %774 = vst [vmem:[#allocation2 + $0xb0] sm:$0x1] %v773_v9  ;;  %v11800_v61 = vrot.slane %v819_v0, 9  ;;  %v937_v55 = vld [vmem:[#allocation2 + $0xa8] sm:$0x1]  ;;  %v11834_v49 = vcombine.low %v1447_v27, %v1457_v25  ;;  %v1461_v56 = vrot.slane %v1459_v37, 4  ;;  %v776_v47 = vsel %vm14658_vm7, %v594_v35, %v775_v29 }
  0xfe   : > { %v1464_v59 = vrot.slane %v1462_v43, 5  ;;  %v1480_v60 = vrot.slane %v1478_v52, 5  ;;  %v603_v46 = vsel %vm14645_vm6, %v595_v32, %v602_v34  ;;  %777 = vst [vmem:[#allocation2 + $0xb4] sm:$0xf] %v776_v47  ;;  %v780_v57 = vsel %vm14664_vm8, %v604_v40, %v779_v39 }
  0xff   : > { %v938_v22 = vsel %vm14664_vm8, %v11800_v61, %v937_v55  ;;  %12965 = vmatprep.mubr.msk.bf16.mxu0 %vm1580_vm13, %v11834_v49  ;;  %778 = vst.msk [vmem:[#allocation2 + $0xb8] sm:$0xf] %vm671_vm3, %v603_v46  ;;  %781 = vst [vmem:[#allocation2 + $0xbc] sm:$0x1] %v780_v57 }
 0x100   : > { %v1465_v54 = vor.u32 %v1464_v59, %v1461_v56  ;;  %939 = vst [vmem:[#allocation2 + $0xa8] sm:$0x1] %v938_v22  ;;  %v1481_v30 = vsel %vm14777_vm12, %v1476_v51, %v1480_v60 }
 0x102   : > { %v1466_v33 = vrot.slane %v1465_v54, 4 }
 0x103   : > { %v963_v2 = vld [vmem:[#allocation2 + $0xac] sm:$0x8] }
 0x104   : > { %v1471_v4 = vsel %vm14777_vm12, %v1466_v33, %v15159_v8  ;;  %v1082_v13 = vld [vmem:[#allocation2 + $0xb0] sm:$0x1]  ;;  %v15209_v63 = vld [vmem:[#allocation2 + $0xac] sm:$0xf]  ;;  %v11818_v42 = vrot.slane %v963_v2, 11 }
 0x105   : > { %v11835_v25 = vcombine.low %v1471_v4, %v1481_v30  ;;  %v1492_v17 = vshll.u32 %v15209_v63, 16  ;;  %v1496_v29 = vshrl.u32 %v15209_v63, 16  ;;  %v798_v8 = vld [vmem:[#allocation2 + $0xb4] sm:$0xf] }
 0x106   : > { %v1083_v21 = vsel %vm14713_vm9, %v11818_v42, %v1082_v13  ;;  %v800_v37 = vld [vmem:[#allocation2 + $0xbc] sm:$0x1]  ;;  %v820_v43 = vld [vmem:[#allocation2 + $0xb4] sm:$0x2]  ;;  %802 = vst.msk [vmem:[#allocation2 + $0xcc] sm:$0xf] %vm671_vm3, %v798_v8 }
 0x107   : > { %12966 = vmatmul.mubr.msk.bf16.gmra.mrb[24].mxu0 %vm1580_vm13, %v11835_v25  ;;  %v15216_v51 = vld [vmem:[#allocation2 + $0xa8] sm:$0xf]  ;;  %v1494_v35 = vrot.slane %v1492_v17, 5  ;;  %v1498_v32 = vrot.slane %v1496_v29, 4  ;;  %1084 = vst [vmem:[#allocation2 + $0xb0] sm:$0x1] %v1083_v21 }
 0x108   : > { %v1483_v15 = vshrl.u32 %v15216_v51, 16  ;;  %v1486_v39 = vshll.u32 %v15216_v51, 16  ;;  %v11801_v58 = vrot.slane %v820_v43, 9  ;;  %v940_v9 = vld [vmem:[#allocation2 + $0xb4] sm:$0x1] }
 0x109   : > { %v964_v0 = vld [vmem:[#allocation2 + $0xb8] sm:$0x8]  ;;  %804 = vst.msk [vmem:[#allocation2 + $0xd4] sm:$0x1] %vm679_vm5, %v800_v37  ;;  %v1085_v55 = vld [vmem:[#allocation2 + $0xbc] sm:$0x1]  ;;  %v1499_v34 = vor.u32 %v1498_v32, %v1494_v35 }
 0x10a   : > { %v1485_v27 = vrot.slane %v1483_v15, 4  ;;  %v1488_v52 = vrot.slane %v1486_v39, 5  ;;  %v11819_v61 = vrot.slane %v964_v0, 11  ;;  %v941_v49 = vsel %vm14664_vm8, %v11801_v58, %v940_v9  ;;  %v15224_v56 = vld [vmem:[#allocation2 + $0xb8] sm:$0xf] }
 0x10b   : > { %942 = vst [vmem:[#allocation2 + $0xb4] sm:$0x1] %v941_v49  ;;  %v1516_v60 = vshll.u32 %v15224_v56, 16  ;;  %v1520_v22 = vshrl.u32 %v15224_v56, 16  ;;  %v1500_v33 = vrot.slane %v1499_v34, 4 }
 0x10c   : > { %v1489_v59 = vor.u32 %v1488_v52, %v1485_v27  ;;  %v1086_v40 = vsel %vm14713_vm9, %v11819_v61, %v1085_v55  ;;  %v15249_v27 = vld [vmem:[#allocation2 + $0x4] sm:$0xf]  ;;  %v14223_v52 = vld [vmem:[#allocation2] sm:$0xf]  ;;  %v15254_v34 = vld [vmem:[#allocation2 + $0x10] sm:$0xf] }
 0x10d   : > { %1087 = vst [vmem:[#allocation2 + $0xbc] sm:$0x1] %v1086_v40  ;;  %v1518_v47 = vrot.slane %v1516_v60, 5  ;;  %v1522_v54 = vrot.slane %v1520_v22, 4  ;;  %v11854_v61 = vcombine.low %v14223_v52, %v15249_v27  ;;  %v14225_v49 = vld [vmem:[#allocation2 + $0xc] sm:$0xf] }
 0x10e   : > { %v1490_v46 = vrot.slane %v1489_v59, 4  ;;  %v15230_v57 = vld [vmem:[#allocation2 + $0xb0] sm:$0x1]  ;;  %v11855_v59 = vcombine.low %v14225_v49, %v15254_v34  ;;  %v15257_v40 = vld [vmem:[#allocation2 + $0x1c] sm:$0xf] }
 0x10f   : > { %v1502_v30 = vshll.u32 %v15230_v57, 16  ;;  %v1523_v13 = vor.u32 %v1522_v54, %v1518_v47  ;;  %v14227_v60 = vld [vmem:[#allocation2 + $0x18] sm:$0xf]  ;;  %v15261_v54 = vld [vmem:[#allocation6 + $0x6] sm:$0x3] }
 0x110   : > { %v1495_v4 = vsel %vm14777_vm12, %v1490_v46, %v1494_v35  ;;  %v11856_v22 = vcombine.low %v14227_v60, %v15257_v40  ;;  %v14228_v46 = vld [vmem:[#allocation6 + $0x4] sm:$0x3]  ;;  %v11867_v60 = vcombine.low %v15179_v31, %v15143_v11  ;;  %v2940_v24 = vld [vmem:[#allocation2 + $0xa8] sm:$0xf]  ;;  %v15676_v36 = vld [vmem:[#allocation2 + $0xb0] sm:$0x1] }
 0x111   : > { %v1504_v2 = vrot.slane %v1502_v30, 5  ;;  %v1524_v37 = vrot.slane %v1523_v13, 4  ;;  %v14230_v30 = vld [vmem:[#allocation2 + $0x24] sm:$0xf]  ;;  %v14232_v13 = vld [vmem:[#allocation2 + $0x30] sm:$0xf] }
 0x112   : > { %v15235_v25 = vld [vmem:[#allocation2 + $0xb4] sm:$0xf] }
 0x113   : > { %v1505_v42 = vsel %vm14777_vm12, %v1500_v33, %v1504_v2  ;;  %v1507_v29 = vshrl.u32 %v15235_v25, 16  ;;  %v1510_v21 = vshll.u32 %v15235_v25, 16  ;;  %v15267_v33 = vld [vmem:[#allocation2 + $0x28] sm:$0xf]  ;;  %v15270_v2 = vld [vmem:[#allocation2 + $0x34] sm:$0xf] }
 0x114   : > { %v15239_v17 = vld [vmem:[#allocation2 + $0xbc] sm:$0x1]  ;;  %v11836_v32 = vcombine.low %v1495_v4, %v1505_v42  ;;  %v11857_v4 = vcombine.low %v14230_v30, %v15267_v33  ;;  %v11858_v42 = vcombine.low %v14232_v13, %v15270_v2 }
 0x115   : > { %v1526_v8 = vshll.u32 %v15239_v17, 16  ;;  %v1509_v15 = vrot.slane %v1507_v29, 4  ;;  %v1512_v39 = vrot.slane %v1510_v21, 5  ;;  %v15275_v29 = vld [vmem:[#allocation2 + $0x40] sm:$0xf] }
 0x116   : > { %12969 = vmatprep.mubr.msk.bf16.mxu0 %vm1580_vm13, %v11836_v32  ;;  %v11859_v21 = vcombine.low %v14902_v41, %v15275_v29  ;;  %v15279_v32 = vld [vmem:[#allocation2 + $0x4c] sm:$0xf] }
 0x117   : > { %v1528_v35 = vrot.slane %v1526_v8, 5  ;;  %v1513_v43 = vor.u32 %v1512_v39, %v1509_v15  ;;  %v11860_v8 = vcombine.low %v14933_v48, %v15279_v32  ;;  %v11861_v15 = vcombine.low %v14944_v7, %v14916_v38  ;;  %v249_v41 = vld [vmem:[%s14628_s30 + $0xf0] sm:$0xff]  ;;  %v782_v7 = vld [vmem:[#allocation2 + $0xc0] sm:$0xf] }
 0x118   : > { %v11862_v39 = vcombine.low %v14968_v3, %v14952_v44  ;;  %v11863_v48 = vcombine.low %v15051_v14, %v15009_v18  ;;  %v11865_v3 = vcombine.low %v15123_v19, %v15080_v53  ;;  %v11866_v14 = vcombine.low %v15153_v62, %v15111_v12 }
 0x119   : > { %v1514_v58 = vrot.slane %v1513_v43, 4  ;;  %v1529_v9 = vsel %vm14777_vm12, %v1524_v37, %v1528_v35  ;;  %v12598_v37 = vpack.c.bf16 %v249_v41, %v249_v41  ;;  %v11864_v35 = vcombine.low %v15086_v16, %v15063_v26  ;;  %v250_v16 = vld [vmem:[%s14628_s30 + $0xf8] sm:$0xff] }
 0x11b   : > { %v1519_v0 = vsel %vm14777_vm12, %v1514_v58, %v1518_v47  ;;  %v2348_v47 = vsel %vm1629_vm0, %v14228_v46, 0  ;;  %v606_v43 = vshrl.u32 %v12598_v37, 16 }
 0x11c   : > { %v11837_v55 = vcombine.low %v1519_v0, %v1529_v9  ;;  %v609_v9 = vshll.u32 %v12598_v37, 16  ;;  %v12599_v0 = vpack.c.bf16 %v250_v16, %v250_v16 }
 0x11d   : > { %v608_v58 = vrot.slane %v606_v43, 7  ;;  %v2153_v43 = vrot.slane %v15257_v40, 5 }
 0x11e   : > { %12970 = vmatmul.mubr.msk.bf16.gmra.mrb[28].mxu0 %vm1580_vm13, %v11837_v55  ;;  %v614_v52 = vshrl.u32 %v12599_v0, 16  ;;  %v2139_v55 = vrot.slane %v15249_v27, 5 }
 0x11f   : > { %12975 = vmatprep.mubr.msk.bf16.mxu0 %vm1580_vm13, %v11854_v61  ;;  %v611_v38 = vor.u32 %v609_v9, %v608_v58  ;;  %v2086_v61 = vld [vmem:[#allocation2] sm:$0xe]  ;;  %v14236_v9 = vld [vmem:[#allocation2 + $0x14] sm:$0x1]  ;;  %v2155_v16 = vrot.slane %v2153_v43, 4 }
 0x120   : > { %v616_v49 = vrot.slane %v614_v52, 7  ;;  %v11886_v30 = vrot.slane %v2086_v61, 9  ;;  %v2141_v13 = vrot.slane %v2139_v55, 4 }
 0x121   : > { %v783_v44 = vsel %vm14658_vm7, %v611_v38, %v782_v7  ;;  %v2149_v38 = vrot.slane %v14236_v9, 5 }
 0x122   : > { %784 = vst [vmem:[#allocation2 + $0xc0] sm:$0xf] %v783_v44  ;;  %v2140_v41 = vsel %vm15316_vm1, %v11886_v30, %v2139_v55  ;;  %v14238_v30 = vld [vmem:[#allocation2 + $0x2c] sm:$0x1] }
 0x126   : > { %12976 = vmatmul.mubr.msk.bf16.vlgmr.msra.gmra.mrb[0].mxu0 %vm1580_vm13, %v11855_v59  ;;  %v617_v59 = vshll.u32 %v12599_v0, 16  ;;  %v14237_v0 = vld [vmem:[#allocation2 + $0x20] sm:$0x1] }
 0x127   : > { %13008 = vmatpush3.bf16.msra.mxu0 %v2348_v47  ;;  %12979 = vmatprep.mubr.msk.bf16.mxu0 %vm1580_vm13, %v11856_v22  ;;  %v612_v22 = vrot.slane %v608_v58, 4  ;;  %v11868_v47 = vcombine.low %v15216_v51, %v15209_v63  ;;  %v2146_v51 = vrot.slane %v15254_v34, 5  ;;  %v11869_v34 = vcombine.low %v15235_v25, %v15224_v56 }
 0x128   : > { %14066 = vmatprep.subr.msk.bf16.mxu0 %vm1629_vm0, %v15261_v54  ;;  %v619_v62 = vor.u32 %v617_v59, %v616_v49  ;;  %v2156_v52 = vrot.slane %v14237_v0, 5  ;;  %v2160_v25 = vrot.slane %v15267_v33, 5  ;;  %v2089_v59 = vld [vmem:[#allocation2 + $0x24] sm:$0xe] }
 0x129   : > { %v821_v19 = vld [vmem:[#allocation2 + $0xc0] sm:$0x2] }
 0x12a   : > { %v11802_v46 = vrot.slane %v821_v19, 9  ;;  %v620_v27 = vsel %vm14645_vm6, %v612_v22, %v619_v62  ;;  %v2090_v19 = vld [vmem:[#allocation2 + $0x30] sm:$0xe] }
 0x12b   : > { %785 = vst.msk [vmem:[#allocation2 + $0xc4] sm:$0xf] %vm671_vm3, %v620_v27  ;;  %v11890_v33 = vrot.slane %v2090_v19, 9 }
 0x12e   : > { %12980 = vmatmul.mubr.msk.bf16.gmra.mrb[4].mxu0 %vm1580_vm13, %v11857_v4  ;;  %v943_v4 = vld [vmem:[#allocation2 + $0xc0] sm:$0x1] }
 0x12f   : > { %12983 = vmatprep.mubr.msk.bf16.mxu0 %vm1580_vm13, %v11858_v42  ;;  %v14235_v42 = vld [vmem:[#allocation2 + $0x8] sm:$0x1]  ;;  %v944_v31 = vsel %vm14664_vm8, %v11802_v46, %v943_v4  ;;  %v11889_v46 = vrot.slane %v2089_v59, 9  ;;  %v2163_v4 = vrot.slane %v14238_v30, 5 }
 0x130   : > { %945 = vst [vmem:[#allocation2 + $0xc0] sm:$0x1] %v944_v31  ;;  %v15347_v31 = vld [vmem:[#allocation6 + $0x8] sm:$0x3] }
 0x136   : > { %12984 = vmatmul.mubr.msk.bf16.gmra.mrb[8].mxu0 %vm1580_vm13, %v11859_v21  ;;  %v2142_v21 = vrot.slane %v14235_v42, 5 }
 0x137   : > { %12987 = vmatprep.mubr.msk.bf16.mxu0 %vm1580_vm13, %v11860_v8  ;;  %v19387_v8 = vmov 0 }
 0x138   : > { %v19388_v8 = vsel %vm15316_vm1, 4294967295, %v19387_v8  ;;  %v2143_v37 = vsel %vm15316_vm1, %v2141_v13, %v2142_v21  ;;  %v2706_v13 = vsel %vm1629_vm0, %v15261_v54, 0  ;;  %v14239_v21 = vld [vmem:[#allocation2 + $0x38] sm:$0x1] }
 0x139   : > { %19389 = vst [vmem:[#allocation18_spill] sm:$0xff] %v19388_v8  ;;  %v11902_v7 = vcombine.low %v2140_v41, %v2143_v37  ;;  %v2170_v27 = vrot.slane %v14239_v21, 5  ;;  %v2091_v41 = vld [vmem:[#allocation2 + $0x3c] sm:$0xe]  ;;  %v2181_v37 = vrot.slane %v15279_v32, 5 }
 0x13a   : > { %v6405_v8 = vld [vmem:[#allocation2 + $0x80] sm:$0x1] }
 0x13e   : > { %12988 = vmatmul.mubr.msk.bf16.gmra.mrb[12].mxu0 %vm1580_vm13, %v11861_v15  ;;  %v621_v15 = vrot.slane %v616_v49, 4  ;;  %v2157_v49 = vsel %vm15316_vm1, %v2155_v16, %v2156_v52  ;;  %v14242_v16 = vld [vmem:[#allocation2 + $0x58] sm:$0xf] }
 0x13f   : > { %12991 = vmatprep.mubr.msk.bf16.mxu0 %vm1580_vm13, %v11862_v39  ;;  %v786_v39 = vld [vmem:[#allocation2 + $0xc8] sm:$0x1]  ;;  %v2188_v0 = vrot.slane %v14242_v16, 5 }
 0x140   : > { %v787_v58 = vsel %vm14664_vm8, %v621_v15, %v786_v39  ;;  %v2174_v15 = vrot.slane %v15275_v29, 5 }
 0x141   : > { %788 = vst [vmem:[#allocation2 + $0xc8] sm:$0x1] %v787_v58  ;;  %v11891_v58 = vrot.slane %v2091_v41, 9 }
 0x142   : > { %v2176_v9 = vrot.slane %v2174_v15, 4 }
 0x143   : > { %v2175_v32 = vsel %vm15316_vm1, %v11891_v58, %v2174_v15  ;;  %v2216_v58 = vrot.slane %v15080_v53, 5  ;;  %v2226_v53 = vrot.slane %v15155_v1, 5  ;;  %v2237_v1 = vrot.slane %v15209_v63, 5 }
 0x146   : > { %12992 = vmatmul.mubr.msk.bf16.gmra.mrb[16].mxu0 %vm1580_vm13, %v11863_v48  ;;  %v2087_v48 = vld [vmem:[#allocation2 + $0xc] sm:$0xe] }
 0x147   : > { %12995 = vmatprep.mubr.msk.bf16.mxu0 %vm1580_vm13, %v11864_v35  ;;  %v2088_v35 = vld [vmem:[#allocation2 + $0x18] sm:$0xe]  ;;  %v11887_v44 = vrot.slane %v2087_v48, 9  ;;  %v2092_v48 = vld [vmem:[#allocation2 + $0x48] sm:$0xe] }
 0x148   : > { %v11892_v29 = vrot.slane %v2092_v48, 9 }
 0x149   : > { %v2147_v40 = vsel %vm15316_vm1, %v11887_v44, %v2146_v51  ;;  %v14241_v44 = vld [vmem:[#allocation2 + $0x50] sm:$0x1] }
 0x14a   : > { %v2182_v52 = vsel %vm15316_vm1, %v11892_v29, %v2181_v37 }
 0x14e   : > { %12996 = vmatmul.mubr.msk.bf16.gmra.mrb[20].mxu0 %vm1580_vm13, %v11865_v3  ;;  %v2148_v3 = vrot.slane %v2146_v51, 4 }
 0x14f   : > { %12999 = vmatprep.mubr.msk.bf16.mxu0 %vm1580_vm13, %v11866_v14  ;;  %v11888_v14 = vrot.slane %v2088_v35, 9 }
 0x150   : > { %v2150_v61 = vsel %vm15316_vm1, %v2148_v3, %v2149_v38  ;;  %v14240_v38 = vld [vmem:[#allocation2 + $0x44] sm:$0x1]  ;;  %v2184_v3 = vrot.slane %v14241_v44, 5 }
 0x151   : > { %v2154_v55 = vsel %vm15316_vm1, %v11888_v14, %v2153_v43  ;;  %v11903_v22 = vcombine.low %v2147_v40, %v2150_v61  ;;  %v2093_v61 = vld [vmem:[#allocation2 + $0x54] sm:$0xe] }
 0x152   : > { %v11904_v62 = vcombine.low %v2154_v55, %v2157_v49  ;;  %v2094_v49 = vld [vmem:[#allocation2 + $0x60] sm:$0xe]  ;;  %v11893_v19 = vrot.slane %v2093_v61, 9  ;;  %v2099_v61 = vld [vmem:[#allocation2 + $0x9c] sm:$0xe] }
 0x156   : > { %13000 = vmatmul.mubr.msk.bf16.gmra.mrb[24].mxu0 %vm1580_vm13, %v11867_v60  ;;  %v2167_v60 = vrot.slane %v15270_v2, 5  ;;  %v2161_v2 = vsel %vm15316_vm1, %v11889_v46, %v2160_v25 }
 0x157   : > { %13003 = vmatprep.mubr.msk.bf16.mxu0 %vm1580_vm13, %v11868_v47  ;;  %v2162_v47 = vrot.slane %v2160_v25, 4  ;;  %v14243_v25 = vld [vmem:[#allocation2 + $0x64] sm:$0xf] }
 0x158   : > { %v2169_v42 = vrot.slane %v2167_v60, 4  ;;  %v2168_v54 = vsel %vm15316_vm1, %v11890_v33, %v2167_v60  ;;  %v2195_v55 = vrot.slane %v14243_v25, 5  ;;  %v2100_v25 = vld [vmem:[#allocation2 + $0xa8] sm:$0xe] }
 0x159   : > { %v2164_v51 = vsel %vm15316_vm1, %v2162_v47, %v2163_v4  ;;  %v11894_v47 = vrot.slane %v2094_v49, 9  ;;  %v2198_v4 = vrot.slane %v14994_v50, 5  ;;  %v2209_v50 = vrot.slane %v15063_v26, 5 }
 0x15a   : > { %v2171_v39 = vsel %vm15316_vm1, %v2169_v42, %v2170_v27  ;;  %v11905_v35 = vcombine.low %v2161_v2, %v2164_v51  ;;  %v2197_v30 = vrot.slane %v2195_v55, 4  ;;  %v2202_v42 = vrot.slane %v15009_v18, 5  ;;  %v2095_v2 = vld [vmem:[#allocation2 + $0x6c] sm:$0xe]  ;;  %v2096_v51 = vld [vmem:[#allocation2 + $0x78] sm:$0xe] }
 0x15b   : > { %v11906_v43 = vcombine.low %v2168_v54, %v2171_v39  ;;  %v2196_v21 = vsel %vm15316_vm1, %v11894_v47, %v2195_v55  ;;  %v11895_v39 = vrot.slane %v2095_v2, 9  ;;  %v11896_v48 = vrot.slane %v2096_v51, 9 }
 0x15c   : > { %v2199_v27 = vsel %vm15316_vm1, %v2197_v30, %v2198_v4  ;;  %v2204_v41 = vrot.slane %v2202_v42, 4  ;;  %v2212_v18 = vrot.slane %v15109_v20, 5  ;;  %v2223_v20 = vrot.slane %v15111_v12, 5  ;;  %v2101_v4 = vld [vmem:[#allocation2 + $0xb4] sm:$0xe] }
 0x15d   : > { %v11910_v54 = vcombine.low %v2196_v21, %v2199_v27  ;;  %v2244_v47 = vrot.slane %v15224_v56, 5  ;;  %v2247_v21 = vrot.slane %v15239_v17, 5  ;;  %v965_v27 = vld [vmem:[#allocation2 + $0xc4] sm:$0x8]  ;;  %v14155_v17 = vld [vmem:[#allocation2 + $0x18] sm:$0xff]  }
 0x15e   : > { %13004 = vmatmul.mubr.msk.bf16.gmra.mrb[28].mxu0 %vm1580_vm13, %v11869_v34  ;;  %v2177_v34 = vrot.slane %v14240_v38, 5  ;;  %v2097_v38 = vld [vmem:[#allocation2 + $0x84] sm:$0xe]  ;;  %v2225_v16 = vrot.slane %v2223_v20, 4  ;;  %v11820_v51 = vrot.slane %v965_v27, 11 }
 0x15f   : > { %13009 = vmatprep.mubr.msk.bf16.mxu0 %vm1580_vm13, %v11902_v7  ;;  %v2183_v7 = vrot.slane %v2181_v37, 4  ;;  %v2205_v37 = vrot.slane %v15061_v23, 5  ;;  %v11897_v44 = vrot.slane %v2097_v38, 9  ;;  %v14163_v38 = vld [vmem:[#allocation2 + $0x78] sm:$0xff]  }
 0x160   : > { %v2178_v14 = vsel %vm15316_vm1, %v2176_v9, %v2177_v34  ;;  %v2210_v9 = vsel %vm15316_vm1, %v11896_v48, %v2209_v50  ;;  %v2098_v34 = vld [vmem:[#allocation2 + $0x90] sm:$0xe]  ;;  %v15440_v48 = vld [vmem:[#allocation6 + $0xa] sm:$0x3] }
 0x161   : > { %v2185_v40 = vsel %vm15316_vm1, %v2183_v7, %v2184_v3  ;;  %v11907_v59 = vcombine.low %v2175_v32, %v2178_v14  ;;  %v2206_v26 = vsel %vm15316_vm1, %v2204_v41, %v2205_v37  ;;  %v2218_v3 = vrot.slane %v2216_v58, 4  ;;  %v14156_v41 = vld [vmem:[#allocation2 + $0x24] sm:$0xff]  }
 0x162   : > { %v11908_v60 = vcombine.low %v2182_v52, %v2185_v40  ;;  %v2219_v32 = vrot.slane %v15129_v5, 5  ;;  %v11898_v14 = vrot.slane %v2098_v34, 9  ;;  %v2230_v52 = vrot.slane %v15143_v11, 5 }
 0x163   : > { %v2227_v5 = vsel %vm15316_vm1, %v2225_v16, %v2226_v53  ;;  %v2240_v11 = vrot.slane %v15230_v57, 5  ;;  %v3432_v37 = vsel %vm1629_vm0, %v15347_v31, 0 }
 0x164   : > { %v2220_v12 = vsel %vm15316_vm1, %v2218_v3, %v2219_v32  ;;  %v2224_v40 = vsel %vm15316_vm1, %v11898_v14, %v2223_v20  ;;  %v2904_v3 = vld [vmem:[#allocation2 + $0x18] sm:$0xf]  ;;  %v15456_v32 = vld [vmem:[#allocation2 + $0x1c] sm:$0xf] }
 0x165   : > { %v11914_v49 = vcombine.low %v2224_v40, %v2227_v5  ;;  %v2974_v53 = vshrl.u32 %v2904_v3, 16  ;;  %v2983_v5 = vshll.u32 %v15456_v32, 16 }
 0x166   : > { %13010 = vmatmul.mubr.msk.bf16.vlgmr.msra.gmra.mrb[0].mxu0 %vm1580_vm13, %v11903_v22  ;;  %v2190_v22 = vrot.slane %v2188_v0, 4 }
 0x167   : > { %13042 = vmatpush3.bf16.msra.mxu0 %v2706_v13  ;;  %13013 = vmatprep.mubr.msk.bf16.mxu0 %vm1580_vm13, %v11904_v62  ;;  %v14244_v62 = vld [vmem:[#allocation2 + $0x5c] sm:$0x1]  ;;  %v2189_v13 = vsel %vm15316_vm1, %v11893_v19, %v2188_v0  ;;  %v2217_v0 = vsel %vm15316_vm1, %v11897_v44, %v2216_v58  ;;  %v2233_v19 = vrot.slane %v15181_v45, 5  ;;  %v14162_v58 = vld [vmem:[#allocation2 + $0x6c] sm:$0xff]  }
 0x168   : > { %14067 = vmatprep.subr.msk.bf16.mxu0 %vm1629_vm0, %v15347_v31  ;;  %v2191_v46 = vrot.slane %v14244_v62, 5  ;;  %v11913_v55 = vcombine.low %v2217_v0, %v2220_v12  ;;  %v2239_v62 = vrot.slane %v2237_v1, 4  ;;  %v14161_v31 = vld [vmem:[#allocation2 + $0x60] sm:$0xff]   ;;  %v2977_v0 = vshll.u32 %v2904_v3, 16  ;;  %v15460_v12 = vld [vmem:[#allocation2 + $0x14] sm:$0x1] }
 0x169   : > { %v2916_v3 = vld [vmem:[#allocation2 + $0x48] sm:$0xf] }
 0x16a   : > { %v2192_v33 = vsel %vm15316_vm1, %v2190_v22, %v2191_v46  ;;  %v11900_v22 = vrot.slane %v2100_v25, 9  ;;  %v2241_v45 = vsel %vm15316_vm1, %v2239_v62, %v2240_v11  ;;  %v15466_v25 = vld [vmem:[#allocation2 + $0x28] sm:$0xf]  ;;  %v15470_v11 = vld [vmem:[#allocation2 + $0x20] sm:$0x1] }
 0x16b   : > { %v11909_v15 = vcombine.low %v2189_v13, %v2192_v33  ;;  %v11901_v33 = vrot.slane %v2101_v4, 9  ;;  %v3011_v4 = vshrl.u32 %v15466_v25, 16 }
 0x16c   : > { %v2238_v30 = vsel %vm15316_vm1, %v11900_v22, %v2237_v1  ;;  %v2907_v1 = vld [vmem:[#allocation2 + $0x24] sm:$0xf] }
 0x16d   : > { %v11916_v13 = vcombine.low %v2238_v30, %v2241_v45  ;;  %v2245_v56 = vsel %vm15316_vm1, %v11901_v33, %v2244_v47  ;;  %v3001_v30 = vshll.u32 %v2907_v1, 16  ;;  %v3007_v45 = vshll.u32 %v15466_v25, 16  ;;  %v2910_v33 = vld [vmem:[#allocation2 + $0x30] sm:$0xf] }
 0x16e   : > { %13014 = vmatmul.mubr.msk.bf16.gmra.mrb[4].mxu0 %vm1580_vm13, %v11905_v35  ;;  %v2211_v35 = vrot.slane %v2209_v50, 4  ;;  %v1088_v50 = vld [vmem:[#allocation2 + $0xc8] sm:$0x1] }
 0x16f   : > { %13017 = vmatprep.mubr.msk.bf16.mxu0 %vm1580_vm13, %v11906_v43  ;;  %v2203_v43 = vsel %vm15316_vm1, %v11895_v39, %v2202_v42  ;;  %v2246_v42 = vrot.slane %v2244_v47, 4  ;;  %v1089_v39 = vsel %vm14713_vm9, %v11820_v51, %v1088_v50  ;;  %v2998_v47 = vshrl.u32 %v2907_v1, 16  ;;  %v2913_v50 = vld [vmem:[#allocation2 + $0x3c] sm:$0xf] }
 0x170   : > { %v2213_v23 = vsel %vm15316_vm1, %v2211_v35, %v2212_v18  ;;  %v11911_v29 = vcombine.low %v2203_v43, %v2206_v26  ;;  %1090 = vst [vmem:[#allocation2 + $0xc8] sm:$0x1] %v1089_v39  ;;  %v14157_v35 = vld [vmem:[#allocation2 + $0x30] sm:$0xff]   ;;  %v14158_v18 = vld [vmem:[#allocation2 + $0x3c] sm:$0xff]   ;;  %v14159_v43 = vld [vmem:[#allocation2 + $0x48] sm:$0xff]   ;;  %v3013_v39 = vrot.slane %v3011_v4, 4 }
 0x171   : > { %v11912_v7 = vcombine.low %v2210_v9, %v2213_v23  ;;  %v2248_v2 = vsel %vm15316_vm1, %v2246_v42, %v2247_v21  ;;  %v14160_v26 = vld [vmem:[#allocation2 + $0x54] sm:$0xff]   ;;  %v2901_v9 = vld [vmem:[#allocation2 + $0xc] sm:$0xf]  ;;  %v15452_v23 = vld [vmem:[#allocation2 + $0x10] sm:$0xf]  ;;  %v3000_v51 = vrot.slane %v2998_v47, 4 }
 0x172   : > { %v2950_v20 = vshrl.u32 %v2901_v9, 16  ;;  %v2953_v34 = vshll.u32 %v2901_v9, 16  ;;  %v2963_v44 = vshrl.u32 %v15452_v23, 16  ;;  %v15478_v42 = vld [vmem:[#allocation2 + $0x34] sm:$0xf]  ;;  %v3046_v9 = vshrl.u32 %v2913_v50, 16 }
 0x174   : > { %v2952_v14 = vrot.slane %v2950_v20, 4  ;;  %v2955_v16 = vrot.slane %v2953_v34, 5  ;;  %v2965_v40 = vrot.slane %v2963_v44, 4  ;;  %v14168_v20 = vld [vmem:[#allocation2 + $0xb4] sm:$0xff]  }
 0x176   : > { %13018 = vmatmul.mubr.msk.bf16.gmra.mrb[8].mxu0 %vm1580_vm13, %v11907_v59  ;;  %v11899_v59 = vrot.slane %v2099_v61, 9  ;;  %v2987_v61 = vshrl.u32 %v15456_v32, 16  ;;  %v2956_v22 = vor.u32 %v2955_v16, %v2952_v14 }
 0x177   : > { %13021 = vmatprep.mubr.msk.bf16.mxu0 %vm1580_vm13, %v11908_v60  ;;  %v2232_v60 = vrot.slane %v2230_v52, 4 }
 0x178   : > { %v2231_v46 = vsel %vm15316_vm1, %v11899_v59, %v2230_v52  ;;  %v2976_v59 = vrot.slane %v2974_v53, 4  ;;  %v2957_v21 = vrot.slane %v2956_v22, 4 }
 0x179   : > { %v2234_v63 = vsel %vm15316_vm1, %v2232_v60, %v2233_v19  ;;  %v2979_v60 = vrot.slane %v2977_v0, 5  ;;  %v14166_v19 = vld [vmem:[#allocation2 + $0x9c] sm:$0xff]  }
 0x17a   : > { %v11915_v57 = vcombine.low %v2231_v46, %v2234_v63  ;;  %v15472_v46 = vrot.slane %v2983_v5, 5  ;;  %v2989_v63 = vrot.slane %v2987_v61, 4 }
 0x17e   : > { %13022 = vmatmul.mubr.msk.bf16.gmra.mrb[12].mxu0 %vm1580_vm13, %v11909_v15  ;;  %v11917_v15 = vcombine.low %v2245_v56, %v2248_v2  ;;  %v2990_v2 = vor.u32 %v2989_v63, %v15472_v46 }
 0x17f   : > { %13025 = vmatprep.mubr.msk.bf16.mxu0 %vm1580_vm13, %v11910_v54  ;;  %v14154_v54 = vld [vmem:[#allocation2 + $0xc] sm:$0xff]  }
 0x180   : > { %v2991_v14 = vrot.slane %v2990_v2, 4  ;;  %v14169_v2 = vld [vmem:[#allocation2 + $0xc0] sm:$0xff]  }
 0x186   : > { %13026 = vmatmul.mubr.msk.bf16.gmra.mrb[16].mxu0 %vm1580_vm13, %v11911_v29  ;;  %v14164_v29 = vld [vmem:[#allocation2 + $0x84] sm:$0xff]  }
 0x187   : > { %13029 = vmatprep.mubr.msk.bf16.mxu0 %vm1580_vm13, %v11912_v7  ;;  %v2959_v7 = vshll.u32 %v15452_v23, 16 }
 0x189   : > { %v15462_v52 = vrot.slane %v2959_v7, 5 }
 0x18b   : > { %v2966_v62 = vor.u32 %v2965_v40, %v15462_v52  ;;  %v2962_v34 = vsel %vm14777_vm12, %v2957_v21, %v15462_v52  ;;  %v15502_v52 = vld [vmem:[#allocation2 + $0x38] sm:$0x1] }
 0x18d   : > { %v2967_v27 = vrot.slane %v2966_v62, 4  ;;  %v15508_v62 = vld [vmem:[#allocation2 + $0x44] sm:$0x1] }
 0x18e   : > { %13030 = vmatmul.mubr.msk.bf16.gmra.mrb[20].mxu0 %vm1580_vm13, %v11913_v55  ;;  %v14165_v55 = vld [vmem:[#allocation2 + $0x90] sm:$0xff]  }
 0x18f   : > { %13033 = vmatprep.mubr.msk.bf16.mxu0 %vm1580_vm13, %v11914_v49  ;;  %v2969_v49 = vshll.u32 %v15460_v12, 16 }
 0x191   : > { %v2971_v56 = vrot.slane %v2969_v49, 5 }
 0x196   : > { %13034 = vmatmul.mubr.msk.bf16.gmra.mrb[24].mxu0 %vm1580_vm13, %v11915_v57  ;;  %v2980_v57 = vor.u32 %v2979_v60, %v2976_v59  ;;  %v3070_v59 = vshrl.u32 %v2916_v3, 16  ;;  %v3073_v60 = vshll.u32 %v2916_v3, 16 }
 0x197   : > { %13037 = vmatprep.mubr.msk.bf16.mxu0 %vm1580_vm13, %v11916_v13  ;;  %v2993_v13 = vshll.u32 %v15470_v11, 16 }
 0x19e   : > { %13038 = vmatmul.mubr.msk.bf16.gmra.mrb[28].mxu0 %vm1580_vm13, %v11917_v15  ;;  %v3003_v15 = vrot.slane %v3001_v30, 5 }
 0x19f   : > { %13043 = vmatprep.mubr.msk.bf16.mxu0 %vm1580_vm13, %v14154_v54  ;;  %v15482_v54 = vrot.slane %v3007_v45, 5 }
 0x1a0   : > { %v3004_v16 = vor.u32 %v3003_v15, %v3000_v51  ;;  %v3065_v51 = vshll.u32 %v15508_v62, 16  ;;  %v3072_v15 = vrot.slane %v3070_v59, 4 }
 0x1a1   : > { %v3014_v53 = vor.u32 %v3013_v39, %v15482_v54  ;;  %v3075_v39 = vrot.slane %v3073_v60, 5 }
 0x1a2   : > { %v3005_v45 = vrot.slane %v3004_v16, 4  ;;  %v3067_v16 = vrot.slane %v3065_v51, 5  ;;  %v2925_v51 = vld [vmem:[#allocation2 + $0x6c] sm:$0xf] }
 0x1a3   : > { %v3015_v4 = vrot.slane %v3014_v53, 4  ;;  %v15538_v53 = vld [vmem:[#allocation2 + $0x64] sm:$0xf] }
 0x1a6   : > { %13044 = vmatmul.mubr.msk.bf16.vlgmr.msra.gmra.mrb[0].mxu0 %vm1580_vm13, %v14155_v17  ;;  %v15484_v17 = vld [vmem:[#allocation2 + $0x40] sm:$0xf] }
 0x1a7   : > { %13076 = vmatpush3.bf16.msra.mxu0 %v3432_v37  ;;  %13047 = vmatprep.mubr.msk.bf16.mxu0 %vm1580_vm13, %v14156_v41  ;;  %v15486_v41 = vld [vmem:[#allocation2 + $0x2c] sm:$0x1]  ;;  %v3022_v37 = vshrl.u32 %v2910_v33, 16  ;;  %v3055_v7 = vshll.u32 %v15484_v17, 16  ;;  %v3059_v44 = vshrl.u32 %v15484_v17, 16 }
 0x1a8   : > { %14068 = vmatprep.subr.msk.bf16.mxu0 %vm1629_vm0, %v15440_v48  ;;  %v3017_v0 = vshll.u32 %v15486_v41, 16 }
 0x1a9   : > { %v3024_v40 = vrot.slane %v3022_v37, 4  ;;  %v15510_v63 = vrot.slane %v3055_v7, 5  ;;  %v3061_v47 = vrot.slane %v3059_v44, 4  ;;  %v15523_v37 = vld [vmem:[#allocation2 + $0x58] sm:$0xf] }
 0x1aa   : > { %v3107_v7 = vshrl.u32 %v15523_v37, 16  ;;  %v2922_v44 = vld [vmem:[#allocation2 + $0x60] sm:$0xf] }
 0x1ab   : > { %v3118_v59 = vshrl.u32 %v2922_v44, 16  ;;  %v3121_v60 = vshll.u32 %v2922_v44, 16 }
 0x1ae   : > { %13048 = vmatmul.mubr.msk.bf16.gmra.mrb[4].mxu0 %vm1580_vm13, %v14157_v35  ;;  %v3025_v35 = vshll.u32 %v2910_v33, 16  ;;  %v15518_v33 = vsel %vm1629_vm0, %v15440_v48, 0 }
 0x1af   : > { %13051 = vmatprep.mubr.msk.bf16.mxu0 %vm1580_vm13, %v14158_v18  ;;  %v3031_v18 = vshll.u32 %v15478_v42, 16 }
 0x1b0   : > { %v3027_v5 = vrot.slane %v3025_v35, 5 }
 0x1b1   : > { %v15499_v61 = vrot.slane %v3031_v18, 5  ;;  %v3062_v18 = vor.u32 %v3061_v47, %v15510_v63 }
 0x1b2   : > { %v3028_v21 = vor.u32 %v3027_v5, %v3024_v40 }
 0x1b6   : > { %13052 = vmatmul.mubr.msk.bf16.gmra.mrb[8].mxu0 %vm1580_vm13, %v14159_v43  ;;  %v3035_v43 = vshrl.u32 %v15478_v42, 16 }
 0x1b7   : > { %13055 = vmatprep.mubr.msk.bf16.mxu0 %vm1580_vm13, %v14160_v26  ;;  %v14167_v26 = vld [vmem:[#allocation2 + $0xa8] sm:$0xff]  }
 0x1b8   : > { %v3037_v1 = vrot.slane %v3035_v43, 4 }
 0x1be   : > { %13056 = vmatmul.mubr.msk.bf16.gmra.mrb[12].mxu0 %vm1580_vm13, %v14161_v31  ;;  %v2981_v31 = vrot.slane %v2980_v57, 4  ;;  %v3019_v57 = vrot.slane %v3017_v0, 5  ;;  %v3063_v0 = vrot.slane %v3062_v18, 4  ;;  %v3120_v18 = vrot.slane %v3118_v59, 4 }
 0x1bf   : > { %13059 = vmatprep.mubr.msk.bf16.mxu0 %vm1580_vm13, %v14162_v58  ;;  %v2995_v58 = vrot.slane %v2993_v13, 5  ;;  %v15514_v13 = vld [vmem:[#allocation2 + $0x4c] sm:$0xf] }
 0x1c0   : > { %v2986_v22 = vsel %vm14777_vm12, %v2981_v31, %v15472_v46  ;;  %v3038_v46 = vor.u32 %v3037_v1, %v15499_v61  ;;  %v3079_v48 = vshll.u32 %v15514_v13, 16  ;;  %v3083_v43 = vshrl.u32 %v15514_v13, 16 }
 0x1c1   : > { %v2996_v30 = vsel %vm14777_vm12, %v2991_v14, %v2995_v58  ;;  %v3020_v31 = vsel %vm14777_vm12, %v3015_v4, %v3019_v57  ;;  %v15533_v58 = vld [vmem:[#allocation2 + $0x50] sm:$0x1]  ;;  %v3131_v4 = vshrl.u32 %v15538_v53, 16 }
 0x1c2   : > { %v11967_v35 = vcombine.low %v2986_v22, %v2996_v30  ;;  %v3039_v3 = vrot.slane %v3038_v46, 4  ;;  %v15541_v40 = vrot.slane %v3079_v48, 5  ;;  %v3085_v5 = vrot.slane %v3083_v43, 4  ;;  %v15544_v22 = vld [vmem:[#allocation2 + $0x5c] sm:$0x1] }
 0x1c3   : > { %v3089_v1 = vshll.u32 %v15533_v58, 16  ;;  %v3109_v30 = vrot.slane %v3107_v7, 4  ;;  %v3123_v48 = vrot.slane %v3121_v60, 5  ;;  %v2928_v43 = vld [vmem:[#allocation2 + $0x78] sm:$0xf]  ;;  %v3145_v7 = vshll.u32 %v2925_v51, 16 }
 0x1c5   : > { %v3124_v59 = vor.u32 %v3123_v48, %v3120_v18  ;;  %v15603_v48 = vld [vmem:[#allocation2 + $0x88] sm:$0xf] }
 0x1c6   : > { %13060 = vmatmul.mubr.msk.bf16.gmra.mrb[16].mxu0 %vm1580_vm13, %v14163_v38  ;;  %v3049_v38 = vshll.u32 %v2913_v50, 16 }
 0x1c7   : > { %13063 = vmatprep.mubr.msk.bf16.mxu0 %vm1580_vm13, %v14164_v29  ;;  %v2972_v29 = vsel %vm14777_vm12, %v2967_v27, %v2971_v56  ;;  %v3041_v27 = vshll.u32 %v15502_v52, 16  ;;  %v2919_v56 = vld [vmem:[#allocation2 + $0x54] sm:$0xf] }
 0x1c8   : > { %v3051_v49 = vrot.slane %v3049_v38, 5  ;;  %v3097_v38 = vshll.u32 %v2919_v56, 16 }
 0x1ce   : > { %13064 = vmatmul.mubr.msk.bf16.gmra.mrb[20].mxu0 %vm1580_vm13, %v14165_v55  ;;  %v3048_v55 = vrot.slane %v3046_v9, 4  ;;  %v3094_v9 = vshrl.u32 %v2919_v56, 16 }
 0x1cf   : > { %13067 = vmatprep.mubr.msk.bf16.mxu0 %vm1580_vm13, %v14166_v19  ;;  %v11966_v19 = vcombine.low %v2962_v34, %v2972_v29  ;;  %v3043_v34 = vrot.slane %v3041_v27, 5  ;;  %v3103_v29 = vshll.u32 %v15523_v37, 16  ;;  %v3068_v27 = vsel %vm14777_vm12, %v3063_v0, %v3067_v16 }
 0x1d0   : > { %v3052_v50 = vor.u32 %v3051_v49, %v3048_v55  ;;  %v3096_v55 = vrot.slane %v3094_v9, 4  ;;  %v3099_v49 = vrot.slane %v3097_v38, 5  ;;  %v3133_v9 = vrot.slane %v3131_v4, 4  ;;  %v15571_v38 = vld [vmem:[#allocation2 + $0x7c] sm:$0xf] }
 0x1d1   : > { %v15546_v47 = vrot.slane %v3103_v29, 5  ;;  %v3142_v29 = vshrl.u32 %v2925_v51, 16  ;;  %v3169_v0 = vshll.u32 %v2928_v43, 16 }
 0x1d2   : > { %v3053_v14 = vrot.slane %v3052_v50, 4  ;;  %v15563_v50 = vrot.slane %v3089_v1, 5 }
 0x1d3   : > { %v3144_v4 = vrot.slane %v3142_v29, 4  ;;  %v3125_v29 = vrot.slane %v3124_v59, 4 }
 0x1d4   : > { %v3058_v46 = vsel %vm14777_vm12, %v3053_v14, %v15510_v63  ;;  %v3110_v63 = vor.u32 %v3109_v30, %v15546_v47  ;;  %v2931_v30 = vld [vmem:[#allocation2 + $0x84] sm:$0xf] }
 0x1d5   : > { %v11970_v14 = vcombine.low %v3058_v46, %v3068_v27 }
 0x1d6   : > { %13068 = vmatmul.mubr.msk.bf16.gmra.mrb[24].mxu0 %vm1580_vm13, %v14167_v26  ;;  %v3010_v26 = vsel %vm14777_vm12, %v3005_v45, %v15482_v54  ;;  %v3076_v54 = vor.u32 %v3075_v39, %v3072_v15  ;;  %v3127_v45 = vshll.u32 %v15538_v53, 16  ;;  %v15565_v15 = vld [vmem:[#allocation2 + $0x70] sm:$0xf]  ;;  %v3113_v39 = vshll.u32 %v15544_v22, 16 }
 0x1d7   : > { %13071 = vmatprep.mubr.msk.bf16.mxu0 %vm1580_vm13, %v14168_v20  ;;  %v3029_v20 = vrot.slane %v3028_v21, 4  ;;  %v3044_v21 = vsel %vm14777_vm12, %v3039_v3, %v3043_v34  ;;  %v15576_v34 = vld [vmem:[#allocation2 + $0x68] sm:$0x1]  ;;  %v3151_v44 = vshll.u32 %v15565_v15, 16  ;;  %v3155_v3 = vshrl.u32 %v15565_v15, 16 }
 0x1d8   : > { %v15560_v56 = vrot.slane %v3076_v54, 4  ;;  %v3166_v54 = vshrl.u32 %v2928_v43, 16  ;;  %v3115_v1 = vrot.slane %v3113_v39, 5  ;;  %v3190_v43 = vshrl.u32 %v2931_v30, 16 }
 0x1d9   : > { %v3034_v57 = vsel %vm14777_vm12, %v3029_v20, %v15499_v61  ;;  %v3100_v61 = vor.u32 %v3099_v49, %v3096_v55  ;;  %v15573_v20 = vld [vmem:[#allocation6 + $0xc] sm:$0x3]  ;;  %v3179_v55 = vshrl.u32 %v15571_v38, 16  ;;  %v3111_v49 = vrot.slane %v3110_v63, 4 }
 0x1da   : > { %v3082_v46 = vsel %vm14777_vm12, %v15560_v56, %v15541_v40  ;;  %v3168_v51 = vrot.slane %v3166_v54, 4  ;;  %v3193_v63 = vshll.u32 %v2931_v30, 16  ;;  %v3199_v54 = vshll.u32 %v15603_v48, 16 }
 0x1db   : > { %v3181_v18 = vrot.slane %v3179_v55, 4  ;;  %v2934_v55 = vld [vmem:[#allocation2 + $0x90] sm:$0xf] }
 0x1de   : > { %13072 = vmatmul.mubr.msk.bf16.gmra.mrb[28].mxu0 %vm1580_vm13, %v14169_v2  ;;  %v3086_v2 = vor.u32 %v3085_v5, %v15541_v40  ;;  %v3101_v5 = vrot.slane %v3100_v61, 4  ;;  %v3171_v61 = vrot.slane %v3169_v0, 5  ;;  %v3116_v40 = vsel %vm14777_vm12, %v3111_v49, %v3115_v1 }
 0x1df   : > { %13077 = vmatprep.mubr.msk.bf16.mxu0 %vm1580_vm13, %v11966_v19  ;;  %v11968_v19 = vcombine.low %v3010_v26, %v3020_v31  ;;  %v11969_v26 = vcombine.low %v3034_v57, %v3044_v21  ;;  %v15569_v31 = vrot.slane %v3127_v45, 5  ;;  %v15588_v45 = vld [vmem:[#allocation2 + $0x74] sm:$0x1]  ;;  %v15590_v57 = vrot.slane %v3151_v44, 5 }
 0x1e0   : > { %v3087_v16 = vrot.slane %v3086_v2, 4  ;;  %v3157_v21 = vrot.slane %v3155_v3, 4  ;;  %v15599_v2 = vld [vmem:[#allocation2 + $0x80] sm:$0x1]  ;;  %v3172_v0 = vor.u32 %v3171_v61, %v3168_v51  ;;  %v3192_v1 = vrot.slane %v3190_v43, 4 }
 0x1e1   : > { %v3134_v60 = vor.u32 %v3133_v9, %v15569_v31  ;;  %v3106_v9 = vsel %vm14777_vm12, %v3101_v5, %v15546_v47  ;;  %v3203_v47 = vshrl.u32 %v15603_v48, 16  ;;  %v3214_v61 = vshrl.u32 %v2934_v55, 16 }
 0x1e2   : > { %v3092_v27 = vsel %vm14777_vm12, %v3087_v16, %v15563_v50  ;;  %v3161_v50 = vshll.u32 %v15588_v45, 16  ;;  %v3158_v3 = vor.u32 %v3157_v21, %v15590_v57  ;;  %v3185_v16 = vshll.u32 %v15599_v2, 16 }
 0x1e3   : > { %v11972_v49 = vcombine.low %v3106_v9, %v3116_v40  ;;  %v15625_v21 = vrot.slane %v3199_v54, 5  ;;  %v3205_v51 = vrot.slane %v3203_v47, 4  ;;  %v15629_v9 = vld [vmem:[#allocation2 + $0x8c] sm:$0x1] }
 0x1e4   : > { %v3163_v59 = vrot.slane %v3161_v50, 5  ;;  %v3159_v30 = vrot.slane %v3158_v3, 4  ;;  %v3209_v47 = vshll.u32 %v15629_v9, 16 }
 0x1e5   : > { %v3206_v54 = vor.u32 %v3205_v51, %v15625_v21  ;;  %v15653_v51 = vld [vmem:[#allocation2 + $0xa4] sm:$0x1] }
 0x1e6   : > { %13078 = vmatmul.mubr.msk.bf16.vlgmr.msra.gmra.mrb[0].mxu0 %vm1580_vm13, %v11967_v35  ;;  %v3175_v35 = vshll.u32 %v15571_v38, 16  ;;  %19391 = vst [vmem:[#allocation20_spill] sm:$0xff] %v15653_v51 }
 0x1e7   : > { %13110 = vmatpush3.bf16.msra.mxu0 %v15518_v33  ;;  %13081 = vmatprep.mubr.msk.bf16.mxu0 %vm1580_vm13, %v11968_v19  ;;  %v3137_v33 = vshll.u32 %v15576_v34, 16  ;;  %v3147_v19 = vrot.slane %v3145_v7, 5  ;;  %v3135_v7 = vrot.slane %v3134_v60, 4  ;;  %v3130_v60 = vsel %vm14777_vm12, %v3125_v29, %v15569_v31 }
 0x1e8   : > { %14069 = vmatprep.subr.msk.bf16.mxu0 %vm1629_vm0, %v15573_v20  ;;  %v15601_v39 = vrot.slane %v3175_v35, 5  ;;  %v3195_v35 = vrot.slane %v3193_v63, 5  ;;  %v3187_v63 = vrot.slane %v3185_v16, 5 }
 0x1e9   : > { %v3139_v56 = vrot.slane %v3137_v33, 5  ;;  %v3148_v44 = vor.u32 %v3147_v19, %v3144_v4  ;;  %v15623_v4 = vld [vmem:[#allocation2 + $0x94] sm:$0xf]  ;;  %v2937_v19 = vld [vmem:[#allocation2 + $0x9c] sm:$0xf] }
 0x1ea   : > { %v3182_v5 = vor.u32 %v3181_v18, %v15601_v39  ;;  %v3217_v18 = vshll.u32 %v2934_v55, 16  ;;  %v3196_v31 = vor.u32 %v3195_v35, %v3192_v1  ;;  %v3223_v40 = vshll.u32 %v15623_v4, 16  ;;  %v15649_v55 = vld [vmem:[#allocation2 + $0x98] sm:$0x1] }
 0x1eb   : > { %v3149_v33 = vrot.slane %v3148_v44, 4  ;;  %v3238_v50 = vshrl.u32 %v2937_v19, 16  ;;  %v3241_v29 = vshll.u32 %v2937_v19, 16  ;;  %v3164_v44 = vsel %vm14777_vm12, %v3159_v30, %v3163_v59  ;;  %19390 = vst [vmem:[#allocation19_spill] sm:$0xff] %v15649_v55 }
 0x1ec   : > { %v3183_v43 = vrot.slane %v3182_v5, 4  ;;  %v3219_v5 = vrot.slane %v3217_v18, 5  ;;  %v3197_v35 = vrot.slane %v3196_v31, 4 }
 0x1ee   : > { %13082 = vmatmul.mubr.msk.bf16.gmra.mrb[4].mxu0 %vm1580_vm13, %v11969_v26  ;;  %v11971_v26 = vcombine.low %v3082_v46, %v3092_v27  ;;  %v15627_v46 = vld [vmem:[#allocation2 + $0xa0] sm:$0xf]  ;;  %v3173_v27 = vrot.slane %v3172_v0, 4  ;;  %v3216_v0 = vrot.slane %v3214_v61, 4 }
 0x1ef   : > { %13085 = vmatprep.mubr.msk.bf16.mxu0 %vm1580_vm13, %v11970_v14  ;;  %v3140_v14 = vsel %vm14777_vm12, %v3135_v7, %v3139_v56  ;;  %v3227_v56 = vshrl.u32 %v15623_v4, 16  ;;  %v3154_v7 = vsel %vm14777_vm12, %v3149_v33, %v15590_v57  ;;  %v3247_v3 = vshll.u32 %v15627_v46, 16 }
 0x1f0   : > { %v3251_v16 = vshrl.u32 %v15627_v46, 16  ;;  %v3178_v1 = vsel %vm14777_vm12, %v3173_v27, %v15601_v39  ;;  %v3188_v57 = vsel %vm14777_vm12, %v3183_v43, %v3187_v63  ;;  %v3243_v33 = vrot.slane %v3241_v29, 5  ;;  %v15658_v63 = vld [vmem:[#allocation2 + $0xac] sm:$0xf]  ;;  %v15662_v29 = vld [vmem:[#allocation2 + $0xb8] sm:$0xf] }
 0x1f1   : > { %v3229_v59 = vrot.slane %v3227_v56, 4  ;;  %v11973_v30 = vcombine.low %v3130_v60, %v3140_v14  ;;  %v11974_v19 = vcombine.low %v3154_v7, %v3164_v44  ;;  %v15655_v61 = vrot.slane %v3247_v3, 5  ;;  %19392 = vst [vmem:[#allocation21_spill] sm:$0xff] %v15658_v63 }
 0x1f2   : > { %v3253_v18 = vrot.slane %v3251_v16, 4  ;;  %v3207_v39 = vrot.slane %v3206_v54, 4  ;;  %v3211_v27 = vrot.slane %v3209_v47, 5  ;;  %v3220_v10 = vor.u32 %v3219_v5, %v3216_v0 }
 0x1f3   : > { %v3233_v43 = vshll.u32 %v15649_v55, 16  ;;  %v11975_v31 = vcombine.low %v3178_v1, %v3188_v57  ;;  %v3257_v60 = vshll.u32 %v15653_v51, 16  ;;  %v3262_v14 = vshrl.u32 %v2940_v24, 16  ;;  %v15678_v55 = vld [vmem:[#allocation2 + $0xc4] sm:$0xf] }
 0x1f4   : > { %v3254_v7 = vor.u32 %v3253_v18, %v15655_v61  ;;  %v3265_v44 = vshll.u32 %v2940_v24, 16  ;;  %v3271_v3 = vshll.u32 %v15658_v63, 16  ;;  %v3275_v16 = vshrl.u32 %v15658_v63, 16 }
 0x1f5   : > { %v3202_v54 = vsel %vm14777_vm12, %v3197_v35, %v15625_v21  ;;  %v3212_v47 = vsel %vm14777_vm12, %v3207_v39, %v3211_v27  ;;  %v3221_v0 = vrot.slane %v3220_v10, 4  ;;  %v3235_v5 = vrot.slane %v3233_v43, 5  ;;  %v2946_v39 = vld [vmem:[#allocation2 + $0xc0] sm:$0xf] }
 0x1f6   : > { %13086 = vmatmul.mubr.msk.bf16.gmra.mrb[8].mxu0 %vm1580_vm13, %v11971_v26  ;;  %v15651_v26 = vrot.slane %v3223_v40, 5  ;;  %v3299_v24 = vshrl.u32 %v15662_v29, 16  ;;  %v3264_v18 = vrot.slane %v3262_v14, 4  ;;  %v3267_v63 = vrot.slane %v3265_v44, 5  ;;  %v15686_v14 = vld [vmem:[#allocation2 + $0xbc] sm:$0x1] }
 0x1f7   : > { %13089 = vmatprep.mubr.msk.bf16.mxu0 %vm1580_vm13, %v11972_v49  ;;  %v3240_v49 = vrot.slane %v3238_v50, 4  ;;  %v2943_v50 = vld [vmem:[#allocation2 + $0xb4] sm:$0xf]  ;;  %v3273_v21 = vrot.slane %v3271_v3, 5  ;;  %v3277_v35 = vrot.slane %v3275_v16, 4  ;;  %v11976_v51 = vcombine.low %v3202_v54, %v3212_v47 }
 0x1f8   : > { %v3230_v40 = vor.u32 %v3229_v59, %v15651_v26  ;;  %v3286_v1 = vshrl.u32 %v2943_v50, 16  ;;  %v3289_v57 = vshll.u32 %v2943_v50, 16  ;;  %v3295_v59 = vshll.u32 %v15662_v29, 16 }
 0x1f9   : > { %v3244_v56 = vor.u32 %v3243_v33, %v3240_v49  ;;  %v3301_v50 = vrot.slane %v3299_v24, 4  ;;  %v3268_v3 = vor.u32 %v3267_v63, %v3264_v18  ;;  %v3278_v16 = vor.u32 %v3277_v35, %v3273_v21 }
 0x1fa   : > { %v3231_v49 = vrot.slane %v3230_v40, 4  ;;  %v3288_v10 = vrot.slane %v3286_v1, 4  ;;  %v3291_v27 = vrot.slane %v3289_v57, 5  ;;  %v3297_v43 = vrot.slane %v3295_v59, 5 }
 0x1fb   : > { %v3245_v33 = vrot.slane %v3244_v56, 4  ;;  %v3226_v40 = vsel %vm14777_vm12, %v3221_v0, %v15651_v26  ;;  %v3310_v26 = vshrl.u32 %v2946_v39, 16  ;;  %v3313_v54 = vshll.u32 %v2946_v39, 16  ;;  %v15698_v39 = vld [vmem:[#allocation2 + $0xc8] sm:$0x1] }
 0x1fc   : > { %v3236_v56 = vsel %vm14777_vm12, %v3231_v49, %v3235_v5  ;;  %v3319_v47 = vshll.u32 %v15678_v55, 16  ;;  %v3323_v0 = vshrl.u32 %v15678_v55, 16  ;;  %v3292_v5 = vor.u32 %v3291_v27, %v3288_v10 }
 0x1fd   : > { %v3302_v1 = vor.u32 %v3301_v50, %v3297_v43  ;;  %v11977_v57 = vcombine.low %v3226_v40, %v3236_v56  ;;  %v3279_v24 = vrot.slane %v3278_v16, 4  ;;  %v3315_v63 = vrot.slane %v3313_v54, 5  ;;  %v822_v16 = vld [vmem:[#allocation2 + $0xcc] sm:$0x2] }
 0x1fe   : > { %13090 = vmatmul.mubr.msk.bf16.gmra.mrb[12].mxu0 %vm1580_vm13, %v11973_v30  ;;  %v3259_v30 = vrot.slane %v3257_v60, 5  ;;  %v3281_v60 = vshll.u32 %v15676_v36, 16  ;;  %v3325_v18 = vrot.slane %v3323_v0, 4  ;;  %v3329_v56 = vshll.u32 %v15698_v39, 16 }
 0x1ff   : > { %13093 = vmatprep.mubr.msk.bf16.mxu0 %vm1580_vm13, %v11974_v19  ;;  %v3255_v19 = vrot.slane %v3254_v7, 4  ;;  %v3250_v7 = vsel %vm14777_vm12, %v3245_v33, %v15655_v61  ;;  %v3269_v61 = vrot.slane %v3268_v3, 4  ;;  %v3312_v33 = vrot.slane %v3310_v26, 4  ;;  %v3627_v3 = vld [vmem:[#allocation2 + $0xc] sm:$0xe] }
 0x200   : > { %v3283_v49 = vrot.slane %v3281_v60, 5  ;;  %v11803_v26 = vrot.slane %v822_v16, 9 }
 0x201   : > { %v3260_v44 = vsel %vm14777_vm12, %v3255_v19, %v3259_v30  ;;  %v3321_v30 = vrot.slane %v3319_v47, 5  ;;  %v3303_v19 = vrot.slane %v3302_v1, 4  ;;  %v3274_v10 = vsel %vm14777_vm12, %v3269_v61, %v3273_v21  ;;  %v946_v1 = vld [vmem:[#allocation2 + $0xcc] sm:$0x1]  ;;  %v799_v61 = vld [vmem:[#allocation2 + $0xb8] sm:$0xf] }
 0x202   : > { %v11978_v59 = vcombine.low %v3250_v7, %v3260_v44  ;;  %v3284_v27 = vsel %vm14777_vm12, %v3279_v24, %v3283_v49  ;;  %v3316_v50 = vor.u32 %v3315_v63, %v3312_v33  ;;  %v3693_v44 = vrot.slane %v15452_v23, 5  ;;  %803 = vst.msk [vmem:[#allocation2 + $0xd0] sm:$0xf] %vm671_vm3, %v799_v61  ;;  %v3628_v63 = vld [vmem:[#allocation2 + $0x18] sm:$0xe] }
 0x203   : > { %v3326_v40 = vor.u32 %v3325_v18, %v3321_v30  ;;  %v11979_v21 = vcombine.low %v3274_v10, %v3284_v27  ;;  %v3700_v49 = vrot.slane %v15456_v32, 5  ;;  %v3707_v18 = vrot.slane %v15466_v25, 5 }
 0x204   : > { %v3317_v47 = vrot.slane %v3316_v50, 4  ;;  %v3710_v50 = vrot.slane %v15486_v41, 5  ;;  %v3735_v61 = vrot.slane %v15523_v37, 5 }
 0x205   : > { %v3327_v0 = vrot.slane %v3326_v40, 4  ;;  %v3702_v27 = vrot.slane %v3700_v49, 4  ;;  %v3709_v32 = vrot.slane %v3707_v18, 4 }
 0x206   : > { %13094 = vmatmul.mubr.msk.bf16.gmra.mrb[16].mxu0 %vm1580_vm13, %v11975_v31  ;;  %v3305_v31 = vshll.u32 %v15686_v14, 16  ;;  %v3322_v23 = vsel %vm14777_vm12, %v3317_v47, %v3321_v30  ;;  %v11999_v30 = vrot.slane %v3628_v63, 9  ;;  %v3717_v47 = vrot.slane %v15502_v52, 5 }
 0x207   : > { %13097 = vmatprep.mubr.msk.bf16.mxu0 %vm1580_vm13, %v11976_v51  ;;  %v3293_v51 = vrot.slane %v3292_v5, 4  ;;  %v3331_v5 = vrot.slane %v3329_v56, 5  ;;  %v3711_v41 = vsel %vm15316_vm1, %v3709_v32, %v3710_v50  ;;  %v3737_v63 = vrot.slane %v3735_v61, 4 }
 0x208   : > { %v3307_v35 = vrot.slane %v3305_v31, 5  ;;  %v11998_v31 = vrot.slane %v3627_v3, 9  ;;  %v3701_v56 = vsel %vm15316_vm1, %v11999_v30, %v3700_v49  ;;  %v3631_v3 = vld [vmem:[#allocation2 + $0x3c] sm:$0xe]  ;;  %v3635_v30 = vld [vmem:[#allocation2 + $0x6c] sm:$0xe] }
 0x209   : > { %v3298_v60 = vsel %vm14777_vm12, %v3293_v51, %v3297_v43  ;;  %v947_v43 = vsel %vm14664_vm8, %v11803_v26, %v946_v1  ;;  %v3332_v24 = vsel %vm14777_vm12, %v3327_v0, %v3331_v5  ;;  %v3629_v51 = vld [vmem:[#allocation2 + $0x24] sm:$0xe]  ;;  %v4260_v0 = vsel %vm1629_vm0, %v15573_v20, 0 }
 0x20a   : > { %v3308_v7 = vsel %vm14777_vm12, %v3303_v19, %v3307_v35  ;;  %948 = vst [vmem:[#allocation2 + $0xcc] sm:$0x1] %v947_v43  ;;  %v11981_v19 = vcombine.low %v3322_v23, %v3332_v24  ;;  %v3703_v35 = vrot.slane %v15470_v11, 5  ;;  %v12000_v40 = vrot.slane %v3629_v51, 9  ;;  %v3633_v43 = vld [vmem:[#allocation2 + $0x54] sm:$0xe] }
 0x20b   : > { %v11980_v54 = vcombine.low %v3298_v60, %v3308_v7  ;;  %v3714_v60 = vrot.slane %v15478_v42, 5  ;;  %v3630_v7 = vld [vmem:[#allocation2 + $0x30] sm:$0xe]  ;;  %v12002_v42 = vrot.slane %v3631_v3, 9  ;;  %v3724_v1 = vrot.slane %v15508_v62, 5 }
 0x20c   : > { %v3704_v25 = vsel %vm15316_vm1, %v3702_v27, %v3703_v35  ;;  %v3708_v11 = vsel %vm15316_vm1, %v12000_v40, %v3707_v18  ;;  %v12001_v26 = vrot.slane %v3630_v7, 9  ;;  %v3738_v18 = vrot.slane %v15544_v22, 5  ;;  %v3637_v3 = vld [vmem:[#allocation2 + $0x84] sm:$0xe] }
 0x20d   : > { %v12015_v16 = vcombine.low %v3701_v56, %v3704_v25  ;;  %v3749_v22 = vrot.slane %v15565_v15, 5  ;;  %v3745_v56 = vrot.slane %v15576_v34, 5  ;;  %v12006_v25 = vrot.slane %v3635_v30, 9 }
 0x20e   : > { %13098 = vmatmul.mubr.msk.bf16.gmra.mrb[20].mxu0 %vm1580_vm13, %v11977_v57  ;;  %v3695_v57 = vrot.slane %v3693_v44, 4 }
 0x20f   : > { %13101 = vmatprep.mubr.msk.bf16.mxu0 %vm1580_vm13, %v11978_v59  ;;  %v3696_v59 = vrot.slane %v15460_v12, 5  ;;  %v3694_v12 = vsel %vm15316_vm1, %v11998_v31, %v3693_v44  ;;  %v3721_v44 = vrot.slane %v15484_v17, 5  ;;  %v15746_v31 = vld [vmem:[#allocation6 + $0xe] sm:$0x3]  ;;  %v3715_v17 = vsel %vm15316_vm1, %v12001_v26, %v3714_v60 }
 0x210   : > { %v3750_v7 = vsel %vm15316_vm1, %v12006_v25, %v3749_v22  ;;  %v3798_v25 = vrot.slane %v15678_v55, 5 }
 0x211   : > { %v3697_v33 = vsel %vm15316_vm1, %v3695_v57, %v3696_v59  ;;  %v3723_v5 = vrot.slane %v3721_v44, 4  ;;  %v3728_v57 = vrot.slane %v15514_v13, 5  ;;  %v3722_v20 = vsel %vm15316_vm1, %v12002_v42, %v3721_v44  ;;  %v3632_v59 = vld [vmem:[#allocation2 + $0x48] sm:$0xe]  ;;  %v3636_v44 = vld [vmem:[#allocation2 + $0x78] sm:$0xe] }
 0x212   : > { %v12014_v10 = vcombine.low %v3694_v12, %v3697_v33  ;;  %v12003_v49 = vrot.slane %v3632_v59, 9  ;;  %v3731_v33 = vrot.slane %v15533_v58, 5  ;;  %v12004_v13 = vrot.slane %v3633_v43, 9  ;;  %v19393_v43 = vld [vmem:[#allocation19_spill] sm:$0xff] }
 0x213   : > { %v3725_v62 = vsel %vm15316_vm1, %v3723_v5, %v3724_v1  ;;  %v3730_v12 = vrot.slane %v3728_v57, 4  ;;  %v3739_v58 = vsel %vm15316_vm1, %v3737_v63, %v3738_v18  ;;  %v12007_v26 = vrot.slane %v3636_v44, 9 }
 0x214   : > { %v12018_v24 = vcombine.low %v3722_v20, %v3725_v62  ;;  %v3729_v37 = vsel %vm15316_vm1, %v12003_v49, %v3728_v57  ;;  %v3736_v35 = vsel %vm15316_vm1, %v12004_v13, %v3735_v61  ;;  %v3770_v1 = vrot.slane %v15623_v4, 5  ;;  %v3639_v57 = vld [vmem:[#allocation2 + $0x9c] sm:$0xe] }
 0x215   : > { %v3732_v51 = vsel %vm15316_vm1, %v3730_v12, %v3731_v33  ;;  %v12020_v50 = vcombine.low %v3736_v35, %v3739_v58  ;;  %v19394_v12 = vld [vmem:[#allocation20_spill] sm:$0xff]  ;;  %v19395_v13 = vld [vmem:[#allocation21_spill] sm:$0xff] }
 0x216   : > { %13102 = vmatmul.mubr.msk.bf16.gmra.mrb[24].mxu0 %vm1580_vm13, %v11979_v21  ;;  %v12016_v21 = vcombine.low %v3708_v11, %v3711_v41  ;;  %v12019_v27 = vcombine.low %v3729_v37, %v3732_v51  ;;  %v3756_v41 = vrot.slane %v15571_v38, 5  ;;  %v3766_v38 = vrot.slane %v15629_v9, 5  ;;  %v3640_v51 = vld [vmem:[#allocation2 + $0xa8] sm:$0xe]  ;;  %v3641_v35 = vld [vmem:[#allocation2 + $0xb4] sm:$0xe] }
 0x217   : > { %13105 = vmatprep.mubr.msk.bf16.mxu0 %vm1580_vm13, %v11980_v54  ;;  %v3716_v54 = vrot.slane %v3714_v60, 4  ;;  %v3751_v60 = vrot.slane %v3749_v22, 4  ;;  %v3777_v9 = vrot.slane %v15627_v46, 5  ;;  %v3772_v61 = vrot.slane %v3770_v1, 4 }
 0x218   : > { %v3757_v5 = vsel %vm15316_vm1, %v12007_v26, %v3756_v41  ;;  %v3780_v4 = vrot.slane %v19394_v12, 5  ;;  %v3784_v63 = vrot.slane %v19395_v13, 5  ;;  %v12011_v22 = vrot.slane %v3640_v51, 9  ;;  %v15866_v13 = vld [vmem:[#allocation2 + $0x28] sm:$0xf] }
 0x219   : > { %v3718_v52 = vsel %vm15316_vm1, %v3716_v54, %v3717_v47  ;;  %v3758_v54 = vrot.slane %v3756_v41, 4  ;;  %v3759_v47 = vrot.slane %v15599_v2, 5  ;;  %v3779_v49 = vrot.slane %v3777_v9, 4  ;;  %v15869_v51 = vld [vmem:[#allocation2 + $0x34] sm:$0xf] }
 0x21a   : > { %v12017_v23 = vcombine.low %v3715_v17, %v3718_v52  ;;  %v3638_v52 = vld [vmem:[#allocation2 + $0x90] sm:$0xe]  ;;  %v3786_v30 = vrot.slane %v3784_v63, 4  ;;  %v3800_v41 = vrot.slane %v3798_v25, 4 }
 0x21b   : > { %v12009_v59 = vrot.slane %v3638_v52, 9  ;;  %v3781_v37 = vsel %vm15316_vm1, %v3779_v49, %v3780_v4  ;;  %v15856_v52 = vld [vmem:[#allocation2 + $0x1c] sm:$0xf] }
 0x21d   : > { %v3771_v33 = vsel %vm15316_vm1, %v12009_v59, %v3770_v1  ;;  %v14176_v1 = vld [vmem:[#allocation2 + $0x60] sm:$0xff]   ;;  %v4513_v59 = vshll.u32 %v15856_v52, 16 }
 0x21e   : > { %13106 = vmatmul.mubr.msk.bf16.gmra.mrb[28].mxu0 %vm1580_vm13, %v11981_v19  ;;  %v3742_v19 = vrot.slane %v15538_v53, 5  ;;  %v3752_v53 = vrot.slane %v15588_v45, 5  ;;  %v3763_v45 = vrot.slane %v15603_v48, 5  ;;  %v3760_v48 = vsel %vm15316_vm1, %v3758_v54, %v3759_v47  ;;  %v14172_v47 = vld [vmem:[#allocation2 + $0x30] sm:$0xff]  }
 0x21f   : > { %13111 = vmatprep.mubr.msk.bf16.mxu0 %vm1580_vm13, %v12014_v10  ;;  %v3634_v10 = vld [vmem:[#allocation2 + $0x60] sm:$0xe]  ;;  %v12023_v20 = vcombine.low %v3757_v5, %v3760_v48  ;;  %v14174_v5 = vld [vmem:[#allocation2 + $0x48] sm:$0xff]   ;;  %v14175_v48 = vld [vmem:[#allocation2 + $0x54] sm:$0xff]  }
 0x220   : > { %v12005_v40 = vrot.slane %v3634_v10, 9  ;;  %v3744_v32 = vrot.slane %v3742_v19, 4  ;;  %v3753_v34 = vsel %vm15316_vm1, %v3751_v60, %v3752_v53  ;;  %v3765_v42 = vrot.slane %v3763_v45, 4  ;;  %v3642_v53 = vld [vmem:[#allocation2 + $0xc0] sm:$0xe] }
 0x222   : > { %v3743_v11 = vsel %vm15316_vm1, %v12005_v40, %v3742_v19  ;;  %v3746_v15 = vsel %vm15316_vm1, %v3744_v32, %v3745_v56  ;;  %v3767_v2 = vsel %vm15316_vm1, %v3765_v42, %v3766_v38  ;;  %v3791_v19 = vrot.slane %v15662_v29, 5  ;;  %v15844_v42 = vld [vmem:[#allocation6 + $0x10] sm:$0x3]  ;;  %v14173_v38 = vld [vmem:[#allocation2 + $0x3c] sm:$0xff]  }
 0x223   : > { %v3794_v32 = vrot.slane %v15686_v14, 5  ;;  %v3785_v56 = vsel %vm15316_vm1, %v12011_v22, %v3784_v63  ;;  %v14181_v63 = vld [vmem:[#allocation2 + $0x9c] sm:$0xff]   ;;  %v14182_v22 = vld [vmem:[#allocation2 + $0xa8] sm:$0xff]  }
 0x224   : > { %v3793_v40 = vrot.slane %v3791_v19, 4 }
 0x226   : > { %13112 = vmatmul.mubr.msk.bf16.vlgmr.msra.gmra.mrb[0].mxu0 %vm1580_vm13, %v12015_v16  ;;  %v12021_v16 = vcombine.low %v3743_v11, %v3746_v15  ;;  %v12013_v15 = vrot.slane %v3642_v53, 9 }
 0x227   : > { %13144 = vmatpush3.bf16.msra.mxu0 %v4260_v0  ;;  %13115 = vmatprep.mubr.msk.bf16.mxu0 %vm1580_vm13, %v12016_v21  ;;  %v12022_v21 = vcombine.low %v3750_v7, %v3753_v34  ;;  %v12008_v0 = vrot.slane %v3637_v3, 9  ;;  %v3801_v7 = vrot.slane %v15698_v39, 5  ;;  %v966_v34 = vld [vmem:[#allocation2 + $0xd0] sm:$0x8]  ;;  %v14171_v39 = vld [vmem:[#allocation2 + $0x24] sm:$0xff]  }
 0x228   : > { %14070 = vmatprep.subr.msk.bf16.mxu0 %vm1629_vm0, %v15746_v31  ;;  %v3799_v55 = vsel %vm15316_vm1, %v12013_v15, %v3798_v25  ;;  %v11821_v3 = vrot.slane %v966_v34, 11  ;;  %v4561_v25 = vshll.u32 %v15869_v51, 16 }
 0x229   : > { %v3764_v17 = vsel %vm15316_vm1, %v12008_v0, %v3763_v45  ;;  %v3802_v44 = vsel %vm15316_vm1, %v3800_v41, %v3801_v7  ;;  %v1091_v45 = vld [vmem:[#allocation2 + $0xd4] sm:$0x1]  ;;  %v4986_v0 = vsel %vm1629_vm0, %v15746_v31, 0  ;;  %v14177_v31 = vld [vmem:[#allocation2 + $0x6c] sm:$0xff]  }
 0x22a   : > { %v12024_v62 = vcombine.low %v3764_v17, %v3767_v2  ;;  %v1092_v54 = vsel %vm14713_vm9, %v11821_v3, %v1091_v45  ;;  %v14178_v17 = vld [vmem:[#allocation2 + $0x78] sm:$0xff]   ;;  %v4467_v3 = vld [vmem:[#allocation2 + $0x48] sm:$0xf] }
 0x22b   : > { %1093 = vst [vmem:[#allocation2 + $0xd4] sm:$0x1] %v1092_v54  ;;  %v4455_v2 = vld [vmem:[#allocation2 + $0x18] sm:$0xf]  ;;  %v15889_v54 = vrot.slane %v4561_v25, 5 }
 0x22c   : > { %v15887_v45 = vld [vmem:[#allocation2 + $0x38] sm:$0x1] }
 0x22e   : > { %13116 = vmatmul.mubr.msk.bf16.gmra.mrb[4].mxu0 %vm1580_vm13, %v12017_v23  ;;  %v3773_v23 = vrot.slane %v19393_v43, 5  ;;  %v4458_v43 = vld [vmem:[#allocation2 + $0x24] sm:$0xf] }
 0x22f   : > { %13119 = vmatprep.mubr.msk.bf16.mxu0 %vm1580_vm13, %v12018_v24  ;;  %v12010_v24 = vrot.slane %v3639_v57, 9  ;;  %v14180_v57 = vld [vmem:[#allocation2 + $0x90] sm:$0xff]   ;;  %v4531_v49 = vshll.u32 %v4458_v43, 16 }
 0x230   : > { %v3774_v46 = vsel %vm15316_vm1, %v3772_v61, %v3773_v23  ;;  %v4517_v61 = vshrl.u32 %v15856_v52, 16  ;;  %v15861_v23 = vld [vmem:[#allocation2 + $0x20] sm:$0x1] }
 0x231   : > { %v3778_v18 = vsel %vm15316_vm1, %v12010_v24, %v3777_v9  ;;  %v12025_v58 = vcombine.low %v3771_v33, %v3774_v46  ;;  %v14179_v9 = vld [vmem:[#allocation2 + $0x84] sm:$0xff]   ;;  %v4528_v24 = vshrl.u32 %v4458_v43, 16  ;;  %v15864_v33 = vrot.slane %v4513_v59, 5  ;;  %v4470_v43 = vld [vmem:[#allocation2 + $0x54] sm:$0xf] }
 0x232   : > { %v12026_v10 = vcombine.low %v3778_v18, %v3781_v37  ;;  %v4519_v46 = vrot.slane %v4517_v61, 4  ;;  %v4523_v18 = vshll.u32 %v15861_v23, 16  ;;  %v4461_v37 = vld [vmem:[#allocation2 + $0x30] sm:$0xf] }
 0x234   : > { %v4525_v15 = vrot.slane %v4523_v18, 5 }
 0x236   : > { %13120 = vmatmul.mubr.msk.bf16.gmra.mrb[8].mxu0 %vm1580_vm13, %v12019_v27  ;;  %v3787_v27 = vrot.slane %v15676_v36, 5  ;;  %v3795_v36 = vsel %vm15316_vm1, %v3793_v40, %v3794_v32  ;;  %v4530_v40 = vrot.slane %v4528_v24, 4  ;;  %v4533_v32 = vrot.slane %v4531_v49, 5 }
 0x237   : > { %13123 = vmatprep.mubr.msk.bf16.mxu0 %vm1580_vm13, %v12020_v50  ;;  %v12012_v50 = vrot.slane %v3641_v35, 9  ;;  %v4541_v35 = vshrl.u32 %v15866_v13, 16 }
 0x238   : > { %v3788_v29 = vsel %vm15316_vm1, %v3786_v30, %v3787_v27  ;;  %v4520_v27 = vor.u32 %v4519_v46, %v15864_v33 }
 0x239   : > { %v3792_v60 = vsel %vm15316_vm1, %v12012_v50, %v3791_v19  ;;  %v12027_v14 = vcombine.low %v3785_v56, %v3788_v29  ;;  %v4537_v19 = vshll.u32 %v15866_v13, 16  ;;  %v15876_v50 = vld [vmem:[#allocation2 + $0x2c] sm:$0x1]  ;;  %v4552_v56 = vshrl.u32 %v4461_v37, 16 }
 0x23a   : > { %v12028_v11 = vcombine.low %v3792_v60, %v3795_v36  ;;  %v4555_v29 = vshll.u32 %v4461_v37, 16  ;;  %v4565_v60 = vshrl.u32 %v15869_v51, 16  ;;  %v4543_v7 = vrot.slane %v4541_v35, 4 }
 0x23b   : > { %v15883_v41 = vrot.slane %v4537_v19, 5  ;;  %v4547_v34 = vshll.u32 %v15876_v50, 16 }
 0x23e   : > { %13124 = vmatmul.mubr.msk.bf16.gmra.mrb[12].mxu0 %vm1580_vm13, %v12021_v16  ;;  %v12029_v16 = vcombine.low %v3799_v55, %v3802_v44  ;;  %v4521_v44 = vrot.slane %v4520_v27, 4 }
 0x23f   : > { %13127 = vmatprep.mubr.msk.bf16.mxu0 %vm1580_vm13, %v12022_v21  ;;  %v14170_v21 = vld [vmem:[#allocation2 + $0x18] sm:$0xff]  }
 0x246   : > { %13128 = vmatmul.mubr.msk.bf16.gmra.mrb[16].mxu0 %vm1580_vm13, %v12023_v20  ;;  %v4504_v20 = vshrl.u32 %v4455_v2, 16 }
 0x247   : > { %13131 = vmatprep.mubr.msk.bf16.mxu0 %vm1580_vm13, %v12024_v62  ;;  %v4507_v62 = vshll.u32 %v4455_v2, 16  ;;  %v4600_v2 = vshrl.u32 %v4467_v3, 16 }
 0x248   : > { %v4506_v12 = vrot.slane %v4504_v20, 4  ;;  %v4544_v20 = vor.u32 %v4543_v7, %v15883_v41  ;;  %v15919_v7 = vld [vmem:[#allocation2 + $0x64] sm:$0xf] }
 0x249   : > { %v4509_v4 = vrot.slane %v4507_v62, 5  ;;  %v15898_v62 = vrot.slane %v4547_v34, 5  ;;  %v4602_v19 = vrot.slane %v4600_v2, 4  ;;  %v14185_v34 = vld [vmem:[#allocation2 + $0xcc] sm:$0xff]   ;;  %v4657_v2 = vshll.u32 %v15919_v7, 16 }
 0x24a   : > { %v4545_v27 = vrot.slane %v4544_v20, 4 }
 0x24b   : > { %v4510_v30 = vor.u32 %v4509_v4, %v4506_v12  ;;  %v4571_v12 = vshll.u32 %v15887_v45, 16 }
 0x24d   : > { %v4511_v55 = vrot.slane %v4510_v30, 4  ;;  %v4573_v25 = vrot.slane %v4571_v12, 5  ;;  %v15946_v12 = vld [vmem:[#allocation2 + $0x70] sm:$0xf] }
 0x24e   : > { %13132 = vmatmul.mubr.msk.bf16.gmra.mrb[20].mxu0 %vm1580_vm13, %v12025_v58  ;;  %v4464_v58 = vld [vmem:[#allocation2 + $0x3c] sm:$0xf] }
 0x24f   : > { %13135 = vmatprep.mubr.msk.bf16.mxu0 %vm1580_vm13, %v12026_v10  ;;  %v15873_v10 = vld [vmem:[#allocation2 + $0x40] sm:$0xf]  ;;  %v4576_v36 = vshrl.u32 %v4464_v58, 16  ;;  %v4579_v53 = vshll.u32 %v4464_v58, 16  ;;  %v4516_v46 = vsel %vm14777_vm12, %v4511_v55, %v15864_v33  ;;  %v4624_v58 = vshrl.u32 %v4470_v43, 16 }
 0x256   : > { %13136 = vmatmul.mubr.msk.bf16.gmra.mrb[24].mxu0 %vm1580_vm13, %v12027_v14  ;;  %v4585_v14 = vshll.u32 %v15873_v10, 16 }
 0x257   : > { %13139 = vmatprep.mubr.msk.bf16.mxu0 %vm1580_vm13, %v12028_v11  ;;  %v4589_v11 = vshrl.u32 %v15873_v10, 16 }
 0x25e   : > { %13140 = vmatmul.mubr.msk.bf16.gmra.mrb[28].mxu0 %vm1580_vm13, %v12029_v16  ;;  %v4554_v16 = vrot.slane %v4552_v56, 4 }
 0x25f   : > { %13145 = vmatprep.mubr.msk.bf16.mxu0 %vm1580_vm13, %v14170_v21  ;;  %v4557_v21 = vrot.slane %v4555_v29, 5 }
 0x261   : > { %v4558_v24 = vor.u32 %v4557_v21, %v4554_v16 }
 0x263   : > { %v4559_v56 = vrot.slane %v4558_v24, 4 }
 0x266   : > { %13146 = vmatmul.mubr.msk.bf16.vlgmr.msra.gmra.mrb[0].mxu0 %vm1580_vm13, %v14171_v39  ;;  %v4567_v39 = vrot.slane %v4565_v60, 4 }
 0x267   : > { %13178 = vmatpush3.bf16.msra.mxu0 %v4986_v0  ;;  %13149 = vmatprep.mubr.msk.bf16.mxu0 %vm1580_vm13, %v14172_v47  ;;  %v15891_v47 = vld [vmem:[#allocation2 + $0x4c] sm:$0xf]  ;;  %v15893_v0 = vld [vmem:[#allocation2 + $0x44] sm:$0x1] }
 0x268   : > { %14071 = vmatprep.subr.msk.bf16.mxu0 %vm1629_vm0, %v15844_v42  ;;  %v4609_v59 = vshll.u32 %v15891_v47, 16  ;;  %v4613_v61 = vshrl.u32 %v15891_v47, 16  ;;  %v4568_v49 = vor.u32 %v4567_v39, %v15889_v54  ;;  %v4595_v4 = vshll.u32 %v15893_v0, 16 }
 0x26a   : > { %v4615_v33 = vrot.slane %v4613_v61, 4  ;;  %v4569_v29 = vrot.slane %v4568_v49, 4  ;;  %v4597_v60 = vrot.slane %v4595_v4, 5 }
 0x26c   : > { %v4574_v20 = vsel %vm14777_vm12, %v4569_v29, %v4573_v25 }
 0x26e   : > { %13150 = vmatmul.mubr.msk.bf16.gmra.mrb[4].mxu0 %vm1580_vm13, %v14173_v38  ;;  %v4578_v38 = vrot.slane %v4576_v36, 4  ;;  %v15917_v36 = vld [vmem:[#allocation2 + $0x58] sm:$0xf] }
 0x26f   : > { %13153 = vmatprep.mubr.msk.bf16.mxu0 %vm1580_vm13, %v14174_v5  ;;  %v4581_v5 = vrot.slane %v4579_v53, 5 }
 0x271   : > { %v4582_v18 = vor.u32 %v4581_v5, %v4578_v38  ;;  %v4633_v38 = vshll.u32 %v15917_v36, 16  ;;  %v4637_v5 = vshrl.u32 %v15917_v36, 16 }
 0x273   : > { %v15949_v4 = vrot.slane %v4633_v38, 5 }
 0x276   : > { %13154 = vmatmul.mubr.msk.bf16.gmra.mrb[8].mxu0 %vm1580_vm13, %v14175_v48  ;;  %v15895_v48 = vrot.slane %v4585_v14, 5  ;;  %v4583_v14 = vrot.slane %v4582_v18, 4 }
 0x277   : > { %13157 = vmatprep.mubr.msk.bf16.mxu0 %vm1580_vm13, %v14176_v1  ;;  %v4591_v1 = vrot.slane %v4589_v11, 4 }
 0x279   : > { %v4592_v37 = vor.u32 %v4591_v1, %v15895_v48  ;;  %v15928_v1 = vld [vmem:[#allocation2 + $0x5c] sm:$0x1] }
 0x27b   : > { %v4593_v11 = vrot.slane %v4592_v37, 4  ;;  %v15952_v37 = vrot.slane %v4657_v2, 5 }
 0x27d   : > { %v4598_v61 = vsel %vm14777_vm12, %v4593_v11, %v4597_v60 }
 0x27e   : > { %13158 = vmatmul.mubr.msk.bf16.gmra.mrb[12].mxu0 %vm1580_vm13, %v14177_v31  ;;  %v14183_v31 = vld [vmem:[#allocation2 + $0xb4] sm:$0xff]  }
 0x27f   : > { %13161 = vmatprep.mubr.msk.bf16.mxu0 %vm1580_vm13, %v14178_v17  ;;  %v4534_v17 = vor.u32 %v4533_v32, %v4530_v40  ;;  %v15913_v40 = vld [vmem:[#allocation2 + $0x50] sm:$0x1]  ;;  %v15915_v32 = vrot.slane %v4609_v59, 5  ;;  %v4588_v59 = vsel %vm14777_vm12, %v4583_v14, %v15895_v48 }
 0x280   : > { %v12081_v25 = vcombine.low %v4588_v59, %v4598_v61 }
 0x281   : > { %v4535_v30 = vrot.slane %v4534_v17, 4  ;;  %v4616_v39 = vor.u32 %v4615_v33, %v15915_v32 }
 0x283   : > { %v4540_v21 = vsel %vm14777_vm12, %v4535_v30, %v15883_v41  ;;  %v4564_v41 = vsel %vm14777_vm12, %v4559_v56, %v15889_v54  ;;  %v4617_v54 = vrot.slane %v4616_v39, 4  ;;  %v4681_v30 = vshll.u32 %v15946_v12, 16 }
 0x284   : > { %v5456_v56 = vsel %vm1629_vm0, %v15844_v42, 0  ;;  %v12080_v29 = vcombine.low %v4564_v41, %v4574_v20 }
 0x285   : > { %v15974_v39 = vrot.slane %v4681_v30, 5 }
 0x286   : > { %13162 = vmatmul.mubr.msk.bf16.gmra.mrb[16].mxu0 %vm1580_vm13, %v14179_v9  ;;  %v4603_v9 = vshll.u32 %v4467_v3, 16  ;;  %v4626_v3 = vrot.slane %v4624_v58, 4 }
 0x287   : > { %13165 = vmatprep.mubr.msk.bf16.mxu0 %vm1580_vm13, %v14180_v57  ;;  %v14184_v57 = vld [vmem:[#allocation2 + $0xc0] sm:$0xff]  }
 0x288   : > { %v4605_v35 = vrot.slane %v4603_v9, 5  ;;  %v4661_v9 = vshrl.u32 %v15919_v7, 16 }
 0x28a   : > { %v4606_v55 = vor.u32 %v4605_v35, %v4602_v19  ;;  %v4663_v19 = vrot.slane %v4661_v9, 4  ;;  %v15954_v35 = vld [vmem:[#allocation2 + $0x68] sm:$0x1] }
 0x28c   : > { %v4664_v42 = vor.u32 %v4663_v19, %v15952_v37  ;;  %v15988_v19 = vld [vmem:[#allocation2 + $0x80] sm:$0x1] }
 0x28e   : > { %13166 = vmatmul.mubr.msk.bf16.gmra.mrb[20].mxu0 %vm1580_vm13, %v14181_v63  ;;  %v4526_v63 = vsel %vm14777_vm12, %v4521_v44, %v4525_v15  ;;  %v4473_v15 = vld [vmem:[#allocation2 + $0x60] sm:$0xf]  ;;  %v4619_v44 = vshll.u32 %v15913_v40, 16 }
 0x28f   : > { %13169 = vmatprep.mubr.msk.bf16.mxu0 %vm1580_vm13, %v14182_v22  ;;  %v4627_v22 = vshll.u32 %v4470_v43, 16  ;;  %v12078_v53 = vcombine.low %v4516_v46, %v4526_v63  ;;  %v4651_v17 = vshll.u32 %v4473_v15, 16  ;;  %v4607_v43 = vrot.slane %v4606_v55, 4 }
 0x290   : > { %v4621_v24 = vrot.slane %v4619_v44, 5  ;;  %v4639_v46 = vrot.slane %v4637_v5, 4  ;;  %v4643_v63 = vshll.u32 %v15928_v1, 16  ;;  %v15976_v5 = vld [vmem:[#allocation2 + $0x88] sm:$0xf] }
 0x291   : > { %v4629_v16 = vrot.slane %v4627_v22, 5  ;;  %v4653_v18 = vrot.slane %v4651_v17, 5  ;;  %v4612_v60 = vsel %vm14777_vm12, %v4607_v43, %v15915_v32 }
 0x292   : > { %v4640_v14 = vor.u32 %v4639_v46, %v15949_v4  ;;  %v15966_v11 = vrot.slane %v4643_v63, 5  ;;  %v4622_v55 = vsel %vm14777_vm12, %v4617_v54, %v4621_v24  ;;  %v4665_v54 = vrot.slane %v4664_v42, 4 }
 0x293   : > { %v4630_v49 = vor.u32 %v4629_v16, %v4626_v3  ;;  %v4667_v3 = vshll.u32 %v15954_v35, 16  ;;  %v4482_v16 = vld [vmem:[#allocation2 + $0x84] sm:$0xf]  ;;  %v12082_v41 = vcombine.low %v4612_v60, %v4622_v55 }
 0x294   : > { %v4641_v20 = vrot.slane %v4640_v14, 4  ;;  %v4720_v59 = vshrl.u32 %v4482_v16, 16  ;;  %v4723_v61 = vshll.u32 %v4482_v16, 16 }
 0x295   : > { %v4669_v24 = vrot.slane %v4667_v3, 5 }
 0x296   : > { %13170 = vmatmul.mubr.msk.bf16.gmra.mrb[24].mxu0 %vm1580_vm13, %v14183_v31  ;;  %v4648_v31 = vshrl.u32 %v4473_v15, 16  ;;  %v4479_v15 = vld [vmem:[#allocation2 + $0x78] sm:$0xf]  ;;  %v4722_v60 = vrot.slane %v4720_v59, 4  ;;  %v4725_v14 = vrot.slane %v4723_v61, 5 }
 0x297   : > { %13173 = vmatprep.mubr.msk.bf16.mxu0 %vm1580_vm13, %v14184_v57  ;;  %v4550_v57 = vsel %vm14777_vm12, %v4545_v27, %v15898_v62  ;;  %v4476_v62 = vld [vmem:[#allocation2 + $0x6c] sm:$0xf]  ;;  %v4685_v27 = vshrl.u32 %v15946_v12, 16  ;;  %v4696_v17 = vshrl.u32 %v4479_v15, 16  ;;  %v4699_v2 = vshll.u32 %v4479_v15, 16 }
 0x298   : > { %v4650_v48 = vrot.slane %v4648_v31, 4  ;;  %v4672_v58 = vshrl.u32 %v4476_v62, 16  ;;  %v4675_v22 = vshll.u32 %v4476_v62, 16  ;;  %v12079_v33 = vcombine.low %v4540_v21, %v4550_v57  ;;  %v15979_v31 = vld [vmem:[#allocation2 + $0x74] sm:$0x1] }
 0x299   : > { %v4687_v38 = vrot.slane %v4685_v27, 4  ;;  %v4733_v62 = vshrl.u32 %v15976_v5, 16 }
 0x29a   : > { %v4654_v44 = vor.u32 %v4653_v18, %v4650_v48  ;;  %v4674_v21 = vrot.slane %v4672_v58, 4  ;;  %v4677_v32 = vrot.slane %v4675_v22, 5  ;;  %v4691_v48 = vshll.u32 %v15979_v31, 16  ;;  %v4485_v18 = vld [vmem:[#allocation2 + $0x90] sm:$0xf] }
 0x29b   : > { %v4688_v63 = vor.u32 %v4687_v38, %v15974_v39  ;;  %v4698_v58 = vrot.slane %v4696_v17, 4  ;;  %v4701_v22 = vrot.slane %v4699_v2, 5  ;;  %v4735_v55 = vrot.slane %v4733_v62, 4 }
 0x29c   : > { %v4655_v43 = vrot.slane %v4654_v44, 4  ;;  %v4678_v46 = vor.u32 %v4677_v32, %v4674_v21  ;;  %v16003_v44 = vld [vmem:[#allocation2 + $0x94] sm:$0xf]  ;;  %v4744_v42 = vshrl.u32 %v4485_v18, 16  ;;  %v4747_v3 = vshll.u32 %v4485_v18, 16 }
 0x29d   : > { %v4689_v32 = vrot.slane %v4688_v63, 4  ;;  %v4702_v38 = vor.u32 %v4701_v22, %v4698_v58  ;;  %v16023_v63 = vld [vmem:[#allocation2 + $0xa0] sm:$0xf] }
 0x29e   : > { %13174 = vmatmul.mubr.msk.bf16.gmra.mrb[28].mxu0 %vm1580_vm13, %v14185_v34  ;;  %v15968_v34 = vld [vmem:[#allocation2 + $0x7c] sm:$0xf]  ;;  %v4660_v16 = vsel %vm14777_vm12, %v4655_v43, %v15952_v37  ;;  %v4679_v21 = vrot.slane %v4678_v46, 4  ;;  %v4757_v37 = vshrl.u32 %v16003_v44, 16  ;;  %v4746_v59 = vrot.slane %v4744_v42, 4 }
 0x29f   : > { %13179 = vmatprep.mubr.msk.bf16.mxu0 %vm1580_vm13, %v12078_v53  ;;  %v15963_v53 = vrot.slane %v4630_v49, 4  ;;  %v4705_v9 = vshll.u32 %v15968_v34, 16  ;;  %v4709_v57 = vshrl.u32 %v15968_v34, 16  ;;  %v4729_v49 = vshll.u32 %v15976_v5, 16  ;;  %v4488_v43 = vld [vmem:[#allocation2 + $0x9c] sm:$0xf] }
 0x2a0   : > { %v4749_v61 = vrot.slane %v4747_v3, 5  ;;  %v4684_v62 = vsel %vm14777_vm12, %v4679_v21, %v15974_v39  ;;  %v4759_v58 = vrot.slane %v4757_v37, 4  ;;  %v4768_v22 = vshrl.u32 %v4488_v43, 16 }
 0x2a1   : > { %v15990_v30 = vrot.slane %v4705_v9, 5  ;;  %v4711_v27 = vrot.slane %v4709_v57, 4  ;;  %v16001_v15 = vrot.slane %v4729_v49, 5  ;;  %v4753_v9 = vshll.u32 %v16003_v44, 16 }
 0x2a2   : > { %v4726_v57 = vor.u32 %v4725_v14, %v4722_v60  ;;  %v4750_v39 = vor.u32 %v4749_v61, %v4746_v59  ;;  %v4777_v42 = vshll.u32 %v16023_v63, 16  ;;  %v4781_v3 = vshrl.u32 %v16023_v63, 16 }
 0x2a3   : > { %v4712_v17 = vor.u32 %v4711_v27, %v15990_v30  ;;  %v16025_v18 = vrot.slane %v4753_v9, 5  ;;  %v4771_v27 = vshll.u32 %v4488_v43, 16 }
 0x2a4   : > { %v16051_v59 = vrot.slane %v4777_v42, 5  ;;  %v4783_v61 = vrot.slane %v4781_v3, 4  ;;  %v4497_v3 = vld [vmem:[#allocation2 + $0xc0] sm:$0xf] }
 0x2a5   : > { %v4713_v46 = vrot.slane %v4712_v17, 4  ;;  %v4773_v9 = vrot.slane %v4771_v27, 5 }
 0x2a6   : > { %13180 = vmatmul.mubr.msk.bf16.vlgmr.msra.gmra.mrb[0].mxu0 %vm1580_vm13, %v12079_v33  ;;  %v4636_v33 = vsel %vm14777_vm12, %v15963_v53, %v15949_v4  ;;  %v4670_v4 = vsel %vm14777_vm12, %v4665_v54, %v4669_v24  ;;  %v4693_v53 = vrot.slane %v4691_v48, 5  ;;  %v4703_v54 = vrot.slane %v4702_v38, 4  ;;  %v4491_v48 = vld [vmem:[#allocation2 + $0xa8] sm:$0xf] }
 0x2a7   : > { %13212 = vmatpush3.bf16.msra.mxu0 %v5456_v56  ;;  %13183 = vmatprep.mubr.msk.bf16.mxu0 %vm1580_vm13, %v12080_v29  ;;  %v4646_v56 = vsel %vm14777_vm12, %v4641_v20, %v15966_v11  ;;  %v15999_v29 = vld [vmem:[#allocation2 + $0x8c] sm:$0x1]  ;;  %v4715_v11 = vshll.u32 %v15988_v19, 16  ;;  %v4736_v20 = vor.u32 %v4735_v55, %v16001_v15  ;;  %v12084_v24 = vcombine.low %v4660_v16, %v4670_v4  ;;  %v16029_v55 = vld [vmem:[#allocation2 + $0x98] sm:$0x1] }
 0x2a8   : > { %v4739_v2 = vshll.u32 %v15999_v29, 16  ;;  %v4792_v16 = vshrl.u32 %v4491_v48, 16  ;;  %v4795_v4 = vshll.u32 %v4491_v48, 16  ;;  %v4760_v38 = vor.u32 %v4759_v58, %v16025_v18  ;;  %v4494_v58 = vld [vmem:[#allocation2 + $0xb4] sm:$0xf] }
 0x2a9   : > { %v4717_v49 = vrot.slane %v4715_v11, 5  ;;  %v4737_v60 = vrot.slane %v4736_v20, 4  ;;  %v4763_v17 = vshll.u32 %v16029_v55, 16  ;;  %v16049_v20 = vld [vmem:[#allocation2 + $0xa4] sm:$0x1] }
 0x2aa   : > { %v4741_v14 = vrot.slane %v4739_v2, 5  ;;  %v4770_v2 = vrot.slane %v4768_v22, 4  ;;  %v4794_v43 = vrot.slane %v4792_v16, 4  ;;  %v16062_v16 = vld [vmem:[#allocation2 + $0xc4] sm:$0xf] }
 0x2ab   : > { %v4718_v11 = vsel %vm14777_vm12, %v4713_v46, %v4717_v49  ;;  %v4765_v22 = vrot.slane %v4763_v17, 5 }
 0x2ac   : > { %v4774_v27 = vor.u32 %v4773_v9, %v4770_v2  ;;  %v4840_v9 = vshrl.u32 %v4497_v3, 16 }
 0x2ae   : > { %13184 = vmatmul.mubr.msk.bf16.gmra.mrb[4].mxu0 %vm1580_vm13, %v12081_v25  ;;  %v12083_v25 = vcombine.low %v4636_v33, %v4646_v56  ;;  %v16027_v33 = vld [vmem:[#allocation2 + $0xac] sm:$0xf]  ;;  %v4727_v56 = vrot.slane %v4726_v57, 4  ;;  %v4751_v57 = vrot.slane %v4750_v39, 4  ;;  %v4784_v39 = vor.u32 %v4783_v61, %v16051_v59 }
 0x2af   : > { %13187 = vmatprep.mubr.msk.bf16.mxu0 %vm1580_vm13, %v12082_v41  ;;  %v4694_v41 = vsel %vm14777_vm12, %v4689_v32, %v4693_v53  ;;  %v4708_v53 = vsel %vm14777_vm12, %v4703_v54, %v15990_v30  ;;  %v4801_v21 = vshll.u32 %v16027_v33, 16  ;;  %v4805_v32 = vshrl.u32 %v16027_v33, 16  ;;  %v16053_v54 = vld [vmem:[#allocation2 + $0xb0] sm:$0x1] }
 0x2b0   : > { %v4732_v37 = vsel %vm14777_vm12, %v4727_v56, %v16001_v15  ;;  %v4742_v30 = vsel %vm14777_vm12, %v4737_v60, %v4741_v14  ;;  %v12086_v49 = vcombine.low %v4708_v53, %v4718_v11  ;;  %v4761_v15 = vrot.slane %v4760_v38, 4  ;;  %v16058_v60 = vld [vmem:[#allocation2 + $0xb8] sm:$0xf] }
 0x2b1   : > { %v16055_v46 = vrot.slane %v4801_v21, 5  ;;  %v4807_v48 = vrot.slane %v4805_v32, 4  ;;  %v4787_v56 = vshll.u32 %v16049_v20, 16  ;;  %19397 = vst [vmem:[#allocation19_spill] sm:$0xff] %v16058_v60  ;;  %v12087_v14 = vcombine.low %v4732_v37, %v4742_v30 }
 0x2b2   : > { %v4819_v53 = vshll.u32 %v4494_v58, 16  ;;  %v4825_v11 = vshll.u32 %v16058_v60, 16  ;;  %v4829_v21 = vshrl.u32 %v16058_v60, 16  ;;  %v4756_v32 = vsel %vm14777_vm12, %v4751_v57, %v16025_v18  ;;  %v16078_v60 = vld [vmem:[#allocation2 + $0xd0] sm:$0xf] }
 0x2b3   : > { %v4766_v38 = vsel %vm14777_vm12, %v4761_v15, %v4765_v22  ;;  %v4775_v17 = vrot.slane %v4774_v27, 4  ;;  %v4789_v2 = vrot.slane %v4787_v56, 5  ;;  %v4843_v37 = vshll.u32 %v4497_v3, 16  ;;  %v4500_v15 = vld [vmem:[#allocation2 + $0xcc] sm:$0xf] }
 0x2b4   : > { %v4849_v30 = vshll.u32 %v16062_v16, 16  ;;  %v4853_v61 = vshrl.u32 %v16062_v16, 16  ;;  %v4821_v26 = vrot.slane %v4819_v53, 5  ;;  %v4827_v18 = vrot.slane %v4825_v11, 5 }
 0x2b5   : > { %v4831_v57 = vrot.slane %v4829_v21, 4  ;;  %v12088_v28 = vcombine.low %v4756_v32, %v4766_v38  ;;  %v4842_v22 = vrot.slane %v4840_v9, 4  ;;  %v4845_v27 = vrot.slane %v4843_v37, 5 }
 0x2b6   : > { %13188 = vmatmul.mubr.msk.bf16.gmra.mrb[8].mxu0 %vm1580_vm13, %v12083_v25  ;;  %v4797_v25 = vrot.slane %v4795_v4, 5  ;;  %v4808_v4 = vor.u32 %v4807_v48, %v16055_v46  ;;  %v4851_v56 = vrot.slane %v4849_v30, 5  ;;  %v4855_v3 = vrot.slane %v4853_v61, 4 }
 0x2b7   : > { %13191 = vmatprep.mubr.msk.bf16.mxu0 %vm1580_vm13, %v12084_v24  ;;  %v12085_v24 = vcombine.low %v4684_v62, %v4694_v41  ;;  %v4811_v62 = vshll.u32 %v16053_v54, 16  ;;  %v4816_v41 = vshrl.u32 %v4494_v58, 16  ;;  %v16076_v58 = vld [vmem:[#allocation2 + $0xbc] sm:$0x1]  ;;  %v4832_v21 = vor.u32 %v4831_v57, %v4827_v18 }
 0x2b8   : > { %v4798_v42 = vor.u32 %v4797_v25, %v4794_v43  ;;  %v4785_v43 = vrot.slane %v4784_v39, 4  ;;  %v4780_v39 = vsel %vm14777_vm12, %v4775_v17, %v16051_v59  ;;  %v4864_v59 = vshrl.u32 %v4500_v15, 16 }
 0x2b9   : > { %v4818_v48 = vrot.slane %v4816_v41, 4  ;;  %v16086_v41 = vld [vmem:[#allocation2 + $0xc8] sm:$0x1]  ;;  %v4867_v32 = vshll.u32 %v4500_v15, 16  ;;  %v4873_v38 = vshll.u32 %v16078_v60, 16  ;;  %v4877_v17 = vshrl.u32 %v16078_v60, 16 }
 0x2ba   : > { %v4799_v25 = vrot.slane %v4798_v42, 4  ;;  %v4790_v42 = vsel %vm14777_vm12, %v4785_v43, %v4789_v2  ;;  %v4846_v2 = vor.u32 %v4845_v27, %v4842_v22  ;;  %v4856_v9 = vor.u32 %v4855_v3, %v4851_v56  ;;  %v16098_v15 = vld [vmem:[#allocation2 + $0xd4] sm:$0x1] }
 0x2bb   : > { %v4822_v11 = vor.u32 %v4821_v26, %v4818_v48  ;;  %v12089_v37 = vcombine.low %v4780_v39, %v4790_v42  ;;  %v4833_v61 = vrot.slane %v4832_v21, 4  ;;  %v4869_v26 = vrot.slane %v4867_v32, 5 }
 0x2bc   : > { %v4879_v48 = vrot.slane %v4877_v17, 4  ;;  %v4883_v42 = vshll.u32 %v16098_v15, 16 }
 0x2be   : > { %13192 = vmatmul.mubr.msk.bf16.gmra.mrb[12].mxu0 %vm1580_vm13, %v12085_v24  ;;  %v4813_v24 = vrot.slane %v4811_v62, 5  ;;  %v4835_v62 = vshll.u32 %v16076_v58, 16 }
 0x2bf   : > { %13195 = vmatprep.mubr.msk.bf16.mxu0 %vm1580_vm13, %v12086_v49  ;;  %v4809_v49 = vrot.slane %v4808_v4, 4  ;;  %v4804_v4 = vsel %vm14777_vm12, %v4799_v25, %v16055_v46  ;;  %v4823_v46 = vrot.slane %v4822_v11, 4  ;;  %v4866_v25 = vrot.slane %v4864_v59, 4  ;;  %v5181_v11 = vld [vmem:[#allocation2 + $0x18] sm:$0xe] }
 0x2c0   : > { %v4837_v43 = vrot.slane %v4835_v62, 5  ;;  %v12110_v17 = vrot.slane %v5181_v11, 9  ;;  %v5271_v11 = vrot.slane %v15893_v0, 5 }
 0x2c1   : > { %v4814_v53 = vsel %vm14777_vm12, %v4809_v49, %v4813_v24  ;;  %v4875_v24 = vrot.slane %v4873_v38, 5  ;;  %v4857_v49 = vrot.slane %v4856_v9, 4  ;;  %v4828_v22 = vsel %vm14777_vm12, %v4823_v46, %v4827_v18  ;;  %v5182_v46 = vld [vmem:[#allocation2 + $0x24] sm:$0xe] }
 0x2c2   : > { %v12090_v30 = vcombine.low %v4804_v4, %v4814_v53  ;;  %v4838_v27 = vsel %vm14777_vm12, %v4833_v61, %v4837_v43  ;;  %v4870_v3 = vor.u32 %v4869_v26, %v4866_v25  ;;  %v5247_v53 = vrot.slane %v15856_v52, 5  ;;  %v5183_v61 = vld [vmem:[#allocation2 + $0x30] sm:$0xe] }
 0x2c3   : > { %v4880_v39 = vor.u32 %v4879_v48, %v4875_v24  ;;  %v12091_v21 = vcombine.low %v4828_v22, %v4838_v27  ;;  %v4885_v38 = vrot.slane %v4883_v42, 5  ;;  %v5250_v9 = vrot.slane %v15861_v23, 5 }
 0x2c4   : > { %v4871_v59 = vrot.slane %v4870_v3, 4  ;;  %v5261_v23 = vrot.slane %v15869_v51, 5  ;;  %v12111_v26 = vrot.slane %v5182_v46, 9  ;;  %v5268_v22 = vrot.slane %v15873_v10, 5  ;;  %v5184_v3 = vld [vmem:[#allocation2 + $0x3c] sm:$0xe] }
 0x2c5   : > { %v4881_v32 = vrot.slane %v4880_v39, 4  ;;  %v5185_v39 = vld [vmem:[#allocation2 + $0x48] sm:$0xe]  ;;  %v5278_v10 = vrot.slane %v15913_v40, 5  ;;  %v5289_v40 = vrot.slane %v15919_v7, 5 }
 0x2c6   : > { %13196 = vmatmul.mubr.msk.bf16.gmra.mrb[16].mxu0 %vm1580_vm13, %v12087_v14  ;;  %v4859_v14 = vshll.u32 %v16086_v41, 16 }
 0x2c7   : > { %13199 = vmatprep.mubr.msk.bf16.mxu0 %vm1580_vm13, %v12088_v28  ;;  %v4847_v28 = vrot.slane %v4846_v2, 4  ;;  %v5249_v2 = vrot.slane %v5247_v53, 4  ;;  %v4886_v52 = vsel %vm14777_vm12, %v4881_v32, %v4885_v38  ;;  %v5282_v32 = vrot.slane %v15917_v36, 5 }
 0x2c8   : > { %v4861_v57 = vrot.slane %v4859_v14, 5  ;;  %v5254_v14 = vrot.slane %v15866_v13, 5  ;;  %v5264_v13 = vrot.slane %v15887_v45, 5  ;;  %v5275_v45 = vrot.slane %v15891_v47, 5 }
 0x2c9   : > { %v4852_v62 = vsel %vm14777_vm12, %v4847_v28, %v4851_v56  ;;  %v4876_v56 = vsel %vm14777_vm12, %v4871_v59, %v4875_v24  ;;  %v5257_v24 = vrot.slane %v15876_v50, 5  ;;  %v12112_v28 = vrot.slane %v5183_v61, 9 }
 0x2ca   : > { %v4862_v4 = vsel %vm14777_vm12, %v4857_v49, %v4861_v57  ;;  %v12093_v43 = vcombine.low %v4876_v56, %v4886_v52  ;;  %v5256_v48 = vrot.slane %v5254_v14, 4  ;;  %v5263_v49 = vrot.slane %v5261_v23, 4 }
 0x2cb   : > { %v12092_v18 = vcombine.low %v4852_v62, %v4862_v4  ;;  %v5255_v57 = vsel %vm15316_vm1, %v12111_v26, %v5254_v14  ;;  %v5262_v27 = vsel %vm15316_vm1, %v12112_v28, %v5261_v23  ;;  %v12113_v4 = vrot.slane %v5184_v3, 9  ;;  %v5189_v26 = vld [vmem:[#allocation2 + $0x78] sm:$0xe]  ;;  %v5190_v3 = vld [vmem:[#allocation2 + $0x84] sm:$0xe] }
 0x2cc   : > { %v5258_v51 = vsel %vm15316_vm1, %v5256_v48, %v5257_v24  ;;  %v5265_v50 = vsel %vm15316_vm1, %v5263_v49, %v5264_v13  ;;  %v5284_v14 = vrot.slane %v5282_v32, 4  ;;  %v5291_v46 = vrot.slane %v5289_v40, 4 }
 0x2cd   : > { %v12127_v42 = vcombine.low %v5255_v57, %v5258_v51  ;;  %v12128_v62 = vcombine.low %v5262_v27, %v5265_v50  ;;  %v5269_v59 = vsel %vm15316_vm1, %v12113_v4, %v5268_v22  ;;  %v5292_v36 = vrot.slane %v15954_v35, 5 }
 0x2ce   : > { %13200 = vmatmul.mubr.msk.bf16.gmra.mrb[20].mxu0 %vm1580_vm13, %v12089_v37  ;;  %v5248_v37 = vsel %vm15316_vm1, %v12110_v17, %v5247_v53  ;;  %v5270_v53 = vrot.slane %v5268_v22, 4  ;;  %v5186_v17 = vld [vmem:[#allocation2 + $0x54] sm:$0xe]  ;;  %v5296_v61 = vrot.slane %v15946_v12, 5  ;;  %v5303_v35 = vrot.slane %v15968_v34, 5 }
 0x2cf   : > { %13203 = vmatprep.mubr.msk.bf16.mxu0 %vm1580_vm13, %v12090_v30  ;;  %v5251_v30 = vsel %vm15316_vm1, %v5249_v2, %v5250_v9  ;;  %v5187_v2 = vld [vmem:[#allocation2 + $0x60] sm:$0xe]  ;;  %v12115_v52 = vrot.slane %v5186_v17, 9  ;;  %v5299_v13 = vrot.slane %v15979_v31, 5  ;;  %v12118_v57 = vrot.slane %v5189_v26, 9 }
 0x2d0   : > { %v12126_v25 = vcombine.low %v5248_v37, %v5251_v30  ;;  %v5272_v47 = vsel %vm15316_vm1, %v5270_v53, %v5271_v11  ;;  %v5285_v37 = vrot.slane %v15928_v1, 5  ;;  %v12116_v30 = vrot.slane %v5187_v2, 9 }
 0x2d1   : > { %v12129_v9 = vcombine.low %v5269_v59, %v5272_v47  ;;  %v5283_v23 = vsel %vm15316_vm1, %v12115_v52, %v5282_v32  ;;  %v5293_v1 = vsel %vm15316_vm1, %v5291_v46, %v5292_v36  ;;  %v5298_v49 = vrot.slane %v5296_v61, 4  ;;  %v5192_v47 = vld [vmem:[#allocation2 + $0x9c] sm:$0xe]  ;;  %v5193_v32 = vld [vmem:[#allocation2 + $0xa8] sm:$0xe] }
 0x2d2   : > { %v5286_v7 = vsel %vm15316_vm1, %v5284_v14, %v5285_v37  ;;  %v5305_v51 = vrot.slane %v5303_v35, 4  ;;  %v5306_v12 = vrot.slane %v15988_v19, 5  ;;  %v5310_v27 = vrot.slane %v15976_v5, 5  ;;  %v19398_v14 = vld [vmem:[#allocation19_spill] sm:$0xff]  ;;  %v5194_v46 = vld [vmem:[#allocation2 + $0xb4] sm:$0xe] }
 0x2d3   : > { %v12131_v48 = vcombine.low %v5283_v23, %v5286_v7  ;;  %v5300_v34 = vsel %vm15316_vm1, %v5298_v49, %v5299_v13  ;;  %v5304_v50 = vsel %vm15316_vm1, %v12118_v57, %v5303_v35  ;;  %v5317_v19 = vrot.slane %v16003_v44, 5  ;;  %v5195_v36 = vld [vmem:[#allocation2 + $0xc0] sm:$0xe]  ;;  %v5196_v49 = vld [vmem:[#allocation2 + $0xcc] sm:$0xe] }
 0x2d4   : > { %v5307_v31 = vsel %vm15316_vm1, %v5305_v51, %v5306_v12  ;;  %v5312_v4 = vrot.slane %v5310_v27, 4  ;;  %v5313_v53 = vrot.slane %v15999_v29, 5  ;;  %v5320_v5 = vrot.slane %v16029_v55, 5 }
 0x2d5   : > { %v5331_v55 = vrot.slane %v16027_v33, 5  ;;  %v12121_v17 = vrot.slane %v5192_v47, 9  ;;  %v5327_v2 = vrot.slane %v16049_v20, 5  ;;  %v5338_v37 = vrot.slane %v19398_v14, 5 }
 0x2d6   : > { %13204 = vmatmul.mubr.msk.bf16.gmra.mrb[24].mxu0 %vm1580_vm13, %v12091_v21  ;;  %v12114_v21 = vrot.slane %v5185_v39, 9  ;;  %v5314_v44 = vsel %vm15316_vm1, %v5312_v4, %v5313_v53  ;;  %v5348_v26 = vrot.slane %v16086_v41, 5  ;;  %v12125_v57 = vrot.slane %v5196_v49, 9 }
 0x2d7   : > { %13207 = vmatprep.mubr.msk.bf16.mxu0 %vm1580_vm13, %v12092_v18  ;;  %v5277_v18 = vrot.slane %v5275_v45, 4  ;;  %v5355_v12 = vrot.slane %v16098_v15, 5 }
 0x2d8   : > { %v5276_v38 = vsel %vm15316_vm1, %v12114_v21, %v5275_v45  ;;  %v5191_v45 = vld [vmem:[#allocation2 + $0x90] sm:$0xe]  ;;  %v5319_v21 = vrot.slane %v5317_v19, 4 }
 0x2d9   : > { %v5279_v0 = vsel %vm15316_vm1, %v5277_v18, %v5278_v10  ;;  %v12120_v11 = vrot.slane %v5191_v45, 9  ;;  %v5324_v10 = vrot.slane %v16023_v63, 5  ;;  %v5334_v63 = vrot.slane %v16053_v54, 5 }
 0x2da   : > { %v12130_v56 = vcombine.low %v5276_v38, %v5279_v0  ;;  %v5321_v29 = vsel %vm15316_vm1, %v5319_v21, %v5320_v5  ;;  %v5345_v54 = vrot.slane %v16062_v16, 5 }
 0x2db   : > { %v5318_v59 = vsel %vm15316_vm1, %v12120_v11, %v5317_v19  ;;  %v5325_v52 = vsel %vm15316_vm1, %v12121_v17, %v5324_v10 }
 0x2dc   : > { %v12136_v0 = vcombine.low %v5318_v59, %v5321_v29  ;;  %v5347_v35 = vrot.slane %v5345_v54, 4 }
 0x2de   : > { %13208 = vmatmul.mubr.msk.bf16.gmra.mrb[28].mxu0 %vm1580_vm13, %v12093_v43  ;;  %v5290_v43 = vsel %vm15316_vm1, %v12116_v30, %v5289_v40  ;;  %v5326_v40 = vrot.slane %v5324_v10, 4 }
 0x2df   : > { %13213 = vmatprep.mubr.msk.bf16.mxu0 %vm1580_vm13, %v12126_v25  ;;  %v5188_v25 = vld [vmem:[#allocation2 + $0x6c] sm:$0xe]  ;;  %v12132_v24 = vcombine.low %v5290_v43, %v5293_v1  ;;  %v5340_v43 = vrot.slane %v5338_v37, 4  ;;  %v5341_v1 = vrot.slane %v16076_v58, 5  ;;  %v5349_v58 = vsel %vm15316_vm1, %v5347_v35, %v5348_v26 }
 0x2e0   : > { %v12117_v28 = vrot.slane %v5188_v25, 9  ;;  %v5328_v33 = vsel %vm15316_vm1, %v5326_v40, %v5327_v2  ;;  %v12124_v25 = vrot.slane %v5195_v36, 9 }
 0x2e1   : > { %v12137_v23 = vcombine.low %v5325_v52, %v5328_v33  ;;  %v5342_v16 = vsel %vm15316_vm1, %v5340_v43, %v5341_v1 }
 0x2e2   : > { %v5297_v22 = vsel %vm15316_vm1, %v12117_v28, %v5296_v61  ;;  %v12123_v61 = vrot.slane %v5194_v46, 9  ;;  %v5346_v28 = vsel %vm15316_vm1, %v12124_v25, %v5345_v54 }
 0x2e3   : > { %v12133_v39 = vcombine.low %v5297_v22, %v5300_v34  ;;  %v12140_v13 = vcombine.low %v5346_v28, %v5349_v58 }
 0x2e6   : > { %13214 = vmatmul.mubr.msk.bf16.vlgmr.msra.gmra.mrb[0].mxu0 %vm1580_vm13, %v12127_v42  ;;  %v12134_v42 = vcombine.low %v5304_v50, %v5307_v31 }
 0x2e7   : > { %13217 = vmatprep.mubr.msk.bf16.mxu0 %vm1580_vm13, %v12128_v62  ;;  %v12119_v62 = vrot.slane %v5190_v3, 9 }
 0x2e9   : > { %v5311_v18 = vsel %vm15316_vm1, %v12119_v62, %v5310_v27 }
 0x2ea   : > { %v12135_v38 = vcombine.low %v5311_v18, %v5314_v44 }
 0x2ee   : > { %13218 = vmatmul.mubr.msk.bf16.gmra.mrb[4].mxu0 %vm1580_vm13, %v12129_v9  ;;  %v12122_v9 = vrot.slane %v5193_v32, 9 }
 0x2ef   : > { %13221 = vmatprep.mubr.msk.bf16.mxu0 %vm1580_vm13, %v12130_v56  ;;  %v5333_v56 = vrot.slane %v5331_v55, 4 }
 0x2f0   : > { %v5332_v30 = vsel %vm15316_vm1, %v12122_v9, %v5331_v55 }
 0x2f1   : > { %v5335_v20 = vsel %vm15316_vm1, %v5333_v56, %v5334_v63 }
 0x2f2   : > { %v12138_v7 = vcombine.low %v5332_v30, %v5335_v20 }
 0x2f6   : > { %13222 = vmatmul.mubr.msk.bf16.gmra.mrb[8].mxu0 %vm1580_vm13, %v12131_v48  ;;  %v5339_v48 = vsel %vm15316_vm1, %v12123_v61, %v5338_v37 }
 0x2f7   : > { %13225 = vmatprep.mubr.msk.bf16.mxu0 %vm1580_vm13, %v12132_v24  ;;  %v5352_v24 = vrot.slane %v16078_v60, 5  ;;  %v12139_v41 = vcombine.low %v5339_v48, %v5342_v16 }
 0x2f9   : > { %v5354_v51 = vrot.slane %v5352_v24, 4  ;;  %v5353_v60 = vsel %vm15316_vm1, %v12125_v57, %v5352_v24 }
 0x2fb   : > { %v5356_v22 = vsel %vm15316_vm1, %v5354_v51, %v5355_v12 }
 0x2fc   : > { %v12141_v34 = vcombine.low %v5353_v60, %v5356_v22 }
 0x2fe   : > { %13226 = vmatmul.mubr.msk.bf16.gmra.mrb[12].mxu0 %vm1580_vm13, %v12133_v39 }
 0x2ff   : > { %13229 = vmatprep.mubr.msk.bf16.mxu0 %vm1580_vm13, %v12134_v42 }
 0x306   : > { %13230 = vmatmul.mubr.msk.bf16.gmra.mrb[16].mxu0 %vm1580_vm13, %v12135_v38 }
 0x307   : > { %13233 = vmatprep.mubr.msk.bf16.mxu0 %vm1580_vm13, %v12136_v0 }
 0x30e   : > { %13234 = vmatmul.mubr.msk.bf16.gmra.mrb[20].mxu0 %vm1580_vm13, %v12137_v23 }
 0x30f   : > { %13237 = vmatprep.mubr.msk.bf16.mxu0 %vm1580_vm13, %v12138_v7 }
 0x316   : > { %13238 = vmatmul.mubr.msk.bf16.gmra.mrb[24].mxu0 %vm1580_vm13, %v12139_v41 }
 0x317   : > { %13241 = vmatprep.mubr.msk.bf16.mxu0 %vm1580_vm13, %v12140_v13 }
 0x31e   : > { %13242 = vmatmul.mubr.msk.bf16.gmra.mrb[28].mxu0 %vm1580_vm13, %v12141_v34 }
 0x3b9   : > { %v16230_v27 = vpop.f32.mrb[0].mxu0 }
 0x3ba   : > { %v16232_v50 = vpop.f32.mrb[1].mxu0  ;;  %v5722_v19 = vmul.f32 %v16230_v27, %v16230_v27  ;;  %v5654_v4 = vsel %vm1580_vm13, %v16230_v27, 0.0 }
 0x3bb   : > { %v5720_v15 = vmul.f32 %v16232_v50, %v16232_v50  ;;  %v16236_v31 = vpop.f32.mrb[2].mxu0  ;;  %v5651_v45 = vsel %vm1580_vm13, %v16232_v50, 0.0 }
 0x3bc   : > { %v16238_v3 = vpop.f32.mrb[3].mxu0  ;;  %v5723_v11 = vmul.f32 %v16236_v31, %v16236_v31  ;;  %v5755_v44 = vsel %vm1580_vm13, %v5722_v19, 0.0  ;;  %v5656_v10 = vsel %vm1580_vm13, %v16236_v31, 0.0 }
 0x3bd   : > { %v5652_v39 = vsel %vm1580_vm13, %v16238_v3, 0.0  ;;  %v5721_v42 = vmul.f32 %v16238_v3, %v16238_v3  ;;  %v5752_v53 = vsel %vm1580_vm13, %v5720_v15, 0.0 }
 0x3be   : > { %v5653_v62 = vadd.f32 %v5652_v39, %v5651_v45  ;;  %v5757_v32 = vsel %vm1580_vm13, %v5723_v11, 0.0 }
 0x3bf   : > { %v5753_v21 = vsel %vm1580_vm13, %v5721_v42, 0.0 }
 0x3c0   : > { %v5655_v5 = vadd.f32 %v5654_v4, %v5653_v62  ;;  %v5754_v18 = vadd.f32 %v5753_v21, %v5752_v53 }
 0x3c1   : > { %v16257_v59 = vpop.f32.mrb[4].mxu0 }
 0x3c2   : > { %v5756_v29 = vadd.f32 %v5755_v44, %v5754_v18  ;;  %v16259_v47 = vpop.f32.mrb[5].mxu0  ;;  %v5657_v55 = vadd.f32 %v5656_v10, %v5655_v5  ;;  %v5726_v56 = vmul.f32 %v16257_v59, %v16257_v59  ;;  %v5662_v30 = vsel %vm1580_vm13, %v16257_v59, 0.0 }
 0x3c3   : > { %v5658_v38 = vsel %vm1580_vm13, %v16259_v47, 0.0  ;;  %v5724_v0 = vmul.f32 %v16259_v47, %v16259_v47  ;;  %v16266_v17 = vpop.f32.mrb[6].mxu0 }
 0x3c4   : > { %v5659_v40 = vadd.f32 %v5658_v38, %v5657_v55  ;;  %v5758_v2 = vadd.f32 %v5757_v32, %v5756_v29  ;;  %v16268_v9 = vpop.f32.mrb[7].mxu0  ;;  %v5727_v20 = vmul.f32 %v16266_v17, %v16266_v17  ;;  %v5763_v23 = vsel %vm1580_vm13, %v5726_v56, 0.0 }
 0x3c5   : > { %v5759_v63 = vsel %vm1580_vm13, %v5724_v0, 0.0  ;;  %v5660_v52 = vsel %vm1580_vm13, %v16268_v9, 0.0  ;;  %v5725_v33 = vmul.f32 %v16268_v9, %v16268_v9  ;;  %v5664_v7 = vsel %vm1580_vm13, %v16266_v17, 0.0 }
 0x3c6   : > { %v5760_v14 = vadd.f32 %v5759_v63, %v5758_v2  ;;  %v5661_v37 = vadd.f32 %v5660_v52, %v5659_v40  ;;  %v5765_v35 = vsel %vm1580_vm13, %v5727_v20, 0.0 }
 0x3c7   : > { %v5761_v46 = vsel %vm1580_vm13, %v5725_v33, 0.0 }
 0x3c8   : > { %v5663_v54 = vadd.f32 %v5662_v30, %v5661_v37  ;;  %v5762_v36 = vadd.f32 %v5761_v46, %v5760_v14 }
 0x3c9   : > { %v16285_v61 = vpop.f32.mrb[8].mxu0 }
 0x3ca   : > { %v5764_v43 = vadd.f32 %v5763_v23, %v5762_v36  ;;  %v16287_v1 = vpop.f32.mrb[9].mxu0  ;;  %v5665_v25 = vadd.f32 %v5664_v7, %v5663_v54  ;;  %v5730_v49 = vmul.f32 %v16285_v61, %v16285_v61  ;;  %v5670_v60 = vsel %vm1580_vm13, %v16285_v61, 0.0 }
 0x3cb   : > { %v5666_v26 = vsel %vm1580_vm13, %v16287_v1, 0.0  ;;  %v5728_v48 = vmul.f32 %v16287_v1, %v16287_v1  ;;  %v16294_v16 = vpop.f32.mrb[10].mxu0 }
 0x3cc   : > { %v5667_v24 = vadd.f32 %v5666_v26, %v5665_v25  ;;  %v5766_v28 = vadd.f32 %v5765_v35, %v5764_v43  ;;  %v16296_v58 = vpop.f32.mrb[11].mxu0  ;;  %v5731_v22 = vmul.f32 %v16294_v16, %v16294_v16  ;;  %v5771_v45 = vsel %vm1580_vm13, %v5730_v49, 0.0 }
 0x3cd   : > { %v5767_v41 = vsel %vm1580_vm13, %v5728_v48, 0.0  ;;  %v5668_v13 = vsel %vm1580_vm13, %v16296_v58, 0.0  ;;  %v5729_v57 = vmul.f32 %v16296_v58, %v16296_v58  ;;  %v5672_v39 = vsel %vm1580_vm13, %v16294_v16, 0.0 }
 0x3ce   : > { %v5768_v51 = vadd.f32 %v5767_v41, %v5766_v28  ;;  %v5669_v12 = vadd.f32 %v5668_v13, %v5667_v24  ;;  %v5773_v11 = vsel %vm1580_vm13, %v5731_v22, 0.0 }
 0x3cf   : > { %v5769_v34 = vsel %vm1580_vm13, %v5729_v57, 0.0 }
 0x3d0   : > { %v5671_v15 = vadd.f32 %v5670_v60, %v5669_v12  ;;  %v5770_v19 = vadd.f32 %v5769_v34, %v5768_v51 }
 0x3d1   : > { %v16313_v42 = vpop.f32.mrb[12].mxu0 }
 0x3d2   : > { %v5772_v62 = vadd.f32 %v5771_v45, %v5770_v19  ;;  %v16315_v4 = vpop.f32.mrb[13].mxu0  ;;  %v5673_v53 = vadd.f32 %v5672_v39, %v5671_v15  ;;  %v5734_v55 = vmul.f32 %v16313_v42, %v16313_v42  ;;  %v5678_v56 = vsel %vm1580_vm13, %v16313_v42, 0.0 }
 0x3d3   : > { %v5674_v21 = vsel %vm1580_vm13, %v16315_v4, 0.0  ;;  %v5732_v5 = vmul.f32 %v16315_v4, %v16315_v4  ;;  %v16322_v18 = vpop.f32.mrb[14].mxu0 }
 0x3d4   : > { %v5675_v44 = vadd.f32 %v5674_v21, %v5673_v53  ;;  %v5774_v10 = vadd.f32 %v5773_v11, %v5772_v62  ;;  %v16324_v29 = vpop.f32.mrb[15].mxu0  ;;  %v5735_v63 = vmul.f32 %v16322_v18, %v16322_v18  ;;  %v5779_v37 = vsel %vm1580_vm13, %v5734_v55, 0.0 }
 0x3d5   : > { %v5775_v32 = vsel %vm1580_vm13, %v5732_v5, 0.0  ;;  %v5676_v38 = vsel %vm1580_vm13, %v16324_v29, 0.0  ;;  %v5733_v0 = vmul.f32 %v16324_v29, %v16324_v29  ;;  %v5680_v30 = vsel %vm1580_vm13, %v16322_v18, 0.0 }
 0x3d6   : > { %v5776_v40 = vadd.f32 %v5775_v32, %v5774_v10  ;;  %v5677_v2 = vadd.f32 %v5676_v38, %v5675_v44  ;;  %v5781_v23 = vsel %vm1580_vm13, %v5735_v63, 0.0 }
 0x3d7   : > { %v5777_v52 = vsel %vm1580_vm13, %v5733_v0, 0.0 }
 0x3d8   : > { %v5679_v33 = vadd.f32 %v5678_v56, %v5677_v2  ;;  %v5778_v14 = vadd.f32 %v5777_v52, %v5776_v40 }
 0x3d9   : > { %v16341_v20 = vpop.f32.mrb[16].mxu0 }
 0x3da   : > { %v5780_v46 = vadd.f32 %v5779_v37, %v5778_v14  ;;  %v16343_v54 = vpop.f32.mrb[17].mxu0  ;;  %v5681_v36 = vadd.f32 %v5680_v30, %v5679_v33  ;;  %v5738_v24 = vmul.f32 %v16341_v20, %v16341_v20  ;;  %v5686_v51 = vsel %vm1580_vm13, %v16341_v20, 0.0 }
 0x3db   : > { %v5682_v7 = vsel %vm1580_vm13, %v16343_v54, 0.0  ;;  %v5736_v43 = vmul.f32 %v16343_v54, %v16343_v54  ;;  %v16350_v25 = vpop.f32.mrb[18].mxu0 }
 0x3dc   : > { %v5683_v35 = vadd.f32 %v5682_v7, %v5681_v36  ;;  %v5782_v26 = vadd.f32 %v5781_v23, %v5780_v46  ;;  %v16352_v48 = vpop.f32.mrb[19].mxu0  ;;  %v5739_v12 = vmul.f32 %v16350_v25, %v16350_v25  ;;  %v5787_v15 = vsel %vm1580_vm13, %v5738_v24, 0.0 }
 0x3dd   : > { %v5783_v28 = vsel %vm1580_vm13, %v5736_v43, 0.0  ;;  %v5684_v49 = vsel %vm1580_vm13, %v16352_v48, 0.0  ;;  %v5737_v41 = vmul.f32 %v16352_v48, %v16352_v48  ;;  %v5688_v19 = vsel %vm1580_vm13, %v16350_v25, 0.0 }
 0x3de   : > { %v5784_v13 = vadd.f32 %v5783_v28, %v5782_v26  ;;  %v5685_v57 = vadd.f32 %v5684_v49, %v5683_v35  ;;  %v5789_v11 = vsel %vm1580_vm13, %v5739_v12, 0.0 }
 0x3df   : > { %v5785_v60 = vsel %vm1580_vm13, %v5737_v41, 0.0 }
 0x3e0   : > { %v5687_v22 = vadd.f32 %v5686_v51, %v5685_v57  ;;  %v5786_v34 = vadd.f32 %v5785_v60, %v5784_v13 }
 0x3e1   : > { %v16369_v45 = vpop.f32.mrb[20].mxu0 }
 0x3e2   : > { %v5788_v39 = vadd.f32 %v5787_v15, %v5786_v34  ;;  %v16371_v62 = vpop.f32.mrb[21].mxu0  ;;  %v5689_v53 = vadd.f32 %v5688_v19, %v5687_v22  ;;  %v5742_v38 = vmul.f32 %v16369_v45, %v16369_v45  ;;  %v5694_v52 = vsel %vm1580_vm13, %v16369_v45, 0.0 }
 0x3e3   : > { %v5690_v21 = vsel %vm1580_vm13, %v16371_v62, 0.0  ;;  %v5740_v5 = vmul.f32 %v16371_v62, %v16371_v62  ;;  %v16378_v44 = vpop.f32.mrb[22].mxu0 }
 0x3e4   : > { %v5691_v10 = vadd.f32 %v5690_v21, %v5689_v53  ;;  %v5790_v55 = vadd.f32 %v5789_v11, %v5788_v39  ;;  %v16380_v32 = vpop.f32.mrb[23].mxu0  ;;  %v5743_v33 = vmul.f32 %v16378_v44, %v16378_v44  ;;  %v5795_v46 = vsel %vm1580_vm13, %v5742_v38, 0.0  ;;  %v7184_v38 = vld [vmem:[#allocation8 + $0x2] sm:$0x3] }
 0x3e5   : > { %v5791_v0 = vsel %vm1580_vm13, %v5740_v5, 0.0  ;;  %v5692_v40 = vsel %vm1580_vm13, %v16380_v32, 0.0  ;;  %v5741_v2 = vmul.f32 %v16380_v32, %v16380_v32  ;;  %v5696_v36 = vsel %vm1580_vm13, %v16378_v44, 0.0  ;;  %14072 = vmatprep.subr.msk.bf16.mxu1 %vm1629_vm0, %v7184_v38 }
 0x3e6   : > { %v5792_v56 = vadd.f32 %v5791_v0, %v5790_v55  ;;  %v5693_v63 = vadd.f32 %v5692_v40, %v5691_v10  ;;  %v5797_v26 = vsel %vm1580_vm13, %v5743_v33, 0.0 }
 0x3e7   : > { %v5793_v14 = vsel %vm1580_vm13, %v5741_v2, 0.0 }
 0x3e8   : > { %v5695_v37 = vadd.f32 %v5694_v52, %v5693_v63  ;;  %v5794_v30 = vadd.f32 %v5793_v14, %v5792_v56  ;;  %v7282_v14 = vsel %vm1629_vm0, %v7184_v38, 0 }
 0x3e9   : > { %v16397_v23 = vpop.f32.mrb[24].mxu0  ;;  %13246 = vmatpush3.bf16.msra.mxu1 %v7282_v14 }
 0x3ea   : > { %v5796_v7 = vadd.f32 %v5795_v46, %v5794_v30  ;;  %v16399_v43 = vpop.f32.mrb[25].mxu0  ;;  %v5697_v35 = vadd.f32 %v5696_v36, %v5695_v37  ;;  %v5746_v51 = vmul.f32 %v16397_v23, %v16397_v23  ;;  %v5702_v19 = vsel %vm1580_vm13, %v16397_v23, 0.0 }
 0x3eb   : > { %v5698_v24 = vsel %vm1580_vm13, %v16399_v43, 0.0  ;;  %v5744_v28 = vmul.f32 %v16399_v43, %v16399_v43  ;;  %v16406_v49 = vpop.f32.mrb[26].mxu0 }
 0x3ec   : > { %v5699_v41 = vadd.f32 %v5698_v24, %v5697_v35  ;;  %v5798_v13 = vadd.f32 %v5797_v26, %v5796_v7  ;;  %v16408_v57 = vpop.f32.mrb[27].mxu0  ;;  %v5747_v39 = vmul.f32 %v16406_v49, %v16406_v49  ;;  %v5803_v5 = vsel %vm1580_vm13, %v5746_v51, 0.0 }
 0x3ed   : > { %v5799_v12 = vsel %vm1580_vm13, %v5744_v28, 0.0  ;;  %v5700_v60 = vsel %vm1580_vm13, %v16408_v57, 0.0  ;;  %v5745_v22 = vmul.f32 %v16408_v57, %v16408_v57  ;;  %v5704_v10 = vsel %vm1580_vm13, %v16406_v49, 0.0 }
 0x3ee   : > { %v5800_v34 = vadd.f32 %v5799_v12, %v5798_v13  ;;  %v5701_v15 = vadd.f32 %v5700_v60, %v5699_v41  ;;  %v5805_v56 = vsel %vm1580_vm13, %v5747_v39, 0.0 }
 0x3ef   : > { %v5801_v53 = vsel %vm1580_vm13, %v5745_v22, 0.0 }
 0x3f0   : > { %v5703_v11 = vadd.f32 %v5702_v19, %v5701_v15  ;;  %v5802_v21 = vadd.f32 %v5801_v53, %v5800_v34 }
 0x3f1   : > { %v16425_v55 = vpop.f32.mrb[28].mxu0 }
 0x3f2   : > { %v5804_v0 = vadd.f32 %v5803_v5, %v5802_v21  ;;  %v16427_v40 = vpop.f32.mrb[29].mxu0  ;;  %v5705_v2 = vadd.f32 %v5704_v10, %v5703_v11  ;;  %v5750_v36 = vmul.f32 %v16425_v55, %v16425_v55  ;;  %v5710_v41 = vsel %vm1580_vm13, %v16425_v55, 0.0 }
 0x3f3   : > { %v5706_v63 = vsel %vm1580_vm13, %v16427_v40, 0.0  ;;  %v5748_v52 = vmul.f32 %v16427_v40, %v16427_v40  ;;  %v16435_v33 = vpop.f32.mrb[30].mxu0 }
 0x3f4   : > { %v5707_v37 = vadd.f32 %v5706_v63, %v5705_v2  ;;  %v5806_v30 = vadd.f32 %v5805_v56, %v5804_v0  ;;  %v16438_v46 = vpop.f32.mrb[31].mxu0  ;;  %v5751_v13 = vmul.f32 %v16435_v33, %v16435_v33  ;;  %v5811_v22 = vsel %vm1580_vm13, %v5750_v36, 0.0 }
 0x3f5   : > { %v5807_v7 = vsel %vm1580_vm13, %v5748_v52, 0.0  ;;  %v5708_v35 = vsel %vm1580_vm13, %v16438_v46, 0.0  ;;  %v5749_v26 = vmul.f32 %v16438_v46, %v16438_v46  ;;  %v5712_v34 = vsel %vm1580_vm13, %v16435_v33, 0.0 }
 0x3f6   : > { %v5808_v24 = vadd.f32 %v5807_v7, %v5806_v30  ;;  %v5709_v28 = vadd.f32 %v5708_v35, %v5707_v37  ;;  %v5813_v39 = vsel %vm1580_vm13, %v5751_v13, 0.0  ;;  %v6782_v37 = vld [vmem:[#allocation8] sm:$0x3] }
 0x3f7   : > { %v5809_v51 = vsel %vm1580_vm13, %v5749_v26, 0.0  ;;  %14073 = vmatprep.subr.msk.bf16.mxu1 %vm1629_vm0, %v6782_v37 }
 0x3f8   : > { %v5711_v12 = vadd.f32 %v5710_v41, %v5709_v28  ;;  %v5810_v60 = vadd.f32 %v5809_v51, %v5808_v24 }
 0x3fa   : > { %v5713_v15 = vadd.f32 %v5712_v34, %v5711_v12  ;;  %v5812_v19 = vadd.f32 %v5811_v22, %v5810_v60 }
 0x3fc   : > { %v5714_v53 = vrot.slane %v5713_v15, 4  ;;  %v5814_v11 = vadd.f32 %v5813_v39, %v5812_v19 }
 0x3fe   : > { %v5715_v21 = vadd.f32 %v5714_v53, %v5713_v15  ;;  %v5815_v5 = vrot.slane %v5814_v11, 4 }
 0x400   : > { %v5716_v10 = vrot.slane %v5715_v21, 2  ;;  %v5816_v38 = vadd.f32 %v5815_v5, %v5814_v11 }
 0x402   : > { %v5717_v0 = vadd.f32 %v5716_v10, %v5715_v21  ;;  %v5817_v2 = vrot.slane %v5816_v38, 2 }
 0x404   : > { %v5718_v56 = vrot.slane %v5717_v0, 1  ;;  %v5818_v63 = vadd.f32 %v5817_v2, %v5816_v38 }
 0x406   : > { %v5719_v52 = vadd.f32 %v5718_v56, %v5717_v0  ;;  %v5819_v14 = vrot.slane %v5818_v63, 1 }
 0x408   : > { %v5820_v30 = vadd.f32 %v5819_v14, %v5818_v63  ;;  %v16456_v36 = vmul.f32 0.00390625, %v5719_v52 }
 0x40a   : > { %v5822_v7 = vmul.f32 0.00390625, %v5820_v30  ;;  %v5823_v35 = vmul.f32 %v16456_v36, %v16456_v36  ;;  %v5853_v26 = vsub.f32 %v16427_v40, %v16456_v36  ;;  %v5854_v24 = vsub.f32 %v16438_v46, %v16456_v36 }
 0x40b   : > { %v5825_v28 = vsub.f32 %v16232_v50, %v16456_v36  ;;  %v5826_v41 = vsub.f32 %v16238_v3, %v16456_v36  ;;  %v5827_v13 = vsub.f32 %v16230_v27, %v16456_v36  ;;  %v5828_v51 = vsub.f32 %v16236_v31, %v16456_v36 }
 0x40c   : > { %v5824_v12 = vsub.f32 %v5822_v7, %v5823_v35  ;;  %v5829_v60 = vsub.f32 %v16259_v47, %v16456_v36  ;;  %v5830_v40 = vsub.f32 %v16268_v9, %v16456_v36  ;;  %v5831_v46 = vsub.f32 %v16257_v59, %v16456_v36 }
 0x40d   : > { %v5832_v50 = vsub.f32 %v16266_v17, %v16456_v36  ;;  %v5833_v3 = vsub.f32 %v16287_v1, %v16456_v36  ;;  %v5834_v27 = vsub.f32 %v16296_v58, %v16456_v36  ;;  %v5835_v31 = vsub.f32 %v16285_v61, %v16456_v36 }
 0x40e   : > { %v5857_v22 = vadd.f32 1e-05, %v5824_v12  ;;  %v5836_v47 = vsub.f32 %v16294_v16, %v16456_v36  ;;  %v5837_v9 = vsub.f32 %v16315_v4, %v16456_v36  ;;  %v5838_v59 = vsub.f32 %v16324_v29, %v16456_v36 }
 0x40f   : > { %v5839_v17 = vsub.f32 %v16313_v42, %v16456_v36  ;;  %v5840_v1 = vsub.f32 %v16322_v18, %v16456_v36  ;;  %v5841_v58 = vsub.f32 %v16343_v54, %v16456_v36  ;;  %v5842_v61 = vsub.f32 %v16352_v48, %v16456_v36 }
 0x410   : > { %14218 = vrsqrt.f32 %v5857_v22  ;;  %v5843_v16 = vsub.f32 %v16341_v20, %v16456_v36  ;;  %v5844_v4 = vsub.f32 %v16350_v25, %v16456_v36  ;;  %v5845_v29 = vsub.f32 %v16371_v62, %v16456_v36 }
 0x411   : > { %v5846_v42 = vsub.f32 %v16380_v32, %v16456_v36  ;;  %v5847_v18 = vsub.f32 %v16369_v45, %v16456_v36  ;;  %v5848_v54 = vsub.f32 %v16378_v44, %v16456_v36  ;;  %v5849_v48 = vsub.f32 %v16399_v43, %v16456_v36 }
 0x412   : > { %v5850_v20 = vsub.f32 %v16408_v57, %v16456_v36  ;;  %v5851_v25 = vsub.f32 %v16397_v23, %v16456_v36  ;;  %v5852_v62 = vsub.f32 %v16406_v49, %v16456_v36  ;;  %v5855_v32 = vsub.f32 %v16425_v55, %v16456_v36 }
 0x413   : > { %v5856_v45 = vsub.f32 %v16435_v33, %v16456_v36 }
 0x41a   : > { %v14219_v34 = vpop.eup %14218 }
 0x41b   : > { %v5887_v44 = vmul.f32 %v14219_v34, %v5853_v26  ;;  %v5888_v15 = vmul.f32 %v14219_v34, %v5854_v24  ;;  %v16525_v19 = vmul.f32 %v14219_v34, %v5825_v28  ;;  %v16527_v43 = vmul.f32 %v14219_v34, %v5826_v41 }
 0x41c   : > { %v16529_v57 = vmul.f32 %v14219_v34, %v5827_v13  ;;  %v16531_v39 = vmul.f32 %v14219_v34, %v5828_v51  ;;  %v16533_v23 = vmul.f32 %v14219_v34, %v5829_v60  ;;  %v16535_v49 = vmul.f32 %v14219_v34, %v5830_v40 }
 0x41d   : > { %v5919_v53 = vmax.f32 %v5887_v44, 0.0  ;;  %v5920_v55 = vmax.f32 %v5888_v15, 0.0  ;;  %v16537_v11 = vmul.f32 %v14219_v34, %v5831_v46  ;;  %v16539_v33 = vmul.f32 %v14219_v34, %v5832_v50  ;;  %v6440_v46 = vld [vmem:[#allocation2 + $0xbc] sm:$0x1] }
 0x41e   : > { %v16541_v21 = vmul.f32 %v14219_v34, %v5833_v3  ;;  %v16543_v5 = vmul.f32 %v14219_v34, %v5834_v27  ;;  %v16545_v10 = vmul.f32 %v14219_v34, %v5835_v31  ;;  %v16547_v38 = vmul.f32 %v14219_v34, %v5836_v47 }
 0x41f   : > { %v16549_v0 = vpack.c.bf16 %v5919_v53, %v5919_v53  ;;  %v12629_v2 = vpack.c.bf16 %v5920_v55, %v5920_v55  ;;  %v16551_v56 = vmul.f32 %v14219_v34, %v5837_v9  ;;  %v16553_v63 = vmul.f32 %v14219_v34, %v5838_v59 }
 0x420   : > { %v16555_v52 = vmul.f32 %v14219_v34, %v5839_v17  ;;  %v16557_v14 = vmul.f32 %v14219_v34, %v5840_v1  ;;  %v16559_v37 = vmul.f32 %v14219_v34, %v5841_v58  ;;  %v16561_v30 = vmul.f32 %v14219_v34, %v5842_v61 }
 0x421   : > { %v6258_v36 = vshrl.u32 %v16549_v0, 16  ;;  %v6266_v7 = vshrl.u32 %v12629_v2, 16  ;;  %v6269_v35 = vshll.u32 %v12629_v2, 16  ;;  %v6261_v26 = vshll.u32 %v16549_v0, 16 }
 0x422   : > { %v16565_v24 = vmul.f32 %v14219_v34, %v5843_v16  ;;  %v16567_v28 = vmul.f32 %v14219_v34, %v5844_v4  ;;  %v16569_v41 = vmul.f32 %v14219_v34, %v5845_v29  ;;  %v16571_v13 = vmul.f32 %v14219_v34, %v5846_v42 }
 0x423   : > { %v16573_v51 = vrot.slane %v6258_v36, 7  ;;  %v6268_v12 = vrot.slane %v6266_v7, 7  ;;  %v16575_v60 = vmul.f32 %v14219_v34, %v5847_v18  ;;  %v16577_v40 = vmul.f32 %v14219_v34, %v5848_v54 }
 0x424   : > { %v16579_v50 = vmul.f32 %v14219_v34, %v5849_v48  ;;  %v16581_v3 = vmul.f32 %v14219_v34, %v5850_v20  ;;  %v16583_v27 = vmul.f32 %v14219_v34, %v5851_v25  ;;  %v16585_v31 = vmul.f32 %v14219_v34, %v5852_v62 }
 0x425   : > { %v6264_v22 = vrot.slane %v16573_v51, 4  ;;  %v6271_v47 = vor.u32 %v6269_v35, %v6268_v12  ;;  %v6273_v9 = vrot.slane %v6268_v12, 4  ;;  %v16588_v59 = vmul.f32 %v14219_v34, %v5855_v32 }
 0x426   : > { %v16590_v17 = vmul.f32 %v14219_v34, %v5856_v45  ;;  %v5891_v1 = vmax.f32 %v16525_v19, 0.0  ;;  %v5892_v58 = vmax.f32 %v16527_v43, 0.0  ;;  %v5893_v61 = vmax.f32 %v16529_v57, 0.0 }
 0x427   : > { %v6272_v4 = vsel %vm14645_vm6, %v6264_v22, %v6271_v47  ;;  %v6441_v42 = vsel %vm14664_vm8, %v6273_v9, %v6440_v46  ;;  %v5894_v18 = vmax.f32 %v16531_v39, 0.0  ;;  %v5895_v54 = vmax.f32 %v16533_v23, 0.0 }
 0x428   : > { %6439 = vst.msk [vmem:[#allocation2 + $0xb8] sm:$0xf] %vm671_vm3, %v6272_v4  ;;  %6442 = vst [vmem:[#allocation2 + $0xbc] sm:$0x1] %v6441_v42  ;;  %v5896_v48 = vmax.f32 %v16535_v49, 0.0  ;;  %v5897_v20 = vmax.f32 %v16537_v11, 0.0 }
 0x429   : > { %v5898_v25 = vmax.f32 %v16539_v33, 0.0  ;;  %v5899_v62 = vmax.f32 %v16541_v21, 0.0  ;;  %v5900_v32 = vmax.f32 %v16543_v5, 0.0  ;;  %v5901_v45 = vmax.f32 %v16545_v10, 0.0 }
 0x42a   : > { %v5902_v34 = vmax.f32 %v16547_v38, 0.0  ;;  %v5903_v44 = vmax.f32 %v16551_v56, 0.0  ;;  %v5904_v15 = vmax.f32 %v16553_v63, 0.0  ;;  %v5905_v19 = vmax.f32 %v16555_v52, 0.0 }
 0x42b   : > { %v5906_v43 = vmax.f32 %v16557_v14, 0.0  ;;  %v5907_v57 = vmax.f32 %v16559_v37, 0.0  ;;  %v5908_v39 = vmax.f32 %v16561_v30, 0.0  ;;  %v5909_v23 = vmax.f32 %v16565_v24, 0.0 }
 0x42c   : > { %v5910_v49 = vmax.f32 %v16567_v28, 0.0  ;;  %v5911_v53 = vmax.f32 %v16569_v41, 0.0  ;;  %v5912_v55 = vmax.f32 %v16571_v13, 0.0  ;;  %v5913_v11 = vmax.f32 %v16575_v60, 0.0 }
 0x42d   : > { %v5914_v33 = vmax.f32 %v16577_v40, 0.0  ;;  %v5915_v21 = vmax.f32 %v16579_v50, 0.0  ;;  %v5916_v5 = vmax.f32 %v16581_v3, 0.0  ;;  %v5917_v10 = vmax.f32 %v16583_v27, 0.0 }
 0x42e   : > { %v5918_v38 = vmax.f32 %v16585_v31, 0.0  ;;  %v5921_v2 = vmax.f32 %v16588_v59, 0.0  ;;  %v5922_v56 = vmax.f32 %v16590_v17, 0.0  ;;  %v12600_v63 = vpack.c.bf16 %v5891_v1, %v5891_v1 }
 0x42f   : > { %v12601_v52 = vpack.c.bf16 %v5892_v58, %v5892_v58  ;;  %v12602_v14 = vpack.c.bf16 %v5893_v61, %v5893_v61  ;;  %v6458_v37 = vld [vmem:[#allocation2 + $0xbc] sm:$0x1]  ;;  %v6621_v30 = vld [vmem:[#allocation2 + $0xb8] sm:$0x8]  ;;  %v12603_v36 = vpack.c.bf16 %v5894_v18, %v5894_v18  ;;  %v16627_v7 = vpack.c.bf16 %v5895_v54, %v5895_v54 }
 0x430   : > { %v16629_v35 = vpack.c.bf16 %v5896_v48, %v5896_v48  ;;  %v16631_v24 = vpack.c.bf16 %v5897_v20, %v5897_v20  ;;  %v12223_v28 = vrot.slane %v6621_v30, 11  ;;  %6461 = vst.msk [vmem:[#allocation2 + $0xd4] sm:$0x1] %vm679_vm5, %v6458_v37  ;;  %v16634_v41 = vpack.c.bf16 %v5898_v25, %v5898_v25  ;;  %v6741_v60 = vld [vmem:[#allocation2 + $0xbc] sm:$0x1] }
 0x431   : > { %v16636_v13 = vpack.c.bf16 %v5899_v62, %v5899_v62  ;;  %v16638_v12 = vpack.c.bf16 %v5900_v32, %v5900_v32  ;;  %v16640_v40 = vpack.c.bf16 %v5901_v45, %v5901_v45  ;;  %v16642_v46 = vpack.c.bf16 %v5902_v34, %v5902_v34 }
 0x432   : > { %v16644_v50 = vpack.c.bf16 %v5903_v44, %v5903_v44  ;;  %v16646_v3 = vpack.c.bf16 %v5904_v15, %v5904_v15  ;;  %v6742_v31 = vsel %vm14713_vm9, %v12223_v28, %v6741_v60  ;;  %v16650_v22 = vpack.c.bf16 %v5905_v19, %v5905_v19 }
 0x433   : > { %v16652_v47 = vpack.c.bf16 %v5906_v43, %v5906_v43  ;;  %v16654_v9 = vpack.c.bf16 %v5907_v57, %v5907_v57  ;;  %6743 = vst [vmem:[#allocation2 + $0xbc] sm:$0x1] %v6742_v31  ;;  %v16656_v59 = vpack.c.bf16 %v5908_v39, %v5908_v39  ;;  %v16658_v17 = vpack.c.bf16 %v5909_v23, %v5909_v23 }
 0x434   : > { %v16660_v1 = vpack.c.bf16 %v5910_v49, %v5910_v49  ;;  %v16662_v58 = vpack.c.bf16 %v5911_v53, %v5911_v53  ;;  %v16664_v61 = vpack.c.bf16 %v5912_v55, %v5912_v55  ;;  %v16666_v4 = vpack.c.bf16 %v5913_v11, %v5913_v11 }
 0x435   : > { %v16668_v42 = vpack.c.bf16 %v5914_v33, %v5914_v33  ;;  %v16670_v18 = vpack.c.bf16 %v5915_v21, %v5915_v21  ;;  %v16672_v54 = vpack.c.bf16 %v5916_v5, %v5916_v5  ;;  %v16674_v48 = vpack.c.bf16 %v5917_v10, %v5917_v10 }
 0x436   : > { %v16676_v20 = vpack.c.bf16 %v5918_v38, %v5918_v38  ;;  %v16678_v25 = vpack.c.bf16 %v5921_v2, %v5921_v2  ;;  %v16680_v62 = vpack.c.bf16 %v5922_v56, %v5922_v56  ;;  %v6020_v32 = vshrl.u32 %v12600_v63, 16 }
 0x437   : > { %v6023_v45 = vshll.u32 %v12600_v63, 16  ;;  %v6028_v34 = vshrl.u32 %v12601_v52, 16  ;;  %v6031_v44 = vshll.u32 %v12601_v52, 16  ;;  %v6037_v15 = vshrl.u32 %v12602_v14, 16  ;;  %v14245_v52 = vld [vmem:[#allocation2 + $0xc] sm:$0xf] }
 0x438   : > { %v6040_v19 = vshll.u32 %v12602_v14, 16  ;;  %v6045_v43 = vshrl.u32 %v12603_v36, 16  ;;  %v6022_v57 = vrot.slane %v6020_v32, 7  ;;  %v6048_v23 = vshll.u32 %v12603_v36, 16 }
 0x439   : > { %v16682_v39 = vrot.slane %v6028_v34, 7  ;;  %v6054_v49 = vshrl.u32 %v16627_v7, 16  ;;  %v6039_v53 = vrot.slane %v6037_v15, 7  ;;  %v6057_v11 = vshll.u32 %v16627_v7, 16 }
 0x43a   : > { %v16685_v55 = vrot.slane %v6045_v43, 7  ;;  %v6062_v33 = vshrl.u32 %v16629_v35, 16  ;;  %v16689_v21 = vor.u32 %v6023_v45, %v6022_v57  ;;  %v6026_v5 = vrot.slane %v6022_v57, 4 }
 0x43b   : > { %v6033_v10 = vor.u32 %v6031_v44, %v16682_v39  ;;  %v16693_v2 = vor.u32 %v6040_v19, %v6039_v53  ;;  %v6043_v56 = vrot.slane %v6039_v53, 4  ;;  %v6056_v37 = vrot.slane %v6054_v49, 7 }
 0x43c   : > { %v6050_v63 = vor.u32 %v6048_v23, %v16685_v55  ;;  %v16699_v30 = vrot.slane %v6062_v33, 7  ;;  %v6065_v36 = vshll.u32 %v16629_v35, 16  ;;  %v6071_v28 = vshrl.u32 %v16631_v24, 16 }
 0x43d   : > { %v6034_v14 = vsel %vm14645_vm6, %v6026_v5, %v6033_v10  ;;  %v6074_v60 = vshll.u32 %v16631_v24, 16  ;;  %v6079_v31 = vshrl.u32 %v16634_v41, 16  ;;  %v16708_v32 = vor.u32 %v6057_v11, %v6056_v37 }
 0x43e   : > { %v6051_v7 = vsel %vm14645_vm6, %v6043_v56, %v6050_v63  ;;  %6341 = vst.msk [vmem:[#allocation2 + $0x10] sm:$0xf] %vm671_vm3, %v6034_v14  ;;  %v6060_v45 = vrot.slane %v6056_v37, 4  ;;  %v6067_v34 = vor.u32 %v6065_v36, %v16699_v30  ;;  %v6073_v35 = vrot.slane %v6071_v28, 7 }
 0x43f   : > { %6348 = vst.msk [vmem:[#allocation2 + $0x1c] sm:$0xf] %vm671_vm3, %v6051_v7  ;;  %v16713_v15 = vrot.slane %v6079_v31, 7  ;;  %v6082_v19 = vshll.u32 %v16634_v41, 16  ;;  %v6088_v24 = vshrl.u32 %v16636_v13, 16  ;;  %v6091_v57 = vshll.u32 %v16636_v13, 16 }
 0x440   : > { %v6068_v43 = vsel %vm14645_vm6, %v6060_v45, %v6067_v34  ;;  %v6096_v23 = vshrl.u32 %v16638_v12, 16  ;;  %v6099_v49 = vshll.u32 %v16638_v12, 16  ;;  %v16722_v53 = vor.u32 %v6074_v60, %v6073_v35 }
 0x441   : > { %v6077_v11 = vrot.slane %v6073_v35, 4  ;;  %v6084_v33 = vor.u32 %v6082_v19, %v16713_v15  ;;  %6355 = vst.msk [vmem:[#allocation2 + $0x28] sm:$0xf] %vm671_vm3, %v6068_v43  ;;  %v6090_v41 = vrot.slane %v6088_v24, 7  ;;  %v6105_v56 = vshrl.u32 %v16640_v40, 16 }
 0x442   : > { %v16727_v10 = vrot.slane %v6096_v23, 7  ;;  %v6108_v13 = vshll.u32 %v16640_v40, 16  ;;  %v6113_v12 = vshrl.u32 %v16642_v46, 16  ;;  %v6116_v14 = vshll.u32 %v16642_v46, 16 }
 0x443   : > { %v6085_v63 = vsel %vm14645_vm6, %v6077_v11, %v6084_v33  ;;  %v6122_v37 = vshrl.u32 %v16644_v50, 16  ;;  %v16736_v36 = vor.u32 %v6091_v57, %v6090_v41  ;;  %v6094_v7 = vrot.slane %v6090_v41, 4 }
 0x444   : > { %v6101_v28 = vor.u32 %v6099_v49, %v16727_v10  ;;  %6362 = vst.msk [vmem:[#allocation2 + $0x34] sm:$0xf] %vm671_vm3, %v6085_v63  ;;  %v6107_v31 = vrot.slane %v6105_v56, 7  ;;  %v16741_v40 = vrot.slane %v6113_v12, 7  ;;  %v6125_v34 = vshll.u32 %v16644_v50, 16 }
 0x445   : > { %v6124_v45 = vrot.slane %v6122_v37, 7  ;;  %v6130_v35 = vshrl.u32 %v16646_v3, 16  ;;  %v6133_v19 = vshll.u32 %v16646_v3, 16  ;;  %v6139_v24 = vshrl.u32 %v16650_v22, 16  ;;  %v16865_v37 = vld [vmem:[#allocation2 + $0x54] sm:$0xf] }
 0x446   : > { %v6102_v46 = vsel %vm14645_vm6, %v6094_v7, %v6101_v28  ;;  %v6451_v43 = vld [vmem:[#allocation2 + $0x1c] sm:$0xf]  ;;  %v16749_v57 = vor.u32 %v6108_v13, %v6107_v31  ;;  %v6111_v23 = vrot.slane %v6107_v31, 4  ;;  %v6118_v49 = vor.u32 %v6116_v14, %v16741_v40 }
 0x447   : > { %6369 = vst.msk [vmem:[#allocation2 + $0x40] sm:$0xf] %vm671_vm3, %v6102_v46  ;;  %6454 = vst.msk [vmem:[#allocation2 + $0x4] sm:$0xf] %vm671_vm3, %v6451_v43  ;;  %v16755_v50 = vor.u32 %v6125_v34, %v6124_v45  ;;  %v6128_v33 = vrot.slane %v6124_v45, 4  ;;  %v16757_v41 = vrot.slane %v6130_v35, 7 }
 0x448   : > { %v6141_v3 = vrot.slane %v6139_v24, 7  ;;  %v6119_v56 = vsel %vm14645_vm6, %v6111_v23, %v6118_v49  ;;  %v6142_v13 = vshll.u32 %v16650_v22, 16  ;;  %v6147_v63 = vshrl.u32 %v16652_v47, 16  ;;  %v16951_v16 = vld [vmem:[#allocation2 + $0x1c] sm:$0x8] }
 0x449   : > { %v6150_v12 = vshll.u32 %v16652_v47, 16  ;;  %v6135_v14 = vor.u32 %v6133_v19, %v16757_v41  ;;  %v6156_v28 = vshrl.u32 %v16654_v9, 16  ;;  %6376 = vst.msk [vmem:[#allocation2 + $0x4c] sm:$0xf] %vm671_vm3, %v6119_v56  ;;  %v6159_v34 = vshll.u32 %v16654_v9, 16 }
 0x44a   : > { %v6145_v7 = vrot.slane %v6141_v3, 4  ;;  %v16768_v31 = vor.u32 %v6142_v13, %v6141_v3  ;;  %v16770_v45 = vrot.slane %v6147_v63, 7  ;;  %v6164_v22 = vshrl.u32 %v16656_v59, 16  ;;  %v6356_v63 = vld [vmem:[#allocation2 + $0x2c] sm:$0x1] }
 0x44b   : > { %v6136_v47 = vsel %vm14645_vm6, %v6128_v33, %v6135_v14  ;;  %v6158_v46 = vrot.slane %v6156_v28, 7  ;;  %v6167_v35 = vshll.u32 %v16656_v59, 16  ;;  %v6173_v19 = vshrl.u32 %v16658_v17, 16 }
 0x44c   : > { %v6152_v24 = vor.u32 %v6150_v12, %v16770_v45  ;;  %v16780_v23 = vrot.slane %v6164_v22, 7  ;;  %v6176_v49 = vshll.u32 %v16658_v17, 16  ;;  %6383 = vst.msk [vmem:[#allocation2 + $0x58] sm:$0xf] %vm671_vm3, %v6136_v47  ;;  %v6181_v33 = vshrl.u32 %v16660_v1, 16 }
 0x44d   : > { %v16784_v9 = vor.u32 %v6159_v34, %v6158_v46  ;;  %v6162_v3 = vrot.slane %v6158_v46, 4  ;;  %v6175_v56 = vrot.slane %v6173_v19, 7  ;;  %v6184_v12 = vshll.u32 %v16660_v1, 16 }
 0x44e   : > { %v6153_v59 = vsel %vm14645_vm6, %v6145_v7, %v6152_v24  ;;  %v6169_v13 = vor.u32 %v6167_v35, %v16780_v23  ;;  %v16794_v28 = vrot.slane %v6181_v33, 7  ;;  %v6190_v34 = vshrl.u32 %v16662_v58, 16 }
 0x44f   : > { %v16792_v14 = vor.u32 %v6176_v49, %v6175_v56  ;;  %v6179_v17 = vrot.slane %v6175_v56, 4  ;;  %6390 = vst.msk [vmem:[#allocation2 + $0x64] sm:$0xf] %vm671_vm3, %v6153_v59  ;;  %v6193_v7 = vshll.u32 %v16662_v58, 16  ;;  %v6198_v47 = vshrl.u32 %v16664_v61, 16 }
 0x450   : > { %v6170_v22 = vsel %vm14645_vm6, %v6162_v3, %v6169_v13  ;;  %v6201_v46 = vshll.u32 %v16664_v61, 16  ;;  %v6186_v1 = vor.u32 %v6184_v12, %v16794_v28  ;;  %v6192_v19 = vrot.slane %v6190_v34, 7 }
 0x451   : > { %v6207_v24 = vshrl.u32 %v16666_v4, 16  ;;  %6397 = vst.msk [vmem:[#allocation2 + $0x70] sm:$0xf] %vm671_vm3, %v6170_v22  ;;  %v16807_v49 = vrot.slane %v6198_v47, 7  ;;  %v6210_v56 = vshll.u32 %v16666_v4, 16  ;;  %v6215_v3 = vshrl.u32 %v16668_v42, 16 }
 0x452   : > { %v6218_v58 = vshll.u32 %v16668_v42, 16  ;;  %v6187_v61 = vsel %vm14645_vm6, %v6179_v17, %v6186_v1  ;;  %v16814_v33 = vor.u32 %v6193_v7, %v6192_v19  ;;  %v6196_v59 = vrot.slane %v6192_v19, 4 }
 0x453   : > { %v6209_v13 = vrot.slane %v6207_v24, 7  ;;  %v6203_v12 = vor.u32 %v6201_v46, %v16807_v49  ;;  %v16818_v22 = vrot.slane %v6215_v3, 7  ;;  %v6224_v47 = vshrl.u32 %v16670_v18, 16  ;;  %6404 = vst.msk [vmem:[#allocation2 + $0x7c] sm:$0xf] %vm671_vm3, %v6187_v61 }
 0x454   : > { %v6227_v35 = vshll.u32 %v16670_v18, 16  ;;  %v6232_v17 = vshrl.u32 %v16672_v54, 16  ;;  %v6235_v3 = vshll.u32 %v16672_v54, 16  ;;  %v6244_v61 = vshll.u32 %v16674_v48, 16  ;;  %v6345_v18 = vld [vmem:[#allocation2 + $0x18] sm:$0xf] }
 0x455   : > { %v16822_v4 = vor.u32 %v6210_v56, %v6209_v13  ;;  %v6213_v42 = vrot.slane %v6209_v13, 4  ;;  %v6204_v7 = vsel %vm14645_vm6, %v6196_v59, %v6203_v12  ;;  %v6220_v46 = vor.u32 %v6218_v58, %v16818_v22  ;;  %v6342_v13 = vld [vmem:[#allocation2 + $0x14] sm:$0x1] }
 0x456   : > { %v6226_v19 = vrot.slane %v6224_v47, 7  ;;  %v16830_v24 = vrot.slane %v6232_v17, 7  ;;  %v6241_v56 = vshrl.u32 %v16674_v48, 16  ;;  %6411 = vst.msk [vmem:[#allocation2 + $0x88] sm:$0xf] %vm671_vm3, %v6204_v7  ;;  %v6249_v47 = vshrl.u32 %v16676_v20, 16 }
 0x457   : > { %v6221_v59 = vsel %vm14645_vm6, %v6213_v42, %v6220_v46  ;;  %v6349_v17 = vld [vmem:[#allocation2 + $0x20] sm:$0x1]  ;;  %v6252_v48 = vshll.u32 %v16676_v20, 16  ;;  %v6352_v7 = vld [vmem:[#allocation2 + $0x24] sm:$0xf]  ;;  %v6275_v42 = vshrl.u32 %v16678_v25, 16 }
 0x458   : > { %v16838_v12 = vor.u32 %v6227_v35, %v6226_v19  ;;  %v6230_v58 = vrot.slane %v6226_v19, 4  ;;  %v6237_v1 = vor.u32 %v6235_v3, %v16830_v24  ;;  %v6243_v34 = vrot.slane %v6241_v56, 7  ;;  %6418 = vst.msk [vmem:[#allocation2 + $0x94] sm:$0xf] %vm671_vm3, %v6221_v59  ;;  %v16854_v19 = vld [vmem:[#allocation2 + $0x30] sm:$0xf] }
 0x459   : > { %v16845_v43 = vrot.slane %v6249_v47, 7  ;;  %v16850_v35 = vor.u32 %v6261_v26, %v16573_v51  ;;  %v6278_v46 = vshll.u32 %v16678_v25, 16  ;;  %v6363_v3 = vld [vmem:[#allocation2 + $0x38] sm:$0x1]  ;;  %v16856_v56 = vld [vmem:[#allocation2 + $0x3c] sm:$0xf] }
 0x45a   : > { %v6370_v20 = vld [vmem:[#allocation2 + $0x44] sm:$0x1]  ;;  %v6238_v59 = vsel %vm14645_vm6, %v6230_v58, %v6237_v1  ;;  %v16860_v47 = vor.u32 %v6244_v61, %v6243_v34  ;;  %v6247_v54 = vrot.slane %v6243_v34, 4  ;;  %v6283_v0 = vshrl.u32 %v16680_v62, 16  ;;  %v16863_v26 = vld [vmem:[#allocation2 + $0x48] sm:$0xf] }
 0x45b   : > { %19402 = vst [vmem:[#allocation20_spill] sm:$0xff] %v16845_v43  ;;  %19403 = vst [vmem:[#allocation21_spill] sm:$0xff] %v16850_v35  ;;  %v6377_v51 = vld [vmem:[#allocation2 + $0x50] sm:$0x1]  ;;  %v6254_v25 = vor.u32 %v6252_v48, %v16845_v43  ;;  %v6277_v60 = vrot.slane %v6275_v42, 7  ;;  %v6286_v5 = vshll.u32 %v16680_v62, 16  ;;  %v6339_v48 = vsel %vm14658_vm7, %v16689_v21, %v14245_v52 }
 0x45c   : > { %6425 = vst.msk [vmem:[#allocation2 + $0xa0] sm:$0xf] %vm671_vm3, %v6238_v59  ;;  %v16871_v1 = vld [vmem:[#allocation2 + $0x60] sm:$0xf]  ;;  %v6391_v61 = vld [vmem:[#allocation2 + $0x68] sm:$0x1]  ;;  %v6346_v42 = vsel %vm14658_vm7, %v16693_v2, %v6345_v18 }
 0x45d   : > { %v6384_v34 = vld [vmem:[#allocation2 + $0x5c] sm:$0x1]  ;;  %v16873_v58 = vld [vmem:[#allocation2 + $0x6c] sm:$0xf]  ;;  %v16875_v44 = vrot.slane %v6283_v0, 7  ;;  %v19405_v11 = vrot.slane %v16682_v39, 4  ;;  %v6255_v27 = vsel %vm14645_vm6, %v6247_v54, %v6254_v25  ;;  %v16893_v35 = vor.u32 %v6278_v46, %v6277_v60 }
 0x45e   : > { %v16887_v59 = vld [vmem:[#allocation2 + $0x78] sm:$0xf]  ;;  %v16889_v0 = vld [vmem:[#allocation2 + $0x84] sm:$0xf]  ;;  %v6281_v21 = vrot.slane %v6277_v60, 4  ;;  %v19406_v39 = vrot.slane %v16685_v55, 4  ;;  %v6353_v60 = vsel %vm14658_vm7, %v16708_v32, %v6352_v7 }
 0x45f   : > { %v6343_v62 = vsel %vm14664_vm8, %v19405_v11, %v6342_v13  ;;  %6347 = vst [vmem:[#allocation2 + $0x18] sm:$0xf] %v6346_v42  ;;  %6340 = vst [vmem:[#allocation2 + $0xc] sm:$0xf] %v6339_v48  ;;  %v16899_v2 = vld [vmem:[#allocation2 + $0x90] sm:$0xf]  ;;  %v6288_v43 = vor.u32 %v6286_v5, %v16875_v44  ;;  %v6360_v5 = vsel %vm14658_vm7, %v16722_v53, %v16854_v19 }
 0x460   : > { %6344 = vst [vmem:[#allocation2 + $0x14] sm:$0x1] %v6343_v62  ;;  %v6350_v52 = vsel %vm14664_vm8, %v19406_v39, %v6349_v17  ;;  %v6419_v11 = vld [vmem:[#allocation2 + $0x98] sm:$0x1]  ;;  %v6412_v18 = vld [vmem:[#allocation2 + $0x8c] sm:$0x1]  ;;  %v6374_v53 = vsel %vm14658_vm7, %v16749_v57, %v16863_v26  ;;  %v6381_v19 = vsel %vm14658_vm7, %v16755_v50, %v16865_v37  ;;  %v6388_v57 = vsel %vm14658_vm7, %v16768_v31, %v16871_v1 }
 0x461   : > { %v16901_v13 = vld [vmem:[#allocation2 + $0x9c] sm:$0xf]  ;;  %v6290_v54 = vrot.slane %v16875_v44, 4  ;;  %6351 = vst [vmem:[#allocation2 + $0x20] sm:$0x1] %v6350_v52  ;;  %v19407_v55 = vrot.slane %v16699_v30, 4  ;;  %v6395_v37 = vsel %vm14658_vm7, %v16784_v9, %v16873_v58  ;;  %v6402_v9 = vsel %vm14658_vm7, %v16792_v14, %v16887_v59 }
 0x462   : > { %6432 = vst.msk [vmem:[#allocation2 + $0xac] sm:$0xf] %vm671_vm3, %v6255_v27  ;;  %v16913_v46 = vld [vmem:[#allocation2 + $0xa8] sm:$0xf]  ;;  %v6433_v25 = vld [vmem:[#allocation2 + $0xb0] sm:$0x1]  ;;  %v6367_v27 = vsel %vm14658_vm7, %v16736_v36, %v16856_v56 }
 0x463   : > { %v6357_v17 = vsel %vm14664_vm8, %v19407_v55, %v6356_v63  ;;  %v6426_v48 = vld [vmem:[#allocation2 + $0xa4] sm:$0x1]  ;;  %v16915_v62 = vld [vmem:[#allocation2 + $0xb4] sm:$0xf]  ;;  %v19408_v32 = vrot.slane %v16713_v15, 4  ;;  %v19409_v63 = vrot.slane %v16727_v10, 4  ;;  %v6289_v15 = vsel %vm14645_vm6, %v6281_v21, %v6288_v43 }
 0x464   : > { %6358 = vst [vmem:[#allocation2 + $0x2c] sm:$0x1] %v6357_v17  ;;  %6354 = vst [vmem:[#allocation2 + $0x24] sm:$0xf] %v6353_v60  ;;  %v16933_v42 = vld [vmem:[#allocation2 + $0xc0] sm:$0xf] }
 0x465   : > { %v6364_v30 = vsel %vm14664_vm8, %v19408_v32, %v6363_v3  ;;  %v6371_v7 = vsel %vm14664_vm8, %v19409_v63, %v6370_v20  ;;  %v6447_v39 = vld [vmem:[#allocation2 + $0xc8] sm:$0x1]  ;;  %v19410_v36 = vrot.slane %v16741_v40, 4  ;;  %v16949_v3 = vld [vmem:[#allocation2 + $0x10] sm:$0x8]  ;;  %v19411_v43 = vrot.slane %v16757_v41, 4 }
 0x466   : > { %6365 = vst [vmem:[#allocation2 + $0x38] sm:$0x1] %v6364_v30  ;;  %6372 = vst [vmem:[#allocation2 + $0x44] sm:$0x1] %v6371_v7  ;;  %v19412_v56 = vrot.slane %v16770_v45, 4  ;;  %v19413_v31 = vrot.slane %v16780_v23, 4  ;;  %v6448_v55 = vsel %vm14664_vm8, %v6290_v54, %v6447_v39 }
 0x467   : > { %v6378_v10 = vsel %vm14664_vm8, %v19410_v36, %v6377_v51  ;;  %6361 = vst [vmem:[#allocation2 + $0x30] sm:$0xf] %v6360_v5  ;;  %6368 = vst [vmem:[#allocation2 + $0x3c] sm:$0xf] %v6367_v27  ;;  %v6385_v40 = vsel %vm14664_vm8, %v19411_v43, %v6384_v34  ;;  %v16970_v41 = vld [vmem:[#allocation2 + $0x28] sm:$0x8]  ;;  %v6409_v34 = vsel %vm14658_vm7, %v16814_v33, %v16889_v0 }
 0x468   : > { %6379 = vst [vmem:[#allocation2 + $0x50] sm:$0x1] %v6378_v10  ;;  %v6392_v50 = vsel %vm14664_vm8, %v19412_v56, %v6391_v61  ;;  %6446 = vst.msk [vmem:[#allocation2 + $0xc4] sm:$0xf] %vm671_vm3, %v6289_v15  ;;  %v16972_v20 = vld [vmem:[#allocation2 + $0x34] sm:$0x8]  ;;  %v6399_v45 = vsel %vm14664_vm8, %v19413_v31, %v6398_v6  ;;  %v6423_v0 = vsel %vm14658_vm7, %v16838_v12, %v16901_v13 }
 0x469   : > { %v16974_v26 = vld [vmem:[#allocation2 + $0x40] sm:$0x8]  ;;  %v16976_v51 = vld [vmem:[#allocation2 + $0x4c] sm:$0x8]  ;;  %6375 = vst [vmem:[#allocation2 + $0x48] sm:$0xf] %v6374_v53 }
 0x46a   : > { %6382 = vst [vmem:[#allocation2 + $0x54] sm:$0xf] %v6381_v19  ;;  %6386 = vst [vmem:[#allocation2 + $0x5c] sm:$0x1] %v6385_v40  ;;  %v19414_v1 = vrot.slane %v16794_v28, 4  ;;  %v19415_v14 = vrot.slane %v16807_v49, 4  ;;  %v6416_v28 = vsel %vm14658_vm7, %v16822_v4, %v16899_v2 }
 0x46b   : > { %6393 = vst [vmem:[#allocation2 + $0x68] sm:$0x1] %v6392_v50  ;;  %v16994_v58 = vld [vmem:[#allocation2 + $0x58] sm:$0x8]  ;;  %v16996_v23 = vld [vmem:[#allocation2 + $0x64] sm:$0x8] }
 0x46c   : > { %v6406_v61 = vsel %vm14664_vm8, %v19414_v1, %v6405_v8  ;;  %v16998_v6 = vld [vmem:[#allocation2 + $0x70] sm:$0x8]  ;;  %6389 = vst [vmem:[#allocation2 + $0x60] sm:$0xf] %v6388_v57  ;;  %6396 = vst [vmem:[#allocation2 + $0x6c] sm:$0xf] %v6395_v37  ;;  %v6413_v8 = vsel %vm14664_vm8, %v19415_v14, %v6412_v18 }
 0x46d   : > { %6400 = vst [vmem:[#allocation2 + $0x74] sm:$0x1] %v6399_v45  ;;  %6407 = vst [vmem:[#allocation2 + $0x80] sm:$0x1] %v6406_v61  ;;  %v19416_v33 = vrot.slane %v16818_v22, 4  ;;  %v19417_v49 = vrot.slane %v16830_v24, 4  ;;  %v6430_v22 = vsel %vm14658_vm7, %v16860_v47, %v16913_v46  ;;  %v6444_v47 = vsel %vm14658_vm7, %v16893_v35, %v16933_v42 }
 0x46e   : > { %v17016_v21 = vld [vmem:[#allocation2 + $0x7c] sm:$0x8]  ;;  %6403 = vst [vmem:[#allocation2 + $0x78] sm:$0xf] %v6402_v9  ;;  %6410 = vst [vmem:[#allocation2 + $0x84] sm:$0xf] %v6409_v34 }
 0x46f   : > { %v6420_v59 = vsel %vm14664_vm8, %v19416_v33, %v6419_v11  ;;  %6414 = vst [vmem:[#allocation2 + $0x8c] sm:$0x1] %v6413_v8  ;;  %v6427_v4 = vsel %vm14664_vm8, %v19417_v49, %v6426_v48  ;;  %v19418_v52 = vld [vmem:[#allocation20_spill] sm:$0xff]  ;;  %v19420_v11 = vld [vmem:[#allocation21_spill] sm:$0xff]  ;;  %v17034_v13 = vld [vmem:[#allocation2 + $0x88] sm:$0x8] }
 0x470   : > { %6421 = vst [vmem:[#allocation2 + $0x98] sm:$0x1] %v6420_v59  ;;  %v19419_v2 = vrot.slane %v19418_v52, 4  ;;  %v6437_v18 = vsel %vm14658_vm7, %v19420_v11, %v16915_v62  ;;  %v17036_v24 = vld [vmem:[#allocation2 + $0x94] sm:$0x8]  ;;  %v12210_v48 = vrot.slane %v16951_v16, 11 }
 0x471   : > { %6417 = vst [vmem:[#allocation2 + $0x90] sm:$0xf] %v6416_v28  ;;  %6424 = vst [vmem:[#allocation2 + $0x9c] sm:$0xf] %v6423_v0  ;;  %v6450_v60 = vld [vmem:[#allocation2 + $0x18] sm:$0xf] }
 0x472   : > { %v6434_v12 = vsel %vm14664_vm8, %v19419_v2, %v6433_v25  ;;  %6428 = vst [vmem:[#allocation2 + $0xa4] sm:$0x1] %v6427_v4  ;;  %v17046_v17 = vld [vmem:[#allocation2 + $0xa0] sm:$0x8]  ;;  %v17048_v46 = vld [vmem:[#allocation2 + $0xac] sm:$0x8] }
 0x473   : > { %6435 = vst [vmem:[#allocation2 + $0xb0] sm:$0x1] %v6434_v12  ;;  %v12209_v25 = vrot.slane %v16949_v3, 11  ;;  %6431 = vst [vmem:[#allocation2 + $0xa8] sm:$0xf] %v6430_v22  ;;  %v12211_v38 = vrot.slane %v16970_v41, 11 }
 0x474   : > { %6438 = vst [vmem:[#allocation2 + $0xb4] sm:$0xf] %v6437_v18  ;;  %6453 = vst.msk [vmem:[#allocation2] sm:$0xf] %vm671_vm3, %v6450_v60  ;;  %v12212_v44 = vrot.slane %v16972_v20, 11  ;;  %v12213_v35 = vrot.slane %v16974_v26, 11 }
 0x475   : > { %6449 = vst [vmem:[#allocation2 + $0xc8] sm:$0x1] %v6448_v55  ;;  %v12214_v54 = vrot.slane %v16976_v51, 11  ;;  %v6699_v62 = vld [vmem:[#allocation2 + $0x14] sm:$0x1]  ;;  %v12215_v32 = vrot.slane %v16994_v58, 11 }
 0x476   : > { %v6705_v5 = vld [vmem:[#allocation2 + $0x2c] sm:$0x1]  ;;  %6445 = vst [vmem:[#allocation2 + $0xc0] sm:$0xf] %v6444_v47  ;;  %v12216_v30 = vrot.slane %v16996_v23, 11  ;;  %v12217_v27 = vrot.slane %v16998_v6, 11  ;;  %v6700_v16 = vsel %vm14713_vm9, %v12209_v25, %v6699_v62 }
 0x477   : > { %v6702_v63 = vld [vmem:[#allocation2 + $0x20] sm:$0x1]  ;;  %v6708_v7 = vld [vmem:[#allocation2 + $0x38] sm:$0x1]  ;;  %v6622_v42 = vld [vmem:[#allocation2 + $0xc4] sm:$0x8]  ;;  %v6706_v43 = vsel %vm14713_vm9, %v12211_v38, %v6705_v5 }
 0x478   : > { %v12218_v39 = vrot.slane %v17016_v21, 11  ;;  %v12219_v15 = vrot.slane %v17034_v13, 11  ;;  %v12220_v53 = vrot.slane %v17036_v24, 11  ;;  %v12221_v36 = vrot.slane %v17046_v17, 11  ;;  %v6711_v40 = vld [vmem:[#allocation2 + $0x44] sm:$0x1] }
 0x479   : > { %v12222_v10 = vrot.slane %v17048_v46, 11  ;;  %v12224_v19 = vrot.slane %v6622_v42, 11  ;;  %v6714_v57 = vld [vmem:[#allocation2 + $0x50] sm:$0x1]  ;;  %v17069_v56 = vld [vmem:[#allocation2 + $0x4] sm:$0x8]  ;;  %v6703_v37 = vsel %vm14713_vm9, %v12210_v48, %v6702_v63  ;;  %v6709_v41 = vsel %vm14713_vm9, %v12212_v44, %v6708_v7 }
 0x47a   : > { %v17071_v50 = vld [vmem:[#allocation2 + $0x4] sm:$0xf]  ;;  %6701 = vst [vmem:[#allocation2 + $0x14] sm:$0x1] %v6700_v16  ;;  %6707 = vst [vmem:[#allocation2 + $0x2c] sm:$0x1] %v6706_v43  ;;  %v6712_v20 = vsel %vm14713_vm9, %v12213_v35, %v6711_v40  ;;  %v6715_v26 = vsel %vm14713_vm9, %v12214_v54, %v6714_v57 }
 0x47b   : > { %v6717_v51 = vld [vmem:[#allocation2 + $0x5c] sm:$0x1]  ;;  %v6720_v31 = vld [vmem:[#allocation2 + $0x68] sm:$0x1]  ;;  %v6723_v45 = vld [vmem:[#allocation2 + $0x74] sm:$0x1] }
 0x47c   : > { %v6463_v9 = vld [vmem:[#allocation2 + $0xc] sm:$0x2]  ;;  %v17081_v1 = vld [vmem:[#allocation2 + $0x10] sm:$0xf]  ;;  %6710 = vst [vmem:[#allocation2 + $0x38] sm:$0x1] %v6709_v41  ;;  %v6718_v61 = vsel %vm14713_vm9, %v12215_v32, %v6717_v51  ;;  %v6721_v34 = vsel %vm14713_vm9, %v12216_v30, %v6720_v31  ;;  %v6724_v58 = vsel %vm14713_vm9, %v12217_v27, %v6723_v45 }
 0x47d   : > { %6713 = vst [vmem:[#allocation2 + $0x44] sm:$0x1] %v6712_v20  ;;  %6716 = vst [vmem:[#allocation2 + $0x50] sm:$0x1] %v6715_v26  ;;  %v6726_v23 = vld [vmem:[#allocation2 + $0x80] sm:$0x1] }
 0x47e   : > { %v6729_v6 = vld [vmem:[#allocation2 + $0x8c] sm:$0x1]  ;;  %v6732_v14 = vld [vmem:[#allocation2 + $0x98] sm:$0x1]  ;;  %6719 = vst [vmem:[#allocation2 + $0x5c] sm:$0x1] %v6718_v61  ;;  %v6727_v8 = vsel %vm14713_vm9, %v12218_v39, %v6726_v23 }
 0x47f   : > { %6722 = vst [vmem:[#allocation2 + $0x68] sm:$0x1] %v6721_v34  ;;  %6725 = vst [vmem:[#allocation2 + $0x74] sm:$0x1] %v6724_v58  ;;  %v6730_v28 = vsel %vm14713_vm9, %v12219_v15, %v6729_v6  ;;  %v6733_v33 = vsel %vm14713_vm9, %v12220_v53, %v6732_v14  ;;  %v6735_v59 = vld [vmem:[#allocation2 + $0xa4] sm:$0x1] }
 0x480   : > { %v6738_v0 = vld [vmem:[#allocation2 + $0xb0] sm:$0x1]  ;;  %v6452_v21 = vld [vmem:[#allocation2 + $0x20] sm:$0x1]  ;;  %6728 = vst [vmem:[#allocation2 + $0x80] sm:$0x1] %v6727_v8  ;;  %v6736_v49 = vsel %vm14713_vm9, %v12221_v36, %v6735_v59 }
 0x481   : > { %6731 = vst [vmem:[#allocation2 + $0x8c] sm:$0x1] %v6730_v28  ;;  %6734 = vst [vmem:[#allocation2 + $0x98] sm:$0x1] %v6733_v33  ;;  %v6739_v4 = vsel %vm14713_vm9, %v12222_v10, %v6738_v0  ;;  %v6744_v22 = vld [vmem:[#allocation2 + $0xc8] sm:$0x1] }
 0x482   : > { %6455 = vst.msk [vmem:[#allocation2 + $0x8] sm:$0x1] %vm679_vm5, %v6452_v21  ;;  %v6462_v52 = vld [vmem:[#allocation2] sm:$0x2]  ;;  %6704 = vst [vmem:[#allocation2 + $0x20] sm:$0x1] %v6703_v37  ;;  %v6745_v12 = vsel %vm14713_vm9, %v12224_v19, %v6744_v22 }
 0x483   : > { %v17100_v2 = vld [vmem:[#allocation2 + $0x1c] sm:$0xf]  ;;  %6737 = vst [vmem:[#allocation2 + $0xa4] sm:$0x1] %v6736_v49  ;;  %6740 = vst [vmem:[#allocation2 + $0xb0] sm:$0x1] %v6739_v4 }
 0x484   : > { %v12190_v11 = vrot.slane %v6462_v52, 9  ;;  %v6552_v18 = vld [vmem:[#allocation2] sm:$0x1]  ;;  %v12208_v13 = vrot.slane %v17069_v56, 11  ;;  %v6809_v24 = vshll.u32 %v17071_v50, 16  ;;  %v6813_v60 = vshrl.u32 %v17071_v50, 16 }
 0x485   : > { %6746 = vst [vmem:[#allocation2 + $0xc8] sm:$0x1] %v6745_v12  ;;  %v12191_v47 = vrot.slane %v6463_v9, 9  ;;  %v6833_v55 = vshll.u32 %v17081_v1, 16  ;;  %v6837_v17 = vshrl.u32 %v17081_v1, 16  ;;  %v6857_v7 = vshll.u32 %v17100_v2, 16 }
 0x486   : > { %v6464_v46 = vld [vmem:[#allocation2 + $0x18] sm:$0x2]  ;;  %v6553_v25 = vsel %vm14664_vm8, %v12190_v11, %v6552_v18  ;;  %v17111_v48 = vrot.slane %v6809_v24, 5  ;;  %v6555_v38 = vld [vmem:[#allocation2 + $0xc] sm:$0x1]  ;;  %v6815_v54 = vrot.slane %v6813_v60, 4 }
 0x487   : > { %v12192_v44 = vrot.slane %v6464_v46, 9  ;;  %v6558_v35 = vld [vmem:[#allocation2 + $0x18] sm:$0x1]  ;;  %6554 = vst [vmem:[#allocation2] sm:$0x1] %v6553_v25  ;;  %v6556_v62 = vsel %vm14664_vm8, %v12191_v47, %v6555_v38  ;;  %v17115_v32 = vrot.slane %v6833_v55, 5 }
 0x488   : > { %v6784_v5 = vld [vmem:[#allocation2 + $0x14] sm:$0x1]  ;;  %v6839_v30 = vrot.slane %v6837_v17, 4  ;;  %6557 = vst [vmem:[#allocation2 + $0xc] sm:$0x1] %v6556_v62  ;;  %v6816_v39 = vor.u32 %v6815_v54, %v17111_v48  ;;  %v6861_v53 = vshrl.u32 %v17100_v2, 16 }
 0x489   : > { %v6843_v27 = vshll.u32 %v6784_v5, 16  ;;  %v6559_v63 = vsel %vm14664_vm8, %v12192_v44, %v6558_v35  ;;  %v6465_v42 = vld [vmem:[#allocation2 + $0x24] sm:$0x2]  ;;  %v17123_v10 = vld [vmem:[#allocation2 + $0x28] sm:$0xf]  ;;  %v17127_v40 = vrot.slane %v6857_v7, 5 }
 0x48a   : > { %v6840_v15 = vor.u32 %v6839_v30, %v17115_v32  ;;  %6560 = vst [vmem:[#allocation2 + $0x18] sm:$0x1] %v6559_v63  ;;  %v12193_v36 = vrot.slane %v6465_v42, 9  ;;  %v6696_v19 = vld [vmem:[#allocation2 + $0x8] sm:$0x1]  ;;  %v6863_v37 = vrot.slane %v6861_v53, 4 }
 0x48b   : > { %v17125_v16 = vrot.slane %v6843_v27, 5  ;;  %v6785_v43 = vld [vmem:[#allocation2 + $0x20] sm:$0x1]  ;;  %v6697_v57 = vsel %vm14713_vm9, %v12208_v13, %v6696_v19  ;;  %v6561_v41 = vld [vmem:[#allocation2 + $0x24] sm:$0x1]  ;;  %v6881_v45 = vshll.u32 %v17123_v10, 16 }
 0x48c   : > { %v17131_v56 = vrot.slane %v6840_v15, 4  ;;  %v6466_v20 = vld [vmem:[#allocation2 + $0x30] sm:$0x2]  ;;  %6698 = vst [vmem:[#allocation2 + $0x8] sm:$0x1] %v6697_v57  ;;  %v6867_v26 = vshll.u32 %v6785_v43, 16  ;;  %v6562_v51 = vsel %vm14664_vm8, %v12193_v36, %v6561_v41  ;;  %v6864_v33 = vor.u32 %v6863_v37, %v17127_v40 }
 0x48d   : > { %v6786_v31 = vld [vmem:[#allocation2 + $0x2c] sm:$0x1]  ;;  %v6885_v9 = vshrl.u32 %v17123_v10, 16  ;;  %v6817_v61 = vrot.slane %v6816_v39, 4  ;;  %v14246_v34 = vld [vmem:[#allocation8] sm:$0x3] }
 0x48e   : > { %v17138_v58 = vsel %vm1629_vm0, %v14246_v34, 0  ;;  %6563 = vst [vmem:[#allocation2 + $0x24] sm:$0x1] %v6562_v51  ;;  %v12194_v23 = vrot.slane %v6466_v20, 9  ;;  %v17140_v6 = vld [vmem:[#allocation2 + $0x34] sm:$0xf]  ;;  %v6846_v28 = vsel %vm14777_vm12, %v17131_v56, %v17125_v16 }
 0x48f   : > { %v17142_v14 = vld [vmem:[#allocation2] sm:$0xf]  ;;  %v17149_v59 = vrot.slane %v6881_v45, 5  ;;  %v6887_v0 = vrot.slane %v6885_v9, 4  ;;  %v6564_v21 = vld [vmem:[#allocation2 + $0x30] sm:$0x1] }
 0x490   : > { %v6800_v49 = vshrl.u32 %v17142_v14, 16  ;;  %v6803_v4 = vshll.u32 %v17142_v14, 16  ;;  %v17153_v22 = vld [vmem:[#allocation2 + $0xc] sm:$0xf]  ;;  %v6869_v52 = vrot.slane %v6867_v26, 5  ;;  %v6891_v12 = vshll.u32 %v6786_v31, 16 }
 0x491   : > { %v6824_v11 = vshrl.u32 %v17153_v22, 16  ;;  %v6827_v18 = vshll.u32 %v17153_v22, 16  ;;  %v17157_v13 = vld [vmem:[#allocation2 + $0x18] sm:$0xf]  ;;  %v6888_v24 = vor.u32 %v6887_v0, %v17149_v59  ;;  %v6565_v60 = vsel %vm14664_vm8, %v12194_v23, %v6564_v21  ;;  %v17182_v45 = vld [vmem:[#allocation2 + $0x40] sm:$0xf] }
 0x492   : > { %v6802_v47 = vrot.slane %v6800_v49, 4  ;;  %v6805_v55 = vrot.slane %v6803_v4, 5  ;;  %v6848_v17 = vshrl.u32 %v17157_v13, 16  ;;  %v6851_v46 = vshll.u32 %v17157_v13, 16  ;;  %6566 = vst [vmem:[#allocation2 + $0x30] sm:$0x1] %v6565_v60 }
 0x493   : > { %v6826_v25 = vrot.slane %v6824_v11, 4  ;;  %v6829_v38 = vrot.slane %v6827_v18, 5  ;;  %v6865_v44 = vrot.slane %v6864_v33, 4  ;;  %v6905_v35 = vshll.u32 %v17140_v6, 16  ;;  %v17165_v54 = vld [vmem:[#allocation2 + $0x8] sm:$0x1] }
 0x494   : > { %19423 = vst [vmem:[#allocation19_spill] sm:$0xff] %v17165_v54  ;;  %v6806_v62 = vor.u32 %v6805_v55, %v6802_v47  ;;  %v6850_v5 = vrot.slane %v6848_v17, 4  ;;  %v6853_v30 = vrot.slane %v6851_v46, 5  ;;  %v17167_v27 = vrot.slane %v6891_v12, 5  ;;  %v6787_v43 = vld [vmem:[#allocation2 + $0x38] sm:$0x1] }
 0x495   : > { %v6819_v63 = vshll.u32 %v17165_v54, 16  ;;  %v6830_v7 = vor.u32 %v6829_v38, %v6826_v25  ;;  %v6870_v42 = vsel %vm14777_vm12, %v6865_v44, %v6869_v52  ;;  %v17172_v39 = vld [vmem:[#allocation2 + $0x24] sm:$0xf]  ;;  %v6889_v15 = vrot.slane %v6888_v24, 4  ;;  %19424 = vst [vmem:[#allocation13_spill] sm:$0xff] %v17182_v45 }
 0x496   : > { %v6807_v53 = vrot.slane %v6806_v62, 4  ;;  %v6854_v36 = vor.u32 %v6853_v30, %v6850_v5  ;;  %v6872_v19 = vshrl.u32 %v17172_v39, 16  ;;  %v6875_v16 = vshll.u32 %v17172_v39, 16  ;;  %v6467_v21 = vld [vmem:[#allocation2 + $0x3c] sm:$0x2] }
 0x497   : > { %v6821_v57 = vrot.slane %v6819_v63, 5  ;;  %v6831_v56 = vrot.slane %v6830_v7, 4  ;;  %v17176_v37 = vrot.slane %v6905_v35, 5  ;;  %v6909_v41 = vshrl.u32 %v17140_v6, 16  ;;  %v17199_v24 = vld [vmem:[#allocation8 + $0x4] sm:$0x3] }
 0x498   : > { %v6812_v20 = vsel %vm14777_vm12, %v6807_v53, %v17111_v48  ;;  %v6855_v26 = vrot.slane %v6854_v36, 4  ;;  %v6874_v51 = vrot.slane %v6872_v19, 4  ;;  %v6877_v31 = vrot.slane %v6875_v16, 5  ;;  %v17202_v47 = vld [vmem:[#allocation2 + $0x44] sm:$0x1] }
 0x499   : > { %v6822_v9 = vsel %vm14777_vm12, %v6817_v61, %v6821_v57  ;;  %v6836_v34 = vsel %vm14777_vm12, %v6831_v56, %v17115_v32  ;;  %v17189_v23 = vld [vmem:[#allocation2 + $0x30] sm:$0xf]  ;;  %v6911_v33 = vrot.slane %v6909_v41, 4  ;;  %v6915_v0 = vshll.u32 %v6787_v43, 16  ;;  %v17197_v32 = vld [vmem:[#allocation2 + $0x4c] sm:$0xf] }
 0x49a   : > { %v12226_v49 = vcombine.low %v6812_v20, %v6822_v9  ;;  %v12227_v4 = vcombine.low %v6836_v34, %v6846_v28  ;;  %v6860_v48 = vsel %vm14777_vm12, %v6855_v26, %v17127_v40  ;;  %v6878_v52 = vor.u32 %v6877_v31, %v6874_v51  ;;  %19425 = vst [vmem:[#allocation14_spill] sm:$0xff] %v17202_v47  ;;  %v6567_v38 = vld [vmem:[#allocation2 + $0x3c] sm:$0x1]  ;;  %v6468_v44 = vld [vmem:[#allocation2 + $0x48] sm:$0x2] }
 0x49b   : > { %v12228_v12 = vcombine.low %v6860_v48, %v6870_v42  ;;  %v6896_v11 = vshrl.u32 %v17189_v23, 16  ;;  %v6899_v61 = vshll.u32 %v17189_v23, 16  ;;  %v6912_v18 = vor.u32 %v6911_v33, %v17176_v37  ;;  %v6469_v63 = vld [vmem:[#allocation2 + $0x54] sm:$0x2]  ;;  %v17222_v53 = vld [vmem:[#allocation2 + $0x50] sm:$0x1] }
 0x49c   : > { %13247 = vmatprep.mubr.msk.bf16.mxu1 %vm1580_vm13, %v12226_v49  ;;  %v6879_v60 = vrot.slane %v6878_v52, 4  ;;  %v12195_v28 = vrot.slane %v6467_v21, 9  ;;  %v6929_v40 = vshll.u32 %v17182_v45, 16  ;;  %v6933_v55 = vshrl.u32 %v17182_v45, 16  ;;  %v6570_v19 = vld [vmem:[#allocation2 + $0x48] sm:$0x1] }
 0x49d   : > { %13248 = vmatmul.mubr.msk.bf16.vlgmr.msra.gmra.mrb[0].mxu1 %vm1580_vm13, %v12227_v4  ;;  %v6894_v17 = vsel %vm14777_vm12, %v6889_v15, %v17167_v27  ;;  %v6898_v46 = vrot.slane %v6896_v11, 4  ;;  %v6901_v25 = vrot.slane %v6899_v61, 5  ;;  %v17219_v27 = vld [vmem:[#allocation2 + $0x58] sm:$0xf]  ;;  %v6913_v42 = vrot.slane %v6912_v18, 4 }
 0x49e   : > { %13280 = vmatpush3.bf16.msra.mxu1 %v17138_v58  ;;  %13251 = vmatprep.mubr.msk.bf16.mxu1 %vm1580_vm13, %v12228_v12  ;;  %v6884_v35 = vsel %vm14777_vm12, %v6879_v60, %v17149_v59  ;;  %v6568_v62 = vsel %vm14664_vm8, %v12195_v28, %v6567_v38  ;;  %v17217_v5 = vrot.slane %v6929_v40, 5  ;;  %v6935_v30 = vrot.slane %v6933_v55, 4  ;;  %19426 = vst [vmem:[#allocation20_spill] sm:$0xff] %v17219_v27  ;;  %v17228_v57 = vld [vmem:[#allocation2 + $0x64] sm:$0xf] }
 0x49f   : > { %v6902_v7 = vor.u32 %v6901_v25, %v6898_v46  ;;  %v6917_v15 = vrot.slane %v6915_v0, 5  ;;  %6569 = vst [vmem:[#allocation2 + $0x3c] sm:$0x1] %v6568_v62  ;;  %v6939_v58 = vshll.u32 %v17202_v47, 16  ;;  %14074 = vmatprep.subr.msk.bf16.mxu1 %vm1629_vm0, %v17199_v24  ;;  %v12229_v59 = vcombine.low %v6884_v35, %v6894_v17  ;;  %v6573_v26 = vld [vmem:[#allocation2 + $0x54] sm:$0x1] }
 0x4a0   : > { %v12196_v36 = vrot.slane %v6468_v44, 9  ;;  %v6953_v16 = vshll.u32 %v17197_v32, 16  ;;  %v6957_v43 = vshrl.u32 %v17197_v32, 16  ;;  %v6936_v41 = vor.u32 %v6935_v30, %v17217_v5  ;;  %v6470_v0 = vld [vmem:[#allocation2 + $0x60] sm:$0x2] }
 0x4a1   : > { %v6903_v56 = vrot.slane %v6902_v7, 4  ;;  %v12197_v20 = vrot.slane %v6469_v63, 9  ;;  %v6977_v51 = vshll.u32 %v17219_v27, 16  ;;  %v6963_v33 = vshll.u32 %v17222_v53, 16  ;;  %v17246_v52 = vld [vmem:[#allocation2 + $0x5c] sm:$0x1] }
 0x4a2   : > { %v6571_v31 = vsel %vm14664_vm8, %v12196_v36, %v6570_v19  ;;  %v17234_v9 = vrot.slane %v6953_v16, 5  ;;  %v6959_v34 = vrot.slane %v6957_v43, 4  ;;  %v6918_v49 = vsel %vm14777_vm12, %v6913_v42, %v6917_v15  ;;  %19427 = vst [vmem:[#allocation21_spill] sm:$0xff] %v17246_v52  ;;  %v6471_v12 = vld [vmem:[#allocation2 + $0x6c] sm:$0x2] }
 0x4a3   : > { %v6908_v21 = vsel %vm14777_vm12, %v6903_v56, %v17176_v37  ;;  %v17242_v4 = vrot.slane %v6939_v58, 5  ;;  %6572 = vst [vmem:[#allocation2 + $0x48] sm:$0x1] %v6571_v31  ;;  %v6574_v48 = vsel %vm14664_vm8, %v12197_v20, %v6573_v26  ;;  %v17249_v18 = vrot.slane %v6977_v51, 5  ;;  %v6576_v60 = vld [vmem:[#allocation2 + $0x60] sm:$0x1] }
 0x4a4   : > { %v12230_v11 = vcombine.low %v6908_v21, %v6918_v49  ;;  %v6960_v61 = vor.u32 %v6959_v34, %v17234_v9  ;;  %6575 = vst [vmem:[#allocation2 + $0x54] sm:$0x1] %v6574_v48  ;;  %v6981_v37 = vshrl.u32 %v17219_v27, 16  ;;  %v6937_v28 = vrot.slane %v6936_v41, 4  ;;  %v17253_v55 = vld [vmem:[#allocation2 + $0x68] sm:$0x1] }
 0x4a5   : > { %13252 = vmatmul.mubr.msk.bf16.gmra.mrb[4].mxu1 %vm1580_vm13, %v12229_v59  ;;  %v12198_v40 = vrot.slane %v6470_v0, 9  ;;  %v7001_v17 = vshll.u32 %v17228_v57, 16  ;;  %v7005_v46 = vshrl.u32 %v17228_v57, 16  ;;  %v17260_v38 = vrot.slane %v6963_v33, 5  ;;  %v17269_v15 = vld [vmem:[#allocation2 + $0x70] sm:$0xf] }
 0x4a6   : > { %13255 = vmatprep.mubr.msk.bf16.mxu1 %vm1580_vm13, %v12230_v11  ;;  %v17258_v25 = vld [vmem:[#allocation2 + $0x3c] sm:$0xf]  ;;  %v6983_v44 = vrot.slane %v6981_v37, 4  ;;  %v6987_v35 = vshll.u32 %v17246_v52, 16  ;;  %v12199_v62 = vrot.slane %v6471_v12, 9  ;;  %v17265_v7 = vrot.slane %v6960_v61, 4 }
 0x4a7   : > { %19428 = vst [vmem:[#allocation17_spill] sm:$0xff] %v17258_v25  ;;  %v6920_v30 = vshrl.u32 %v17258_v25, 16  ;;  %v6923_v63 = vshll.u32 %v17258_v25, 16  ;;  %v6577_v42 = vsel %vm14664_vm8, %v12198_v40, %v6576_v60  ;;  %v17272_v59 = vrot.slane %v7001_v17, 5  ;;  %v6579_v16 = vld [vmem:[#allocation2 + $0x6c] sm:$0x1] }
 0x4a8   : > { %v6984_v58 = vor.u32 %v6983_v44, %v17249_v18  ;;  %6578 = vst [vmem:[#allocation2 + $0x60] sm:$0x1] %v6577_v42  ;;  %v7007_v36 = vrot.slane %v7005_v46, 4  ;;  %v7011_v19 = vshll.u32 %v17253_v55, 16  ;;  %v6942_v41 = vsel %vm14777_vm12, %v6937_v28, %v17242_v4  ;;  %v6456_v26 = vld [vmem:[#allocation2 + $0xb4] sm:$0xf] }
 0x4a9   : > { %v6922_v43 = vrot.slane %v6920_v30, 4  ;;  %v6925_v56 = vrot.slane %v6923_v63, 5  ;;  %v6580_v20 = vsel %vm14664_vm8, %v12199_v62, %v6579_v16  ;;  %v6966_v31 = vsel %vm14777_vm12, %v17265_v7, %v17260_v38  ;;  %6459 = vst.msk [vmem:[#allocation2 + $0xcc] sm:$0xf] %vm671_vm3, %v6456_v26  ;;  %v17296_v11 = vld [vmem:[#allocation2 + $0x74] sm:$0x1] }
 0x4aa   : > { %v17280_v51 = vld [vmem:[#allocation2 + $0x48] sm:$0xf]  ;;  %v17286_v34 = vrot.slane %v6987_v35, 5  ;;  %6581 = vst [vmem:[#allocation2 + $0x6c] sm:$0x1] %v6580_v20  ;;  %v7025_v33 = vshll.u32 %v17269_v15, 16  ;;  %v7008_v12 = vor.u32 %v7007_v36, %v17272_v59 }
 0x4ab   : > { %v7029_v0 = vshrl.u32 %v17269_v15, 16  ;;  %v6926_v21 = vor.u32 %v6925_v56, %v6922_v43  ;;  %v6944_v49 = vshrl.u32 %v17280_v51, 16  ;;  %v6947_v4 = vshll.u32 %v17280_v51, 16  ;;  %v17293_v48 = vld [vmem:[#allocation2 + $0x54] sm:$0xf] }
 0x4ac   : > { %19429 = vst [vmem:[#allocation22_spill] sm:$0xff] %v17293_v48  ;;  %v6968_v61 = vshrl.u32 %v17293_v48, 16  ;;  %v6971_v37 = vshll.u32 %v17293_v48, 16  ;;  %v6985_v60 = vrot.slane %v6984_v58, 4  ;;  %v17300_v28 = vrot.slane %v7011_v19, 5 }
 0x4ad   : > { %v6472_v40 = vld [vmem:[#allocation2 + $0x78] sm:$0x2]  ;;  %v6927_v17 = vrot.slane %v6926_v21, 4  ;;  %v6946_v46 = vrot.slane %v6944_v49, 4  ;;  %v6949_v38 = vrot.slane %v6947_v4, 5  ;;  %v17302_v44 = vrot.slane %v7025_v33, 5 }
 0x4ae   : > { %v6970_v35 = vrot.slane %v6968_v61, 4  ;;  %v6973_v62 = vrot.slane %v6971_v37, 5  ;;  %v7031_v30 = vrot.slane %v7029_v0, 4  ;;  %v7035_v63 = vshll.u32 %v17296_v11, 16  ;;  %v17305_v7 = vld [vmem:[#allocation2 + $0x7c] sm:$0xf] }
 0x4af   : > { %v6932_v42 = vsel %vm14777_vm12, %v6927_v17, %v17217_v5  ;;  %v6950_v58 = vor.u32 %v6949_v38, %v6946_v46  ;;  %v17310_v36 = vld [vmem:[#allocation2 + $0x60] sm:$0xf]  ;;  %v7009_v19 = vrot.slane %v7008_v12, 4  ;;  %v12200_v16 = vrot.slane %v6472_v40, 9  ;;  %v6582_v33 = vld [vmem:[#allocation2 + $0x78] sm:$0x1] }
 0x4b0   : > { %v12231_v43 = vcombine.low %v6932_v42, %v6942_v41  ;;  %v6974_v56 = vor.u32 %v6973_v62, %v6970_v35  ;;  %v6992_v20 = vshrl.u32 %v17310_v36, 16  ;;  %v6995_v26 = vshll.u32 %v17310_v36, 16  ;;  %v6473_v35 = vld [vmem:[#allocation2 + $0x84] sm:$0x2]  ;;  %v17332_v62 = vld [vmem:[#allocation2 + $0x88] sm:$0xf] }
 0x4b1   : > { %v6951_v0 = vrot.slane %v6950_v58, 4  ;;  %v17314_v21 = vld [vmem:[#allocation2 + $0x6c] sm:$0xf]  ;;  %v7032_v49 = vor.u32 %v7031_v30, %v17302_v44  ;;  %v6583_v5 = vsel %vm14664_vm8, %v12200_v16, %v6582_v33  ;;  %v7049_v4 = vshll.u32 %v17305_v7, 16 }
 0x4b2   : > { %13256 = vmatmul.mubr.msk.bf16.gmra.mrb[8].mxu1 %vm1580_vm13, %v12231_v43  ;;  %v6975_v12 = vrot.slane %v6974_v56, 4  ;;  %v6994_v41 = vrot.slane %v6992_v20, 4  ;;  %v6997_v61 = vrot.slane %v6995_v26, 5  ;;  %v7016_v37 = vshrl.u32 %v17314_v21, 16  ;;  %6584 = vst [vmem:[#allocation2 + $0x78] sm:$0x1] %v6583_v5 }
 0x4b3   : > { %v6956_v40 = vsel %vm14777_vm12, %v6951_v0, %v17234_v9  ;;  %v6990_v17 = vsel %vm14777_vm12, %v6985_v60, %v17286_v34  ;;  %v7014_v46 = vsel %vm14777_vm12, %v7009_v19, %v17300_v28  ;;  %v7019_v38 = vshll.u32 %v17314_v21, 16  ;;  %v17334_v43 = vld [vmem:[#allocation2 + $0x80] sm:$0x1]  ;;  %v6585_v19 = vld [vmem:[#allocation2 + $0x84] sm:$0x1] }
 0x4b4   : > { %v12232_v30 = vcombine.low %v6956_v40, %v6966_v31  ;;  %v6998_v42 = vor.u32 %v6997_v61, %v6994_v41  ;;  %v7018_v58 = vrot.slane %v7016_v37, 4  ;;  %v7037_v16 = vrot.slane %v7035_v63, 5  ;;  %v17343_v26 = vld [vmem:[#allocation2 + $0x8c] sm:$0x1]  ;;  %v17355_v37 = vld [vmem:[#allocation2 + $0x94] sm:$0xf] }
 0x4b5   : > { %v6980_v9 = vsel %vm14777_vm12, %v6975_v12, %v17249_v18  ;;  %v7021_v34 = vrot.slane %v7019_v38, 5  ;;  %v17339_v60 = vrot.slane %v7049_v4, 5  ;;  %v7053_v28 = vshrl.u32 %v17305_v7, 16  ;;  %v6474_v4 = vld [vmem:[#allocation2 + $0x90] sm:$0x2] }
 0x4b6   : > { %13259 = vmatprep.mubr.msk.bf16.mxu1 %vm1580_vm13, %v12232_v30  ;;  %v6999_v56 = vrot.slane %v6998_v42, 4  ;;  %v7033_v20 = vrot.slane %v7032_v49, 4  ;;  %v12201_v31 = vrot.slane %v6473_v35, 9  ;;  %v7073_v63 = vshll.u32 %v17332_v62, 16 }
 0x4b7   : > { %v7022_v33 = vor.u32 %v7021_v34, %v7018_v58  ;;  %v7055_v0 = vrot.slane %v7053_v28, 4  ;;  %v7059_v5 = vshll.u32 %v17334_v43, 16  ;;  %v7077_v18 = vshrl.u32 %v17332_v62, 16  ;;  %v17360_v58 = vld [vmem:[#allocation2 + $0xa0] sm:$0xf] }
 0x4b8   : > { %v12233_v12 = vcombine.low %v6980_v9, %v6990_v17  ;;  %v7004_v41 = vsel %vm14777_vm12, %v6999_v56, %v17272_v59  ;;  %v6586_v49 = vsel %vm14664_vm8, %v12201_v31, %v6585_v19  ;;  %v17353_v61 = vrot.slane %v7073_v63, 5  ;;  %v6588_v17 = vld [vmem:[#allocation2 + $0x90] sm:$0x1]  ;;  %v17368_v31 = vld [vmem:[#allocation2 + $0x98] sm:$0x1] }
 0x4b9   : > { %v12234_v40 = vcombine.low %v7004_v41, %v7014_v46  ;;  %v7023_v38 = vrot.slane %v7022_v33, 4  ;;  %v17357_v35 = vld [vmem:[#allocation2 + $0x78] sm:$0xf]  ;;  %v7056_v30 = vor.u32 %v7055_v0, %v17339_v60  ;;  %6587 = vst [vmem:[#allocation2 + $0x84] sm:$0x1] %v6586_v49  ;;  %v7079_v42 = vrot.slane %v7077_v18, 4 }
 0x4ba   : > { %13260 = vmatmul.mubr.msk.bf16.gmra.mrb[12].mxu1 %vm1580_vm13, %v12233_v12  ;;  %v7040_v59 = vshrl.u32 %v17357_v35, 16  ;;  %v7043_v9 = vshll.u32 %v17357_v35, 16  ;;  %v7083_v34 = vshll.u32 %v17343_v26, 16  ;;  %v12202_v28 = vrot.slane %v6474_v4, 9  ;;  %v6475_v46 = vld [vmem:[#allocation2 + $0x9c] sm:$0x2] }
 0x4bb   : > { %13263 = vmatprep.mubr.msk.bf16.mxu1 %vm1580_vm13, %v12234_v40  ;;  %v7061_v19 = vrot.slane %v7059_v5, 5  ;;  %v7080_v56 = vor.u32 %v7079_v42, %v17353_v61  ;;  %v7097_v63 = vshll.u32 %v17355_v37, 16  ;;  %v7028_v33 = vsel %vm14777_vm12, %v7023_v38, %v17302_v44  ;;  %v17376_v4 = vld [vmem:[#allocation2 + $0xa4] sm:$0x1]  ;;  %v6591_v40 = vld [vmem:[#allocation2 + $0x9c] sm:$0x1] }
 0x4bc   : > { %v7042_v0 = vrot.slane %v7040_v59, 4  ;;  %v7045_v18 = vrot.slane %v7043_v9, 5  ;;  %v6589_v12 = vsel %vm14664_vm8, %v12202_v28, %v6588_v17  ;;  %v7038_v5 = vsel %vm14777_vm12, %v7033_v20, %v7037_v16  ;;  %v6476_v42 = vld [vmem:[#allocation2 + $0xa8] sm:$0x2]  ;;  %v17385_v28 = vld [vmem:[#allocation2 + $0xac] sm:$0xf] }
 0x4bd   : > { %v7057_v41 = vrot.slane %v7056_v30, 4  ;;  %6590 = vst [vmem:[#allocation2 + $0x90] sm:$0x1] %v6589_v12  ;;  %v7101_v49 = vshrl.u32 %v17355_v37, 16  ;;  %v7085_v52 = vrot.slane %v7083_v34, 5  ;;  %v12203_v47 = vrot.slane %v6475_v46, 9 }
 0x4be   : > { %v7046_v3 = vor.u32 %v7045_v18, %v7042_v0  ;;  %v7121_v44 = vshll.u32 %v17360_v58, 16  ;;  %v12235_v38 = vcombine.low %v7028_v33, %v7038_v5  ;;  %v7081_v59 = vrot.slane %v7080_v56, 4  ;;  %v6594_v18 = vld [vmem:[#allocation2 + $0xa8] sm:$0x1]  ;;  %v6477_v12 = vld [vmem:[#allocation2 + $0xb4] sm:$0x2] }
 0x4bf   : > { %v7062_v17 = vsel %vm14777_vm12, %v7057_v41, %v7061_v19  ;;  %v7125_v9 = vshrl.u32 %v17360_v58, 16  ;;  %v17389_v30 = vrot.slane %v7097_v63, 5  ;;  %v7107_v0 = vshll.u32 %v17368_v31, 16 }
 0x4c0   : > { %v7047_v16 = vrot.slane %v7046_v3, 4  ;;  %v17387_v20 = vld [vmem:[#allocation2 + $0x84] sm:$0xf]  ;;  %v6592_v34 = vsel %vm14664_vm8, %v12203_v47, %v6591_v40  ;;  %v7103_v19 = vrot.slane %v7101_v49, 4  ;;  %v7131_v56 = vshll.u32 %v17376_v4, 16 }
 0x4c1   : > { %v7064_v46 = vshrl.u32 %v17387_v20, 16  ;;  %v7067_v33 = vshll.u32 %v17387_v20, 16  ;;  %6593 = vst [vmem:[#allocation2 + $0x9c] sm:$0x1] %v6592_v34  ;;  %v17401_v63 = vrot.slane %v7121_v44, 5  ;;  %v12204_v5 = vrot.slane %v6476_v42, 9 }
 0x4c2   : > { %13264 = vmatmul.mubr.msk.bf16.gmra.mrb[16].mxu1 %vm1580_vm13, %v12235_v38  ;;  %v7052_v3 = vsel %vm14777_vm12, %v7047_v16, %v17339_v60  ;;  %v7145_v47 = vshll.u32 %v17385_v28, 16  ;;  %v7127_v49 = vrot.slane %v7125_v9, 4  ;;  %v7149_v38 = vshrl.u32 %v17385_v28, 16  ;;  %v17416_v9 = vld [vmem:[#allocation2 + $0xb0] sm:$0x1] }
 0x4c3   : > { %v12236_v41 = vcombine.low %v7052_v3, %v7062_v17  ;;  %v7066_v40 = vrot.slane %v7064_v46, 4  ;;  %v7069_v54 = vrot.slane %v7067_v33, 5  ;;  %v6595_v48 = vsel %vm14664_vm8, %v12204_v5, %v6594_v18  ;;  %v17418_v16 = vld [vmem:[#allocation2 + $0xb8] sm:$0xf] }
 0x4c4   : > { %v17404_v34 = vld [vmem:[#allocation2 + $0x90] sm:$0xf]  ;;  %v17408_v27 = vrot.slane %v7145_v47, 5  ;;  %v7086_v42 = vsel %vm14777_vm12, %v7081_v59, %v7085_v52  ;;  %6596 = vst [vmem:[#allocation2 + $0xa8] sm:$0x1] %v6595_v48  ;;  %v7104_v46 = vor.u32 %v7103_v19, %v17389_v30  ;;  %v7109_v33 = vrot.slane %v7107_v0, 5 }
 0x4c5   : > { %13267 = vmatprep.mubr.msk.bf16.mxu1 %vm1580_vm13, %v12236_v41  ;;  %v7070_v60 = vor.u32 %v7069_v54, %v7066_v40  ;;  %v7088_v44 = vshrl.u32 %v17404_v34, 16  ;;  %v7091_v17 = vshll.u32 %v17404_v34, 16  ;;  %v7151_v18 = vrot.slane %v7149_v38, 4  ;;  %v6597_v52 = vld [vmem:[#allocation2 + $0xb4] sm:$0x1] }
 0x4c6   : > { %v12205_v3 = vrot.slane %v6477_v12, 9  ;;  %v7128_v41 = vor.u32 %v7127_v49, %v17401_v63  ;;  %v7133_v40 = vrot.slane %v7131_v56, 5  ;;  %v7155_v25 = vshll.u32 %v17416_v9, 16 }
 0x4c7   : > { %v7071_v5 = vrot.slane %v7070_v60, 4  ;;  %v7090_v47 = vrot.slane %v7088_v44, 4  ;;  %v7093_v54 = vrot.slane %v7091_v17, 5  ;;  %v7152_v48 = vor.u32 %v7151_v18, %v17408_v27 }
 0x4c8   : > { %v17422_v59 = vld [vmem:[#allocation2 + $0x9c] sm:$0xf]  ;;  %v6598_v45 = vsel %vm14664_vm8, %v12205_v3, %v6597_v52  ;;  %v7105_v60 = vrot.slane %v7104_v46, 4  ;;  %v7169_v56 = vshll.u32 %v17418_v16, 16  ;;  %v7173_v44 = vshrl.u32 %v17418_v16, 16 }
 0x4c9   : > { %v7076_v0 = vsel %vm14777_vm12, %v7071_v5, %v17353_v61  ;;  %v7094_v19 = vor.u32 %v7093_v54, %v7090_v47  ;;  %v7112_v12 = vshrl.u32 %v17422_v59, 16  ;;  %v7115_v49 = vshll.u32 %v17422_v59, 16  ;;  %6599 = vst [vmem:[#allocation2 + $0xb4] sm:$0x1] %v6598_v45  ;;  %v17435_v52 = vld [vmem:[#allocation2 + $0xbc] sm:$0x1] }
 0x4ca   : > { %v12237_v38 = vcombine.low %v7076_v0, %v7086_v42  ;;  %v7129_v3 = vrot.slane %v7128_v41, 4  ;;  %v7110_v61 = vsel %vm14777_vm12, %v7105_v60, %v7109_v33  ;;  %v7153_v45 = vrot.slane %v7152_v48, 4 }
 0x4cb   : > { %v7095_v17 = vrot.slane %v7094_v19, 4  ;;  %v7114_v18 = vrot.slane %v7112_v12, 4  ;;  %v7117_v29 = vrot.slane %v7115_v49, 5  ;;  %v17440_v5 = vld [vmem:[#allocation2 + $0xa8] sm:$0xf]  ;;  %v7157_v42 = vrot.slane %v7155_v25, 5 }
 0x4cc   : > { %13268 = vmatmul.mubr.msk.bf16.gmra.mrb[20].mxu1 %vm1580_vm13, %v12237_v38  ;;  %v7136_v54 = vshrl.u32 %v17440_v5, 16  ;;  %v7139_v41 = vshll.u32 %v17440_v5, 16  ;;  %v7171_v19 = vrot.slane %v7169_v56, 5  ;;  %v7175_v12 = vrot.slane %v7173_v44, 4 }
 0x4cd   : > { %v7100_v46 = vsel %vm14777_vm12, %v7095_v17, %v17389_v30  ;;  %v7118_v47 = vor.u32 %v7117_v29, %v7114_v18  ;;  %v7179_v49 = vshll.u32 %v17435_v52, 16  ;;  %v7134_v25 = vsel %vm14777_vm12, %v7129_v3, %v7133_v40 }
 0x4ce   : > { %v12238_v0 = vcombine.low %v7100_v46, %v7110_v61  ;;  %v7138_v33 = vrot.slane %v7136_v54, 4  ;;  %v7141_v60 = vrot.slane %v7139_v41, 5  ;;  %v7158_v29 = vsel %vm14777_vm12, %v7153_v45, %v7157_v42 }
 0x4cf   : > { %v7119_v38 = vrot.slane %v7118_v47, 4  ;;  %v7176_v61 = vor.u32 %v7175_v12, %v7171_v19  ;;  %v7181_v46 = vrot.slane %v7179_v49, 5  ;;  %v12264_v40 = vcombine.low %v17280_v51, %v17197_v32  ;;  %v19436_v51 = vld [vmem:[#allocation19_spill] sm:$0xff] }
 0x4d0   : > { %13271 = vmatprep.mubr.msk.bf16.mxu1 %vm1580_vm13, %v12238_v0  ;;  %v17453_v30 = vld [vmem:[#allocation2 + $0xb4] sm:$0xf]  ;;  %v7142_v56 = vor.u32 %v7141_v60, %v7138_v33  ;;  %v12266_v42 = vcombine.low %v17310_v36, %v17228_v57  ;;  %v12268_v54 = vcombine.low %v17357_v35, %v17305_v7  ;;  %v12269_v41 = vcombine.low %v17387_v20, %v17332_v62 }
 0x4d1   : > { %v7124_v48 = vsel %vm14777_vm12, %v7119_v38, %v17401_v63  ;;  %v7160_v44 = vshrl.u32 %v17453_v30, 16  ;;  %v7163_v17 = vshll.u32 %v17453_v30, 16  ;;  %v12267_v63 = vcombine.low %v17314_v21, %v17269_v15 }
 0x4d2   : > { %v12239_v18 = vcombine.low %v7124_v48, %v7134_v25  ;;  %v7143_v3 = vrot.slane %v7142_v56, 4  ;;  %v12270_v0 = vcombine.low %v17404_v34, %v17355_v37  ;;  %v12271_v38 = vcombine.low %v17422_v59, %v17360_v58  ;;  %v7738_v34 = vld [vmem:[#allocation2 + $0xc] sm:$0xe]  ;;  %v14250_v59 = vld [vmem:[#allocation2 + $0x14] sm:$0x1] }
 0x4d3   : > { %v7162_v47 = vrot.slane %v7160_v44, 4  ;;  %v7165_v45 = vrot.slane %v7163_v17, 5  ;;  %v12272_v33 = vcombine.low %v17440_v5, %v17385_v28  ;;  %v12273_v25 = vcombine.low %v17453_v30, %v17418_v16 }
 0x4d4   : > { %13272 = vmatmul.mubr.msk.bf16.gmra.mrb[24].mxu1 %vm1580_vm13, %v12239_v18  ;;  %v7148_v12 = vsel %vm14777_vm12, %v7143_v3, %v17408_v27  ;;  %v7177_v56 = vrot.slane %v7176_v61, 4  ;;  %v12258_v18 = vcombine.low %v17142_v14, %v17071_v50  ;;  %v7829_v61 = vrot.slane %v17197_v32, 5  ;;  %v7746_v14 = vld [vmem:[#allocation2 + $0x6c] sm:$0xe]  ;;  %v14247_v32 = vld [vmem:[#allocation2 + $0x4] sm:$0xf] }
 0x4d5   : > { %v7166_v49 = vor.u32 %v7165_v45, %v7162_v47  ;;  %v12240_v60 = vcombine.low %v7148_v12, %v7158_v29  ;;  %v7743_v29 = vld [vmem:[#allocation2 + $0x48] sm:$0xe]  ;;  %v7745_v47 = vld [vmem:[#allocation2 + $0x60] sm:$0xe]  ;;  %v7832_v12 = vrot.slane %v17222_v53, 5  ;;  %v12260_v50 = vcombine.low %v17157_v13, %v17100_v2 }
 0x4d6   : > { %v7182_v27 = vsel %vm14777_vm12, %v7177_v56, %v7181_v46  ;;  %v12296_v3 = vrot.slane %v7743_v29, 9  ;;  %v7831_v45 = vrot.slane %v7829_v61, 4  ;;  %v7996_v46 = vsel %vm1629_vm0, %v17199_v24, 0 }
 0x4d7   : > { %v7167_v48 = vrot.slane %v7166_v49, 4  ;;  %13275 = vmatprep.mubr.msk.bf16.mxu1 %vm1580_vm13, %v12240_v60  ;;  %v17499_v49 = vld [vmem:[#allocation8 + $0x6] sm:$0x3]  ;;  %v12298_v53 = vrot.slane %v7745_v47, 9  ;;  %v7846_v13 = vrot.slane %v17253_v55, 5  ;;  %v7790_v36 = vrot.slane %v19436_v51, 5 }
 0x4d8   : > { %v17507_v56 = vsel %vm15316_vm1, %v7831_v45, %v7832_v12  ;;  %v7749_v45 = vld [vmem:[#allocation2 + $0x90] sm:$0xe] }
 0x4d9   : > { %v7172_v44 = vsel %vm14777_vm12, %v7167_v48, %v7171_v19  ;;  %v12259_v19 = vcombine.low %v17153_v22, %v17081_v1  ;;  %v17503_v48 = vsel %vm15316_vm1, %v12296_v3, %v7829_v61  ;;  %v7843_v1 = vrot.slane %v17228_v57, 5  ;;  %v7747_v22 = vld [vmem:[#allocation2 + $0x78] sm:$0xe]  ;;  %v7748_v61 = vld [vmem:[#allocation2 + $0x84] sm:$0xe] }
 0x4da   : > { %v12241_v17 = vcombine.low %v7172_v44, %v7182_v27  ;;  %v12299_v44 = vrot.slane %v7746_v14, 9  ;;  %v7850_v27 = vrot.slane %v17269_v15, 5  ;;  %v12300_v29 = vrot.slane %v7747_v22, 9  ;;  %v7750_v22 = vld [vmem:[#allocation2 + $0x9c] sm:$0xe] }
 0x4db   : > { %v7845_v24 = vrot.slane %v7843_v1, 4  ;;  %v7857_v3 = vrot.slane %v17305_v7, 5  ;;  %v17524_v55 = vsel %vm15316_vm1, %v12298_v53, %v7843_v1  ;;  %v12301_v14 = vrot.slane %v7748_v61, 9  ;;  %v7737_v15 = vld [vmem:[#allocation2] sm:$0xe] }
 0x4dc   : > { %13276 = vmatmul.mubr.msk.bf16.gmra.mrb[28].mxu1 %vm1580_vm13, %v12241_v17  ;;  %v12261_v17 = vcombine.low %v17172_v39, %v17123_v10  ;;  %v17532_v10 = vsel %vm15316_vm1, %v12299_v44, %v7850_v27  ;;  %v7852_v39 = vrot.slane %v7850_v27, 4  ;;  %v7864_v53 = vrot.slane %v17332_v62, 5  ;;  %v7751_v27 = vld [vmem:[#allocation2 + $0xa8] sm:$0xe] }
 0x4dd   : > { %13281 = vmatprep.mubr.msk.bf16.mxu1 %vm1580_vm13, %v12258_v18  ;;  %v7853_v18 = vrot.slane %v17296_v11, 5  ;;  %v17528_v47 = vsel %vm15316_vm1, %v7845_v24, %v7846_v13  ;;  %v17538_v12 = vsel %vm15316_vm1, %v12300_v29, %v7857_v3  ;;  %v7867_v1 = vrot.slane %v17343_v26, 5  ;;  %v6600_v29 = vld [vmem:[#allocation2 + $0xc0] sm:$0x1]  ;;  %v17844_v13 = vld [vmem:[#allocation2 + $0xa4] sm:$0x1] }
 0x4de   : > { %v12302_v44 = vrot.slane %v7749_v45, 9  ;;  %v7874_v26 = vrot.slane %v17368_v31, 5  ;;  %v17562_v61 = vsel %vm15316_vm1, %v12301_v14, %v7864_v53  ;;  %v12303_v45 = vrot.slane %v7750_v22, 9 }
 0x4df   : > { %v7885_v31 = vrot.slane %v17385_v28, 5  ;;  %v7888_v14 = vrot.slane %v17416_v9, 5  ;;  %v7787_v57 = vrot.slane %v14247_v32, 5  ;;  %v12290_v7 = vrot.slane %v7737_v15, 9  ;;  %v14251_v28 = vld [vmem:[#allocation2 + $0x20] sm:$0x1] }
 0x4e0   : > { %v7804_v5 = vrot.slane %v14251_v28, 5  ;;  %v7741_v32 = vld [vmem:[#allocation2 + $0x30] sm:$0xe]  ;;  %v14255_v15 = vld [vmem:[#allocation2 + $0x38] sm:$0x1] }
 0x4e1   : > { %v7789_v21 = vrot.slane %v7787_v57, 4  ;;  %v7788_v20 = vsel %vm15316_vm1, %v12290_v7, %v7787_v57  ;;  %v17678_v57 = vld [vmem:[#allocation8 + $0x8] sm:$0x3]  ;;  %v7818_v51 = vrot.slane %v14255_v15, 5  ;;  %v12294_v7 = vrot.slane %v7741_v32, 9 }
 0x4e2   : > { %v17721_v15 = vld [vmem:[#allocation2 + $0x44] sm:$0x1] }
 0x4e3   : > { %v7791_v62 = vsel %vm15316_vm1, %v7789_v21, %v7790_v36 }
 0x4e4   : > { %13282 = vmatmul.mubr.msk.bf16.vlgmr.msra.gmra.mrb[0].mxu1 %vm1580_vm13, %v12259_v19  ;;  %v7859_v19 = vrot.slane %v7857_v3, 4  ;;  %v7866_v3 = vrot.slane %v7864_v53, 4 }
 0x4e5   : > { %13314 = vmatpush3.bf16.msra.mxu1 %v7996_v46  ;;  %13285 = vmatprep.mubr.msk.bf16.mxu1 %vm1580_vm13, %v12260_v50  ;;  %v7860_v46 = vrot.slane %v17334_v43, 5  ;;  %v17543_v50 = vsel %vm15316_vm1, %v7852_v39, %v7853_v18  ;;  %v7871_v43 = vrot.slane %v17355_v37, 5  ;;  %v12262_v18 = vcombine.low %v17189_v23, %v17140_v6  ;;  %v14248_v37 = vld [vmem:[#allocation2 + $0x10] sm:$0xf] }
 0x4e6   : > { %14075 = vmatprep.subr.msk.bf16.mxu1 %vm1629_vm0, %v17499_v49  ;;  %v17568_v6 = vsel %vm15316_vm1, %v7866_v3, %v7867_v1  ;;  %v7881_v23 = vrot.slane %v17376_v4, 5  ;;  %v6478_v1 = vld [vmem:[#allocation2 + $0xc0] sm:$0x2]  ;;  %v7887_v3 = vrot.slane %v7885_v31, 4  ;;  %v7794_v35 = vrot.slane %v14248_v37, 5 }
 0x4e7   : > { %v17551_v24 = vsel %vm15316_vm1, %v7859_v19, %v7860_v46  ;;  %v7873_v39 = vrot.slane %v7871_v43, 4  ;;  %v7878_v19 = vrot.slane %v17360_v58, 5  ;;  %v12304_v46 = vrot.slane %v7751_v27, 9  ;;  %v17856_v4 = vld [vmem:[#allocation2 + $0xac] sm:$0xf] }
 0x4e8   : > { %v17576_v53 = vsel %vm15316_vm1, %v12302_v44, %v7871_v43  ;;  %v17603_v9 = vsel %vm15316_vm1, %v7887_v3, %v7888_v14  ;;  %v9286_v14 = vld [vmem:[#allocation2 + $0x90] sm:$0xe] }
 0x4e9   : > { %v17580_v22 = vsel %vm15316_vm1, %v7873_v39, %v7874_v26  ;;  %v17586_v27 = vsel %vm15316_vm1, %v12303_v45, %v7878_v19  ;;  %v7892_v26 = vrot.slane %v17418_v16, 5  ;;  %v7895_v39 = vrot.slane %v17435_v52, 5  ;;  %v14252_v16 = vld [vmem:[#allocation2 + $0x28] sm:$0xf] }
 0x4ea   : > { %v17599_v45 = vsel %vm15316_vm1, %v12304_v46, %v7885_v31  ;;  %v7808_v30 = vrot.slane %v14252_v16, 5  ;;  %v19439_v16 = vcombine.low %v17503_v48, %v17507_v56  ;;  %v17718_v48 = vld [vmem:[#allocation2 + $0x40] sm:$0xf] }
 0x4eb   : > { %v7894_v52 = vrot.slane %v7892_v26, 4 }
 0x4ec   : > { %13286 = vmatmul.mubr.msk.bf16.gmra.mrb[4].mxu1 %vm1580_vm13, %v12261_v17  ;;  %v7752_v17 = vld [vmem:[#allocation2 + $0xb4] sm:$0xe]  ;;  %v7810_v36 = vrot.slane %v7808_v30, 4 }
 0x4ed   : > { %13289 = vmatprep.mubr.msk.bf16.mxu1 %vm1580_vm13, %v12262_v18  ;;  %v7880_v18 = vrot.slane %v7878_v19, 4  ;;  %v12305_v43 = vrot.slane %v7752_v17, 9  ;;  %v12206_v19 = vrot.slane %v6478_v1, 9  ;;  %v17618_v31 = vsel %vm15316_vm1, %v7894_v52, %v7895_v39  ;;  %v19435_v1 = vld [vmem:[#allocation22_spill] sm:$0xff] }
 0x4ef   : > { %v17591_v44 = vsel %vm15316_vm1, %v7880_v18, %v7881_v23  ;;  %v19431_v23 = vld [vmem:[#allocation13_spill] sm:$0xff]  ;;  %v6601_v2 = vsel %vm14664_vm8, %v12206_v19, %v6600_v29  ;;  %v17614_v46 = vsel %vm15316_vm1, %v12305_v43, %v7892_v26  ;;  %v19434_v29 = vld [vmem:[#allocation20_spill] sm:$0xff]  ;;  %v8354_v19 = vsel %vm1629_vm0, %v17499_v49, 0 }
 0x4f0   : > { %v19432_v18 = vld [vmem:[#allocation17_spill] sm:$0xff]  ;;  %6602 = vst [vmem:[#allocation2 + $0xc0] sm:$0x1] %v6601_v2  ;;  %v12265_v3 = vcombine.low %v19435_v1, %v19434_v29  ;;  %v6457_v43 = vld [vmem:[#allocation2 + $0xb8] sm:$0xf]  ;;  %v19474_v11 = vcombine.low %v17614_v46, %v17618_v31  ;;  %v14189_v31 = vld [vmem:[#allocation2 + $0x30] sm:$0xff]  }
 0x4f1   : > { %v12263_v17 = vcombine.low %v19432_v18, %v19431_v23  ;;  %6460 = vst.msk [vmem:[#allocation2 + $0xd0] sm:$0xf] %vm671_vm3, %v6457_v43  ;;  %v7740_v18 = vld [vmem:[#allocation2 + $0x24] sm:$0xe]  ;;  %v8549_v46 = vld [vmem:[#allocation2 + $0xc] sm:$0xf] }
 0x4f2   : > { %v12293_v49 = vrot.slane %v7740_v18, 9 }
 0x4f4   : > { %13290 = vmatmul.mubr.msk.bf16.gmra.mrb[8].mxu1 %vm1580_vm13, %v12263_v17  ;;  %v14253_v17 = vld [vmem:[#allocation2 + $0x34] sm:$0xf] }
 0x4f5   : > { %13293 = vmatprep.mubr.msk.bf16.mxu1 %vm1580_vm13, %v12264_v40  ;;  %v14249_v40 = vld [vmem:[#allocation2 + $0x1c] sm:$0xf]  ;;  %v7815_v52 = vrot.slane %v14253_v17, 5  ;;  %v17712_v17 = vld [vmem:[#allocation2 + $0x34] sm:$0xf] }
 0x4f6   : > { %v7801_v58 = vrot.slane %v14249_v40, 5 }
 0x4f7   : > { %v7817_v21 = vrot.slane %v7815_v52, 4 }
 0x4f9   : > { %v7819_v37 = vsel %vm15316_vm1, %v7817_v21, %v7818_v51  ;;  %v17723_v51 = vld [vmem:[#allocation2 + $0x4c] sm:$0xf] }
 0x4fc   : > { %13294 = vmatmul.mubr.msk.bf16.gmra.mrb[12].mxu1 %vm1580_vm13, %v12265_v3  ;;  %v14254_v3 = vld [vmem:[#allocation2 + $0x2c] sm:$0x1] }
 0x4fd   : > { %13297 = vmatprep.mubr.msk.bf16.mxu1 %vm1580_vm13, %v12266_v42  ;;  %v7797_v42 = vrot.slane %v14250_v59, 5  ;;  %v7811_v43 = vrot.slane %v14254_v3, 5  ;;  %v7742_v59 = vld [vmem:[#allocation2 + $0x3c] sm:$0xe] }
 0x4fe   : > { %v12295_v28 = vrot.slane %v7742_v59, 9 }
 0x504   : > { %13298 = vmatmul.mubr.msk.bf16.gmra.mrb[16].mxu1 %vm1580_vm13, %v12267_v63  ;;  %v12306_v63 = vcombine.low %v7788_v20, %v7791_v62  ;;  %v7812_v62 = vsel %vm15316_vm1, %v7810_v36, %v7811_v43  ;;  %v14256_v20 = vld [vmem:[#allocation2 + $0x40] sm:$0xf]  ;;  %v9278_v43 = vld [vmem:[#allocation2 + $0x30] sm:$0xe]  ;;  %v17725_v36 = vld [vmem:[#allocation2 + $0x50] sm:$0x1] }
 0x505   : > { %13301 = vmatprep.mubr.msk.bf16.mxu1 %vm1580_vm13, %v12268_v54  ;;  %v7739_v54 = vld [vmem:[#allocation2 + $0x18] sm:$0xe] }
 0x50c   : > { %13302 = vmatmul.mubr.msk.bf16.gmra.mrb[20].mxu1 %vm1580_vm13, %v12269_v41  ;;  %v12291_v41 = vrot.slane %v7738_v34, 9  ;;  %v7822_v34 = vrot.slane %v14256_v20, 5 }
 0x50d   : > { %13305 = vmatprep.mubr.msk.bf16.mxu1 %vm1580_vm13, %v12270_v0  ;;  %v7796_v0 = vrot.slane %v7794_v35, 4 }
 0x50e   : > { %v7795_v39 = vsel %vm15316_vm1, %v12291_v41, %v7794_v35  ;;  %v7809_v35 = vsel %vm15316_vm1, %v12293_v49, %v7808_v30  ;;  %v9279_v49 = vld [vmem:[#allocation2 + $0x3c] sm:$0xe] }
 0x50f   : > { %v7798_v2 = vsel %vm15316_vm1, %v7796_v0, %v7797_v42  ;;  %v12309_v40 = vcombine.low %v7809_v35, %v7812_v62  ;;  %v7823_v0 = vsel %vm15316_vm1, %v12295_v28, %v7822_v34  ;;  %v9362_v35 = vrot.slane %v17712_v17, 5  ;;  %v9281_v28 = vld [vmem:[#allocation2 + $0x54] sm:$0xe] }
 0x514   : > { %13306 = vmatmul.mubr.msk.bf16.gmra.mrb[24].mxu1 %vm1580_vm13, %v12271_v38  ;;  %v12292_v38 = vrot.slane %v7739_v54, 9 }
 0x515   : > { %13309 = vmatprep.mubr.msk.bf16.mxu1 %vm1580_vm13, %v12272_v33  ;;  %v7803_v33 = vrot.slane %v7801_v58, 4 }
 0x516   : > { %v7802_v23 = vsel %vm15316_vm1, %v12292_v38, %v7801_v58  ;;  %v7816_v58 = vsel %vm15316_vm1, %v12294_v7, %v7815_v52  ;;  %v7836_v38 = vrot.slane %v19434_v29, 5  ;;  %v17710_v29 = vld [vmem:[#allocation2 + $0x2c] sm:$0x1]  ;;  %v17714_v52 = vld [vmem:[#allocation2 + $0x38] sm:$0x1] }
 0x517   : > { %v7805_v26 = vsel %vm15316_vm1, %v7803_v33, %v7804_v5  ;;  %v12310_v42 = vcombine.low %v7816_v58, %v7819_v37  ;;  %v7824_v5 = vrot.slane %v7822_v34, 4  ;;  %v17727_v7 = vld [vmem:[#allocation2 + $0x58] sm:$0xf]  ;;  %v9358_v62 = vrot.slane %v17710_v29, 5  ;;  %v9280_v34 = vld [vmem:[#allocation2 + $0x48] sm:$0xe] }
 0x518   : > { %v12308_v1 = vcombine.low %v7802_v23, %v7805_v26  ;;  %v19438_v26 = vld [vmem:[#allocation21_spill] sm:$0xff]  ;;  %v9277_v23 = vld [vmem:[#allocation2 + $0x24] sm:$0xe]  ;;  %v12405_v37 = vrot.slane %v9278_v43, 9  ;;  %v9365_v20 = vrot.slane %v17714_v52, 5 }
 0x519   : > { %v12404_v56 = vrot.slane %v9277_v23, 9  ;;  %v17737_v58 = vld [vmem:[#allocation2 + $0x5c] sm:$0x1]  ;;  %v9379_v23 = vrot.slane %v17725_v36, 5 }
 0x51c   : > { %13310 = vmatmul.mubr.msk.bf16.gmra.mrb[28].mxu1 %vm1580_vm13, %v12273_v25  ;;  %v12307_v25 = vcombine.low %v7795_v39, %v7798_v2  ;;  %v7744_v2 = vld [vmem:[#allocation2 + $0x54] sm:$0xe]  ;;  %v7839_v39 = vrot.slane %v19438_v26, 5 }
 0x51d   : > { %13315 = vmatprep.mubr.msk.bf16.mxu1 %vm1580_vm13, %v12306_v63  ;;  %v19437_v63 = vld [vmem:[#allocation14_spill] sm:$0xff]  ;;  %v12297_v30 = vrot.slane %v7744_v2, 9 }
 0x51e   : > { %v7825_v54 = vrot.slane %v19437_v63, 5  ;;  %v12406_v63 = vrot.slane %v9279_v49, 9 }
 0x520   : > { %v7826_v41 = vsel %vm15316_vm1, %v7824_v5, %v7825_v54  ;;  %v9369_v54 = vrot.slane %v17718_v48, 5  ;;  %v17748_v5 = vld [vmem:[#allocation2 + $0x64] sm:$0xf] }
 0x521   : > { %v12311_v33 = vcombine.low %v7823_v0, %v7826_v41  ;;  %v17750_v41 = vld [vmem:[#allocation2 + $0x68] sm:$0x1]  ;;  %v9364_v0 = vrot.slane %v9362_v35, 4 }
 0x522   : > { %v17763_v2 = vsel %vm15316_vm1, %v12406_v63, %v9369_v54  ;;  %v9371_v26 = vrot.slane %v9369_v54, 4  ;;  %v9386_v63 = vrot.slane %v17737_v58, 5 }
 0x523   : > { %19443 = vst [vmem:[#allocation17_spill] sm:$0xff] %v17763_v2 }
 0x524   : > { %13316 = vmatmul.mubr.msk.bf16.vlgmr.msra.gmra.mrb[0].mxu1 %vm1580_vm13, %v12307_v25  ;;  %v7838_v25 = vrot.slane %v7836_v38, 4 }
 0x525   : > { %13348 = vmatpush3.bf16.msra.mxu1 %v8354_v19  ;;  %13319 = vmatprep.mubr.msk.bf16.mxu1 %vm1580_vm13, %v12308_v1  ;;  %v17706_v19 = vld [vmem:[#allocation2 + $0x28] sm:$0xf]  ;;  %v7837_v1 = vsel %vm15316_vm1, %v12297_v30, %v7836_v38  ;;  %v9372_v38 = vrot.slane %v17721_v15, 5  ;;  %v17766_v30 = vld [vmem:[#allocation2 + $0x74] sm:$0x1] }
 0x526   : > { %14076 = vmatprep.subr.msk.bf16.mxu1 %vm1629_vm0, %v17678_v57  ;;  %v7840_v18 = vsel %vm15316_vm1, %v7838_v25, %v7839_v39  ;;  %v9355_v3 = vrot.slane %v17706_v19, 5  ;;  %v12407_v39 = vrot.slane %v9280_v34, 9  ;;  %v17770_v25 = vsel %vm15316_vm1, %v9364_v0, %v9365_v20 }
 0x527   : > { %v12313_v32 = vcombine.low %v7837_v1, %v7840_v18  ;;  %19444 = vst [vmem:[#allocation15_spill] sm:$0xff] %v17770_v25  ;;  %v12408_v18 = vrot.slane %v9281_v28, 9  ;;  %v9383_v1 = vrot.slane %v17727_v7, 5  ;;  %v9390_v0 = vrot.slane %v17748_v5, 5 }
 0x528   : > { %v9357_v21 = vrot.slane %v9355_v3, 4  ;;  %v17741_v59 = vsel %vm15316_vm1, %v12404_v56, %v9355_v3  ;;  %v9282_v56 = vld [vmem:[#allocation2 + $0x60] sm:$0xe]  ;;  %v17774_v3 = vld [vmem:[#allocation2 + $0x7c] sm:$0xf]  ;;  %v19451_v20 = vcombine.low %v17538_v12, %v17551_v24 }
 0x529   : > { %v17794_v34 = vsel %vm15316_vm1, %v12408_v18, %v9383_v1  ;;  %v12409_v28 = vrot.slane %v9282_v56, 9  ;;  %v17831_v18 = vld [vmem:[#allocation2 + $0xa0] sm:$0xf]  ;;  %v9404_v43 = vrot.slane %v17774_v3, 5 }
 0x52a   : > { %19447 = vst [vmem:[#allocation19_spill] sm:$0xff] %v17794_v34 }
 0x52c   : > { %13320 = vmatmul.mubr.msk.bf16.gmra.mrb[4].mxu1 %vm1580_vm13, %v12309_v40  ;;  %v19440_v40 = vcombine.low %v17524_v55, %v17528_v47  ;;  %v17756_v47 = vsel %vm15316_vm1, %v12405_v37, %v9362_v35  ;;  %v17786_v37 = vld [vmem:[#allocation2 + $0x80] sm:$0x1]  ;;  %v17788_v35 = vld [vmem:[#allocation2 + $0x88] sm:$0xf] }
 0x52d   : > { %13323 = vmatprep.mubr.msk.bf16.mxu1 %vm1580_vm13, %v12310_v42  ;;  %v17745_v42 = vsel %vm15316_vm1, %v9357_v21, %v9358_v62  ;;  %19442 = vst [vmem:[#allocation13_spill] sm:$0xff] %v17756_v47  ;;  %v9283_v62 = vld [vmem:[#allocation2 + $0x6c] sm:$0xe] }
 0x52e   : > { %19441 = vst [vmem:[#allocation18_spill] sm:$0xff] %v17745_v42 }
 0x534   : > { %13324 = vmatmul.mubr.msk.bf16.gmra.mrb[8].mxu1 %vm1580_vm13, %v12311_v33  ;;  %v17759_v33 = vld [vmem:[#allocation2 + $0x70] sm:$0xf] }
 0x535   : > { %13327 = vmatprep.mubr.msk.bf16.mxu1 %vm1580_vm13, %v19439_v16  ;;  %v9376_v16 = vrot.slane %v17723_v51, 5  ;;  %v9397_v56 = vrot.slane %v17759_v33, 5 }
 0x537   : > { %v17784_v49 = vsel %vm15316_vm1, %v12407_v39, %v9376_v16  ;;  %v9378_v21 = vrot.slane %v9376_v16, 4  ;;  %v19449_v39 = vcombine.low %v17532_v10, %v17543_v50  ;;  %v17807_v16 = vld [vmem:[#allocation2 + $0x8c] sm:$0x1]  ;;  %v17820_v10 = vld [vmem:[#allocation2 + $0x94] sm:$0xf]  ;;  %v9399_v24 = vrot.slane %v9397_v56, 4 }
 0x538   : > { %19446 = vst [vmem:[#allocation22_spill] sm:$0xff] %v17784_v49  ;;  %v17822_v50 = vld [vmem:[#allocation2 + $0x98] sm:$0x1] }
 0x539   : > { %v17799_v54 = vsel %vm15316_vm1, %v9378_v21, %v9379_v23  ;;  %v9285_v21 = vld [vmem:[#allocation2 + $0x84] sm:$0xe] }
 0x53a   : > { %19448 = vst [vmem:[#allocation14_spill] sm:$0xff] %v17799_v54  ;;  %v12412_v55 = vrot.slane %v9285_v21, 9  ;;  %v8590_v21 = vld [vmem:[#allocation2 + $0xb0] sm:$0x1]  ;;  %v17871_v54 = vld [vmem:[#allocation2 + $0xb8] sm:$0xf] }
 0x53b   : > { %v9439_v49 = vrot.slane %v17871_v54, 5 }
 0x53c   : > { %13328 = vmatmul.mubr.msk.bf16.gmra.mrb[12].mxu1 %vm1580_vm13, %v12313_v32  ;;  %v17780_v32 = vsel %vm15316_vm1, %v9371_v26, %v9372_v38  ;;  %v9393_v38 = vrot.slane %v17750_v41, 5  ;;  %v9284_v26 = vld [vmem:[#allocation2 + $0x78] sm:$0xe] }
 0x53d   : > { %13331 = vmatprep.mubr.msk.bf16.mxu1 %vm1580_vm13, %v19440_v40  ;;  %19445 = vst [vmem:[#allocation20_spill] sm:$0xff] %v17780_v32  ;;  %v9385_v40 = vrot.slane %v9383_v1, 4  ;;  %v12410_v1 = vrot.slane %v9283_v62, 9  ;;  %v9392_v62 = vrot.slane %v9390_v0, 4 }
 0x53f   : > { %v17813_v23 = vsel %vm15316_vm1, %v9385_v40, %v9386_v63  ;;  %v17828_v40 = vsel %vm15316_vm1, %v12409_v28, %v9390_v0  ;;  %v9400_v63 = vrot.slane %v17766_v30, 5  ;;  %v17835_v12 = vsel %vm15316_vm1, %v12410_v1, %v9397_v56 }
 0x540   : > { %19450 = vst [vmem:[#allocation21_spill] sm:$0xff] %v17813_v23  ;;  %19452 = vst [vmem:[#allocation23_spill] sm:$0xff] %v17828_v40  ;;  %v9407_v28 = vrot.slane %v17786_v37, 5  ;;  %v9411_v0 = vrot.slane %v17788_v35, 5  ;;  %v9288_v40 = vld [vmem:[#allocation2 + $0xa8] sm:$0xe] }
 0x541   : > { %19453 = vst [vmem:[#allocation24_spill] sm:$0xff] %v17835_v12  ;;  %v17886_v12 = vld [vmem:[#allocation2 + $0xc4] sm:$0xf] }
 0x542   : > { %v17862_v34 = vsel %vm15316_vm1, %v12412_v55, %v9411_v0  ;;  %v9413_v1 = vrot.slane %v9411_v0, 4 }
 0x543   : > { %19457 = vst [vmem:[#allocation28_spill] sm:$0xff] %v17862_v34 }
 0x544   : > { %13332 = vmatmul.mubr.msk.bf16.gmra.mrb[16].mxu1 %vm1580_vm13, %v19449_v39  ;;  %v17840_v39 = vsel %vm15316_vm1, %v9392_v62, %v9393_v38  ;;  %v9406_v38 = vrot.slane %v9404_v43, 4  ;;  %v9287_v62 = vld [vmem:[#allocation2 + $0x9c] sm:$0xe] }
 0x545   : > { %13335 = vmatprep.mubr.msk.bf16.mxu1 %vm1580_vm13, %v19451_v20  ;;  %v12411_v20 = vrot.slane %v9284_v26, 9  ;;  %19454 = vst [vmem:[#allocation25_spill] sm:$0xff] %v17840_v39  ;;  %v17850_v26 = vsel %vm15316_vm1, %v9399_v24, %v9400_v63  ;;  %v9414_v63 = vrot.slane %v17807_v16, 5  ;;  %v9421_v39 = vrot.slane %v17822_v50, 5 }
 0x546   : > { %19455 = vst [vmem:[#allocation26_spill] sm:$0xff] %v17850_v26  ;;  %v17867_v24 = vsel %vm15316_vm1, %v9406_v38, %v9407_v28  ;;  %v12414_v0 = vrot.slane %v9287_v62, 9  ;;  %v9425_v26 = vrot.slane %v17831_v18, 5  ;;  %v9289_v28 = vld [vmem:[#allocation2 + $0xb4] sm:$0xe]  ;;  %v19461_v62 = vcombine.low %v17576_v53, %v17580_v22 }
 0x547   : > { %v17854_v56 = vsel %vm15316_vm1, %v12411_v20, %v9404_v43  ;;  %19458 = vst [vmem:[#allocation29_spill] sm:$0xff] %v17867_v24  ;;  %v12413_v20 = vrot.slane %v9286_v14, 9  ;;  %v9418_v43 = vrot.slane %v17820_v10, 5  ;;  %v17877_v55 = vsel %vm15316_vm1, %v9413_v1, %v9414_v63  ;;  %v17884_v38 = vld [vmem:[#allocation2 + $0xbc] sm:$0x1] }
 0x548   : > { %19456 = vst [vmem:[#allocation27_spill] sm:$0xff] %v17854_v56  ;;  %19459 = vst [vmem:[#allocation30_spill] sm:$0xff] %v17877_v55  ;;  %v19460_v14 = vcombine.low %v17562_v61, %v17568_v6  ;;  %v9428_v1 = vrot.slane %v17844_v13, 5  ;;  %v8596_v63 = vld [vmem:[#allocation2 + $0xc8] sm:$0x1]  ;;  %v9427_v6 = vrot.slane %v9425_v26, 4 }
 0x549   : > { %v9420_v24 = vrot.slane %v9418_v43, 4  ;;  %v17897_v61 = vsel %vm15316_vm1, %v12413_v20, %v9418_v43  ;;  %v9432_v56 = vrot.slane %v17856_v4, 5  ;;  %v9435_v55 = vrot.slane %v8590_v21, 5  ;;  %v9290_v53 = vld [vmem:[#allocation2 + $0xc0] sm:$0xe] }
 0x54a   : > { %19462 = vst [vmem:[#allocation31_spill] sm:$0xff] %v17897_v61  ;;  %v12416_v34 = vrot.slane %v9289_v28, 9  ;;  %v17909_v20 = vsel %vm15316_vm1, %v12414_v0, %v9425_v26  ;;  %v9442_v28 = vrot.slane %v17884_v38, 5  ;;  %v12417_v0 = vrot.slane %v9290_v53, 9  ;;  %v6603_v53 = vld [vmem:[#allocation2 + $0xcc] sm:$0x1] }
 0x54b   : > { %v17902_v23 = vsel %vm15316_vm1, %v9420_v24, %v9421_v39  ;;  %19464 = vst [vmem:[#allocation33_spill] sm:$0xff] %v17909_v20  ;;  %v9434_v43 = vrot.slane %v9432_v56, 4  ;;  %v9441_v24 = vrot.slane %v9439_v49, 4 }
 0x54c   : > { %13336 = vmatmul.mubr.msk.bf16.gmra.mrb[20].mxu1 %vm1580_vm13, %v19460_v14  ;;  %v12415_v14 = vrot.slane %v9288_v40, 9  ;;  %19463 = vst [vmem:[#allocation32_spill] sm:$0xff] %v17902_v23  ;;  %v17913_v40 = vsel %vm15316_vm1, %v9427_v6, %v9428_v1  ;;  %v9446_v1 = vrot.slane %v17886_v12, 5  ;;  %v9449_v6 = vrot.slane %v8596_v63, 5 }
 0x54d   : > { %13339 = vmatprep.mubr.msk.bf16.mxu1 %vm1580_vm13, %v19461_v62  ;;  %19465 = vst [vmem:[#allocation34_spill] sm:$0xff] %v17913_v40  ;;  %v6479_v62 = vld [vmem:[#allocation2 + $0xcc] sm:$0x2]  ;;  %v17924_v26 = vsel %vm15316_vm1, %v9434_v43, %v9435_v55  ;;  %v17931_v39 = vsel %vm15316_vm1, %v12416_v34, %v9439_v49  ;;  %v19470_v63 = vcombine.low %v17586_v27, %v17591_v44  ;;  %v17980_v27 = vld [vmem:[#allocation2 + $0x14] sm:$0x1] }
 0x54e   : > { %v17919_v21 = vsel %vm15316_vm1, %v12415_v14, %v9432_v56  ;;  %19467 = vst [vmem:[#allocation36_spill] sm:$0xff] %v17924_v26  ;;  %19468 = vst [vmem:[#allocation37_spill] sm:$0xff] %v17931_v39  ;;  %v17935_v56 = vsel %vm15316_vm1, %v9441_v24, %v9442_v28  ;;  %v12207_v14 = vrot.slane %v6479_v62, 9  ;;  %v9448_v43 = vrot.slane %v9446_v1, 4  ;;  %v14186_v44 = vld [vmem:[#allocation2 + $0xc] sm:$0xff]   ;;  %v14188_v24 = vld [vmem:[#allocation2 + $0x24] sm:$0xff]  }
 0x54f   : > { %19466 = vst [vmem:[#allocation35_spill] sm:$0xff] %v17919_v21  ;;  %19469 = vst [vmem:[#allocation38_spill] sm:$0xff] %v17935_v56  ;;  %v19471_v49 = vcombine.low %v17599_v45, %v17603_v9  ;;  %v17951_v34 = vsel %vm15316_vm1, %v12417_v0, %v9446_v1  ;;  %v14187_v45 = vld [vmem:[#allocation2 + $0x18] sm:$0xff]   ;;  %v9080_v9 = vsel %vm1629_vm0, %v17678_v57, 0  ;;  %v17966_v28 = vld [vmem:[#allocation8 + $0xa] sm:$0x3] }
 0x550   : > { %v6604_v22 = vsel %vm14664_vm8, %v12207_v14, %v6603_v53  ;;  %19472 = vst [vmem:[#allocation39_spill] sm:$0xff] %v17951_v34  ;;  %v17955_v62 = vsel %vm15316_vm1, %v9448_v43, %v9449_v6  ;;  %v8598_v0 = vshrl.u32 %v8549_v46, 16  ;;  %v8601_v1 = vshll.u32 %v8549_v46, 16  ;;  %v14190_v6 = vld [vmem:[#allocation2 + $0x3c] sm:$0xff]   ;;  %v8552_v14 = vld [vmem:[#allocation2 + $0x18] sm:$0xf] }
 0x551   : > { %19473 = vst [vmem:[#allocation40_spill] sm:$0xff] %v17955_v62  ;;  %6605 = vst [vmem:[#allocation2 + $0xcc] sm:$0x1] %v6604_v22  ;;  %v17972_v22 = vld [vmem:[#allocation2 + $0x10] sm:$0xf]  ;;  %v14191_v46 = vld [vmem:[#allocation2 + $0x48] sm:$0xff]  }
 0x552   : > { %v8607_v57 = vshll.u32 %v17972_v22, 16  ;;  %v8611_v43 = vshrl.u32 %v17972_v22, 16  ;;  %v8600_v53 = vrot.slane %v8598_v0, 4  ;;  %v14192_v62 = vld [vmem:[#allocation2 + $0x54] sm:$0xff]  }
 0x554   : > { %13340 = vmatmul.mubr.msk.bf16.gmra.mrb[24].mxu1 %vm1580_vm13, %v19470_v63  ;;  %v8603_v63 = vrot.slane %v8601_v1, 5 }
 0x555   : > { %13343 = vmatprep.mubr.msk.bf16.mxu1 %vm1580_vm13, %v19471_v49  ;;  %v8622_v49 = vshrl.u32 %v8552_v14, 16 }
 0x556   : > { %v8604_v55 = vor.u32 %v8603_v63, %v8600_v53  ;;  %v8655_v53 = vshll.u32 %v17706_v19, 16  ;;  %v8659_v63 = vshrl.u32 %v17706_v19, 16 }
 0x558   : > { %v8605_v39 = vrot.slane %v8604_v55, 4  ;;  %v8657_v32 = vrot.slane %v8655_v53, 5  ;;  %v8661_v55 = vrot.slane %v8659_v63, 4 }
 0x55c   : > { %13344 = vmatmul.mubr.msk.bf16.gmra.mrb[28].mxu1 %vm1580_vm13, %v19474_v11  ;;  %v8625_v11 = vshll.u32 %v8552_v14, 16 }
 0x55d   : > { %13349 = vmatprep.mubr.msk.bf16.mxu1 %vm1580_vm13, %v14186_v44  ;;  %v17978_v44 = vld [vmem:[#allocation2 + $0x1c] sm:$0xf] }
 0x55e   : > { %v8627_v34 = vrot.slane %v8625_v11, 5  ;;  %v8635_v56 = vshrl.u32 %v17978_v44, 16 }
 0x560   : > { %v8637_v21 = vrot.slane %v8635_v56, 4  ;;  %v8665_v56 = vshll.u32 %v17710_v29, 16 }
 0x562   : > { %v8667_v53 = vrot.slane %v8665_v56, 5 }
 0x564   : > { %13350 = vmatmul.mubr.msk.bf16.vlgmr.msra.gmra.mrb[0].mxu1 %vm1580_vm13, %v14187_v45  ;;  %v8555_v45 = vld [vmem:[#allocation2 + $0x24] sm:$0xf] }
 0x565   : > { %13382 = vmatpush3.bf16.msra.mxu1 %v9080_v9  ;;  %13353 = vmatprep.mubr.msk.bf16.mxu1 %vm1580_vm13, %v14188_v24  ;;  %v8609_v9 = vrot.slane %v8607_v57, 5  ;;  %v8613_v24 = vrot.slane %v8611_v43, 4  ;;  %v8646_v0 = vshrl.u32 %v8555_v45, 16  ;;  %v8649_v1 = vshll.u32 %v8555_v45, 16  ;;  %v8558_v43 = vld [vmem:[#allocation2 + $0x30] sm:$0xf] }
 0x566   : > { %14077 = vmatprep.subr.msk.bf16.mxu1 %vm1629_vm0, %v17966_v28  ;;  %v8617_v57 = vshll.u32 %v17980_v27, 16  ;;  %v8670_v20 = vshrl.u32 %v8558_v43, 16 }
 0x567   : > { %v8614_v14 = vor.u32 %v8613_v24, %v8609_v9  ;;  %v8648_v40 = vrot.slane %v8646_v0, 4  ;;  %v8651_v45 = vrot.slane %v8649_v1, 5  ;;  %v8610_v2 = vsel %vm14777_vm12, %v8605_v39, %v8609_v9 }
 0x568   : > { %v8619_v23 = vrot.slane %v8617_v57, 5  ;;  %v8679_v0 = vshll.u32 %v17712_v17, 16  ;;  %v8683_v1 = vshrl.u32 %v17712_v17, 16  ;;  %v8662_v9 = vor.u32 %v8661_v55, %v8657_v32  ;;  %v8567_v17 = vld [vmem:[#allocation2 + $0x54] sm:$0xf]  ;;  %v14196_v55 = vld [vmem:[#allocation2 + $0x84] sm:$0xff]  }
 0x569   : > { %v8615_v24 = vrot.slane %v8614_v14, 4  ;;  %v8652_v47 = vor.u32 %v8651_v45, %v8648_v40  ;;  %v8561_v14 = vld [vmem:[#allocation2 + $0x3c] sm:$0xf]  ;;  %v8742_v56 = vshrl.u32 %v8567_v17, 16 }
 0x56a   : > { %v8694_v45 = vshrl.u32 %v8561_v14, 16 }
 0x56b   : > { %v8620_v57 = vsel %vm14777_vm12, %v8615_v24, %v8619_v23  ;;  %v8703_v23 = vshll.u32 %v17718_v48, 16 }
 0x56c   : > { %13354 = vmatmul.mubr.msk.bf16.gmra.mrb[4].mxu1 %vm1580_vm13, %v14189_v31  ;;  %v8624_v31 = vrot.slane %v8622_v49, 4  ;;  %v17989_v49 = vld [vmem:[#allocation2 + $0x20] sm:$0x1] }
 0x56d   : > { %13357 = vmatprep.mubr.msk.bf16.mxu1 %vm1580_vm13, %v14190_v6  ;;  %v8631_v6 = vshll.u32 %v17978_v44, 16  ;;  %v8641_v61 = vshll.u32 %v17989_v49, 16 }
 0x56e   : > { %v8628_v11 = vor.u32 %v8627_v34, %v8624_v31  ;;  %v8672_v34 = vrot.slane %v8670_v20, 4  ;;  %v8653_v20 = vrot.slane %v8652_v47, 4 }
 0x56f   : > { %v8633_v26 = vrot.slane %v8631_v6, 5  ;;  %v14194_v6 = vld [vmem:[#allocation2 + $0x6c] sm:$0xff]   ;;  %v8643_v39 = vrot.slane %v8641_v61, 5  ;;  %v8707_v61 = vshrl.u32 %v17718_v48, 16 }
 0x570   : > { %v8629_v19 = vrot.slane %v8628_v11, 4  ;;  %v18005_v11 = vrot.slane %v8679_v0, 5 }
 0x571   : > { %v8638_v25 = vor.u32 %v8637_v21, %v8633_v26  ;;  %v18001_v21 = vcombine.low %v8610_v2, %v8620_v57  ;;  %v14195_v2 = vld [vmem:[#allocation2 + $0x78] sm:$0xff]  }
 0x572   : > { %v8634_v40 = vsel %vm14777_vm12, %v8629_v19, %v8633_v26  ;;  %v8663_v26 = vrot.slane %v8662_v9, 4  ;;  %v8689_v19 = vshll.u32 %v17714_v52, 16  ;;  %v8709_v52 = vrot.slane %v8707_v61, 4 }
 0x573   : > { %v8639_v29 = vrot.slane %v8638_v25, 4 }
 0x574   : > { %13358 = vmatmul.mubr.msk.bf16.gmra.mrb[8].mxu1 %vm1580_vm13, %v14191_v46  ;;  %v8673_v46 = vshll.u32 %v8558_v43, 16  ;;  %v8564_v43 = vld [vmem:[#allocation2 + $0x48] sm:$0xf]  ;;  %v8668_v48 = vsel %vm14777_vm12, %v8663_v26, %v8667_v53  ;;  %v8713_v53 = vshll.u32 %v17721_v15, 16  ;;  %v8573_v26 = vld [vmem:[#allocation2 + $0x6c] sm:$0xf] }
 0x575   : > { %13361 = vmatprep.mubr.msk.bf16.mxu1 %vm1580_vm13, %v14192_v62  ;;  %v14193_v62 = vld [vmem:[#allocation2 + $0x60] sm:$0xff]   ;;  %v8644_v24 = vsel %vm14777_vm12, %v8639_v29, %v8643_v39  ;;  %v8718_v25 = vshrl.u32 %v8564_v43, 16  ;;  %v8721_v47 = vshll.u32 %v8564_v43, 16  ;;  %v18023_v39 = vrot.slane %v8703_v23, 5 }
 0x576   : > { %v8675_v31 = vrot.slane %v8673_v46, 5  ;;  %v8685_v46 = vrot.slane %v8683_v1, 4  ;;  %v8696_v1 = vrot.slane %v8694_v45, 4  ;;  %v8727_v29 = vshll.u32 %v17723_v51, 16 }
 0x577   : > { %v8720_v9 = vrot.slane %v8718_v25, 4  ;;  %v8691_v43 = vrot.slane %v8689_v19, 5  ;;  %v8755_v23 = vshrl.u32 %v17727_v7, 16  ;;  %v14197_v25 = vld [vmem:[#allocation2 + $0x90] sm:$0xff]   ;;  %v8710_v15 = vor.u32 %v8709_v52, %v18023_v39 }
 0x578   : > { %v8676_v63 = vor.u32 %v8675_v31, %v8672_v34  ;;  %v8745_v34 = vshll.u32 %v8567_v17, 16  ;;  %v8658_v31 = vsel %vm14777_vm12, %v8653_v20, %v8657_v32  ;;  %v8731_v32 = vshrl.u32 %v17723_v51, 16  ;;  %v8570_v20 = vld [vmem:[#allocation2 + $0x60] sm:$0xf] }
 0x579   : > { %v18028_v17 = vcombine.low %v8658_v31, %v8668_v48  ;;  %v8766_v51 = vshrl.u32 %v8570_v20, 16  ;;  %v8775_v31 = vshll.u32 %v17748_v5, 16 }
 0x57a   : > { %v18019_v0 = vrot.slane %v8676_v63, 4  ;;  %v8744_v63 = vrot.slane %v8742_v56, 4  ;;  %v8747_v45 = vrot.slane %v8745_v34, 5  ;;  %v8733_v19 = vrot.slane %v8731_v32, 4  ;;  %v14198_v56 = vld [vmem:[#allocation2 + $0x9c] sm:$0xff]  }
 0x57b   : > { %v18039_v34 = vrot.slane %v8713_v53, 5  ;;  %v6623_v53 = vld [vmem:[#allocation2 + $0xd0] sm:$0x8] }
 0x57c   : > { %13362 = vmatmul.mubr.msk.bf16.gmra.mrb[12].mxu1 %vm1580_vm13, %v14193_v62  ;;  %v8697_v62 = vshll.u32 %v8561_v14, 16  ;;  %v8686_v14 = vor.u32 %v8685_v46, %v18005_v11  ;;  %v8682_v46 = vsel %vm14777_vm12, %v18019_v0, %v18005_v11  ;;  %v8748_v11 = vor.u32 %v8747_v45, %v8744_v63 }
 0x57d   : > { %13365 = vmatprep.mubr.msk.bf16.mxu1 %vm1580_vm13, %v14194_v6  ;;  %v18011_v6 = vcombine.low %v8634_v40, %v8644_v24  ;;  %v8723_v40 = vrot.slane %v8721_v47, 5  ;;  %v8769_v24 = vshll.u32 %v8570_v20, 16  ;;  %v8757_v0 = vrot.slane %v8755_v23, 4 }
 0x57e   : > { %v8699_v57 = vrot.slane %v8697_v62, 5  ;;  %v8751_v62 = vshll.u32 %v17727_v7, 16  ;;  %v8687_v61 = vrot.slane %v8686_v14, 4  ;;  %v8779_v7 = vshrl.u32 %v17748_v5, 16 }
 0x57f   : > { %v8724_v47 = vor.u32 %v8723_v40, %v8720_v9  ;;  %v8793_v14 = vshll.u32 %v8573_v26, 16  ;;  %v8768_v9 = vrot.slane %v8766_v51, 4  ;;  %v8771_v40 = vrot.slane %v8769_v24, 5 }
 0x580   : > { %v18044_v48 = vrot.slane %v8751_v62, 5  ;;  %v8737_v5 = vshll.u32 %v17725_v36, 16  ;;  %v8749_v63 = vrot.slane %v8748_v11, 4  ;;  %v8761_v45 = vshll.u32 %v17737_v58, 16  ;;  %v14199_v36 = vld [vmem:[#allocation2 + $0xa8] sm:$0xff]   ;;  %v14200_v11 = vld [vmem:[#allocation2 + $0xb4] sm:$0xff]  }
 0x581   : > { %v8725_v32 = vrot.slane %v8724_v47, 4  ;;  %v18052_v62 = vrot.slane %v8775_v31, 5  ;;  %v8781_v23 = vrot.slane %v8779_v7, 4  ;;  %v8772_v51 = vor.u32 %v8771_v40, %v8768_v9 }
 0x582   : > { %v8799_v24 = vshll.u32 %v17759_v33, 16  ;;  %v8763_v7 = vrot.slane %v8761_v45, 5 }
 0x584   : > { %13366 = vmatmul.mubr.msk.bf16.gmra.mrb[16].mxu1 %vm1580_vm13, %v14195_v2  ;;  %v8700_v2 = vor.u32 %v8699_v57, %v8696_v1  ;;  %v8790_v1 = vshrl.u32 %v8573_v26, 16  ;;  %v8692_v57 = vsel %vm14777_vm12, %v8687_v61, %v8691_v43  ;;  %v8758_v26 = vor.u32 %v8757_v0, %v18044_v48 }
 0x585   : > { %13369 = vmatprep.mubr.msk.bf16.mxu1 %vm1580_vm13, %v14196_v55  ;;  %v18037_v55 = vrot.slane %v8727_v29, 5  ;;  %v8711_v29 = vrot.slane %v8710_v15, 4  ;;  %v8785_v43 = vshll.u32 %v17750_v41, 16  ;;  %v12225_v15 = vrot.slane %v6623_v53, 11 }
 0x586   : > { %v8701_v52 = vrot.slane %v8700_v2, 4  ;;  %v8792_v61 = vrot.slane %v8790_v1, 4  ;;  %v8795_v2 = vrot.slane %v8793_v14, 5  ;;  %v18058_v47 = vcombine.low %v8682_v46, %v8692_v57  ;;  %v10833_v1 = vld [vmem:[#allocation2 + $0x48] sm:$0xe] }
 0x587   : > { %v8734_v20 = vor.u32 %v8733_v19, %v18037_v55  ;;  %v8730_v19 = vsel %vm14777_vm12, %v8725_v32, %v18037_v55  ;;  %v8739_v41 = vrot.slane %v8737_v5, 5  ;;  %v8782_v0 = vor.u32 %v8781_v23, %v18052_v62 }
 0x588   : > { %v8706_v58 = vsel %vm14777_vm12, %v8701_v52, %v18023_v39  ;;  %v8754_v39 = vsel %vm14777_vm12, %v8749_v63, %v18044_v48  ;;  %v8759_v14 = vrot.slane %v8758_v26, 4  ;;  %v18073_v57 = vrot.slane %v8785_v43, 5  ;;  %v18085_v63 = vld [vmem:[#allocation2 + $0x34] sm:$0xf] }
 0x589   : > { %v8735_v31 = vrot.slane %v8734_v20, 4  ;;  %v8796_v55 = vor.u32 %v8795_v2, %v8792_v61  ;;  %v18076_v52 = vrot.slane %v8772_v51, 4  ;;  %v18078_v9 = vrot.slane %v8799_v24, 5  ;;  %19476 = vst [vmem:[#allocation16_spill] sm:$0xff] %v18085_v63  ;;  %v18098_v61 = vld [vmem:[#allocation2 + $0x40] sm:$0xf] }
 0x58a   : > { %v8809_v32 = vshll.u32 %v17766_v30, 16  ;;  %v8823_v53 = vshll.u32 %v17774_v3, 16  ;;  %v8827_v48 = vshrl.u32 %v17774_v3, 16  ;;  %v8716_v45 = vsel %vm14777_vm12, %v8711_v29, %v18039_v34  ;;  %v18096_v30 = vld [vmem:[#allocation2 + $0x38] sm:$0x1]  ;;  %19478 = vst [vmem:[#allocation42_spill] sm:$0xff] %v18098_v61 }
 0x58b   : > { %v8740_v23 = vsel %vm14777_vm12, %v8735_v31, %v8739_v41  ;;  %v8764_v26 = vsel %vm14777_vm12, %v8759_v14, %v8763_v7  ;;  %v18094_v43 = vrot.slane %v8782_v0, 4  ;;  %19477 = vst [vmem:[#allocation41_spill] sm:$0xff] %v18096_v30  ;;  %v18100_v2 = vcombine.low %v8706_v58, %v8716_v45  ;;  %v18108_v34 = vld [vmem:[#allocation2 + $0x84] sm:$0xf] }
 0x58c   : > { %13370 = vmatmul.mubr.msk.bf16.gmra.mrb[20].mxu1 %vm1580_vm13, %v14197_v25  ;;  %v8803_v25 = vshrl.u32 %v17759_v33, 16  ;;  %v8576_v33 = vld [vmem:[#allocation2 + $0x78] sm:$0xf]  ;;  %v18102_v3 = vcombine.low %v8730_v19, %v8740_v23  ;;  %v18104_v51 = vcombine.low %v8754_v39, %v8764_v26  ;;  %v18106_v24 = vrot.slane %v8796_v55, 4  ;;  %v18110_v29 = vld [vmem:[#allocation2 + $0x44] sm:$0x1] }
 0x58d   : > { %13373 = vmatprep.mubr.msk.bf16.mxu1 %vm1580_vm13, %v14198_v56  ;;  %v6747_v56 = vld [vmem:[#allocation2 + $0xd4] sm:$0x1]  ;;  %v8814_v20 = vshrl.u32 %v8576_v33, 16  ;;  %v8817_v5 = vshll.u32 %v8576_v33, 16  ;;  %19479 = vst [vmem:[#allocation43_spill] sm:$0xff] %v18110_v29  ;;  %v18122_v41 = vrot.slane %v8809_v32, 5 }
 0x58e   : > { %v6748_v46 = vsel %vm14713_vm9, %v12225_v15, %v6747_v56  ;;  %v18080_v40 = vrot.slane %v8803_v25, 4  ;;  %v10831_v25 = vld [vmem:[#allocation2 + $0x30] sm:$0xe]  ;;  %v14201_v15 = vld [vmem:[#allocation2 + $0xc0] sm:$0xff]   ;;  %v18124_v56 = vld [vmem:[#allocation2 + $0x4c] sm:$0xf] }
 0x58f   : > { %6749 = vst [vmem:[#allocation2 + $0xd4] sm:$0x1] %v6748_v46  ;;  %19480 = vst [vmem:[#allocation44_spill] sm:$0xff] %v18124_v56  ;;  %v18126_v31 = vrot.slane %v8814_v20, 4  ;;  %v18128_v7 = vrot.slane %v8817_v5, 5  ;;  %v18130_v0 = vrot.slane %v8823_v53, 5 }
 0x590   : > { %v18132_v33 = vrot.slane %v8827_v48, 4  ;;  %v18135_v39 = vld [vmem:[#allocation2 + $0x50] sm:$0x1]  ;;  %v12516_v14 = vrot.slane %v10831_v25, 9  ;;  %v10909_v55 = vrot.slane %v18085_v63, 5  ;;  %v10912_v32 = vrot.slane %v18096_v30, 5 }
 0x591   : > { %19481 = vst [vmem:[#allocation45_spill] sm:$0xff] %v18135_v39  ;;  %v18144_v5 = vld [vmem:[#allocation2 + $0x58] sm:$0xf]  ;;  %v10916_v48 = vrot.slane %v18098_v61, 5  ;;  %v10919_v45 = vrot.slane %v18110_v29, 5  ;;  %v12518_v46 = vrot.slane %v10833_v1, 9 }
 0x592   : > { %19482 = vst [vmem:[#allocation46_spill] sm:$0xff] %v18144_v5  ;;  %v18152_v25 = vld [vmem:[#allocation2 + $0x5c] sm:$0x1]  ;;  %v18156_v58 = vld [vmem:[#allocation2 + $0x64] sm:$0xf]  ;;  %v10923_v29 = vrot.slane %v18124_v56, 5 }
 0x593   : > { %19483 = vst [vmem:[#allocation47_spill] sm:$0xff] %v18152_v25  ;;  %v10918_v19 = vrot.slane %v10916_v48, 4  ;;  %v18159_v30 = vld [vmem:[#allocation2 + $0x68] sm:$0x1]  ;;  %v10926_v1 = vrot.slane %v18135_v39, 5  ;;  %v10930_v20 = vrot.slane %v18144_v5, 5 }
 0x594   : > { %13374 = vmatmul.mubr.msk.bf16.gmra.mrb[24].mxu1 %vm1580_vm13, %v14199_v36  ;;  %v10834_v36 = vld [vmem:[#allocation2 + $0x54] sm:$0xe]  ;;  %19484 = vst [vmem:[#allocation48_spill] sm:$0xff] %v18159_v30  ;;  %v18171_v23 = vld [vmem:[#allocation2 + $0x70] sm:$0xf]  ;;  %v10940_v56 = vrot.slane %v18159_v30, 5 }
 0x595   : > { %13377 = vmatprep.mubr.msk.bf16.mxu1 %vm1580_vm13, %v14200_v11  ;;  %v10832_v11 = vld [vmem:[#allocation2 + $0x3c] sm:$0xe]  ;;  %19487 = vst [vmem:[#allocation51_spill] sm:$0xff] %v18171_v23  ;;  %v18185_v39 = vld [vmem:[#allocation2 + $0x74] sm:$0x1] }
 0x596   : > { %v12517_v53 = vrot.slane %v10832_v11, 9  ;;  %v10835_v11 = vld [vmem:[#allocation2 + $0x60] sm:$0xe]  ;;  %19490 = vst [vmem:[#allocation54_spill] sm:$0xff] %v18185_v39  ;;  %v18187_v5 = vld [vmem:[#allocation2 + $0x7c] sm:$0xf] }
 0x597   : > { %19491 = vst [vmem:[#allocation55_spill] sm:$0xff] %v18187_v5  ;;  %v18189_v63 = vld [vmem:[#allocation2 + $0x80] sm:$0x1]  ;;  %v10839_v30 = vld [vmem:[#allocation2 + $0x90] sm:$0xe] }
 0x598   : > { %v18177_v61 = vsel %vm15316_vm1, %v12517_v53, %v10916_v48  ;;  %19492 = vst [vmem:[#allocation56_spill] sm:$0xff] %v18189_v63  ;;  %v18195_v53 = vsel %vm15316_vm1, %v12518_v46, %v10923_v29  ;;  %v10932_v48 = vrot.slane %v10930_v20, 4  ;;  %v10944_v46 = vrot.slane %v18171_v23, 5  ;;  %v18254_v23 = vld [vmem:[#allocation2 + $0xac] sm:$0xf] }
 0x599   : > { %19488 = vst [vmem:[#allocation52_spill] sm:$0xff] %v18177_v61  ;;  %19493 = vst [vmem:[#allocation57_spill] sm:$0xff] %v18195_v53  ;;  %v18231_v61 = vld [vmem:[#allocation2 + $0x98] sm:$0x1]  ;;  %v10954_v53 = vrot.slane %v18189_v63, 5 }
 0x59c   : > { %13378 = vmatmul.mubr.msk.bf16.gmra.mrb[28].mxu1 %vm1580_vm13, %v14201_v15  ;;  %v10911_v15 = vrot.slane %v10909_v55, 4 }
 0x59d   : > { %13383 = vmatprep.mubr.msk.bf16.mxu1 %vm1580_vm13, %v18001_v21  ;;  %v18163_v21 = vsel %vm15316_vm1, %v12516_v14, %v10909_v55  ;;  %v18181_v14 = vsel %vm15316_vm1, %v10918_v19, %v10919_v45  ;;  %v12519_v55 = vrot.slane %v10834_v36, 9  ;;  %v10925_v19 = vrot.slane %v10923_v29, 4  ;;  %v18209_v29 = vld [vmem:[#allocation2 + $0x88] sm:$0xf] }
 0x59e   : > { %19485 = vst [vmem:[#allocation49_spill] sm:$0xff] %v18163_v21  ;;  %v18167_v26 = vsel %vm15316_vm1, %v10911_v15, %v10912_v32  ;;  %19489 = vst [vmem:[#allocation53_spill] sm:$0xff] %v18181_v14  ;;  %v10836_v32 = vld [vmem:[#allocation2 + $0x6c] sm:$0xe]  ;;  %v9550_v15 = vsel %vm1629_vm0, %v17966_v28, 0  ;;  %v10933_v36 = vrot.slane %v18152_v25, 5 }
 0x59f   : > { %19486 = vst [vmem:[#allocation50_spill] sm:$0xff] %v18167_v26  ;;  %v12520_v45 = vrot.slane %v10835_v11, 9  ;;  %v10937_v28 = vrot.slane %v18156_v58, 5  ;;  %v10837_v26 = vld [vmem:[#allocation2 + $0x78] sm:$0xe]  ;;  %v18203_v42 = vsel %vm15316_vm1, %v10925_v19, %v10926_v1  ;;  %v12521_v14 = vrot.slane %v10836_v32, 9 }
 0x5a0   : > { %v18199_v21 = vld [vmem:[#allocation8 + $0xc] sm:$0x3]  ;;  %19494 = vst [vmem:[#allocation58_spill] sm:$0xff] %v18203_v42  ;;  %19495 = vst [vmem:[#allocation59_spill] sm:$0xff] %v18209_v29  ;;  %v18211_v11 = vld [vmem:[#allocation2 + $0x8c] sm:$0x1]  ;;  %v18217_v25 = vsel %vm15316_vm1, %v12519_v55, %v10930_v20  ;;  %v18221_v1 = vsel %vm15316_vm1, %v10932_v48, %v10933_v36 }
 0x5a1   : > { %19496 = vst [vmem:[#allocation60_spill] sm:$0xff] %v18211_v11  ;;  %19497 = vst [vmem:[#allocation61_spill] sm:$0xff] %v18217_v25  ;;  %v18225_v32 = vsel %vm15316_vm1, %v12520_v45, %v10937_v28  ;;  %v18229_v19 = vld [vmem:[#allocation2 + $0x94] sm:$0xf]  ;;  %v10939_v55 = vrot.slane %v10937_v28, 4  ;;  %v18237_v48 = vsel %vm15316_vm1, %v12521_v14, %v10944_v46  ;;  %v10946_v36 = vrot.slane %v10944_v46, 4 }
 0x5a2   : > { %19498 = vst [vmem:[#allocation62_spill] sm:$0xff] %v18221_v1  ;;  %19499 = vst [vmem:[#allocation63_spill] sm:$0xff] %v18225_v32  ;;  %v12522_v45 = vrot.slane %v10837_v26, 9  ;;  %v10951_v42 = vrot.slane %v18187_v5, 5  ;;  %v10958_v46 = vrot.slane %v18209_v29, 5  ;;  %v10961_v20 = vrot.slane %v18211_v11, 5 }
 0x5a3   : > { %19500 = vst [vmem:[#allocation64_spill] sm:$0xff] %v18237_v48  ;;  %v18248_v28 = vsel %vm15316_vm1, %v10939_v55, %v10940_v56  ;;  %v10840_v1 = vld [vmem:[#allocation2 + $0x9c] sm:$0xe]  ;;  %v18252_v25 = vld [vmem:[#allocation2 + $0xa4] sm:$0x1]  ;;  %v12524_v26 = vrot.slane %v10839_v30, 9 }
 0x5a4   : > { %13384 = vmatmul.mubr.msk.bf16.vlgmr.msra.gmra.mrb[0].mxu1 %vm1580_vm13, %v18011_v6  ;;  %v10838_v6 = vld [vmem:[#allocation2 + $0x84] sm:$0xe]  ;;  %19501 = vst [vmem:[#allocation65_spill] sm:$0xff] %v18248_v28  ;;  %19502 = vst [vmem:[#allocation66_spill] sm:$0xff] %v18252_v25  ;;  %v18264_v56 = vsel %vm15316_vm1, %v12522_v45, %v10951_v42  ;;  %v18266_v55 = vld [vmem:[#allocation2 + $0xb0] sm:$0x1] }
 0x5a5   : > { %13416 = vmatpush3.bf16.msra.mxu1 %v9550_v15  ;;  %13387 = vmatprep.mubr.msk.bf16.mxu1 %vm1580_vm13, %v18028_v17  ;;  %v18241_v15 = vld [vmem:[#allocation2 + $0xa0] sm:$0xf]  ;;  %v10947_v17 = vrot.slane %v18185_v39, 5  ;;  %v12523_v14 = vrot.slane %v10838_v6, 9  ;;  %19504 = vst [vmem:[#allocation68_spill] sm:$0xff] %v18264_v56  ;;  %v10953_v6 = vrot.slane %v10951_v42, 4 }
 0x5a6   : > { %14078 = vmatprep.subr.msk.bf16.mxu1 %vm1629_vm0, %v18199_v21  ;;  %19505 = vst [vmem:[#allocation69_spill] sm:$0xff] %v18266_v55  ;;  %v10960_v39 = vrot.slane %v10958_v46, 4  ;;  %v10841_v28 = vld [vmem:[#allocation2 + $0xa8] sm:$0xe]  ;;  %v18274_v32 = vld [vmem:[#allocation2 + $0xb8] sm:$0xf] }
 0x5a7   : > { %v18260_v63 = vsel %vm15316_vm1, %v10946_v36, %v10947_v17  ;;  %v18272_v29 = vsel %vm15316_vm1, %v12523_v14, %v10958_v46  ;;  %19507 = vst [vmem:[#allocation71_spill] sm:$0xff] %v18274_v32  ;;  %v18278_v36 = vsel %vm15316_vm1, %v10953_v6, %v10954_v53  ;;  %v10965_v42 = vrot.slane %v18229_v19, 5  ;;  %v10144_v5 = vld [vmem:[#allocation2 + $0xbc] sm:$0x1]  ;;  %v18292_v53 = vld [vmem:[#allocation2 + $0xc4] sm:$0xf] }
 0x5a8   : > { %19503 = vst [vmem:[#allocation67_spill] sm:$0xff] %v18260_v63  ;;  %19506 = vst [vmem:[#allocation70_spill] sm:$0xff] %v18272_v29  ;;  %v10968_v17 = vrot.slane %v18231_v61, 5  ;;  %v12525_v45 = vrot.slane %v10840_v1, 9  ;;  %v18286_v14 = vsel %vm15316_vm1, %v10960_v39, %v10961_v20  ;;  %v10972_v30 = vrot.slane %v18241_v15, 5  ;;  %v19590_v60 = vld [vmem:[#allocation61_spill] sm:$0xff] }
 0x5a9   : > { %19508 = vst [vmem:[#allocation72_spill] sm:$0xff] %v18278_v36  ;;  %19509 = vst [vmem:[#allocation73_spill] sm:$0xff] %v18286_v14  ;;  %v10975_v46 = vrot.slane %v18252_v25, 5  ;;  %v10842_v63 = vld [vmem:[#allocation2 + $0xb4] sm:$0xe]  ;;  %v18298_v11 = vsel %vm15316_vm1, %v12524_v26, %v10965_v42  ;;  %v10967_v39 = vrot.slane %v10965_v42, 4 }
 0x5aa   : > { %v10147_v6 = vld [vmem:[#allocation2 + $0xc8] sm:$0x1]  ;;  %v12526_v20 = vrot.slane %v10841_v28, 9  ;;  %v18304_v36 = vsel %vm15316_vm1, %v12525_v45, %v10972_v30  ;;  %v10979_v56 = vrot.slane %v18254_v23, 5  ;;  %v10982_v48 = vrot.slane %v18266_v55, 5 }
 0x5ab   : > { %v10843_v25 = vld [vmem:[#allocation2 + $0xc0] sm:$0xe]  ;;  %v18310_v1 = vsel %vm15316_vm1, %v10967_v39, %v10968_v17  ;;  %v12527_v26 = vrot.slane %v10842_v63, 9  ;;  %v10986_v28 = vrot.slane %v18274_v32, 5  ;;  %v10989_v42 = vrot.slane %v10144_v5, 5 }
 0x5ac   : > { %13388 = vmatmul.mubr.msk.bf16.gmra.mrb[4].mxu1 %vm1580_vm13, %v18058_v47  ;;  %v10974_v47 = vrot.slane %v10972_v30, 4  ;;  %19510 = vst [vmem:[#allocation74_spill] sm:$0xff] %v18310_v1  ;;  %v10844_v14 = vld [vmem:[#allocation2 + $0xcc] sm:$0xe]  ;;  %v10150_v29 = vld [vmem:[#allocation2 + $0xd4] sm:$0x1]  ;;  %v18323_v55 = vsel %vm15316_vm1, %v12526_v20, %v10979_v56 }
 0x5ad   : > { %13391 = vmatprep.mubr.msk.bf16.mxu1 %vm1580_vm13, %v18100_v2  ;;  %v18313_v2 = vld [vmem:[#allocation2 + $0xd0] sm:$0xf]  ;;  %19511 = vst [vmem:[#allocation75_spill] sm:$0xff] %v18323_v55  ;;  %v10981_v17 = vrot.slane %v10979_v56, 4  ;;  %v18329_v5 = vsel %vm15316_vm1, %v12527_v26, %v10986_v28  ;;  %v10988_v39 = vrot.slane %v10986_v28, 4  ;;  %v12528_v32 = vrot.slane %v10843_v25, 9 }
 0x5ae   : > { %v18319_v30 = vsel %vm15316_vm1, %v10974_v47, %v10975_v46  ;;  %v10993_v46 = vrot.slane %v18292_v53, 5  ;;  %v10996_v47 = vrot.slane %v10147_v6, 5  ;;  %v12529_v1 = vrot.slane %v10844_v14, 9  ;;  %v8582_v20 = vld [vmem:[#allocation2 + $0x90] sm:$0xf] }
 0x5af   : > { %v18333_v45 = vsel %vm15316_vm1, %v10981_v17, %v10982_v48  ;;  %v18340_v63 = vsel %vm15316_vm1, %v10988_v39, %v10989_v42  ;;  %v11000_v26 = vrot.slane %v18313_v2, 5  ;;  %v11003_v28 = vrot.slane %v10150_v29, 5 }
 0x5b0   : > { %19512 = vst [vmem:[#allocation76_spill] sm:$0xff] %v18333_v45  ;;  %v19513_v25 = vor.u32 %v18080_v40, %v18078_v9  ;;  %v8820_v17 = vor.u32 %v18128_v7, %v18126_v31  ;;  %v10995_v6 = vrot.slane %v10993_v46, 4  ;;  %v19514_v42 = vshrl.u32 %v18108_v34, 16 }
 0x5b1   : > { %v19515_v56 = vshll.u32 %v18108_v34, 16  ;;  %v19516_v45 = vshll.u32 %v17788_v35, 16  ;;  %v11002_v55 = vrot.slane %v11000_v26, 4  ;;  %v8862_v31 = vshrl.u32 %v8582_v20, 16 }
 0x5b2   : > { %v8807_v48 = vrot.slane %v19513_v25, 4  ;;  %v8840_v39 = vrot.slane %v19514_v42, 4  ;;  %v8585_v25 = vld [vmem:[#allocation2 + $0x9c] sm:$0xf]  ;;  %v8865_v7 = vshll.u32 %v8582_v20, 16  ;;  %v18368_v42 = vsel %vm15316_vm1, %v10995_v6, %v10996_v47 }
 0x5b3   : > { %v8843_v29 = vrot.slane %v19515_v56, 5  ;;  %v18358_v40 = vrot.slane %v19516_v45, 5  ;;  %v19517_v34 = vshrl.u32 %v17788_v35, 16  ;;  %v18376_v14 = vsel %vm15316_vm1, %v12529_v1, %v11000_v26 }
 0x5b4   : > { %13392 = vmatmul.mubr.msk.bf16.gmra.mrb[8].mxu1 %vm1580_vm13, %v18102_v3  ;;  %v18364_v3 = vsel %vm15316_vm1, %v12528_v32, %v10993_v46  ;;  %v8830_v32 = vor.u32 %v18132_v33, %v18130_v0  ;;  %v8886_v46 = vshrl.u32 %v8585_v25, 16  ;;  %v8889_v47 = vshll.u32 %v8585_v25, 16 }
 0x5b5   : > { %13395 = vmatprep.mubr.msk.bf16.mxu1 %vm1580_vm13, %v18104_v51  ;;  %v8853_v56 = vrot.slane %v19517_v34, 4  ;;  %v18380_v51 = vsel %vm15316_vm1, %v11002_v55, %v11003_v28  ;;  %v8812_v20 = vsel %vm14777_vm12, %v8807_v48, %v18122_v41  ;;  %v8821_v6 = vrot.slane %v8820_v17, 4 }
 0x5b6   : > { %v12545_v35 = vcombine.low %v18376_v14, %v18380_v51  ;;  %v8844_v34 = vor.u32 %v8843_v29, %v8840_v39  ;;  %v8857_v1 = vshll.u32 %v17807_v16, 16  ;;  %v8864_v26 = vrot.slane %v8862_v31, 4 }
 0x5b7   : > { %v8867_v45 = vrot.slane %v8865_v7, 5  ;;  %v8871_v55 = vshll.u32 %v17820_v10, 16  ;;  %v8875_v28 = vshrl.u32 %v17820_v10, 16  ;;  %v19518_v33 = vsel %vm14777_vm12, %v18094_v43, %v18073_v57  ;;  %v8588_v7 = vld [vmem:[#allocation2 + $0xa8] sm:$0xf] }
 0x5b8   : > { %v19519_v41 = vsel %vm14777_vm12, %v18076_v52, %v18052_v62  ;;  %v19520_v16 = vsel %vm14777_vm12, %v18106_v24, %v18078_v9  ;;  %v19521_v39 = vshll.u32 %v17786_v37, 16  ;;  %v8854_v29 = vor.u32 %v8853_v56, %v18358_v40 }
 0x5b9   : > { %v12377_v48 = vcombine.low %v19519_v41, %v19518_v33  ;;  %v12378_v17 = vcombine.low %v19520_v16, %v8812_v20  ;;  %v8888_v25 = vrot.slane %v8886_v46, 4  ;;  %v8891_v31 = vrot.slane %v8889_v47, 5  ;;  %v8591_v47 = vld [vmem:[#allocation2 + $0xb4] sm:$0xf] }
 0x5ba   : > { %v8835_v10 = vrot.slane %v19521_v39, 5  ;;  %v8895_v57 = vshll.u32 %v17831_v18, 16  ;;  %v8899_v43 = vshrl.u32 %v17831_v18, 16  ;;  %v8826_v62 = vsel %vm14777_vm12, %v8821_v6, %v18130_v0 }
 0x5bb   : > { %v8831_v52 = vrot.slane %v8830_v32, 4  ;;  %v8845_v9 = vrot.slane %v8844_v34, 4  ;;  %v8859_v37 = vrot.slane %v8857_v1, 5  ;;  %v8868_v24 = vor.u32 %v8867_v45, %v8864_v26 }
 0x5bc   : > { %13396 = vmatmul.mubr.msk.bf16.gmra.mrb[12].mxu1 %vm1580_vm13, %v12377_v48  ;;  %v8873_v56 = vrot.slane %v8871_v55, 5  ;;  %v8877_v46 = vrot.slane %v8875_v28, 4  ;;  %v8855_v18 = vrot.slane %v8854_v29, 4  ;;  %v8910_v33 = vshrl.u32 %v8588_v7, 16 }
 0x5bd   : > { %13399 = vmatprep.mubr.msk.bf16.mxu1 %vm1580_vm13, %v12378_v17  ;;  %v8836_v20 = vsel %vm14777_vm12, %v8831_v52, %v8835_v10  ;;  %v8913_v41 = vshll.u32 %v8588_v7, 16  ;;  %v8881_v48 = vshll.u32 %v17822_v50, 16  ;;  %v8892_v16 = vor.u32 %v8891_v31, %v8888_v25 }
 0x5be   : > { %v8897_v39 = vrot.slane %v8895_v57, 5  ;;  %v8901_v0 = vrot.slane %v8899_v43, 4  ;;  %v12379_v32 = vcombine.low %v8826_v62, %v8836_v20  ;;  %v8850_v6 = vsel %vm14777_vm12, %v8845_v9, %v18358_v40  ;;  %v8594_v9 = vld [vmem:[#allocation2 + $0xc0] sm:$0xf] }
 0x5bf   : > { %v8934_v45 = vshrl.u32 %v8591_v47, 16  ;;  %v8937_v34 = vshll.u32 %v8591_v47, 16  ;;  %v8860_v1 = vsel %vm14777_vm12, %v8855_v18, %v8859_v37  ;;  %v8869_v26 = vrot.slane %v8868_v24, 4 }
 0x5c0   : > { %v8878_v55 = vor.u32 %v8877_v46, %v8873_v56  ;;  %v8905_v28 = vshll.u32 %v17844_v13, 16  ;;  %v8912_v17 = vrot.slane %v8910_v33, 4  ;;  %v8915_v10 = vrot.slane %v8913_v41, 5 }
 0x5c1   : > { %v8919_v50 = vshll.u32 %v17856_v4, 16  ;;  %v8923_v29 = vshrl.u32 %v17856_v4, 16  ;;  %v12380_v25 = vcombine.low %v8850_v6, %v8860_v1  ;;  %v8883_v31 = vrot.slane %v8881_v48, 5  ;;  %v14257_v6 = vld [vmem:[#allocation2 + $0xb0] sm:$0x1] }
 0x5c2   : > { %v8893_v57 = vrot.slane %v8892_v16, 4  ;;  %v8902_v43 = vor.u32 %v8901_v0, %v8897_v39  ;;  %v8936_v40 = vrot.slane %v8934_v45, 4  ;;  %v8939_v7 = vrot.slane %v8937_v34, 5 }
 0x5c3   : > { %v8943_v62 = vshll.u32 %v17871_v54, 16  ;;  %v8947_v52 = vshrl.u32 %v17871_v54, 16  ;;  %v8874_v13 = vsel %vm14777_vm12, %v8869_v26, %v8873_v56  ;;  %v8907_v37 = vrot.slane %v8905_v28, 5 }
 0x5c4   : > { %13400 = vmatmul.mubr.msk.bf16.gmra.mrb[16].mxu1 %vm1580_vm13, %v12379_v32  ;;  %v8879_v4 = vrot.slane %v8878_v55, 4  ;;  %v8916_v24 = vor.u32 %v8915_v10, %v8912_v17  ;;  %v8921_v46 = vrot.slane %v8919_v50, 5  ;;  %v8925_v47 = vrot.slane %v8923_v29, 4 }
 0x5c5   : > { %13403 = vmatprep.mubr.msk.bf16.mxu1 %vm1580_vm13, %v12380_v25  ;;  %v8898_v20 = vsel %vm14777_vm12, %v8893_v57, %v8897_v39  ;;  %v8903_v18 = vrot.slane %v8902_v43, 4  ;;  %v8958_v33 = vshrl.u32 %v8594_v9, 16  ;;  %v8961_v41 = vshll.u32 %v8594_v9, 16  ;;  %v14258_v9 = vld [vmem:[#allocation2 + $0xc8] sm:$0x1] }
 0x5c6   : > { %v8884_v54 = vsel %vm14777_vm12, %v8879_v4, %v8883_v31  ;;  %v8940_v48 = vor.u32 %v8939_v7, %v8936_v40  ;;  %v8945_v16 = vrot.slane %v8943_v62, 5  ;;  %v8949_v0 = vrot.slane %v8947_v52, 4 }
 0x5c7   : > { %v12381_v32 = vcombine.low %v8874_v13, %v8884_v54  ;;  %v8908_v56 = vsel %vm14777_vm12, %v8903_v18, %v8907_v37  ;;  %v8929_v45 = vshll.u32 %v14257_v6, 16  ;;  %v8917_v1 = vrot.slane %v8916_v24, 4  ;;  %v9275_v18 = vld [vmem:[#allocation2 + $0xc] sm:$0xe] }
 0x5c8   : > { %v12382_v34 = vcombine.low %v8898_v20, %v8908_v56  ;;  %v8926_v26 = vor.u32 %v8925_v47, %v8921_v46  ;;  %v8953_v39 = vshll.u32 %v17884_v38, 16  ;;  %v8960_v55 = vrot.slane %v8958_v33, 4 }
 0x5c9   : > { %v8963_v28 = vrot.slane %v8961_v41, 5  ;;  %v8967_v17 = vshll.u32 %v17886_v12, 16  ;;  %v8971_v10 = vshrl.u32 %v17886_v12, 16  ;;  %v8941_v50 = vrot.slane %v8940_v48, 4 }
 0x5ca   : > { %v8950_v29 = vor.u32 %v8949_v0, %v8945_v16  ;;  %v8931_v25 = vrot.slane %v8929_v45, 5  ;;  %v8922_v31 = vsel %vm14777_vm12, %v8917_v1, %v8921_v46  ;;  %v8955_v57 = vrot.slane %v8953_v39, 5  ;;  %v9276_v45 = vld [vmem:[#allocation2 + $0x18] sm:$0xe] }
 0x5cb   : > { %v8927_v43 = vrot.slane %v8926_v26, 4  ;;  %v8964_v40 = vor.u32 %v8963_v28, %v8960_v55  ;;  %v8969_v38 = vrot.slane %v8967_v17, 5  ;;  %v8973_v7 = vrot.slane %v8971_v10, 4  ;;  %v10536_v10 = vld [vmem:[#allocation8 + $0xe] sm:$0x3] }
 0x5cc   : > { %13404 = vmatmul.mubr.msk.bf16.gmra.mrb[20].mxu1 %vm1580_vm13, %v12381_v32  ;;  %v8946_v62 = vsel %vm14777_vm12, %v8941_v50, %v8945_v16  ;;  %v8951_v52 = vrot.slane %v8950_v29, 4  ;;  %v8977_v13 = vshll.u32 %v14258_v9, 16  ;;  %v9341_v24 = vrot.slane %v17972_v22, 5  ;;  %v19524_v29 = vld [vmem:[#allocation13_spill] sm:$0xff] }
 0x5cd   : > { %13407 = vmatprep.mubr.msk.bf16.mxu1 %vm1580_vm13, %v12382_v34  ;;  %v8932_v12 = vsel %vm14777_vm12, %v8927_v43, %v8931_v25  ;;  %v8965_v47 = vrot.slane %v8964_v40, 4  ;;  %v8974_v20 = vor.u32 %v8973_v7, %v8969_v38  ;;  %v9344_v33 = vrot.slane %v17980_v27, 5  ;;  %v19525_v25 = vld [vmem:[#allocation15_spill] sm:$0xff]  ;;  %v19528_v43 = vld [vmem:[#allocation20_spill] sm:$0xff]  ;;  %v19537_v9 = vld [vmem:[#allocation25_spill] sm:$0xff] }
 0x5ce   : > { %v12383_v37 = vcombine.low %v8922_v31, %v8932_v12  ;;  %v8956_v4 = vsel %vm14777_vm12, %v8951_v52, %v8955_v57  ;;  %v8979_v41 = vrot.slane %v8977_v13, 5  ;;  %v12402_v54 = vrot.slane %v9275_v18, 9  ;;  %v19527_v57 = vld [vmem:[#allocation17_spill] sm:$0xff]  ;;  %v19536_v12 = vld [vmem:[#allocation23_spill] sm:$0xff]  ;;  %v19545_v18 = vld [vmem:[#allocation28_spill] sm:$0xff] }
 0x5cf   : > { %v12384_v46 = vcombine.low %v8946_v62, %v8956_v4  ;;  %v9343_v48 = vrot.slane %v9341_v24, 4  ;;  %v8970_v16 = vsel %vm14777_vm12, %v8965_v47, %v8969_v38  ;;  %v8975_v0 = vrot.slane %v8974_v20, 4  ;;  %v19531_v38 = vld [vmem:[#allocation14_spill] sm:$0xff]  ;;  %v19534_v62 = vld [vmem:[#allocation21_spill] sm:$0xff] }
 0x5d0   : > { %v9348_v56 = vrot.slane %v17978_v44, 5  ;;  %v9342_v27 = vsel %vm15316_vm1, %v12402_v54, %v9341_v24  ;;  %v9351_v1 = vrot.slane %v17989_v49, 5  ;;  %v12403_v26 = vrot.slane %v9276_v45, 9  ;;  %v19522_v49 = vld [vmem:[#allocation18_spill] sm:$0xff]  ;;  %v19543_v47 = vld [vmem:[#allocation29_spill] sm:$0xff]  ;;  %v19548_v54 = vld [vmem:[#allocation31_spill] sm:$0xff] }
 0x5d1   : > { %v9345_v22 = vsel %vm15316_vm1, %v9343_v48, %v9344_v33  ;;  %v8980_v32 = vsel %vm14777_vm12, %v8975_v0, %v8979_v41  ;;  %v9908_v17 = vsel %vm1629_vm0, %v18199_v21, 0  ;;  %v19523_v50 = vcombine.low %v17741_v59, %v19522_v49  ;;  %v19530_v21 = vld [vmem:[#allocation22_spill] sm:$0xff]  ;;  %v19533_v59 = vld [vmem:[#allocation19_spill] sm:$0xff]  ;;  %v19549_v48 = vld [vmem:[#allocation32_spill] sm:$0xff] }
 0x5d2   : > { %v12385_v6 = vcombine.low %v8970_v16, %v8980_v32  ;;  %v12418_v34 = vcombine.low %v9342_v27, %v9345_v22  ;;  %v9350_v39 = vrot.slane %v9348_v56, 4  ;;  %v9349_v44 = vsel %vm15316_vm1, %v12403_v26, %v9348_v56  ;;  %v19540_v4 = vld [vmem:[#allocation26_spill] sm:$0xff]  ;;  %v19551_v0 = vld [vmem:[#allocation33_spill] sm:$0xff]  ;;  %v19554_v56 = vld [vmem:[#allocation35_spill] sm:$0xff] }
 0x5d3   : > { %v19526_v31 = vcombine.low %v19524_v29, %v19525_v25  ;;  %v19529_v40 = vcombine.low %v19527_v57, %v19528_v43  ;;  %v19532_v7 = vcombine.low %v19530_v21, %v19531_v38  ;;  %v19535_v52 = vcombine.low %v19533_v59, %v19534_v62  ;;  %v19546_v33 = vld [vmem:[#allocation30_spill] sm:$0xff]  ;;  %v19557_v45 = vld [vmem:[#allocation37_spill] sm:$0xff]  ;;  %v14204_v49 = vld [vmem:[#allocation2 + $0x30] sm:$0xff]  }
 0x5d4   : > { %13408 = vmatmul.mubr.msk.bf16.gmra.mrb[24].mxu1 %vm1580_vm13, %v12383_v37  ;;  %v9352_v55 = vsel %vm15316_vm1, %v9350_v39, %v9351_v1  ;;  %v19538_v13 = vcombine.low %v19536_v12, %v19537_v9  ;;  %v19539_v37 = vld [vmem:[#allocation24_spill] sm:$0xff]  ;;  %v19547_v41 = vcombine.low %v19545_v18, %v19546_v33  ;;  %v19550_v16 = vcombine.low %v19548_v54, %v19549_v48  ;;  %v19552_v22 = vld [vmem:[#allocation34_spill] sm:$0xff]  ;;  %v19560_v39 = vld [vmem:[#allocation39_spill] sm:$0xff] }
 0x5d5   : > { %13411 = vmatprep.mubr.msk.bf16.mxu1 %vm1580_vm13, %v12384_v46  ;;  %v12419_v28 = vcombine.low %v9349_v44, %v9352_v55  ;;  %v19541_v24 = vcombine.low %v19539_v37, %v19540_v4  ;;  %v19542_v46 = vld [vmem:[#allocation27_spill] sm:$0xff]  ;;  %v19553_v32 = vcombine.low %v19551_v0, %v19552_v22  ;;  %v14202_v26 = vld [vmem:[#allocation2 + $0x18] sm:$0xff]   ;;  %v14208_v57 = vld [vmem:[#allocation2 + $0x60] sm:$0xff]  }
 0x5d6   : > { %v19544_v20 = vcombine.low %v19542_v46, %v19543_v47  ;;  %v19561_v55 = vld [vmem:[#allocation40_spill] sm:$0xff]  ;;  %v14205_v29 = vld [vmem:[#allocation2 + $0x3c] sm:$0xff]   ;;  %v14206_v25 = vld [vmem:[#allocation2 + $0x48] sm:$0xff]  }
 0x5d7   : > { %v19562_v44 = vcombine.low %v19560_v39, %v19561_v55  ;;  %v14210_v43 = vld [vmem:[#allocation2 + $0x78] sm:$0xff]   ;;  %v14211_v21 = vld [vmem:[#allocation2 + $0x84] sm:$0xff]   ;;  %v14212_v38 = vld [vmem:[#allocation2 + $0x90] sm:$0xff]  }
 0x5d8   : > { %v14213_v46 = vld [vmem:[#allocation2 + $0x9c] sm:$0xff]   ;;  %v18553_v47 = vld [vmem:[#allocation2 + $0x28] sm:$0xf]  ;;  %v19563_v55 = vld [vmem:[#allocation16_spill] sm:$0xff] }
 0x5d9   : > { %v14214_v18 = vld [vmem:[#allocation2 + $0xa8] sm:$0xff]   ;;  %v18556_v54 = vld [vmem:[#allocation2 + $0x20] sm:$0x1]  ;;  %v10185_v22 = vshll.u32 %v18553_v47, 16 }
 0x5dc   : > { %13412 = vmatmul.mubr.msk.bf16.gmra.mrb[28].mxu1 %vm1580_vm13, %v12385_v6  ;;  %v19555_v6 = vld [vmem:[#allocation36_spill] sm:$0xff] }
 0x5dd   : > { %13417 = vmatprep.mubr.msk.bf16.mxu1 %vm1580_vm13, %v12418_v34  ;;  %v19556_v27 = vcombine.low %v19554_v56, %v19555_v6  ;;  %v19558_v34 = vld [vmem:[#allocation38_spill] sm:$0xff] }
 0x5de   : > { %v19559_v1 = vcombine.low %v19557_v45, %v19558_v34  ;;  %v10171_v45 = vshll.u32 %v18556_v54, 16  ;;  %v10112_v34 = vld [vmem:[#allocation2 + $0x3c] sm:$0xf] }
 0x5e4   : > { %13418 = vmatmul.mubr.msk.bf16.vlgmr.msra.gmra.mrb[0].mxu1 %vm1580_vm13, %v12419_v28  ;;  %v14203_v28 = vld [vmem:[#allocation2 + $0x24] sm:$0xff]  }
 0x5e5   : > { %13450 = vmatpush3.bf16.msra.mxu1 %v9908_v17  ;;  %13421 = vmatprep.mubr.msk.bf16.mxu1 %vm1580_vm13, %v19523_v50  ;;  %v10634_v17 = vsel %vm1629_vm0, %v10536_v10, 0  ;;  %v18535_v50 = vld [vmem:[#allocation8 + $0x10] sm:$0x3] }
 0x5e6   : > { %14079 = vmatprep.subr.msk.bf16.mxu1 %vm1629_vm0, %v10536_v10  ;;  %v14209_v10 = vld [vmem:[#allocation2 + $0x6c] sm:$0xff]  }
 0x5ec   : > { %13422 = vmatmul.mubr.msk.bf16.gmra.mrb[4].mxu1 %vm1580_vm13, %v19526_v31  ;;  %v14207_v31 = vld [vmem:[#allocation2 + $0x54] sm:$0xff]  }
 0x5ed   : > { %13425 = vmatprep.mubr.msk.bf16.mxu1 %vm1580_vm13, %v19529_v40  ;;  %v10103_v40 = vld [vmem:[#allocation2 + $0x18] sm:$0xf] }
 0x5ee   : > { %v10152_v59 = vshrl.u32 %v10103_v40, 16  ;;  %v10155_v62 = vshll.u32 %v10103_v40, 16 }
 0x5f0   : > { %v10157_v37 = vrot.slane %v10155_v62, 5 }
 0x5f4   : > { %13426 = vmatmul.mubr.msk.bf16.gmra.mrb[8].mxu1 %vm1580_vm13, %v19532_v7  ;;  %v18548_v7 = vld [vmem:[#allocation2 + $0x1c] sm:$0xf] }
 0x5f5   : > { %13429 = vmatprep.mubr.msk.bf16.mxu1 %vm1580_vm13, %v19535_v52  ;;  %v10106_v52 = vld [vmem:[#allocation2 + $0x24] sm:$0xf]  ;;  %v10161_v12 = vshll.u32 %v18548_v7, 16  ;;  %v10165_v9 = vshrl.u32 %v18548_v7, 16 }
 0x5f6   : > { %v10176_v4 = vshrl.u32 %v10106_v52, 16 }
 0x5f7   : > { %v10163_v33 = vrot.slane %v10161_v12, 5 }
 0x5fc   : > { %13430 = vmatmul.mubr.msk.bf16.gmra.mrb[12].mxu1 %vm1580_vm13, %v19538_v13  ;;  %v10154_v13 = vrot.slane %v10152_v59, 4 }
 0x5fd   : > { %13433 = vmatprep.mubr.msk.bf16.mxu1 %vm1580_vm13, %v19541_v24  ;;  %v10179_v24 = vshll.u32 %v10106_v52, 16 }
 0x5fe   : > { %v10158_v48 = vor.u32 %v10157_v37, %v10154_v13 }
 0x5ff   : > { %v10181_v0 = vrot.slane %v10179_v24, 5 }
 0x604   : > { %13434 = vmatmul.mubr.msk.bf16.gmra.mrb[16].mxu1 %vm1580_vm13, %v19544_v20  ;;  %v10109_v20 = vld [vmem:[#allocation2 + $0x30] sm:$0xf] }
 0x605   : > { %13437 = vmatprep.mubr.msk.bf16.mxu1 %vm1580_vm13, %v19547_v41  ;;  %v10167_v41 = vrot.slane %v10165_v9, 4  ;;  %v10200_v56 = vshrl.u32 %v10109_v20, 16  ;;  %v10203_v6 = vshll.u32 %v10109_v20, 16  ;;  %v10115_v9 = vld [vmem:[#allocation2 + $0x48] sm:$0xf]  ;;  %v19565_v20 = vld [vmem:[#allocation41_spill] sm:$0xff] }
 0x60c   : > { %13438 = vmatmul.mubr.msk.bf16.gmra.mrb[20].mxu1 %vm1580_vm13, %v19550_v16  ;;  %v10178_v16 = vrot.slane %v10176_v4, 4  ;;  %v19564_v4 = vld [vmem:[#allocation42_spill] sm:$0xff] }
 0x60d   : > { %13441 = vmatprep.mubr.msk.bf16.mxu1 %vm1580_vm13, %v19553_v32  ;;  %v10189_v32 = vshrl.u32 %v18553_v47, 16  ;;  %v10233_v24 = vshll.u32 %v19564_v4, 16 }
 0x60e   : > { %v10182_v39 = vor.u32 %v10181_v0, %v10178_v16  ;;  %v10248_v0 = vshrl.u32 %v10115_v9, 16 }
 0x610   : > { %v10183_v62 = vrot.slane %v10182_v39, 4  ;;  %v10118_v39 = vld [vmem:[#allocation2 + $0x54] sm:$0xf] }
 0x614   : > { %13442 = vmatmul.mubr.msk.bf16.gmra.mrb[24].mxu1 %vm1580_vm13, %v19556_v27  ;;  %v10168_v27 = vor.u32 %v10167_v41, %v10163_v33 }
 0x615   : > { %13445 = vmatprep.mubr.msk.bf16.mxu1 %vm1580_vm13, %v19559_v1  ;;  %v10159_v1 = vrot.slane %v10158_v48, 4 }
 0x616   : > { %v10169_v40 = vrot.slane %v10168_v27, 4 }
 0x617   : > { %v10164_v59 = vsel %vm14777_vm12, %v10159_v1, %v10163_v33 }
 0x61c   : > { %13446 = vmatmul.mubr.msk.bf16.gmra.mrb[28].mxu1 %vm1580_vm13, %v19562_v44  ;;  %v10209_v44 = vshll.u32 %v19563_v55, 16 }
 0x61d   : > { %13451 = vmatprep.mubr.msk.bf16.mxu1 %vm1580_vm13, %v14202_v26  ;;  %v18562_v26 = vld [vmem:[#allocation2 + $0x2c] sm:$0x1] }
 0x61e   : > { %v10211_v52 = vrot.slane %v10209_v44, 5 }
 0x624   : > { %13452 = vmatmul.mubr.msk.bf16.vlgmr.msra.gmra.mrb[0].mxu1 %vm1580_vm13, %v14203_v28  ;;  %v10213_v28 = vshrl.u32 %v19563_v55, 16  ;;  %v14217_v55 = vld [vmem:[#allocation2 + $0xcc] sm:$0xff]  }
 0x625   : > { %13484 = vmatpush3.bf16.msra.mxu1 %v10634_v17  ;;  %13455 = vmatprep.mubr.msk.bf16.mxu1 %vm1580_vm13, %v14204_v49  ;;  %v10187_v17 = vrot.slane %v10185_v22, 5  ;;  %v10191_v49 = vrot.slane %v10189_v32, 4  ;;  %v10251_v22 = vshll.u32 %v10115_v9, 16 }
 0x626   : > { %14080 = vmatprep.subr.msk.bf16.mxu1 %vm1629_vm0, %v18535_v50  ;;  %v10215_v12 = vrot.slane %v10213_v28, 4 }
 0x627   : > { %v10192_v13 = vor.u32 %v10191_v49, %v10187_v17  ;;  %v19566_v49 = vld [vmem:[#allocation44_spill] sm:$0xff] }
 0x629   : > { %v10193_v27 = vrot.slane %v10192_v13, 4 }
 0x62c   : > { %13456 = vmatmul.mubr.msk.bf16.gmra.mrb[4].mxu1 %vm1580_vm13, %v14205_v29  ;;  %v10202_v29 = vrot.slane %v10200_v56, 4  ;;  %v10188_v56 = vsel %vm14777_vm12, %v10183_v62, %v10187_v17  ;;  %v10250_v17 = vrot.slane %v10248_v0, 4  ;;  %v10275_v62 = vshll.u32 %v10118_v39, 16  ;;  %v19569_v0 = vld [vmem:[#allocation45_spill] sm:$0xff] }
 0x62d   : > { %13459 = vmatprep.mubr.msk.bf16.mxu1 %vm1580_vm13, %v14206_v25  ;;  %v10205_v25 = vrot.slane %v10203_v6, 5  ;;  %v10216_v6 = vor.u32 %v10215_v12, %v10211_v52 }
 0x62f   : > { %v10206_v37 = vor.u32 %v10205_v25, %v10202_v29  ;;  %v10257_v29 = vshll.u32 %v19566_v49, 16  ;;  %v10261_v25 = vshrl.u32 %v19566_v49, 16  ;;  %v10124_v49 = vld [vmem:[#allocation2 + $0x6c] sm:$0xf] }
 0x634   : > { %13460 = vmatmul.mubr.msk.bf16.gmra.mrb[8].mxu1 %vm1580_vm13, %v14207_v31  ;;  %v14215_v31 = vld [vmem:[#allocation2 + $0xb4] sm:$0xff]  }
 0x635   : > { %13463 = vmatprep.mubr.msk.bf16.mxu1 %vm1580_vm13, %v14208_v57  ;;  %v10224_v57 = vshrl.u32 %v10112_v34, 16 }
 0x637   : > { %v10226_v41 = vrot.slane %v10224_v57, 4 }
 0x63c   : > { %13464 = vmatmul.mubr.msk.bf16.gmra.mrb[12].mxu1 %vm1580_vm13, %v14209_v10  ;;  %v10227_v10 = vshll.u32 %v10112_v34, 16  ;;  %v10235_v34 = vrot.slane %v10233_v24, 5 }
 0x63d   : > { %13467 = vmatprep.mubr.msk.bf16.mxu1 %vm1580_vm13, %v14210_v43  ;;  %v14216_v43 = vld [vmem:[#allocation2 + $0xc0] sm:$0xff]  }
 0x63e   : > { %v10229_v48 = vrot.slane %v10227_v10, 5  ;;  %v19567_v10 = vld [vmem:[#allocation43_spill] sm:$0xff] }
 0x640   : > { %v10230_v28 = vor.u32 %v10229_v48, %v10226_v41  ;;  %v19568_v48 = vld [vmem:[#allocation46_spill] sm:$0xff] }
 0x642   : > { %v10231_v24 = vrot.slane %v10230_v28, 4 }
 0x644   : > { %13468 = vmatmul.mubr.msk.bf16.gmra.mrb[16].mxu1 %vm1580_vm13, %v14211_v21  ;;  %v10173_v21 = vrot.slane %v10171_v45, 5  ;;  %v10207_v45 = vrot.slane %v10206_v37, 4 }
 0x645   : > { %13471 = vmatprep.mubr.msk.bf16.mxu1 %vm1580_vm13, %v14212_v38  ;;  %v10195_v38 = vshll.u32 %v18562_v26, 16 }
 0x646   : > { %v10174_v16 = vsel %vm14777_vm12, %v10169_v40, %v10173_v21  ;;  %v10253_v40 = vrot.slane %v10251_v22, 5  ;;  %v10212_v12 = vsel %vm14777_vm12, %v10207_v45, %v10211_v52  ;;  %v10267_v22 = vshll.u32 %v19569_v0, 16 }
 0x647   : > { %v10197_v33 = vrot.slane %v10195_v38, 5  ;;  %v12482_v32 = vcombine.low %v10164_v59, %v10174_v16  ;;  %v10217_v38 = vrot.slane %v10216_v6, 4  ;;  %v10272_v59 = vshrl.u32 %v10118_v39, 16 }
 0x648   : > { %v10254_v41 = vor.u32 %v10253_v40, %v10250_v17  ;;  %v10281_v16 = vshll.u32 %v19568_v48, 16  ;;  %v10305_v52 = vshll.u32 %v18156_v58, 16  ;;  %v11104_v39 = vsel %vm1629_vm0, %v18535_v50, 0  ;;  %v10127_v40 = vld [vmem:[#allocation2 + $0x78] sm:$0xf] }
 0x649   : > { %v10198_v57 = vsel %vm14777_vm12, %v10193_v27, %v10197_v33  ;;  %v10285_v33 = vshrl.u32 %v19568_v48, 16 }
 0x64a   : > { %v12483_v21 = vcombine.low %v10188_v56, %v10198_v57  ;;  %v10277_v56 = vrot.slane %v10275_v62, 5  ;;  %v10307_v50 = vrot.slane %v10305_v52, 5  ;;  %v10323_v62 = vshll.u32 %v10124_v49, 16 }
 0x64b   : > { %v10287_v57 = vrot.slane %v10285_v33, 4  ;;  %v19572_v33 = vld [vmem:[#allocation48_spill] sm:$0xff] }
 0x64c   : > { %13472 = vmatmul.mubr.msk.bf16.gmra.mrb[20].mxu1 %vm1580_vm13, %v14213_v46  ;;  %v10237_v46 = vshrl.u32 %v19564_v4, 16  ;;  %v10315_v0 = vshll.u32 %v19572_v33, 16  ;;  %v10325_v52 = vrot.slane %v10323_v62, 5 }
 0x64d   : > { %13475 = vmatprep.mubr.msk.bf16.mxu1 %vm1580_vm13, %v14214_v18  ;;  %v10219_v18 = vshll.u32 %v19565_v20, 16  ;;  %v10263_v20 = vrot.slane %v10261_v25, 4  ;;  %v10255_v25 = vrot.slane %v10254_v41, 4 }
 0x64e   : > { %v10239_v1 = vrot.slane %v10237_v46, 4  ;;  %v10259_v46 = vrot.slane %v10257_v29, 5 }
 0x64f   : > { %v10221_v44 = vrot.slane %v10219_v18, 5 }
 0x650   : > { %v10240_v9 = vor.u32 %v10239_v1, %v10235_v34  ;;  %v10309_v1 = vshrl.u32 %v18156_v58, 16  ;;  %v10264_v28 = vor.u32 %v10263_v20, %v10259_v46  ;;  %v10344_v20 = vshrl.u32 %v10127_v40, 16 }
 0x651   : > { %v10222_v4 = vsel %vm14777_vm12, %v10217_v38, %v10221_v44  ;;  %v10236_v44 = vsel %vm14777_vm12, %v10231_v24, %v10235_v34 }
 0x652   : > { %v10241_v6 = vrot.slane %v10240_v9, 4  ;;  %v10311_v38 = vrot.slane %v10309_v1, 4  ;;  %v10265_v9 = vrot.slane %v10264_v28, 4  ;;  %v10346_v28 = vrot.slane %v10344_v20, 4 }
 0x654   : > { %13476 = vmatmul.mubr.msk.bf16.gmra.mrb[24].mxu1 %vm1580_vm13, %v14215_v31  ;;  %v10121_v31 = vld [vmem:[#allocation2 + $0x60] sm:$0xf] }
 0x655   : > { %13479 = vmatprep.mubr.msk.bf16.mxu1 %vm1580_vm13, %v14216_v43  ;;  %v10243_v43 = vshll.u32 %v19567_v10, 16  ;;  %v10296_v13 = vshrl.u32 %v10121_v31, 16  ;;  %v10299_v37 = vshll.u32 %v10121_v31, 16  ;;  %v18600_v31 = vrot.slane %v10281_v16, 5 }
 0x656   : > { %v10269_v10 = vrot.slane %v10267_v22, 5 }
 0x657   : > { %v10245_v18 = vrot.slane %v10243_v43, 5  ;;  %v10298_v27 = vrot.slane %v10296_v13, 4  ;;  %v10301_v45 = vrot.slane %v10299_v37, 5  ;;  %v19570_v43 = vld [vmem:[#allocation47_spill] sm:$0xff]  ;;  %v10288_v24 = vor.u32 %v10287_v57, %v18600_v31 }
 0x658   : > { %v10291_v17 = vshll.u32 %v19570_v43, 16  ;;  %v19571_v13 = vld [vmem:[#allocation51_spill] sm:$0xff]  ;;  %v10270_v41 = vsel %vm14777_vm12, %v10265_v9, %v10269_v10 }
 0x659   : > { %v10246_v29 = vsel %vm14777_vm12, %v10241_v6, %v10245_v18  ;;  %v10302_v34 = vor.u32 %v10301_v45, %v10298_v27  ;;  %v10329_v37 = vshll.u32 %v19571_v13, 16  ;;  %v10347_v18 = vshll.u32 %v10127_v40, 16  ;;  %v10130_v6 = vld [vmem:[#allocation2 + $0x84] sm:$0xf] }
 0x65a   : > { %v10293_v16 = vrot.slane %v10291_v17, 5  ;;  %v10368_v57 = vshrl.u32 %v10130_v6, 16  ;;  %v10371_v10 = vshll.u32 %v10130_v6, 16  ;;  %v19574_v40 = vld [vmem:[#allocation54_spill] sm:$0xff]  ;;  %v10136_v6 = vld [vmem:[#allocation2 + $0x9c] sm:$0xf] }
 0x65b   : > { %v10303_v22 = vrot.slane %v10302_v34, 4  ;;  %v18613_v27 = vrot.slane %v10329_v37, 5  ;;  %v10339_v34 = vshll.u32 %v19574_v40, 16 }
 0x65c   : > { %13480 = vmatmul.mubr.msk.bf16.gmra.mrb[28].mxu1 %vm1580_vm13, %v14217_v55  ;;  %v12484_v55 = vcombine.low %v10212_v12, %v10222_v4  ;;  %v12485_v12 = vcombine.low %v10236_v44, %v10246_v29  ;;  %v10333_v4 = vshrl.u32 %v19571_v13, 16  ;;  %v10289_v44 = vrot.slane %v10288_v24, 4  ;;  %v19575_v13 = vld [vmem:[#allocation56_spill] sm:$0xff] }
 0x65d   : > { %13485 = vmatprep.mubr.msk.bf16.mxu1 %vm1580_vm13, %v12482_v32  ;;  %v10274_v32 = vrot.slane %v10272_v59, 4  ;;  %v10320_v59 = vshrl.u32 %v10124_v49, 16  ;;  %v10349_v49 = vrot.slane %v10347_v18, 5  ;;  %v10308_v43 = vsel %vm14777_vm12, %v10303_v22, %v10307_v50 }
 0x65e   : > { %v10335_v45 = vrot.slane %v10333_v4, 4  ;;  %v10363_v37 = vshll.u32 %v19575_v13, 16  ;;  %v19576_v4 = vld [vmem:[#allocation59_spill] sm:$0xff]  ;;  %v10370_v20 = vrot.slane %v10368_v57, 4  ;;  %v10373_v18 = vrot.slane %v10371_v10, 5 }
 0x65f   : > { %v10278_v58 = vor.u32 %v10277_v56, %v10274_v32  ;;  %v10312_v32 = vor.u32 %v10311_v38, %v10307_v50  ;;  %v10322_v56 = vrot.slane %v10320_v59, 4  ;;  %v10133_v38 = vld [vmem:[#allocation2 + $0x90] sm:$0xf]  ;;  %v10350_v9 = vor.u32 %v10349_v49, %v10346_v28 }
 0x660   : > { %v10336_v62 = vor.u32 %v10335_v45, %v18613_v27  ;;  %v10381_v24 = vshrl.u32 %v19576_v4, 16  ;;  %v10395_v50 = vshll.u32 %v10133_v38, 16  ;;  %v10416_v57 = vshrl.u32 %v10136_v6, 16 }
 0x661   : > { %v10279_v48 = vrot.slane %v10278_v58, 4  ;;  %v10294_v58 = vsel %vm14777_vm12, %v10289_v44, %v10293_v16  ;;  %v10326_v17 = vor.u32 %v10325_v52, %v10322_v56  ;;  %v10313_v59 = vrot.slane %v10312_v32, 4 }
 0x662   : > { %v10401_v56 = vshll.u32 %v18229_v19, 16  ;;  %v10405_v52 = vshrl.u32 %v18229_v19, 16  ;;  %v10337_v45 = vrot.slane %v10336_v62, 4  ;;  %v10374_v44 = vor.u32 %v10373_v18, %v10370_v20 }
 0x663   : > { %v10284_v29 = vsel %vm14777_vm12, %v10279_v48, %v18600_v31  ;;  %v10327_v33 = vrot.slane %v10326_v17, 4  ;;  %v10397_v49 = vrot.slane %v10395_v50, 5  ;;  %v10419_v10 = vshll.u32 %v10136_v6, 16 }
 0x664   : > { %13486 = vmatmul.mubr.msk.bf16.vlgmr.msra.gmra.mrb[0].mxu1 %vm1580_vm13, %v12483_v21  ;;  %v10260_v21 = vsel %vm14777_vm12, %v10255_v25, %v10259_v46  ;;  %v19573_v46 = vld [vmem:[#allocation55_spill] sm:$0xff]  ;;  %v10317_v25 = vrot.slane %v10315_v0, 5  ;;  %v12487_v48 = vcombine.low %v10284_v29, %v10294_v58  ;;  %v10341_v0 = vrot.slane %v10339_v34, 5  ;;  %v10139_v29 = vld [vmem:[#allocation2 + $0xa8] sm:$0xf] }
 0x665   : > { %13518 = vmatpush3.bf16.msra.mxu1 %v11104_v39  ;;  %13489 = vmatprep.mubr.msk.bf16.mxu1 %vm1580_vm13, %v12484_v55  ;;  %v10353_v1 = vshll.u32 %v19573_v46, 16  ;;  %v10357_v39 = vshrl.u32 %v19573_v46, 16  ;;  %v12486_v55 = vcombine.low %v10260_v21, %v10270_v41  ;;  %v10377_v21 = vshll.u32 %v19576_v4, 16 }
 0x666   : > { %v10392_v41 = vshrl.u32 %v10133_v38, 16  ;;  %v10318_v16 = vsel %vm14777_vm12, %v10313_v59, %v10317_v25  ;;  %v10351_v46 = vrot.slane %v10350_v9, 4  ;;  %v10332_v25 = vsel %vm14777_vm12, %v10327_v33, %v18613_v27 }
 0x667   : > { %v10359_v31 = vrot.slane %v10357_v39, 4  ;;  %v12488_v22 = vcombine.low %v10308_v43, %v10318_v16  ;;  %v10383_v39 = vrot.slane %v10381_v24, 4  ;;  %v10342_v19 = vsel %vm14777_vm12, %v10337_v45, %v10341_v0  ;;  %v19577_v43 = vld [vmem:[#allocation60_spill] sm:$0xff] }
 0x668   : > { %v10394_v28 = vrot.slane %v10392_v41, 4  ;;  %v10387_v17 = vshll.u32 %v19577_v43, 16  ;;  %v10403_v40 = vrot.slane %v10401_v56, 5  ;;  %v10407_v34 = vrot.slane %v10405_v52, 4 }
 0x669   : > { %v10440_v62 = vshrl.u32 %v10139_v29, 16  ;;  %v10375_v27 = vrot.slane %v10374_v44, 4  ;;  %v10418_v4 = vrot.slane %v10416_v57, 4  ;;  %v10425_v24 = vshll.u32 %v18241_v15, 16 }
 0x66a   : > { %v10398_v13 = vor.u32 %v10397_v49, %v10394_v28  ;;  %v10429_v20 = vshrl.u32 %v18241_v15, 16  ;;  %v12489_v18 = vcombine.low %v10332_v25, %v10342_v19  ;;  %v10389_v50 = vrot.slane %v10387_v17, 5  ;;  %v19578_v28 = vld [vmem:[#allocation66_spill] sm:$0xff] }
 0x66b   : > { %v10449_v33 = vshll.u32 %v18254_v23, 16  ;;  %v10453_v0 = vshrl.u32 %v18254_v23, 16  ;;  %v10427_v6 = vrot.slane %v10425_v24, 5  ;;  %v10435_v49 = vshll.u32 %v19578_v28, 16 }
 0x66c   : > { %13490 = vmatmul.mubr.msk.bf16.gmra.mrb[4].mxu1 %vm1580_vm13, %v12485_v12  ;;  %v10355_v12 = vrot.slane %v10353_v1, 5  ;;  %v10379_v1 = vrot.slane %v10377_v21, 5  ;;  %v10421_v21 = vrot.slane %v10419_v10, 5  ;;  %v10399_v56 = vrot.slane %v10398_v13, 4 }
 0x66d   : > { %13493 = vmatprep.mubr.msk.bf16.mxu1 %vm1580_vm13, %v12486_v55  ;;  %v10365_v55 = vrot.slane %v10363_v37, 5  ;;  %v10411_v37 = vshll.u32 %v18231_v61, 16  ;;  %v10431_v45 = vrot.slane %v10429_v20, 4  ;;  %v10451_v25 = vrot.slane %v10449_v33, 5 }
 0x66e   : > { %v10360_v32 = vor.u32 %v10359_v31, %v10355_v12  ;;  %v10356_v38 = vsel %vm14777_vm12, %v10351_v46, %v10355_v12  ;;  %v10384_v59 = vor.u32 %v10383_v39, %v10379_v1  ;;  %v10443_v31 = vshll.u32 %v10139_v29, 16  ;;  %v10145_v46 = vld [vmem:[#allocation2 + $0xc0] sm:$0xf] }
 0x66f   : > { %v10408_v12 = vor.u32 %v10407_v34, %v10403_v40  ;;  %v10380_v61 = vsel %vm14777_vm12, %v10375_v27, %v10379_v1  ;;  %v10413_v15 = vrot.slane %v10411_v37, 5  ;;  %v10422_v52 = vor.u32 %v10421_v21, %v10418_v4 }
 0x670   : > { %v10361_v58 = vrot.slane %v10360_v32, 4  ;;  %v10445_v16 = vrot.slane %v10443_v31, 5  ;;  %v10385_v32 = vrot.slane %v10384_v59, 4  ;;  %v10455_v1 = vrot.slane %v10453_v0, 4 }
 0x671   : > { %v10404_v57 = vsel %vm14777_vm12, %v10399_v56, %v10403_v40  ;;  %v10488_v10 = vshrl.u32 %v10145_v46, 16  ;;  %v10423_v17 = vrot.slane %v10422_v52, 4  ;;  %v10432_v34 = vor.u32 %v10431_v45, %v10427_v6 }
 0x672   : > { %v10366_v9 = vsel %vm14777_vm12, %v10361_v58, %v10365_v55  ;;  %v10390_v39 = vsel %vm14777_vm12, %v10385_v32, %v10389_v50  ;;  %v10409_v55 = vrot.slane %v10408_v12, 4  ;;  %v10491_v58 = vshll.u32 %v10145_v46, 16  ;;  %v10148_v50 = vld [vmem:[#allocation2 + $0xcc] sm:$0xf] }
 0x673   : > { %v12490_v41 = vcombine.low %v10356_v38, %v10366_v9  ;;  %v12491_v19 = vcombine.low %v10380_v61, %v10390_v39  ;;  %v19579_v38 = vld [vmem:[#allocation69_spill] sm:$0xff]  ;;  %v19580_v9 = vld [vmem:[#allocation71_spill] sm:$0xff]  ;;  %v10437_v4 = vrot.slane %v10435_v49, 5  ;;  %v10456_v24 = vor.u32 %v10455_v1, %v10451_v25 }
 0x674   : > { %13494 = vmatmul.mubr.msk.bf16.gmra.mrb[8].mxu1 %vm1580_vm13, %v12487_v48  ;;  %v10442_v48 = vrot.slane %v10440_v62, 4  ;;  %v10414_v43 = vsel %vm14777_vm12, %v10409_v55, %v10413_v15  ;;  %v10459_v59 = vshll.u32 %v19579_v38, 16  ;;  %v10473_v27 = vshll.u32 %v19580_v9, 16  ;;  %v14259_v55 = vld [vmem:[#allocation2 + $0xbc] sm:$0x1] }
 0x675   : > { %13497 = vmatprep.mubr.msk.bf16.mxu1 %vm1580_vm13, %v12488_v22  ;;  %v10142_v22 = vld [vmem:[#allocation2 + $0xb4] sm:$0xf]  ;;  %v10477_v13 = vshrl.u32 %v19580_v9, 16  ;;  %v12492_v37 = vcombine.low %v10404_v57, %v10414_v43  ;;  %v10490_v40 = vrot.slane %v10488_v10, 4  ;;  %v10493_v20 = vrot.slane %v10491_v58, 5 }
 0x676   : > { %v10464_v23 = vshrl.u32 %v10142_v22, 16  ;;  %v10467_v44 = vshll.u32 %v10142_v22, 16  ;;  %v10446_v29 = vor.u32 %v10445_v16, %v10442_v48  ;;  %v10428_v12 = vsel %vm14777_vm12, %v10423_v17, %v10427_v6 }
 0x677   : > { %v10461_v48 = vrot.slane %v10459_v59, 5  ;;  %v10433_v16 = vrot.slane %v10432_v34, 4  ;;  %v10475_v0 = vrot.slane %v10473_v27, 5  ;;  %v10479_v22 = vrot.slane %v10477_v13, 4 }
 0x678   : > { %v10466_v62 = vrot.slane %v10464_v23, 4  ;;  %v10469_v31 = vrot.slane %v10467_v44, 5  ;;  %v10447_v21 = vrot.slane %v10446_v29, 4  ;;  %v10457_v32 = vrot.slane %v10456_v24, 4  ;;  %v14260_v29 = vld [vmem:[#allocation2 + $0xc8] sm:$0x1] }
 0x679   : > { %v10512_v56 = vshrl.u32 %v10148_v50, 16  ;;  %v10515_v15 = vshll.u32 %v10148_v50, 16  ;;  %v10494_v52 = vor.u32 %v10493_v20, %v10490_v40  ;;  %v10483_v23 = vshll.u32 %v14259_v55, 16  ;;  %v10829_v50 = vld [vmem:[#allocation2 + $0x18] sm:$0xe]  ;;  %v19582_v55 = vld [vmem:[#allocation50_spill] sm:$0xff] }
 0x67a   : > { %v10470_v33 = vor.u32 %v10469_v31, %v10466_v62  ;;  %v10452_v61 = vsel %vm14777_vm12, %v10447_v21, %v10451_v25  ;;  %v10462_v6 = vsel %vm14777_vm12, %v10457_v32, %v10461_v48  ;;  %v10480_v49 = vor.u32 %v10479_v22, %v10475_v0 }
 0x67b   : > { %v12494_v44 = vcombine.low %v10452_v61, %v10462_v6  ;;  %v10507_v25 = vshll.u32 %v14260_v29, 16  ;;  %v10514_v1 = vrot.slane %v10512_v56, 4  ;;  %v10521_v57 = vshll.u32 %v18313_v2, 16  ;;  %v19581_v6 = vld [vmem:[#allocation49_spill] sm:$0xff]  ;;  %v19588_v29 = vld [vmem:[#allocation58_spill] sm:$0xff] }
 0x67c   : > { %13498 = vmatmul.mubr.msk.bf16.gmra.mrb[12].mxu1 %vm1580_vm13, %v12489_v18  ;;  %v10497_v18 = vshll.u32 %v18292_v53, 16  ;;  %v10471_v28 = vrot.slane %v10470_v33, 4  ;;  %v10525_v10 = vshrl.u32 %v18313_v2, 16  ;;  %v10495_v58 = vrot.slane %v10494_v52, 4 }
 0x67d   : > { %13501 = vmatprep.mubr.msk.bf16.mxu1 %vm1580_vm13, %v12490_v41  ;;  %v10501_v41 = vshrl.u32 %v18292_v53, 16  ;;  %v10438_v53 = vsel %vm14777_vm12, %v10433_v16, %v10437_v4  ;;  %v10485_v17 = vrot.slane %v10483_v23, 5  ;;  %v10509_v38 = vrot.slane %v10507_v25, 5 }
 0x67e   : > { %v10499_v45 = vrot.slane %v10497_v18, 5  ;;  %v12493_v39 = vcombine.low %v10428_v12, %v10438_v53  ;;  %v10476_v34 = vsel %vm14777_vm12, %v10471_v28, %v10475_v0  ;;  %v10481_v59 = vrot.slane %v10480_v49, 4  ;;  %v19587_v49 = vld [vmem:[#allocation57_spill] sm:$0xff] }
 0x67f   : > { %v10503_v46 = vrot.slane %v10501_v41, 4  ;;  %v10523_v31 = vrot.slane %v10521_v57, 5  ;;  %v10527_v9 = vrot.slane %v10525_v10, 4  ;;  %v10895_v40 = vrot.slane %v18548_v7, 5  ;;  %v19593_v57 = vld [vmem:[#allocation63_spill] sm:$0xff]  ;;  %v19594_v10 = vld [vmem:[#allocation65_spill] sm:$0xff] }
 0x680   : > { %v10500_v27 = vsel %vm14777_vm12, %v10495_v58, %v10499_v45  ;;  %v10486_v2 = vsel %vm14777_vm12, %v10481_v59, %v10485_v17  ;;  %v10898_v12 = vrot.slane %v18556_v54, 5  ;;  %v12514_v16 = vrot.slane %v10829_v50, 9  ;;  %v19597_v17 = vld [vmem:[#allocation67_spill] sm:$0xff]  ;;  %v19600_v59 = vld [vmem:[#allocation72_spill] sm:$0xff] }
 0x681   : > { %v10504_v43 = vor.u32 %v10503_v46, %v10499_v45  ;;  %v12495_v21 = vcombine.low %v10476_v34, %v10486_v2  ;;  %v10528_v41 = vor.u32 %v10527_v9, %v10523_v31  ;;  %v10897_v33 = vrot.slane %v10895_v40, 4  ;;  %v19603_v9 = vld [vmem:[#allocation73_spill] sm:$0xff] }
 0x682   : > { %v10902_v32 = vrot.slane %v18553_v47, 5  ;;  %v10896_v54 = vsel %vm15316_vm1, %v12514_v16, %v10895_v40  ;;  %v10905_v52 = vrot.slane %v18562_v26, 5  ;;  %v19583_v23 = vcombine.low %v19581_v6, %v19582_v55  ;;  %v19584_v26 = vld [vmem:[#allocation52_spill] sm:$0xff] }
 0x683   : > { %v10505_v13 = vrot.slane %v10504_v43, 4  ;;  %v10529_v22 = vrot.slane %v10528_v41, 4  ;;  %v10899_v7 = vsel %vm15316_vm1, %v10897_v33, %v10898_v12  ;;  %v19589_v25 = vcombine.low %v19587_v49, %v19588_v29  ;;  %v19596_v43 = vld [vmem:[#allocation64_spill] sm:$0xff] }
 0x684   : > { %13502 = vmatmul.mubr.msk.bf16.gmra.mrb[16].mxu1 %vm1580_vm13, %v12491_v19  ;;  %v10517_v19 = vrot.slane %v10515_v15, 5  ;;  %v10830_v15 = vld [vmem:[#allocation2 + $0x24] sm:$0xe]  ;;  %v12530_v53 = vcombine.low %v10896_v54, %v10899_v7  ;;  %v10904_v46 = vrot.slane %v10902_v32, 4  ;;  %v19595_v58 = vcombine.low %v19593_v57, %v19594_v10 }
 0x685   : > { %13505 = vmatprep.mubr.msk.bf16.mxu1 %vm1580_vm13, %v12492_v37  ;;  %v14261_v37 = vld [vmem:[#allocation2 + $0xd4] sm:$0x1]  ;;  %v10510_v24 = vsel %vm14777_vm12, %v10505_v13, %v10509_v38  ;;  %v12515_v45 = vrot.slane %v10830_v15, 9  ;;  %v19598_v34 = vcombine.low %v19596_v43, %v19597_v17  ;;  %v19605_v13 = vld [vmem:[#allocation74_spill] sm:$0xff]  ;;  %v19611_v40 = vcombine.low %v18329_v5, %v18340_v63 }
 0x686   : > { %v10518_v62 = vor.u32 %v10517_v19, %v10514_v1  ;;  %v10531_v4 = vshll.u32 %v14261_v37, 16  ;;  %v12496_v20 = vcombine.low %v10500_v27, %v10510_v24  ;;  %v10906_v8 = vsel %vm15316_vm1, %v10904_v46, %v10905_v52  ;;  %v19591_v1 = vld [vmem:[#allocation62_spill] sm:$0xff]  ;;  %v19599_v38 = vld [vmem:[#allocation68_spill] sm:$0xff] }
 0x687   : > { %v10903_v47 = vsel %vm15316_vm1, %v12515_v45, %v10902_v32  ;;  %v19592_v19 = vcombine.low %v19590_v60, %v19591_v1  ;;  %v19606_v2 = vcombine.low %v18298_v11, %v19605_v13  ;;  %v19607_v37 = vcombine.low %v18304_v36, %v18319_v30 }
 0x688   : > { %v10519_v18 = vrot.slane %v10518_v62, 4  ;;  %v10533_v48 = vrot.slane %v10531_v4, 5  ;;  %v19601_v62 = vcombine.low %v19599_v38, %v19600_v59  ;;  %v19608_v4 = vld [vmem:[#allocation75_spill] sm:$0xff]  ;;  %v19612_v11 = vcombine.low %v18364_v3, %v18368_v42 }
 0x68a   : > { %v10524_v0 = vsel %vm14777_vm12, %v10519_v18, %v10523_v31  ;;  %v10534_v61 = vsel %vm14777_vm12, %v10529_v22, %v10533_v48  ;;  %v19602_v31 = vld [vmem:[#allocation70_spill] sm:$0xff] }
 0x68b   : > { %v12497_v56 = vcombine.low %v10524_v0, %v10534_v61  ;;  %v19604_v27 = vcombine.low %v19602_v31, %v19603_v9 }
 0x68c   : > { %13506 = vmatmul.mubr.msk.bf16.gmra.mrb[20].mxu1 %vm1580_vm13, %v12493_v39  ;;  %v12531_v39 = vcombine.low %v10903_v47, %v10906_v8 }
 0x68d   : > { %13509 = vmatprep.mubr.msk.bf16.mxu1 %vm1580_vm13, %v12494_v44  ;;  %v19585_v44 = vld [vmem:[#allocation53_spill] sm:$0xff] }
 0x68e   : > { %v19586_v28 = vcombine.low %v19584_v26, %v19585_v44 }
 0x694   : > { %13510 = vmatmul.mubr.msk.bf16.gmra.mrb[24].mxu1 %vm1580_vm13, %v12495_v21  ;;  %v19609_v21 = vld [vmem:[#allocation76_spill] sm:$0xff] }
 0x695   : > { %13513 = vmatprep.mubr.msk.bf16.mxu1 %vm1580_vm13, %v12496_v20  ;;  %v19610_v24 = vcombine.low %v19608_v4, %v19609_v21 }
 0x69c   : > { %13514 = vmatmul.mubr.msk.bf16.gmra.mrb[28].mxu1 %vm1580_vm13, %v12497_v56 }
 0x69d   : > { %13519 = vmatprep.mubr.msk.bf16.mxu1 %vm1580_vm13, %v12530_v53 }
 0x6a4   : > { %13520 = vmatmul.mubr.msk.bf16.vlgmr.msra.gmra.mrb[0].mxu1 %vm1580_vm13, %v12531_v39 }
 0x6a5   : > { %13523 = vmatprep.mubr.msk.bf16.mxu1 %vm1580_vm13, %v19583_v23 }
 0x6ac   : > { %13524 = vmatmul.mubr.msk.bf16.gmra.mrb[4].mxu1 %vm1580_vm13, %v19586_v28 }
 0x6ad   : > { %13527 = vmatprep.mubr.msk.bf16.mxu1 %vm1580_vm13, %v19589_v25 }
 0x6b4   : > { %13528 = vmatmul.mubr.msk.bf16.gmra.mrb[8].mxu1 %vm1580_vm13, %v19592_v19 }
 0x6b5   : > { %13531 = vmatprep.mubr.msk.bf16.mxu1 %vm1580_vm13, %v19595_v58 }
 0x6bc   : > { %13532 = vmatmul.mubr.msk.bf16.gmra.mrb[12].mxu1 %vm1580_vm13, %v19598_v34 }
 0x6bd   : > { %13535 = vmatprep.mubr.msk.bf16.mxu1 %vm1580_vm13, %v19601_v62 }
 0x6c4   : > { %13536 = vmatmul.mubr.msk.bf16.gmra.mrb[16].mxu1 %vm1580_vm13, %v19604_v27 }
 0x6c5   : > { %13539 = vmatprep.mubr.msk.bf16.mxu1 %vm1580_vm13, %v19606_v2 }
 0x6cc   : > { %13540 = vmatmul.mubr.msk.bf16.gmra.mrb[20].mxu1 %vm1580_vm13, %v19607_v37 }
 0x6cd   : > { %13543 = vmatprep.mubr.msk.bf16.mxu1 %vm1580_vm13, %v19610_v24 }
 0x6d4   : > { %13544 = vmatmul.mubr.msk.bf16.gmra.mrb[24].mxu1 %vm1580_vm13, %v19611_v40 }
 0x6d5   : > { %13547 = vmatprep.mubr.msk.bf16.mxu1 %vm1580_vm13, %v19612_v11 }
 0x6dc   : > { %13548 = vmatmul.mubr.msk.bf16.gmra.mrb[28].mxu1 %vm1580_vm13, %v12545_v35 }
 0x777   : > { %v18767_v36 = vpop.f32.mrb[0].mxu1 }
 0x778   : > { %v18769_v30 = vpop.f32.mrb[1].mxu1  ;;  %v11370_v3 = vmul.f32 %v18767_v36, %v18767_v36  ;;  %v11302_v18 = vsel %vm1580_vm13, %v18767_v36, 0.0 }
 0x779   : > { %v11368_v20 = vmul.f32 %v18769_v30, %v18769_v30  ;;  %v18773_v63 = vpop.f32.mrb[2].mxu1  ;;  %v11299_v42 = vsel %vm1580_vm13, %v18769_v30, 0.0 }
 0x77a   : > { %v18775_v5 = vpop.f32.mrb[3].mxu1  ;;  %v11371_v50 = vmul.f32 %v18773_v63, %v18773_v63  ;;  %v11403_v33 = vsel %vm1580_vm13, %v11370_v3, 0.0  ;;  %v11304_v0 = vsel %vm1580_vm13, %v18773_v63, 0.0 }
 0x77b   : > { %v11300_v14 = vsel %vm1580_vm13, %v18775_v5, 0.0  ;;  %v11369_v51 = vmul.f32 %v18775_v5, %v18775_v5  ;;  %v11400_v41 = vsel %vm1580_vm13, %v11368_v20, 0.0 }
 0x77c   : > { %v11301_v35 = vadd.f32 %v11300_v14, %v11299_v42  ;;  %v11405_v56 = vsel %vm1580_vm13, %v11371_v50, 0.0 }
 0x77d   : > { %v11401_v12 = vsel %vm1580_vm13, %v11369_v51, 0.0 }
 0x77e   : > { %v11303_v48 = vadd.f32 %v11302_v18, %v11301_v35  ;;  %v11402_v16 = vadd.f32 %v11401_v12, %v11400_v41 }
 0x77f   : > { %v18794_v22 = vpop.f32.mrb[4].mxu1 }
 0x780   : > { %v11404_v7 = vadd.f32 %v11403_v33, %v11402_v16  ;;  %v18796_v61 = vpop.f32.mrb[5].mxu1  ;;  %v11305_v32 = vadd.f32 %v11304_v0, %v11303_v48  ;;  %v11374_v8 = vmul.f32 %v18794_v22, %v18794_v22  ;;  %v11310_v26 = vsel %vm1580_vm13, %v18794_v22, 0.0 }
 0x781   : > { %v11306_v54 = vsel %vm1580_vm13, %v18796_v61, 0.0  ;;  %v11372_v15 = vmul.f32 %v18796_v61, %v18796_v61  ;;  %v18803_v53 = vpop.f32.mrb[6].mxu1 }
 0x782   : > { %v11307_v52 = vadd.f32 %v11306_v54, %v11305_v32  ;;  %v11406_v45 = vadd.f32 %v11405_v56, %v11404_v7  ;;  %v18805_v46 = vpop.f32.mrb[7].mxu1  ;;  %v11375_v44 = vmul.f32 %v18803_v53, %v18803_v53  ;;  %v11411_v25 = vsel %vm1580_vm13, %v11374_v8, 0.0 }
 0x783   : > { %v11407_v47 = vsel %vm1580_vm13, %v11372_v15, 0.0  ;;  %v11308_v39 = vsel %vm1580_vm13, %v18805_v46, 0.0  ;;  %v11373_v6 = vmul.f32 %v18805_v46, %v18805_v46  ;;  %v11312_v60 = vsel %vm1580_vm13, %v18803_v53, 0.0 }
 0x784   : > { %v11408_v55 = vadd.f32 %v11407_v47, %v11406_v45  ;;  %v11309_v23 = vadd.f32 %v11308_v39, %v11307_v52  ;;  %v11413_v58 = vsel %vm1580_vm13, %v11375_v44, 0.0 }
 0x785   : > { %v11409_v28 = vsel %vm1580_vm13, %v11373_v6, 0.0 }
 0x786   : > { %v11311_v49 = vadd.f32 %v11310_v26, %v11309_v23  ;;  %v11410_v29 = vadd.f32 %v11409_v28, %v11408_v55 }
 0x787   : > { %v18822_v1 = vpop.f32.mrb[8].mxu1 }
 0x788   : > { %v11412_v19 = vadd.f32 %v11411_v25, %v11410_v29  ;;  %v18824_v57 = vpop.f32.mrb[9].mxu1  ;;  %v11313_v10 = vadd.f32 %v11312_v60, %v11311_v49  ;;  %v11378_v31 = vmul.f32 %v18822_v1, %v18822_v1  ;;  %v11318_v4 = vsel %vm1580_vm13, %v18822_v1, 0.0 }
 0x789   : > { %v11314_v43 = vsel %vm1580_vm13, %v18824_v57, 0.0  ;;  %v11376_v17 = vmul.f32 %v18824_v57, %v18824_v57  ;;  %v18831_v34 = vpop.f32.mrb[10].mxu1 }
 0x78a   : > { %v11315_v38 = vadd.f32 %v11314_v43, %v11313_v10  ;;  %v11414_v59 = vadd.f32 %v11413_v58, %v11412_v19  ;;  %v18833_v62 = vpop.f32.mrb[11].mxu1  ;;  %v11379_v21 = vmul.f32 %v18831_v34, %v18831_v34  ;;  %v11419_v20 = vsel %vm1580_vm13, %v11378_v31, 0.0 }
 0x78b   : > { %v11415_v9 = vsel %vm1580_vm13, %v11376_v17, 0.0  ;;  %v11316_v27 = vsel %vm1580_vm13, %v18833_v62, 0.0  ;;  %v11377_v13 = vmul.f32 %v18833_v62, %v18833_v62  ;;  %v11320_v3 = vsel %vm1580_vm13, %v18831_v34, 0.0 }
 0x78c   : > { %v11416_v2 = vadd.f32 %v11415_v9, %v11414_v59  ;;  %v11317_v37 = vadd.f32 %v11316_v27, %v11315_v38  ;;  %v11421_v18 = vsel %vm1580_vm13, %v11379_v21, 0.0 }
 0x78d   : > { %v11417_v24 = vsel %vm1580_vm13, %v11377_v13, 0.0 }
 0x78e   : > { %v11319_v40 = vadd.f32 %v11318_v4, %v11317_v37  ;;  %v11418_v11 = vadd.f32 %v11417_v24, %v11416_v2 }
 0x78f   : > { %v18850_v42 = vpop.f32.mrb[12].mxu1 }
 0x790   : > { %v11420_v14 = vadd.f32 %v11419_v20, %v11418_v11  ;;  %v18852_v51 = vpop.f32.mrb[13].mxu1  ;;  %v11321_v35 = vadd.f32 %v11320_v3, %v11319_v40  ;;  %v11382_v0 = vmul.f32 %v18850_v42, %v18850_v42  ;;  %v11326_v52 = vsel %vm1580_vm13, %v18850_v42, 0.0 }
 0x791   : > { %v11322_v41 = vsel %vm1580_vm13, %v18852_v51, 0.0  ;;  %v11380_v50 = vmul.f32 %v18852_v51, %v18852_v51  ;;  %v18859_v12 = vpop.f32.mrb[14].mxu1 }
 0x792   : > { %v11323_v48 = vadd.f32 %v11322_v41, %v11321_v35  ;;  %v11422_v16 = vadd.f32 %v11421_v18, %v11420_v14  ;;  %v18861_v33 = vpop.f32.mrb[15].mxu1  ;;  %v11383_v45 = vmul.f32 %v18859_v12, %v18859_v12  ;;  %v11427_v6 = vsel %vm1580_vm13, %v11382_v0, 0.0 }
 0x793   : > { %v11423_v7 = vsel %vm1580_vm13, %v11380_v50, 0.0  ;;  %v11324_v32 = vsel %vm1580_vm13, %v18861_v33, 0.0  ;;  %v11381_v56 = vmul.f32 %v18861_v33, %v18861_v33  ;;  %v11328_v55 = vsel %vm1580_vm13, %v18859_v12, 0.0 }
 0x794   : > { %v11424_v54 = vadd.f32 %v11423_v7, %v11422_v16  ;;  %v11325_v15 = vadd.f32 %v11324_v32, %v11323_v48  ;;  %v11429_v49 = vsel %vm1580_vm13, %v11383_v45, 0.0 }
 0x795   : > { %v11425_v8 = vsel %vm1580_vm13, %v11381_v56, 0.0 }
 0x796   : > { %v11327_v47 = vadd.f32 %v11326_v52, %v11325_v15  ;;  %v11426_v39 = vadd.f32 %v11425_v8, %v11424_v54 }
 0x797   : > { %v18878_v23 = vpop.f32.mrb[16].mxu1 }
 0x798   : > { %v11428_v26 = vadd.f32 %v11427_v6, %v11426_v39  ;;  %v18880_v44 = vpop.f32.mrb[17].mxu1  ;;  %v11329_v28 = vadd.f32 %v11328_v55, %v11327_v47  ;;  %v11386_v43 = vmul.f32 %v18878_v23, %v18878_v23  ;;  %v11334_v27 = vsel %vm1580_vm13, %v18878_v23, 0.0 }
 0x799   : > { %v11330_v29 = vsel %vm1580_vm13, %v18880_v44, 0.0  ;;  %v11384_v25 = vmul.f32 %v18880_v44, %v18880_v44  ;;  %v18887_v60 = vpop.f32.mrb[18].mxu1 }
 0x79a   : > { %v11331_v19 = vadd.f32 %v11330_v29, %v11329_v28  ;;  %v11430_v10 = vadd.f32 %v11429_v49, %v11428_v26  ;;  %v18889_v58 = vpop.f32.mrb[19].mxu1  ;;  %v11387_v13 = vmul.f32 %v18887_v60, %v18887_v60  ;;  %v11435_v21 = vsel %vm1580_vm13, %v11386_v43, 0.0 }
 0x79b   : > { %v11431_v17 = vsel %vm1580_vm13, %v11384_v25, 0.0  ;;  %v11332_v38 = vsel %vm1580_vm13, %v18889_v58, 0.0  ;;  %v11385_v59 = vmul.f32 %v18889_v58, %v18889_v58  ;;  %v11336_v24 = vsel %vm1580_vm13, %v18887_v60, 0.0 }
 0x79c   : > { %v11432_v31 = vadd.f32 %v11431_v17, %v11430_v10  ;;  %v11333_v9 = vadd.f32 %v11332_v38, %v11331_v19  ;;  %v11437_v14 = vsel %vm1580_vm13, %v11387_v13, 0.0 }
 0x79d   : > { %v11433_v2 = vsel %vm1580_vm13, %v11385_v59, 0.0 }
 0x79e   : > { %v11335_v37 = vadd.f32 %v11334_v27, %v11333_v9  ;;  %v11434_v4 = vadd.f32 %v11433_v2, %v11432_v31 }
 0x79f   : > { %v18906_v40 = vpop.f32.mrb[20].mxu1 }
 0x7a0   : > { %v11436_v11 = vadd.f32 %v11435_v21, %v11434_v4  ;;  %v18908_v20 = vpop.f32.mrb[21].mxu1  ;;  %v11337_v3 = vadd.f32 %v11336_v24, %v11335_v37  ;;  %v11390_v0 = vmul.f32 %v18906_v40, %v18906_v40  ;;  %v11342_v52 = vsel %vm1580_vm13, %v18906_v40, 0.0 }
 0x7a1   : > { %v11338_v35 = vsel %vm1580_vm13, %v18908_v20, 0.0  ;;  %v11388_v18 = vmul.f32 %v18908_v20, %v18908_v20  ;;  %v18915_v41 = vpop.f32.mrb[22].mxu1 }
 0x7a2   : > { %v11339_v50 = vadd.f32 %v11338_v35, %v11337_v3  ;;  %v11438_v48 = vadd.f32 %v11437_v14, %v11436_v11  ;;  %v18917_v16 = vpop.f32.mrb[23].mxu1  ;;  %v11391_v45 = vmul.f32 %v18915_v41, %v18915_v41  ;;  %v11443_v6 = vsel %vm1580_vm13, %v11390_v0, 0.0 }
 0x7a3   : > { %v11439_v7 = vsel %vm1580_vm13, %v11388_v18, 0.0  ;;  %v11340_v32 = vsel %vm1580_vm13, %v18917_v16, 0.0  ;;  %v11389_v56 = vmul.f32 %v18917_v16, %v18917_v16  ;;  %v11344_v55 = vsel %vm1580_vm13, %v18915_v41, 0.0 }
 0x7a4   : > { %v11440_v54 = vadd.f32 %v11439_v7, %v11438_v48  ;;  %v11341_v15 = vadd.f32 %v11340_v32, %v11339_v50  ;;  %v11445_v25 = vsel %vm1580_vm13, %v11391_v45, 0.0 }
 0x7a5   : > { %v11441_v8 = vsel %vm1580_vm13, %v11389_v56, 0.0 }
 0x7a6   : > { %v11343_v47 = vadd.f32 %v11342_v52, %v11341_v15  ;;  %v11442_v39 = vadd.f32 %v11441_v8, %v11440_v54 }
 0x7a7   : > { %v18934_v26 = vpop.f32.mrb[24].mxu1 }
 0x7a8   : > { %v11444_v28 = vadd.f32 %v11443_v6, %v11442_v39  ;;  %v18936_v49 = vpop.f32.mrb[25].mxu1  ;;  %v11345_v29 = vadd.f32 %v11344_v55, %v11343_v47  ;;  %v11394_v31 = vmul.f32 %v18934_v26, %v18934_v26  ;;  %v11350_v4 = vsel %vm1580_vm13, %v18934_v26, 0.0 }
 0x7a9   : > { %v11346_v19 = vsel %vm1580_vm13, %v18936_v49, 0.0  ;;  %v11392_v10 = vmul.f32 %v18936_v49, %v18936_v49  ;;  %v18943_v43 = vpop.f32.mrb[26].mxu1 }
 0x7aa   : > { %v11347_v17 = vadd.f32 %v11346_v19, %v11345_v29  ;;  %v11446_v38 = vadd.f32 %v11445_v25, %v11444_v28  ;;  %v18945_v59 = vpop.f32.mrb[27].mxu1  ;;  %v11395_v21 = vmul.f32 %v18943_v43, %v18943_v43  ;;  %v11451_v14 = vsel %vm1580_vm13, %v11394_v31, 0.0 }
 0x7ab   : > { %v11447_v9 = vsel %vm1580_vm13, %v11392_v10, 0.0  ;;  %v11348_v27 = vsel %vm1580_vm13, %v18945_v59, 0.0  ;;  %v11393_v13 = vmul.f32 %v18945_v59, %v18945_v59  ;;  %v11352_v35 = vsel %vm1580_vm13, %v18943_v43, 0.0 }
 0x7ac   : > { %v11448_v2 = vadd.f32 %v11447_v9, %v11446_v38  ;;  %v11349_v37 = vadd.f32 %v11348_v27, %v11347_v17  ;;  %v11453_v7 = vsel %vm1580_vm13, %v11395_v21, 0.0 }
 0x7ad   : > { %v11449_v24 = vsel %vm1580_vm13, %v11393_v13, 0.0 }
 0x7ae   : > { %v11351_v11 = vadd.f32 %v11350_v4, %v11349_v37  ;;  %v11450_v3 = vadd.f32 %v11449_v24, %v11448_v2 }
 0x7af   : > { %v18962_v18 = vpop.f32.mrb[28].mxu1 }
 0x7b0   : > { %v11452_v50 = vadd.f32 %v11451_v14, %v11450_v3  ;;  %v18964_v48 = vpop.f32.mrb[29].mxu1  ;;  %v11353_v0 = vadd.f32 %v11352_v35, %v11351_v11  ;;  %v11398_v8 = vmul.f32 %v18962_v18, %v18962_v18  ;;  %v11358_v29 = vsel %vm1580_vm13, %v18962_v18, 0.0 }
 0x7b1   : > { %v11354_v32 = vsel %vm1580_vm13, %v18964_v48, 0.0  ;;  %v11396_v56 = vmul.f32 %v18964_v48, %v18964_v48  ;;  %v18971_v54 = vpop.f32.mrb[30].mxu1 }
 0x7b2   : > { %v11355_v15 = vadd.f32 %v11354_v32, %v11353_v0  ;;  %v11454_v52 = vadd.f32 %v11453_v7, %v11452_v50  ;;  %v18973_v45 = vpop.f32.mrb[31].mxu1  ;;  %v11399_v25 = vmul.f32 %v18971_v54, %v18971_v54  ;;  %v11459_v38 = vsel %vm1580_vm13, %v11398_v8, 0.0 }
 0x7b3   : > { %v11455_v47 = vsel %vm1580_vm13, %v11396_v56, 0.0  ;;  %v11356_v39 = vsel %vm1580_vm13, %v18973_v45, 0.0  ;;  %v11397_v6 = vmul.f32 %v18973_v45, %v18973_v45  ;;  %v11360_v31 = vsel %vm1580_vm13, %v18971_v54, 0.0 }
 0x7b4   : > { %v11456_v55 = vadd.f32 %v11455_v47, %v11454_v52  ;;  %v11357_v28 = vadd.f32 %v11356_v39, %v11355_v15  ;;  %v11461_v13 = vsel %vm1580_vm13, %v11399_v25, 0.0 }
 0x7b5   : > { %v11457_v19 = vsel %vm1580_vm13, %v11397_v6, 0.0 }
 0x7b6   : > { %v11359_v10 = vadd.f32 %v11358_v29, %v11357_v28  ;;  %v11458_v17 = vadd.f32 %v11457_v19, %v11456_v55 }
 0x7b8   : > { %v11361_v9 = vadd.f32 %v11360_v31, %v11359_v10  ;;  %v11460_v27 = vadd.f32 %v11459_v38, %v11458_v17  ;;  %v11568_v10 = vld [vmem:[%s14628_s30 + $0xe8] sm:$0xff] }
 0x7ba   : > { %v11362_v2 = vrot.slane %v11361_v9, 4  ;;  %v11462_v37 = vadd.f32 %v11461_v13, %v11460_v27 }
 0x7bc   : > { %v11363_v4 = vadd.f32 %v11362_v2, %v11361_v9  ;;  %v11463_v21 = vrot.slane %v11462_v37, 4  ;;  %v11541_v2 = vld [vmem:[%s14628_s30 + $0x10] sm:$0xff] }
 0x7be   : > { %v11364_v24 = vrot.slane %v11363_v4, 2  ;;  %v11464_v11 = vadd.f32 %v11463_v21, %v11462_v37  ;;  %v11539_v37 = vld [vmem:[%s14628_s30] sm:$0xff] }
 0x7c0   : > { %v11365_v3 = vadd.f32 %v11364_v24, %v11363_v4  ;;  %v11465_v14 = vrot.slane %v11464_v11, 2 }
 0x7c2   : > { %v11366_v35 = vrot.slane %v11365_v3, 1  ;;  %v11466_v50 = vadd.f32 %v11465_v14, %v11464_v11  ;;  %v11540_v14 = vld [vmem:[%s14628_s30 + $0x8] sm:$0xff] }
 0x7c4   : > { %v11367_v0 = vadd.f32 %v11366_v35, %v11365_v3  ;;  %v11467_v7 = vrot.slane %v11466_v50, 1  ;;  %v11542_v3 = vld [vmem:[%s14628_s30 + $0x18] sm:$0xff]  ;;  %v11545_v35 = vld [vmem:[%s14628_s30 + $0x30] sm:$0xff] }
 0x7c6   : > { %v11468_v32 = vadd.f32 %v11467_v7, %v11466_v50  ;;  %v18991_v56 = vmul.f32 0.00390625, %v11367_v0  ;;  %v11543_v50 = vld [vmem:[%s14628_s30 + $0x20] sm:$0xff] }
 0x7c8   : > { %v11470_v15 = vmul.f32 0.00390625, %v11468_v32  ;;  %v11471_v52 = vmul.f32 %v18991_v56, %v18991_v56  ;;  %v11502_v8 = vsub.f32 %v18973_v45, %v18991_v56  ;;  %v11473_v47 = vsub.f32 %v18769_v30, %v18991_v56 }
 0x7c9   : > { %v11474_v39 = vsub.f32 %v18775_v5, %v18991_v56  ;;  %v11475_v6 = vsub.f32 %v18767_v36, %v18991_v56  ;;  %v11476_v55 = vsub.f32 %v18773_v63, %v18991_v56  ;;  %v11477_v28 = vsub.f32 %v18796_v61, %v18991_v56 }
 0x7ca   : > { %v11472_v29 = vsub.f32 %v11470_v15, %v11471_v52  ;;  %v11478_v25 = vsub.f32 %v18805_v46, %v18991_v56  ;;  %v11479_v45 = vsub.f32 %v18794_v22, %v18991_v56  ;;  %v11480_v30 = vsub.f32 %v18803_v53, %v18991_v56  ;;  %v11546_v15 = vld [vmem:[%s14628_s30 + $0x38] sm:$0xff]  ;;  %v11544_v52 = vld [vmem:[%s14628_s30 + $0x28] sm:$0xff] }
 0x7cb   : > { %v11481_v5 = vsub.f32 %v18824_v57, %v18991_v56  ;;  %v11482_v36 = vsub.f32 %v18833_v62, %v18991_v56  ;;  %v11483_v63 = vsub.f32 %v18822_v1, %v18991_v56  ;;  %v11484_v61 = vsub.f32 %v18831_v34, %v18991_v56 }
 0x7cc   : > { %v11505_v19 = vadd.f32 1e-05, %v11472_v29  ;;  %v11485_v46 = vsub.f32 %v18852_v51, %v18991_v56  ;;  %v11486_v22 = vsub.f32 %v18861_v33, %v18991_v56  ;;  %v11487_v53 = vsub.f32 %v18850_v42, %v18991_v56  ;;  %v11550_v29 = vld [vmem:[%s14628_s30 + $0x58] sm:$0xff] }
 0x7cd   : > { %v11488_v57 = vsub.f32 %v18859_v12, %v18991_v56  ;;  %v11489_v62 = vsub.f32 %v18880_v44, %v18991_v56  ;;  %v11490_v1 = vsub.f32 %v18889_v58, %v18991_v56  ;;  %v11491_v34 = vsub.f32 %v18878_v23, %v18991_v56 }
 0x7ce   : > { %14220 = vrsqrt.f32 %v11505_v19  ;;  %v11492_v51 = vsub.f32 %v18887_v60, %v18991_v56  ;;  %v11493_v42 = vsub.f32 %v18908_v20, %v18991_v56  ;;  %v11494_v12 = vsub.f32 %v18917_v16, %v18991_v56  ;;  %v11554_v19 = vld [vmem:[%s14628_s30 + $0x78] sm:$0xff] }
 0x7cf   : > { %v11495_v33 = vsub.f32 %v18906_v40, %v18991_v56  ;;  %v11496_v44 = vsub.f32 %v18915_v41, %v18991_v56  ;;  %v11497_v58 = vsub.f32 %v18936_v49, %v18991_v56  ;;  %v11498_v23 = vsub.f32 %v18945_v59, %v18991_v56 }
 0x7d0   : > { %v11499_v60 = vsub.f32 %v18934_v26, %v18991_v56  ;;  %v11500_v20 = vsub.f32 %v18943_v43, %v18991_v56  ;;  %v11501_v16 = vsub.f32 %v18964_v48, %v18991_v56  ;;  %v11503_v40 = vsub.f32 %v18962_v18, %v18991_v56 }
 0x7d1   : > { %v11504_v41 = vsub.f32 %v18971_v54, %v18991_v56 }
 0x7d8   : > { %v14221_v49 = vpop.eup %14220 }
 0x7d9   : > { %v11536_v59 = vmul.f32 %v14221_v49, %v11502_v8  ;;  %v11507_v17 = vmul.f32 %v14221_v49, %v11473_v47  ;;  %v11508_v38 = vmul.f32 %v14221_v49, %v11474_v39  ;;  %v11509_v26 = vmul.f32 %v14221_v49, %v11475_v6  ;;  %v11549_v8 = vld [vmem:[%s14628_s30 + $0x50] sm:$0xff]  ;;  %v11547_v47 = vld [vmem:[%s14628_s30 + $0x40] sm:$0xff] }
 0x7da   : > { %v11510_v43 = vmul.f32 %v14221_v49, %v11476_v55  ;;  %v11511_v31 = vmul.f32 %v14221_v49, %v11477_v28  ;;  %v11512_v48 = vmul.f32 %v14221_v49, %v11478_v25  ;;  %v11513_v18 = vmul.f32 %v14221_v49, %v11479_v45  ;;  %v11548_v25 = vld [vmem:[%s14628_s30 + $0x48] sm:$0xff]  ;;  %v11553_v45 = vld [vmem:[%s14628_s30 + $0x70] sm:$0xff] }
 0x7db   : > { %v11600_v9 = vadd.f32 %v11568_v10, %v11536_v59  ;;  %v11514_v27 = vmul.f32 %v14221_v49, %v11480_v30  ;;  %v11515_v13 = vmul.f32 %v14221_v49, %v11481_v5  ;;  %v11516_v54 = vmul.f32 %v14221_v49, %v11482_v36  ;;  %v11562_v59 = vld [vmem:[%s14628_s30 + $0xb8] sm:$0xff] }
 0x7dc   : > { %v11517_v4 = vmul.f32 %v14221_v49, %v11483_v63  ;;  %v11518_v21 = vmul.f32 %v14221_v49, %v11484_v61  ;;  %v11519_v24 = vmul.f32 %v14221_v49, %v11485_v46  ;;  %v11520_v11 = vmul.f32 %v14221_v49, %v11486_v22  ;;  %v11551_v61 = vld [vmem:[%s14628_s30 + $0x60] sm:$0xff]  ;;  %v11552_v46 = vld [vmem:[%s14628_s30 + $0x68] sm:$0xff] }
 0x7dd   : > { %11632 = vst.msk [vmem:[%s19068_s18 + $0xe8] sm:$0xff] %vm1580_vm13, %v11600_v9  ;;  %v11521_v0 = vmul.f32 %v14221_v49, %v11487_v53  ;;  %v19072_v7 = vmul.f32 %v14221_v49, %v11488_v57  ;;  %v19074_v32 = vmul.f32 %v14221_v49, %v11489_v62  ;;  %v19076_v56 = vmul.f32 %v14221_v49, %v11490_v1  ;;  %v11557_v1 = vld [vmem:[%s14628_s30 + $0x90] sm:$0xff]  ;;  %v11560_v9 = vld [vmem:[%s14628_s30 + $0xa8] sm:$0xff] }
 0x7de   : > { %v11525_v39 = vmul.f32 %v14221_v49, %v11491_v34  ;;  %v19082_v6 = vmul.f32 %v14221_v49, %v11492_v51  ;;  %v19084_v55 = vmul.f32 %v14221_v49, %v11493_v42  ;;  %v19086_v28 = vmul.f32 %v14221_v49, %v11494_v12  ;;  %v11555_v34 = vld [vmem:[%s14628_s30 + $0x80] sm:$0xff]  ;;  %v11558_v51 = vld [vmem:[%s14628_s30 + $0x98] sm:$0xff] }
 0x7df   : > { %v11529_v30 = vmul.f32 %v14221_v49, %v11495_v33  ;;  %v19091_v5 = vmul.f32 %v14221_v49, %v11496_v44  ;;  %v19093_v36 = vmul.f32 %v14221_v49, %v11497_v58  ;;  %v19095_v63 = vmul.f32 %v14221_v49, %v11498_v23  ;;  %v11556_v58 = vld [vmem:[%s14628_s30 + $0x88] sm:$0xff]  ;;  %v11561_v23 = vld [vmem:[%s14628_s30 + $0xb0] sm:$0xff] }
 0x7e0   : > { %v19100_v22 = vmul.f32 %v14221_v49, %v11499_v60  ;;  %v19102_v53 = vmul.f32 %v14221_v49, %v11500_v20  ;;  %v19104_v57 = vmul.f32 %v14221_v49, %v11501_v16  ;;  %v19106_v62 = vmul.f32 %v14221_v49, %v11503_v40  ;;  %v11559_v60 = vld [vmem:[%s14628_s30 + $0xa0] sm:$0xff] }
 0x7e1   : > { %v19111_v42 = vmul.f32 %v14221_v49, %v11504_v41  ;;  %v11571_v12 = vadd.f32 %v11539_v37, %v11507_v17  ;;  %v11572_v33 = vadd.f32 %v11540_v14, %v11508_v38  ;;  %v11573_v44 = vadd.f32 %v11541_v2, %v11509_v26  ;;  %v11565_v41 = vld [vmem:[%s14628_s30 + $0xd0] sm:$0xff]  ;;  %v11567_v37 = vld [vmem:[%s14628_s30 + $0xe0] sm:$0xff] }
 0x7e2   : > { %v11574_v20 = vadd.f32 %v11542_v3, %v11510_v43  ;;  %v11575_v16 = vadd.f32 %v11543_v50, %v11511_v31  ;;  %v11576_v40 = vadd.f32 %v11544_v52, %v11512_v48  ;;  %v11577_v10 = vadd.f32 %v11545_v35, %v11513_v18  ;;  %v11563_v43 = vld [vmem:[%s14628_s30 + $0xc0] sm:$0xff]  ;;  %v11566_v31 = vld [vmem:[%s14628_s30 + $0xd8] sm:$0xff]  ;;  %v11564_v48 = vld [vmem:[%s14628_s30 + $0xc8] sm:$0xff] }
 0x7e3   : > { %v11578_v49 = vadd.f32 %v11546_v15, %v11514_v27  ;;  %v11579_v17 = vadd.f32 %v11547_v47, %v11515_v13  ;;  %v11580_v38 = vadd.f32 %v11548_v25, %v11516_v54  ;;  %v11581_v26 = vadd.f32 %v11549_v8, %v11517_v4  ;;  %11603 = vst.msk [vmem:[%s19068_s18] sm:$0xff] %vm1580_vm13, %v11571_v12  ;;  %v11569_v2 = vld [vmem:[%s14628_s30 + $0xf0] sm:$0xff]  ;;  %v11570_v4 = vld [vmem:[%s14628_s30 + $0xf8] sm:$0xff] }
 0x7e4   : > { %11604 = vst.msk [vmem:[%s19068_s18 + $0x8] sm:$0xff] %vm1580_vm13, %v11572_v33  ;;  %11605 = vst.msk [vmem:[%s19068_s18 + $0x10] sm:$0xff] %vm1580_vm13, %v11573_v44  ;;  %v11582_v18 = vadd.f32 %v11550_v29, %v11518_v21  ;;  %v11583_v27 = vadd.f32 %v11551_v61, %v11519_v24  ;;  %v11584_v13 = vadd.f32 %v11552_v46, %v11520_v11 }
 0x7e5   : > { %v11585_v54 = vadd.f32 %v11553_v45, %v11521_v0  ;;  %11606 = vst.msk [vmem:[%s19068_s18 + $0x18] sm:$0xff] %vm1580_vm13, %v11574_v20  ;;  %11607 = vst.msk [vmem:[%s19068_s18 + $0x20] sm:$0xff] %vm1580_vm13, %v11575_v16  ;;  %v11586_v21 = vadd.f32 %v11554_v19, %v19072_v7  ;;  %v11587_v24 = vadd.f32 %v11555_v34, %v19074_v32 }
 0x7e6   : > { %11608 = vst.msk [vmem:[%s19068_s18 + $0x28] sm:$0xff] %vm1580_vm13, %v11576_v40  ;;  %11609 = vst.msk [vmem:[%s19068_s18 + $0x30] sm:$0xff] %vm1580_vm13, %v11577_v10  ;;  %v11588_v11 = vadd.f32 %v11556_v58, %v19076_v56  ;;  %v11589_v3 = vadd.f32 %v11557_v1, %v11525_v39  ;;  %v11590_v14 = vadd.f32 %v11558_v51, %v19082_v6 }
 0x7e7   : > { %11610 = vst.msk [vmem:[%s19068_s18 + $0x38] sm:$0xff] %vm1580_vm13, %v11578_v49  ;;  %11611 = vst.msk [vmem:[%s19068_s18 + $0x40] sm:$0xff] %vm1580_vm13, %v11579_v17  ;;  %v11591_v35 = vadd.f32 %v11559_v60, %v19084_v55  ;;  %v11592_v50 = vadd.f32 %v11560_v9, %v19086_v28  ;;  %v11593_v0 = vadd.f32 %v11561_v23, %v11529_v30 }
 0x7e8   : > { %11612 = vst.msk [vmem:[%s19068_s18 + $0x48] sm:$0xff] %vm1580_vm13, %v11580_v38  ;;  %11613 = vst.msk [vmem:[%s19068_s18 + $0x50] sm:$0xff] %vm1580_vm13, %v11581_v26  ;;  %v11594_v7 = vadd.f32 %v11562_v59, %v19091_v5  ;;  %v11595_v32 = vadd.f32 %v11563_v43, %v19093_v36  ;;  %v11596_v56 = vadd.f32 %v11564_v48, %v19095_v63 }
 0x7e9   : > { %11614 = vst.msk [vmem:[%s19068_s18 + $0x58] sm:$0xff] %vm1580_vm13, %v11582_v18  ;;  %11615 = vst.msk [vmem:[%s19068_s18 + $0x60] sm:$0xff] %vm1580_vm13, %v11583_v27  ;;  %v11597_v15 = vadd.f32 %v11565_v41, %v19100_v22  ;;  %v11598_v52 = vadd.f32 %v11566_v31, %v19102_v53  ;;  %v11599_v8 = vadd.f32 %v11567_v37, %v19104_v57 }
 0x7ea   : > { %11616 = vst.msk [vmem:[%s19068_s18 + $0x68] sm:$0xff] %vm1580_vm13, %v11584_v13  ;;  %11617 = vst.msk [vmem:[%s19068_s18 + $0x70] sm:$0xff] %vm1580_vm13, %v11585_v54  ;;  %v11601_v47 = vadd.f32 %v11569_v2, %v19106_v62  ;;  %v11602_v39 = vadd.f32 %v11570_v4, %v19111_v42 }
 0x7eb   : > { %11618 = vst.msk [vmem:[%s19068_s18 + $0x78] sm:$0xff] %vm1580_vm13, %v11586_v21  ;;  %11619 = vst.msk [vmem:[%s19068_s18 + $0x80] sm:$0xff] %vm1580_vm13, %v11587_v24 }
 0x7ec   : > { %11620 = vst.msk [vmem:[%s19068_s18 + $0x88] sm:$0xff] %vm1580_vm13, %v11588_v11  ;;  %11621 = vst.msk [vmem:[%s19068_s18 + $0x90] sm:$0xff] %vm1580_vm13, %v11589_v3 }
 0x7ed   : > { %11622 = vst.msk [vmem:[%s19068_s18 + $0x98] sm:$0xff] %vm1580_vm13, %v11590_v14  ;;  %11623 = vst.msk [vmem:[%s19068_s18 + $0xa0] sm:$0xff] %vm1580_vm13, %v11591_v35 }
 0x7ee   : > { %11624 = vst.msk [vmem:[%s19068_s18 + $0xa8] sm:$0xff] %vm1580_vm13, %v11592_v50  ;;  %11625 = vst.msk [vmem:[%s19068_s18 + $0xb0] sm:$0xff] %vm1580_vm13, %v11593_v0 }
 0x7ef   : > { %11626 = vst.msk [vmem:[%s19068_s18 + $0xb8] sm:$0xff] %vm1580_vm13, %v11594_v7  ;;  %11627 = vst.msk [vmem:[%s19068_s18 + $0xc0] sm:$0xff] %vm1580_vm13, %v11595_v32 }
 0x7f0   : > { %11628 = vst.msk [vmem:[%s19068_s18 + $0xc8] sm:$0xff] %vm1580_vm13, %v11596_v56  ;;  %11629 = vst.msk [vmem:[%s19068_s18 + $0xd0] sm:$0xff] %vm1580_vm13, %v11597_v15 }
 0x7f1   : > { %11630 = vst.msk [vmem:[%s19068_s18 + $0xd8] sm:$0xff] %vm1580_vm13, %v11598_v52  ;;  %11631 = vst.msk [vmem:[%s19068_s18 + $0xe0] sm:$0xff] %vm1580_vm13, %v11599_v8 }
 0x7f2   : > { %11633 = vst.msk [vmem:[%s19068_s18 + $0xf0] sm:$0xff] %vm1580_vm13, %v11601_v47  ;;  %11634 = vst.msk [vmem:[%s19068_s18 + $0xf8] sm:$0xff] %vm1580_vm13, %v11602_v39 }
 0x7f3   : > { %14361 = shalt.err (!%p14358_p2)
}
 0x7f4   : > { %s14362_s25 = scalar_lea.hbm %s19180_s27, 4096  ;;  %s14366_s21 = scalar_lea.hbm %s19259_s3, 8192 }
 0x7f5   : > { %p14363_p13 = scmp.ne.s32.totalorder %s19180_s27, %s14362_s25  ;;  %p14367_p4 = scmp.lt.u32.totalorder %s19180_s27, %s19259_s3 }
 0x7f6   : > { %p14368_p5 = scmp.lt.u32.totalorder %s14366_s21, %s14362_s25  ;;  %p14370_p11 = scmp.lt.u32.totalorder %s14362_s25, %s19180_s27 }
 0x7f7   : > { %p14364_p6 = pnand %p14363_p13, %p19613_p0 }
 0x7f8   : > { %p14369_p8 = por %p14368_p5, %p14367_p4 }
 0x7f9   : > { %p14365_p10 = pneg %p14364_p6 }
 0x7fa   : > { %p14371_p1 = por %p14370_p11, %p14369_p8 }
 0x7fc   : > { %p14372_p3 = pnand %p14371_p1, %p14365_p10 }
 0x7fe   : > { %14375 = shalt.err (!%p14372_p3)
}
 0x7ff   : > { %s14428_s30 = smov 128   ;;  %s14429_s18 = smov 8  }
 0x800   : > { %14091 = dma.vmem_to_hbm [thread:$0]  (%p19613_p0), %s19184_s17, 4096, %s19180_s27, %s11636_s16, %s14428_s30, %s14428_s30, %s14429_s18  }
 0x801 PF: > { %s11664_s20 = sand.u32 1, %s14406_s12   ;;  %p19614_p7 = scmp.ne.s32.totalorder %s19363_s19, 0 }
 0x802   : > { %p19615_p9 = scmp.ge.s32.totalorder %s14418_s15, 2  ;;  %s11665_s24 = scalar_lea.sflag [#allocation5], %s11664_s20 }
 0x804   : > { %p14105_p12 = pnand %p19615_p9, %p19614_p7 }
 0x806   : > { %14401 = dma.done.wait (!%p14105_p12), %s11665_s24, 4096  }
 0x807   : > { %14403 = vsyncadd (!%p14105_p12), %s11665_s24, 4294963200  ;;  %p17_p2 = scmp.ge.s32.totalorder %s14560_s4, 4   ;;  %s19616_s12 = smov %s14410_s13 }
 0x808   : > { %s19617_s13 = smov %s14414_s14  ;;  %s19618_s14 = smov %s14576_s9 }
 0x809   : > { %s19619_s15 = smov %s14560_s4  ;;  %19 = sbr.rel (!%p17_p2) target bundleno = 6 (0x6), region = 105 }
 0x810   :  { %11670 = vsyncpa [#allocation4], 1 }
 0x811   :  { %11672 = vsyncpa [#allocation4 + $0x1], 1 }
 0x812   :  { %11673 = vsyncpa [#allocation7], 1 }
 0x813   :  { %11674 = vsyncpa [#allocation5], 1 }
 0x814   :  { %11676 = vsyncpa [#allocation5 + $0x1], 1 }

</bundles_post_ra>
